<compile_context>
chip_gen: v7x
topology: tpu7x:2x2x1
jax: 0.10.0
libtpu: 0.0.40
codegen_flags: <defaults>
</compile_context>

<pallas_src>
import jax
import jax.numpy as jnp
from jax.experimental import pallas as pl
from jax.experimental.pallas import tpu as pltpu


_VMEM_LIMIT = 32 * 1024 * 1024  # well under v7x's 64 MiB/TC; actual use ~5 MiB


# ----------------------------------------------------------------------------
# Kernel 1: fused conv1(3x3 SAME)+ReLU -> conv2(3x3 SAME)+ReLU.
# One sample per grid step; batch axis is "parallel" (v7x megacore).
# Each conv is a tap-concatenated im2col-K matmul per 8-row chunk.
# ----------------------------------------------------------------------------
def _conv_stack_kernel(x_ref, w1_ref, b1_ref, w2_ref, b2_ref, out_ref,
                       xpad_ref, h1pad_ref):
    # x_ref:     (1, H, W, C0) f32 one sample (NHWC, unpadded)
    # w1_ref:    (9*C0, C1)   b1_ref: (1, C1)     (tap-concatenated weights)
    # w2_ref:    (9*C1, C2)   b2_ref: (1, C2)
    # out_ref:   (1, H*W, C2) bf16
    # xpad_ref:  VMEM scratch (H+2, W+2, C0) f32  (SAME-padded obs)
    # h1pad_ref: VMEM scratch (H+2, W+2, C1) f32  (SAME-padded conv1 act)
    H = x_ref.shape[1]
    W = x_ref.shape[2]
    C0 = x_ref.shape[3]
    C1 = b1_ref.shape[1]
    C2 = b2_ref.shape[1]
    CH = 8  # board-row chunk per matmul (keeps vreg pressure bounded)

    # SAME padding on chip: zero the padded fields (cheap, and safe under
    # megacore since scratch is per-core), drop the board in at offset (1,1).
    xpad_ref[...] = jnp.zeros_like(xpad_ref)
    h1pad_ref[...] = jnp.zeros_like(h1pad_ref)
    xpad_ref[1:H + 1, 1:W + 1, :] = x_ref[0]

    w1 = w1_ref[...]
    w2 = w2_ref[...]
    b1 = b1_ref[...]
    b2 = b2_ref[...]

    def im2col(src_ref, r0, rows, c):
        # Concatenate the 9 taps along lanes -> K = 9*c, so each conv chunk is
        # ONE MXU matmul instead of 9 tiny K=c matmuls (9x fewer MXU pushes).
        taps = []
        for kh in range(3):
            for kw in range(3):
                taps.append(src_ref[r0 + kh:r0 + kh + rows, kw:kw + W, :])
        return jnp.concatenate(taps, axis=-1).reshape(rows * W, 9 * c)

    # ---- conv1: (CH*W, 9*C0) x (9*C0, C1), written zero-padded into h1pad.
    for r0 in range(0, H, CH):
        lhs = im2col(xpad_ref, r0, CH, C0)
        h = jnp.dot(lhs, w1, preferred_element_type=jnp.float32) + b1
        h = jnp.maximum(h, 0.0)
        h1pad_ref[1 + r0:1 + r0 + CH, 1:W + 1, :] = h.reshape(CH, W, C1)

    # ---- conv2: (CH*W, 9*C1) x (9*C1, C2) -> bf16 feature rows.
    for r0 in range(0, H, CH):
        lhs = im2col(h1pad_ref, r0, CH, C1)
        a = jnp.dot(lhs, w2, preferred_element_type=jnp.float32) + b2
        a = jnp.maximum(a, 0.0)
        out_ref[0, r0 * W:(r0 + CH) * W, :] = a.astype(out_ref.dtype)


def conv_stack(x_nhwc, w1cat, b1, w2cat, b2):
    B, H, W, C0 = x_nhwc.shape
    C1 = w1cat.shape[-1]
    C2 = w2cat.shape[-1]
    assert H == W and H % 8 == 0, "row-chunked im2col assumes board % 8 == 0"
    return pl.pallas_call(
        _conv_stack_kernel,
        out_shape=jax.ShapeDtypeStruct((B, H * W, C2), jnp.bfloat16),
        grid=(B,),
        in_specs=[
            pl.BlockSpec((1, H, W, C0), lambda b: (b, 0, 0, 0)),
            pl.BlockSpec((9 * C0, C1), lambda b: (0, 0)),
            pl.BlockSpec((1, C1), lambda b: (0, 0)),
            pl.BlockSpec((9 * C1, C2), lambda b: (0, 0)),
            pl.BlockSpec((1, C2), lambda b: (0, 0)),
        ],
        out_specs=pl.BlockSpec((1, H * W, C2), lambda b: (b, 0, 0)),
        scratch_shapes=[
            pltpu.VMEM((H + 2, W + 2, C0), jnp.float32),
            pltpu.VMEM((H + 2, W + 2, C1), jnp.float32),
        ],
        compiler_params=pltpu.CompilerParams(
            dimension_semantics=("parallel",),
            vmem_limit_bytes=_VMEM_LIMIT),
    )(x_nhwc, w1cat, b1, w2cat, b2)


# ----------------------------------------------------------------------------
# Kernel 2: fused FC trunk (bf16 weights, f32 accumulation) + combined
# logits|value head matmul, gridded over hidden-dim chunks ("parallel") so a
# second TensorCore (v7x) halves the w_fc1 HBM stream. Each grid step emits a
# head partial; the wrapper sums the partials and adds b_head.
# ----------------------------------------------------------------------------
def _fc_heads_kernel(feat_ref, wfc_ref, bfc_ref, whead_ref, out_ref):
    # feat_ref:  (B, feat_dim) bf16       wfc_ref:  (feat_dim, Hc) bf16
    # bfc_ref:   (1, Hc) f32              whead_ref:(Hc, n_out+1) f32
    # out_ref:   (1, B, n_out+1) f32      (this hidden chunk's head partial)
    h = jnp.dot(feat_ref[...], wfc_ref[...],
                preferred_element_type=jnp.float32)          # bf16 x bf16 -> f32
    h = jnp.maximum(h + bfc_ref[...], 0.0)
    out_ref[0] = jnp.dot(h, whead_ref[...],
                         preferred_element_type=jnp.float32)


def fc_heads(feat, w_fc1, b_fc1, w_head):
    B, feat_dim = feat.shape
    hidden, n_head = w_head.shape
    n_chunks = 2 if hidden % 256 == 0 else 1
    hc = hidden // n_chunks
    return pl.pallas_call(
        _fc_heads_kernel,
        out_shape=jax.ShapeDtypeStruct((n_chunks, B, n_head), jnp.float32),
        grid=(n_chunks,),
        in_specs=[
            pl.BlockSpec((B, feat_dim), lambda j: (0, 0)),
            pl.BlockSpec((feat_dim, hc), lambda j: (0, j)),
            pl.BlockSpec((1, hc), lambda j: (0, j)),
            pl.BlockSpec((hc, n_head), lambda j: (j, 0)),
        ],
        out_specs=pl.BlockSpec((1, B, n_head), lambda j: (j, 0, 0)),
        compiler_params=pltpu.CompilerParams(
            dimension_semantics=("parallel",),
            vmem_limit_bytes=_VMEM_LIMIT),
    )(feat, w_fc1, b_fc1, w_head)


# ----------------------------------------------------------------------------
# Jitted forward: two Pallas calls plus tiny XLA glue (transpose, flatten,
# partial-sum of the two head chunks).
# ----------------------------------------------------------------------------
@jax.jit
def _hex_cnn_forward(params, obs_nchw):
    x = obs_nchw.astype(jnp.float32)              # Hex_CNN.forward: obs.float()
    x = jnp.transpose(x, (0, 2, 3, 1))            # NCHW -> NHWC (tiny, B*4 KiB)
    a2 = conv_stack(x, params["w1"], params["b1"],
                    params["w2"], params["b2"])   # (B, H*W, C2) bf16
    feat = a2.reshape(a2.shape[0], -1)            # (B, H*W*C2) bf16 handoff
    parts = fc_heads(feat, params["w_fc1"], params["b_fc1"], params["w_head"])
    out = jnp.sum(parts, axis=0) + params["b_head"][None, :]   # (B, n_out+1)
    return out[:, :-1], out[:, -1]


# ----------------------------------------------------------------------------
# Model: deterministic parameter init + forward matching Hex_CNN semantics.
# ----------------------------------------------------------------------------
class HexCNNPallas:
    def __init__(self, key, in_channels=4, board=16, num_outputs=8,
                 conv_channels=(16, 32), hidden=256):
        assert board % 8 == 0, "kernel assumes board % 8 == 0"
        self.board = board
        self.num_outputs = num_outputs
        c1, c2 = conv_channels
        ks = jax.random.split(key, 5)

        def init(k, shape, fan_in):
            return (jax.random.normal(k, shape, jnp.float32)
                    / jnp.sqrt(jnp.float32(fan_in)))

        feat_dim = board * board * c2
        self.params = {
            # Conv weights pre-reshaped to tap-concatenated (im2col-K) form:
            # (3,3,Cin,Cout) -> (9*Cin, Cout), row order (kh, kw, cin).
            "w1": init(ks[0], (3, 3, in_channels, c1),
                       9 * in_channels).reshape(9 * in_channels, c1),
            "b1": jnp.zeros((1, c1), jnp.float32),
            "w2": init(ks[1], (3, 3, c1, c2), 9 * c1).reshape(9 * c1, c2),
            "b2": jnp.zeros((1, c2), jnp.float32),
            # FC trunk weight kept bf16 (dominant HBM stream ~halved vs f32).
            "w_fc1": init(ks[2], (feat_dim, hidden), feat_dim).astype(jnp.bfloat16),
            "b_fc1": jnp.zeros((1, hidden), jnp.float32),
            # logits and value heads fused into a single (hidden, n_out+1) matmul.
            "w_head": jnp.concatenate(
                [init(ks[3], (hidden, num_outputs), hidden),
                 init(ks[4], (hidden, 1), hidden)], axis=1),
            "b_head": jnp.zeros((num_outputs + 1,), jnp.float32),
        }

    def forward(self, obs_nchw):
        logits, value = _hex_cnn_forward(self.params, obs_nchw)
        # Hex_CNN.forward returns (fc_out, []); value_function() -> reshape [-1]
        return logits, [], value


if __name__ == "__main__":
    key = jax.random.PRNGKey(0)
    k_obs, k_params = jax.random.split(key)

    # obs: (batch=2, channels=4, H=16, W=16), NCHW like the PyTorch module.
    obs = jax.random.normal(k_obs, (2, 4, 16, 16), jnp.float32)

    model = HexCNNPallas(k_params, in_channels=4, board=16, num_outputs=8)
    logits, state, value = model.forward(obs)
    jax.block_until_ready((logits, value))

    assert logits.shape == (2, 8) and value.shape == (2,)
    assert bool(jnp.isfinite(logits).all()) and bool(jnp.isfinite(value).all())
    print("KERNEL_OK")
</pallas_src>

<mosaic_0001>
module attributes {stable_mosaic.version = 11 : i64} {
  func.func @_conv_stack_kernel(%arg0: i32, %arg1: memref<1x16x16x4xf32, #tpu.memory_space<vmem>>, %arg2: memref<36x16xf32, #tpu.memory_space<vmem>>, %arg3: memref<1x16xf32, #tpu.memory_space<vmem>>, %arg4: memref<144x32xf32, #tpu.memory_space<vmem>>, %arg5: memref<1x32xf32, #tpu.memory_space<vmem>>, %arg6: memref<1x256x32xbf16, #tpu.memory_space<vmem>>, %arg7: memref<18x18x4xf32, #tpu.memory_space<vmem>>, %arg8: memref<18x18x16xf32, #tpu.memory_space<vmem>>) attributes {dimension_semantics = [#tpu.dimension_semantics<parallel>], iteration_bounds = array<i64: 2>, scalar_prefetch = 0 : i64, scratch_operands = 2 : i64, tpu.core_type = #tpu.core_type<tc>, window_params = [{transform_indices = @transform_0, window_bounds = array<i64: 1, 16, 16, 4>}, {pipeline_mode = #tpu.pipeline_mode<synchronous>, transform_indices = @transform_1, window_bounds = array<i64: 36, 16>}, {pipeline_mode = #tpu.pipeline_mode<synchronous>, transform_indices = @transform_2, window_bounds = array<i64: 1, 16>}, {pipeline_mode = #tpu.pipeline_mode<synchronous>, transform_indices = @transform_3, window_bounds = array<i64: 144, 32>}, {pipeline_mode = #tpu.pipeline_mode<synchronous>, transform_indices = @transform_4, window_bounds = array<i64: 1, 32>}, {transform_indices = @transform_5, window_bounds = array<i64: 1, 256, 32>}]} {
    %cst = arith.constant 0.000000e+00 : f32
    %0 = vector.broadcast %cst : f32 to vector<18x18x4xf32>
    %c0 = arith.constant 0 : index
    %c0_0 = arith.constant 0 : index
    %c0_1 = arith.constant 0 : index
    %1 = vector.load %arg7[%c0, %c0_0, %c0_1] : memref<18x18x4xf32, #tpu.memory_space<vmem>>, vector<18x18x4xf32>
    tpu.vector_store %arg7[%c0, %c0_0, %c0_1], %0 {strides = array<i32>} : memref<18x18x4xf32, #tpu.memory_space<vmem>>, vector<18x18x4xf32>,
    %cst_2 = arith.constant 0.000000e+00 : f32
    %2 = vector.broadcast %cst_2 : f32 to vector<18x18x16xf32>
    %c0_3 = arith.constant 0 : index
    %c0_4 = arith.constant 0 : index
    %c0_5 = arith.constant 0 : index
    %3 = vector.load %arg8[%c0_3, %c0_4, %c0_5] : memref<18x18x16xf32, #tpu.memory_space<vmem>>, vector<18x18x16xf32>
    tpu.vector_store %arg8[%c0_3, %c0_4, %c0_5], %2 {strides = array<i32>} : memref<18x18x16xf32, #tpu.memory_space<vmem>>, vector<18x18x16xf32>,
    %c0_6 = arith.constant 0 : index
    %c0_7 = arith.constant 0 : index
    %c0_8 = arith.constant 0 : index
    %c0_9 = arith.constant 0 : index
    %4 = vector.load %arg1[%c0_6, %c0_7, %c0_8, %c0_9] : memref<1x16x16x4xf32, #tpu.memory_space<vmem>>, vector<1x16x16x4xf32>
    %5 = vector.shape_cast %4 : vector<1x16x16x4xf32> to vector<16x16x4xf32>
    %c1 = arith.constant 1 : index
    %c1_10 = arith.constant 1 : index
    %c0_11 = arith.constant 0 : index
    %6 = vector.load %arg7[%c1, %c1_10, %c0_11] : memref<18x18x4xf32, #tpu.memory_space<vmem>>, vector<16x16x4xf32>
    tpu.vector_store %arg7[%c1, %c1_10, %c0_11], %5 {strides = array<i32>} : memref<18x18x4xf32, #tpu.memory_space<vmem>>, vector<16x16x4xf32>,
    %c0_12 = arith.constant 0 : index
    %c0_13 = arith.constant 0 : index
    %7 = vector.load %arg2[%c0_12, %c0_13] : memref<36x16xf32, #tpu.memory_space<vmem>>, vector<36x16xf32>
    %c0_14 = arith.constant 0 : index
    %c0_15 = arith.constant 0 : index
    %8 = vector.load %arg4[%c0_14, %c0_15] : memref<144x32xf32, #tpu.memory_space<vmem>>, vector<144x32xf32>
    %c0_16 = arith.constant 0 : index
    %c0_17 = arith.constant 0 : index
    %9 = vector.load %arg3[%c0_16, %c0_17] : memref<1x16xf32, #tpu.memory_space<vmem>>, vector<1x16xf32>
    %c0_18 = arith.constant 0 : index
    %c0_19 = arith.constant 0 : index
    %10 = vector.load %arg5[%c0_18, %c0_19] : memref<1x32xf32, #tpu.memory_space<vmem>>, vector<1x32xf32>
    %c0_20 = arith.constant 0 : index
    %c0_21 = arith.constant 0 : index
    %c0_22 = arith.constant 0 : index
    %11 = vector.load %arg7[%c0_20, %c0_21, %c0_22] : memref<18x18x4xf32, #tpu.memory_space<vmem>>, vector<8x16x4xf32>
    %c0_23 = arith.constant 0 : index
    %c1_24 = arith.constant 1 : index
    %c0_25 = arith.constant 0 : index
    %12 = vector.load %arg7[%c0_23, %c1_24, %c0_25] : memref<18x18x4xf32, #tpu.memory_space<vmem>>, vector<8x16x4xf32>
    %c0_26 = arith.constant 0 : index
    %c2 = arith.constant 2 : index
    %c0_27 = arith.constant 0 : index
    %13 = vector.load %arg7[%c0_26, %c2, %c0_27] : memref<18x18x4xf32, #tpu.memory_space<vmem>>, vector<8x16x4xf32>
    %c1_28 = arith.constant 1 : index
    %c0_29 = arith.constant 0 : index
    %c0_30 = arith.constant 0 : index
    %14 = vector.load %arg7[%c1_28, %c0_29, %c0_30] : memref<18x18x4xf32, #tpu.memory_space<vmem>>, vector<8x16x4xf32>
    %c1_31 = arith.constant 1 : index
    %c1_32 = arith.constant 1 : index
    %c0_33 = arith.constant 0 : index
    %15 = vector.load %arg7[%c1_31, %c1_32, %c0_33] : memref<18x18x4xf32, #tpu.memory_space<vmem>>, vector<8x16x4xf32>
    %c1_34 = arith.constant 1 : index
    %c2_35 = arith.constant 2 : index
    %c0_36 = arith.constant 0 : index
    %16 = vector.load %arg7[%c1_34, %c2_35, %c0_36] : memref<18x18x4xf32, #tpu.memory_space<vmem>>, vector<8x16x4xf32>
    %c2_37 = arith.constant 2 : index
    %c0_38 = arith.constant 0 : index
    %c0_39 = arith.constant 0 : index
    %17 = vector.load %arg7[%c2_37, %c0_38, %c0_39] : memref<18x18x4xf32, #tpu.memory_space<vmem>>, vector<8x16x4xf32>
    %c2_40 = arith.constant 2 : index
    %c1_41 = arith.constant 1 : index
    %c0_42 = arith.constant 0 : index
    %18 = vector.load %arg7[%c2_40, %c1_41, %c0_42] : memref<18x18x4xf32, #tpu.memory_space<vmem>>, vector<8x16x4xf32>
    %c2_43 = arith.constant 2 : index
    %c2_44 = arith.constant 2 : index
    %c0_45 = arith.constant 0 : index
    %19 = vector.load %arg7[%c2_43, %c2_44, %c0_45] : memref<18x18x4xf32, #tpu.memory_space<vmem>>, vector<8x16x4xf32>
    %20 = tpu.concatenate %11, %12, %13, %14, %15, %16, %17, %18, %19 in 2 : vector<8x16x4xf32>, vector<8x16x4xf32>, vector<8x16x4xf32>, vector<8x16x4xf32>, vector<8x16x4xf32>, vector<8x16x4xf32>, vector<8x16x4xf32>, vector<8x16x4xf32>, vector<8x16x4xf32> -> vector<8x16x36xf32>
    %21 = vector.shape_cast %20 : vector<8x16x36xf32> to vector<128x36xf32>
    %cst_46 = arith.constant dense<0.000000e+00> : vector<128x16xf32>
    %22 = tpu.matmul %21, %7, %cst_46 {dimension_numbers = #tpu.dot_dimension_numbers<[1], [0], [0], [1], [0, 0, 1, 1], [], []>} : vector<128x36xf32>, vector<36x16xf32>, vector<128x16xf32> -> vector<128x16xf32>
    %23 = vector.broadcast %9 : vector<1x16xf32> to vector<128x16xf32>
    %24 = arith.addf %22, %23 : vector<128x16xf32>
    %cst_47 = arith.constant 0.000000e+00 : f32
    %25 = vector.broadcast %cst_47 : f32 to vector<128x16xf32>
    %26 = arith.maximumf %24, %25 : vector<128x16xf32>
    %27 = vector.shape_cast %26 : vector<128x16xf32> to vector<8x16x16xf32>
    %c1_48 = arith.constant 1 : index
    %c1_49 = arith.constant 1 : index
    %c0_50 = arith.constant 0 : index
    %28 = vector.load %arg8[%c1_48, %c1_49, %c0_50] : memref<18x18x16xf32, #tpu.memory_space<vmem>>, vector<8x16x16xf32>
    tpu.vector_store %arg8[%c1_48, %c1_49, %c0_50], %27 {strides = array<i32>} : memref<18x18x16xf32, #tpu.memory_space<vmem>>, vector<8x16x16xf32>,
    %c8 = arith.constant 8 : index
    %c0_51 = arith.constant 0 : index
    %c0_52 = arith.constant 0 : index
    %29 = vector.load %arg7[%c8, %c0_51, %c0_52] : memref<18x18x4xf32, #tpu.memory_space<vmem>>, vector<8x16x4xf32>
    %c8_53 = arith.constant 8 : index
    %c1_54 = arith.constant 1 : index
    %c0_55 = arith.constant 0 : index
    %30 = vector.load %arg7[%c8_53, %c1_54, %c0_55] : memref<18x18x4xf32, #tpu.memory_space<vmem>>, vector<8x16x4xf32>
    %c8_56 = arith.constant 8 : index
    %c2_57 = arith.constant 2 : index
    %c0_58 = arith.constant 0 : index
    %31 = vector.load %arg7[%c8_56, %c2_57, %c0_58] : memref<18x18x4xf32, #tpu.memory_space<vmem>>, vector<8x16x4xf32>
    %c9 = arith.constant 9 : index
    %c0_59 = arith.constant 0 : index
    %c0_60 = arith.constant 0 : index
    %32 = vector.load %arg7[%c9, %c0_59, %c0_60] : memref<18x18x4xf32, #tpu.memory_space<vmem>>, vector<8x16x4xf32>
    %c9_61 = arith.constant 9 : index
    %c1_62 = arith.constant 1 : index
    %c0_63 = arith.constant 0 : index
    %33 = vector.load %arg7[%c9_61, %c1_62, %c0_63] : memref<18x18x4xf32, #tpu.memory_space<vmem>>, vector<8x16x4xf32>
    %c9_64 = arith.constant 9 : index
    %c2_65 = arith.constant 2 : index
    %c0_66 = arith.constant 0 : index
    %34 = vector.load %arg7[%c9_64, %c2_65, %c0_66] : memref<18x18x4xf32, #tpu.memory_space<vmem>>, vector<8x16x4xf32>
    %c10 = arith.constant 10 : index
    %c0_67 = arith.constant 0 : index
    %c0_68 = arith.constant 0 : index
    %35 = vector.load %arg7[%c10, %c0_67, %c0_68] : memref<18x18x4xf32, #tpu.memory_space<vmem>>, vector<8x16x4xf32>
    %c10_69 = arith.constant 10 : index
    %c1_70 = arith.constant 1 : index
    %c0_71 = arith.constant 0 : index
    %36 = vector.load %arg7[%c10_69, %c1_70, %c0_71] : memref<18x18x4xf32, #tpu.memory_space<vmem>>, vector<8x16x4xf32>
    %c10_72 = arith.constant 10 : index
    %c2_73 = arith.constant 2 : index
    %c0_74 = arith.constant 0 : index
    %37 = vector.load %arg7[%c10_72, %c2_73, %c0_74] : memref<18x18x4xf32, #tpu.memory_space<vmem>>, vector<8x16x4xf32>
    %38 = tpu.concatenate %29, %30, %31, %32, %33, %34, %35, %36, %37 in 2 : vector<8x16x4xf32>, vector<8x16x4xf32>, vector<8x16x4xf32>, vector<8x16x4xf32>, vector<8x16x4xf32>, vector<8x16x4xf32>, vector<8x16x4xf32>, vector<8x16x4xf32>, vector<8x16x4xf32> -> vector<8x16x36xf32>
    %39 = vector.shape_cast %38 : vector<8x16x36xf32> to vector<128x36xf32>
    %cst_75 = arith.constant dense<0.000000e+00> : vector<128x16xf32>
    %40 = tpu.matmul %39, %7, %cst_75 {dimension_numbers = #tpu.dot_dimension_numbers<[1], [0], [0], [1], [0, 0, 1, 1], [], []>} : vector<128x36xf32>, vector<36x16xf32>, vector<128x16xf32> -> vector<128x16xf32>
    %41 = vector.broadcast %9 : vector<1x16xf32> to vector<128x16xf32>
    %42 = arith.addf %40, %41 : vector<128x16xf32>
    %cst_76 = arith.constant 0.000000e+00 : f32
    %43 = vector.broadcast %cst_76 : f32 to vector<128x16xf32>
    %44 = arith.maximumf %42, %43 : vector<128x16xf32>
    %45 = vector.shape_cast %44 : vector<128x16xf32> to vector<8x16x16xf32>
    %c9_77 = arith.constant 9 : index
    %c1_78 = arith.constant 1 : index
    %c0_79 = arith.constant 0 : index
    %46 = vector.load %arg8[%c9_77, %c1_78, %c0_79] : memref<18x18x16xf32, #tpu.memory_space<vmem>>, vector<8x16x16xf32>
    tpu.vector_store %arg8[%c9_77, %c1_78, %c0_79], %45 {strides = array<i32>} : memref<18x18x16xf32, #tpu.memory_space<vmem>>, vector<8x16x16xf32>,
    %c0_80 = arith.constant 0 : index
    %c0_81 = arith.constant 0 : index
    %c0_82 = arith.constant 0 : index
    %47 = vector.load %arg8[%c0_80, %c0_81, %c0_82] : memref<18x18x16xf32, #tpu.memory_space<vmem>>, vector<8x16x16xf32>
    %c0_83 = arith.constant 0 : index
    %c1_84 = arith.constant 1 : index
    %c0_85 = arith.constant 0 : index
    %48 = vector.load %arg8[%c0_83, %c1_84, %c0_85] : memref<18x18x16xf32, #tpu.memory_space<vmem>>, vector<8x16x16xf32>
    %c0_86 = arith.constant 0 : index
    %c2_87 = arith.constant 2 : index
    %c0_88 = arith.constant 0 : index
    %49 = vector.load %arg8[%c0_86, %c2_87, %c0_88] : memref<18x18x16xf32, #tpu.memory_space<vmem>>, vector<8x16x16xf32>
    %c1_89 = arith.constant 1 : index
    %c0_90 = arith.constant 0 : index
    %c0_91 = arith.constant 0 : index
    %50 = vector.load %arg8[%c1_89, %c0_90, %c0_91] : memref<18x18x16xf32, #tpu.memory_space<vmem>>, vector<8x16x16xf32>
    %c1_92 = arith.constant 1 : index
    %c1_93 = arith.constant 1 : index
    %c0_94 = arith.constant 0 : index
    %51 = vector.load %arg8[%c1_92, %c1_93, %c0_94] : memref<18x18x16xf32, #tpu.memory_space<vmem>>, vector<8x16x16xf32>
    %c1_95 = arith.constant 1 : index
    %c2_96 = arith.constant 2 : index
    %c0_97 = arith.constant 0 : index
    %52 = vector.load %arg8[%c1_95, %c2_96, %c0_97] : memref<18x18x16xf32, #tpu.memory_space<vmem>>, vector<8x16x16xf32>
    %c2_98 = arith.constant 2 : index
    %c0_99 = arith.constant 0 : index
    %c0_100 = arith.constant 0 : index
    %53 = vector.load %arg8[%c2_98, %c0_99, %c0_100] : memref<18x18x16xf32, #tpu.memory_space<vmem>>, vector<8x16x16xf32>
    %c2_101 = arith.constant 2 : index
    %c1_102 = arith.constant 1 : index
    %c0_103 = arith.constant 0 : index
    %54 = vector.load %arg8[%c2_101, %c1_102, %c0_103] : memref<18x18x16xf32, #tpu.memory_space<vmem>>, vector<8x16x16xf32>
    %c2_104 = arith.constant 2 : index
    %c2_105 = arith.constant 2 : index
    %c0_106 = arith.constant 0 : index
    %55 = vector.load %arg8[%c2_104, %c2_105, %c0_106] : memref<18x18x16xf32, #tpu.memory_space<vmem>>, vector<8x16x16xf32>
    %56 = tpu.concatenate %47, %48, %49, %50, %51, %52, %53, %54, %55 in 2 : vector<8x16x16xf32>, vector<8x16x16xf32>, vector<8x16x16xf32>, vector<8x16x16xf32>, vector<8x16x16xf32>, vector<8x16x16xf32>, vector<8x16x16xf32>, vector<8x16x16xf32>, vector<8x16x16xf32> -> vector<8x16x144xf32>
    %57 = vector.shape_cast %56 : vector<8x16x144xf32> to vector<128x144xf32>
    %cst_107 = arith.constant dense<0.000000e+00> : vector<128x32xf32>
    %58 = tpu.matmul %57, %8, %cst_107 {dimension_numbers = #tpu.dot_dimension_numbers<[1], [0], [0], [1], [0, 0, 1, 1], [], []>} : vector<128x144xf32>, vector<144x32xf32>, vector<128x32xf32> -> vector<128x32xf32>
    %59 = vector.broadcast %10 : vector<1x32xf32> to vector<128x32xf32>
    %60 = arith.addf %58, %59 : vector<128x32xf32>
    %cst_108 = arith.constant 0.000000e+00 : f32
    %61 = vector.broadcast %cst_108 : f32 to vector<128x32xf32>
    %62 = arith.maximumf %60, %61 : vector<128x32xf32>
    %63 = arith.truncf %62 : vector<128x32xf32> to vector<128x32xbf16>
    %c0_109 = arith.constant 0 : index
    %c0_110 = arith.constant 0 : index
    %c0_111 = arith.constant 0 : index
    %64 = vector.load %arg6[%c0_109, %c0_110, %c0_111] : memref<1x256x32xbf16, #tpu.memory_space<vmem>>, vector<1x128x32xbf16>
    %65 = vector.shape_cast %64 : vector<1x128x32xbf16> to vector<128x32xbf16>
    %66 = vector.shape_cast %63 : vector<128x32xbf16> to vector<1x128x32xbf16>
    tpu.vector_store %arg6[%c0_109, %c0_110, %c0_111], %66 {strides = array<i32>} : memref<1x256x32xbf16, #tpu.memory_space<vmem>>, vector<1x128x32xbf16>,
    %c8_112 = arith.constant 8 : index
    %c0_113 = arith.constant 0 : index
    %c0_114 = arith.constant 0 : index
    %67 = vector.load %arg8[%c8_112, %c0_113, %c0_114] : memref<18x18x16xf32, #tpu.memory_space<vmem>>, vector<8x16x16xf32>
    %c8_115 = arith.constant 8 : index
    %c1_116 = arith.constant 1 : index
    %c0_117 = arith.constant 0 : index
    %68 = vector.load %arg8[%c8_115, %c1_116, %c0_117] : memref<18x18x16xf32, #tpu.memory_space<vmem>>, vector<8x16x16xf32>
    %c8_118 = arith.constant 8 : index
    %c2_119 = arith.constant 2 : index
    %c0_120 = arith.constant 0 : index
    %69 = vector.load %arg8[%c8_118, %c2_119, %c0_120] : memref<18x18x16xf32, #tpu.memory_space<vmem>>, vector<8x16x16xf32>
    %c9_121 = arith.constant 9 : index
    %c0_122 = arith.constant 0 : index
    %c0_123 = arith.constant 0 : index
    %70 = vector.load %arg8[%c9_121, %c0_122, %c0_123] : memref<18x18x16xf32, #tpu.memory_space<vmem>>, vector<8x16x16xf32>
    %c9_124 = arith.constant 9 : index
    %c1_125 = arith.constant 1 : index
    %c0_126 = arith.constant 0 : index
    %71 = vector.load %arg8[%c9_124, %c1_125, %c0_126] : memref<18x18x16xf32, #tpu.memory_space<vmem>>, vector<8x16x16xf32>
    %c9_127 = arith.constant 9 : index
    %c2_128 = arith.constant 2 : index
    %c0_129 = arith.constant 0 : index
    %72 = vector.load %arg8[%c9_127, %c2_128, %c0_129] : memref<18x18x16xf32, #tpu.memory_space<vmem>>, vector<8x16x16xf32>
    %c10_130 = arith.constant 10 : index
    %c0_131 = arith.constant 0 : index
    %c0_132 = arith.constant 0 : index
    %73 = vector.load %arg8[%c10_130, %c0_131, %c0_132] : memref<18x18x16xf32, #tpu.memory_space<vmem>>, vector<8x16x16xf32>
    %c10_133 = arith.constant 10 : index
    %c1_134 = arith.constant 1 : index
    %c0_135 = arith.constant 0 : index
    %74 = vector.load %arg8[%c10_133, %c1_134, %c0_135] : memref<18x18x16xf32, #tpu.memory_space<vmem>>, vector<8x16x16xf32>
    %c10_136 = arith.constant 10 : index
    %c2_137 = arith.constant 2 : index
    %c0_138 = arith.constant 0 : index
    %75 = vector.load %arg8[%c10_136, %c2_137, %c0_138] : memref<18x18x16xf32, #tpu.memory_space<vmem>>, vector<8x16x16xf32>
    %76 = tpu.concatenate %67, %68, %69, %70, %71, %72, %73, %74, %75 in 2 : vector<8x16x16xf32>, vector<8x16x16xf32>, vector<8x16x16xf32>, vector<8x16x16xf32>, vector<8x16x16xf32>, vector<8x16x16xf32>, vector<8x16x16xf32>, vector<8x16x16xf32>, vector<8x16x16xf32> -> vector<8x16x144xf32>
    %77 = vector.shape_cast %76 : vector<8x16x144xf32> to vector<128x144xf32>
    %cst_139 = arith.constant dense<0.000000e+00> : vector<128x32xf32>
    %78 = tpu.matmul %77, %8, %cst_139 {dimension_numbers = #tpu.dot_dimension_numbers<[1], [0], [0], [1], [0, 0, 1, 1], [], []>} : vector<128x144xf32>, vector<144x32xf32>, vector<128x32xf32> -> vector<128x32xf32>
    %79 = vector.broadcast %10 : vector<1x32xf32> to vector<128x32xf32>
    %80 = arith.addf %78, %79 : vector<128x32xf32>
    %cst_140 = arith.constant 0.000000e+00 : f32
    %81 = vector.broadcast %cst_140 : f32 to vector<128x32xf32>
    %82 = arith.maximumf %80, %81 : vector<128x32xf32>
    %83 = arith.truncf %82 : vector<128x32xf32> to vector<128x32xbf16>
    %c0_141 = arith.constant 0 : index
    %c128 = arith.constant 128 : index
    %c0_142 = arith.constant 0 : index
    %84 = vector.load %arg6[%c0_141, %c128, %c0_142] : memref<1x256x32xbf16, #tpu.memory_space<vmem>>, vector<1x128x32xbf16>
    %85 = vector.shape_cast %84 : vector<1x128x32xbf16> to vector<128x32xbf16>
    %86 = vector.shape_cast %83 : vector<128x32xbf16> to vector<1x128x32xbf16>
    tpu.vector_store %arg6[%c0_141, %c128, %c0_142], %86 {strides = array<i32>} : memref<1x256x32xbf16, #tpu.memory_space<vmem>>, vector<1x128x32xbf16>,
    return
  }
  func.func @transform_0(%arg0: i32) -> (i32, i32, i32, i32) {
    %c0_i32 = arith.constant 0 : i32
    %c0_i32_0 = arith.constant 0 : i32
    %c0_i32_1 = arith.constant 0 : i32
    %c0_i32_2 = arith.constant 0 : i32
    return %arg0, %c0_i32, %c0_i32_0, %c0_i32_1 : i32, i32, i32, i32
  }
  func.func @transform_1(%arg0: i32) -> (i32, i32) {
    %c0_i32 = arith.constant 0 : i32
    %c0_i32_0 = arith.constant 0 : i32
    %c0_i32_1 = arith.constant 0 : i32
    return %c0_i32, %c0_i32_0 : i32, i32
  }
  func.func @transform_2(%arg0: i32) -> (i32, i32) {
    %c0_i32 = arith.constant 0 : i32
    %c0_i32_0 = arith.constant 0 : i32
    %c0_i32_1 = arith.constant 0 : i32
    return %c0_i32, %c0_i32_0 : i32, i32
  }
  func.func @transform_3(%arg0: i32) -> (i32, i32) {
    %c0_i32 = arith.constant 0 : i32
    %c0_i32_0 = arith.constant 0 : i32
    %c0_i32_1 = arith.constant 0 : i32
    return %c0_i32, %c0_i32_0 : i32, i32
  }
  func.func @transform_4(%arg0: i32) -> (i32, i32) {
    %c0_i32 = arith.constant 0 : i32
    %c0_i32_0 = arith.constant 0 : i32
    %c0_i32_1 = arith.constant 0 : i32
    return %c0_i32, %c0_i32_0 : i32, i32
  }
  func.func @transform_5(%arg0: i32) -> (i32, i32, i32) {
    %c0_i32 = arith.constant 0 : i32
    %c0_i32_0 = arith.constant 0 : i32
    %c0_i32_1 = arith.constant 0 : i32
    return %arg0, %c0_i32, %c0_i32_0 : i32, i32, i32
  }
}

module attributes {stable_mosaic.version = 11 : i64} {
  func.func @_fc_heads_kernel(%arg0: i32, %arg1: memref<2x8192xbf16, #tpu.memory_space<vmem>>, %arg2: memref<8192x128xbf16, #tpu.memory_space<vmem>>, %arg3: memref<1x128xf32, #tpu.memory_space<vmem>>, %arg4: memref<128x9xf32, #tpu.memory_space<vmem>>, %arg5: memref<1x2x9xf32, #tpu.memory_space<vmem>>) attributes {dimension_semantics = [#tpu.dimension_semantics<parallel>], iteration_bounds = array<i64: 2>, scalar_prefetch = 0 : i64, scratch_operands = 0 : i64, tpu.core_type = #tpu.core_type<tc>, window_params = [{pipeline_mode = #tpu.pipeline_mode<synchronous>, transform_indices = @transform_0, window_bounds = array<i64: 2, 8192>}, {transform_indices = @transform_1, window_bounds = array<i64: 8192, 128>}, {transform_indices = @transform_2, window_bounds = array<i64: 1, 128>}, {transform_indices = @transform_3, window_bounds = array<i64: 128, 9>}, {transform_indices = @transform_4, window_bounds = array<i64: 1, 2, 9>}]} {
    %c0 = arith.constant 0 : index
    %c0_0 = arith.constant 0 : index
    %0 = vector.load %arg1[%c0, %c0_0] : memref<2x8192xbf16, #tpu.memory_space<vmem>>, vector<2x8192xbf16>
    %c0_1 = arith.constant 0 : index
    %c0_2 = arith.constant 0 : index
    %1 = vector.load %arg2[%c0_1, %c0_2] : memref<8192x128xbf16, #tpu.memory_space<vmem>>, vector<8192x128xbf16>
    %cst = arith.constant dense<0.000000e+00> : vector<2x128xf32>
    %2 = tpu.matmul %0, %1, %cst {dimension_numbers = #tpu.dot_dimension_numbers<[1], [0], [0], [1], [0, 0, 1, 1], [], []>} : vector<2x8192xbf16>, vector<8192x128xbf16>, vector<2x128xf32> -> vector<2x128xf32>
    %c0_3 = arith.constant 0 : index
    %c0_4 = arith.constant 0 : index
    %3 = vector.load %arg3[%c0_3, %c0_4] : memref<1x128xf32, #tpu.memory_space<vmem>>, vector<1x128xf32>
    %4 = vector.broadcast %3 : vector<1x128xf32> to vector<2x128xf32>
    %5 = arith.addf %2, %4 : vector<2x128xf32>
    %cst_5 = arith.constant 0.000000e+00 : f32
    %6 = vector.broadcast %cst_5 : f32 to vector<2x128xf32>
    %7 = arith.maximumf %5, %6 : vector<2x128xf32>
    %c0_6 = arith.constant 0 : index
    %c0_7 = arith.constant 0 : index
    %8 = vector.load %arg4[%c0_6, %c0_7] : memref<128x9xf32, #tpu.memory_space<vmem>>, vector<128x9xf32>
    %cst_8 = arith.constant dense<0.000000e+00> : vector<2x9xf32>
    %9 = tpu.matmul %7, %8, %cst_8 {dimension_numbers = #tpu.dot_dimension_numbers<[1], [0], [0], [1], [0, 0, 1, 1], [], []>} : vector<2x128xf32>, vector<128x9xf32>, vector<2x9xf32> -> vector<2x9xf32>
    %c0_9 = arith.constant 0 : index
    %c0_10 = arith.constant 0 : index
    %c0_11 = arith.constant 0 : index
    %10 = vector.load %arg5[%c0_9, %c0_10, %c0_11] : memref<1x2x9xf32, #tpu.memory_space<vmem>>, vector<1x2x9xf32>
    %11 = vector.shape_cast %10 : vector<1x2x9xf32> to vector<2x9xf32>
    %12 = vector.shape_cast %9 : vector<2x9xf32> to vector<1x2x9xf32>
    tpu.vector_store %arg5[%c0_9, %c0_10, %c0_11], %12 {strides = array<i32>} : memref<1x2x9xf32, #tpu.memory_space<vmem>>, vector<1x2x9xf32>,
    return
  }
  func.func @transform_0(%arg0: i32) -> (i32, i32) {
    %c0_i32 = arith.constant 0 : i32
    %c0_i32_0 = arith.constant 0 : i32
    %c0_i32_1 = arith.constant 0 : i32
    return %c0_i32, %c0_i32_0 : i32, i32
  }
  func.func @transform_1(%arg0: i32) -> (i32, i32) {
    %c0_i32 = arith.constant 0 : i32
    %c0_i32_0 = arith.constant 0 : i32
    return %c0_i32, %arg0 : i32, i32
  }
  func.func @transform_2(%arg0: i32) -> (i32, i32) {
    %c0_i32 = arith.constant 0 : i32
    %c0_i32_0 = arith.constant 0 : i32
    return %c0_i32, %arg0 : i32, i32
  }
  func.func @transform_3(%arg0: i32) -> (i32, i32) {
    %c0_i32 = arith.constant 0 : i32
    %c0_i32_0 = arith.constant 0 : i32
    return %arg0, %c0_i32 : i32, i32
  }
  func.func @transform_4(%arg0: i32) -> (i32, i32, i32) {
    %c0_i32 = arith.constant 0 : i32
    %c0_i32_0 = arith.constant 0 : i32
    %c0_i32_1 = arith.constant 0 : i32
    return %arg0, %c0_i32, %c0_i32_0 : i32, i32, i32
  }
}

</mosaic_0001>

<bundles_post_ra>
// kernel: _hex_cnn_forward.2
= control target key start
LH: loop header
LB: loop body
LE: loop exit
PB: predicated region body
PF: predicated region fallthrough
CT: control target
= control target key end

     0   :  { %10 = vsyncpa [#allocation5], 0  ;;  %s8577_s0 = inlined_call_operand.vmem [shape: f32[2,16,16,4], index: 0, kind: input, shape index: {}]   ;;  %s8578_s1 = inlined_call_operand.vmem [shape: f32[36,16], index: 1, kind: input, shape index: {}]   ;;  %s8579_s2 = inlined_call_operand.hbm [shape: f32[1,16], index: 2, kind: input, shape index: {}]   ;;  %s8580_s3 = inlined_call_operand.vmem [shape: f32[144,32], index: 3, kind: input, shape index: {}]   ;;  %s8581_s4 = inlined_call_operand.hbm [shape: f32[1,32], index: 4, kind: input, shape index: {}]   ;;  %s8582_s5 = inlined_call_operand.vmem [shape: bf16[2,256,32], index: 5, kind: output, shape index: {}]  }
   0x1   :  { %11 = vsyncpa [#allocation7], 0  ;;  %s5638_s18 = smov 0  }
   0x2 LB: > { %s5644_s19 = sadd.s32 4294967295, %s5589_s18   ;;  %p4574_p0 = scmp.ge.s32.totalorder %s5589_s18, 1  ;;  %s5589_s18 = sphi %s5638_s18, %s17_s18  }
   0x3   : > { %p158_p1 = scmp.lt.s32.totalorder %s5589_s18, 3  ;;  %p8583_p2 = scmp.eq.s32.totalorder %s5644_s19, 0 }
   0x4   : > { %s5591_s21 = smov [#allocation4]   ;;  %s5592_s23 = smov [#allocation6]  }
   0x5   : > { %p5649_p3 = pnand %p4574_p0, %p158_p1  ;;  %s174_s22 = sshll.u32 %s5591_s21, 4  ;;  %s175_s22 = int_to_ptr.vmem [resolvable:$true] %s174_s22 }
   0x6   : > { %s188_s24 = sshll.u32 %s5592_s23, 4  ;;  %s5519_s28 = scalar_lea.hbm %s8579_s2, 16  ;;  %s5661_s24 = int_to_ptr.vmem [resolvable:$true] %s188_s24 }
   0x7   : > { %s8641_s20 = scalar_select %p5649_p3, 1, 0 }
   0x8   : > { %p4909_p4 = pneg %p5649_p3  ;;  %p5520_p6 = scmp.ne.s32.totalorder %s8579_s2, %s5519_s28 }
   0x9   : > { %p5526_p10 = scmp.lt.u32.totalorder %s5519_s28, %s8579_s2 }
   0xa   : > { %p5657_p5 = pnand %p8583_p2, %p4909_p4 }
   0xc   : > { %p5521_p7 = pneg %p5657_p5 }
   0xe   : > { %p5522_p8 = pnand %p5521_p7, %p5520_p6 }
  0x10   : > { %p5523_p9 = pneg %p5522_p8 }
  0x12   : > { %p5528_p11 = pnand %p5526_p10, %p5523_p9 }
  0x14   : > { %5531 = shalt.err (!%p5528_p11)
}
  0x15   : > { %s5532_s8 = scalar_lea.vmem %s175_s22, 16  ;;  %s5539_s9 = scalar_lea.vmem %s175_s22, 32 }
  0x16   : > { %p5533_p12 = scmp.ne.s32.totalorder %s175_s22, %s5532_s8  ;;  %p5540_p1 = scmp.lt.s32.totalorder %s175_s22, %s175_s22 }
  0x17   : > { %p5541_p4 = scmp.lt.s32.totalorder %s5539_s9, %s5532_s8 }
  0x18   : > { %p5535_p13 = pnand %p5533_p12, %p5521_p7 }
  0x19   : > { %p5542_p2 = por %p5541_p4, %p5540_p1 }
  0x1a   : > { %p5536_p0 = pneg %p5535_p13 }
  0x1c   : > { %p5543_p3 = pnand %p5542_p2, %p5536_p0 }
  0x1e   : > { %5546 = shalt.err (!%p5543_p3)
}
  0x1f   : > { %4912 = dma.hbm_to_vmem [thread:$0]  (!%p5657_p5), %s8579_s2, 16, %s175_s22, [#allocation5]  }
  0x20   : > { %s5547_s14 = scalar_lea.hbm %s8581_s4, 16 }
  0x21   : > { %p5548_p6 = scmp.ne.s32.totalorder %s8581_s4, %s5547_s14  ;;  %p5554_p3 = scmp.lt.u32.totalorder %s5547_s14, %s8581_s4 }
  0x23   : > { %p5550_p8 = pnand %p5548_p6, %p5521_p7 }
  0x25   : > { %p5551_p2 = pneg %p5550_p8 }
  0x27   : > { %p5556_p9 = pnand %p5554_p3, %p5551_p2 }
  0x29   : > { %5559 = shalt.err (!%p5556_p9)
}
  0x2a   : > { %s5560_s22 = scalar_lea.vmem %s5661_s24, 16  ;;  %s5567_s23 = scalar_lea.vmem %s5661_s24, 32 }
  0x2b   : > { %p5561_p10 = scmp.ne.s32.totalorder %s5661_s24, %s5560_s22  ;;  %p5568_p13 = scmp.lt.s32.totalorder %s5661_s24, %s5661_s24 }
  0x2c   : > { %p5569_p0 = scmp.lt.s32.totalorder %s5567_s23, %s5560_s22 }
  0x2d   : > { %p5563_p11 = pnand %p5561_p10, %p5521_p7 }
  0x2e   : > { %p5570_p1 = por %p5569_p0, %p5568_p13 }
  0x2f   : > { %p5564_p12 = pneg %p5563_p11 }
  0x31   : > { %p5571_p4 = pnand %p5570_p1, %p5564_p12 }
  0x33   : > { %5574 = shalt.err (!%p5571_p4)
}
  0x34   : > { %4915 = dma.hbm_to_vmem [thread:$0]  (!%p5657_p5), %s8581_s4, 16, %s5661_s24, [#allocation7]  }
  0x35   : > { %p8643_p6 = scmp.ne.s32.totalorder %s8641_s20, 0 }
  0x37   : > { %209 = sbr.rel (%p8643_p6) target bundleno = 1324 (0x52c), region = 40 }
  0x3e   : > { %p8644_p7 = scmp.eq.s32.totalorder %s5644_s19, 0 }
  0x40   : > { %5580 = dma.done.wait (%p8644_p7), [#allocation5], 16   ;;  %p8645_p8 = pmov %p8644_p7 }
  0x41   : > { %p8646_p2 = pmov %p8644_p7 }
  0x42   : > { %5582 = vsyncadd (%p8645_p8), [#allocation5], 4294967280 }
  0x43   : > { %5584 = dma.done.wait (%p8646_p2), [#allocation7], 16   ;;  %p8647_p3 = pmov %p8646_p2 }
  0x44   : > { %vm251_vm0 = vcmask 31744   ;;  %vm254_vm1 = vcmask 25600   ;;  %v8585_v0 = vmov 0.0   ;;  %p241_p5 = scmp.lt.s32.totalorder %s5644_s19, 1  ;;  %s5594_s29 = smov 4   ;;  %vm307_vm2 = vcmask 130048  }
  0x45   : > { %5586 = vsyncadd (%p8647_p3), [#allocation7], 4294967280  ;;  %252 = vst.msk [vmem:[#allocation2] sm:$0xff] %vm251_vm0, %v8585_v0  ;;  %s5595_s30 = smov 8   ;;  %s5596_s6 = smov 12   ;;  %vm1299_vm3 = vcmask 1043456  }
  0x46   : > { %253 = vst.msk [vmem:[#allocation2 + $0x8] sm:$0xff] %vm251_vm0, %v8585_v0  ;;  %256 = vst.msk [vmem:[#allocation2 + $0x18] sm:$0xff] %vm251_vm0, %v8585_v0  ;;  %s8856_s19 = smov (!%p241_p5, %s5644_s19), 1  ;;  %s5597_s7 = smov 16   ;;  %vm1126_vm4 = vcmask 64512   ;;  %vm1143_vm5 = vcmask 97280  }
  0x47   : > { %257 = vst.msk [vmem:[#allocation2 + $0x20] sm:$0xff] %vm251_vm0, %v8585_v0  ;;  %259 = vst.msk [vmem:[#allocation2 + $0x30] sm:$0xff] %vm251_vm0, %v8585_v0  ;;  %s4687_s20 = sshll.u32 %s8856_s19, 8  ;;  %s5598_s8 = smov 20   ;;  %vm1176_vm6 = vcmask 162816   ;;  %vm1193_vm7 = vcmask 195584  }
  0x48   : > { %260 = vst.msk [vmem:[#allocation2 + $0x38] sm:$0xff] %vm251_vm0, %v8585_v0  ;;  %262 = vst.msk [vmem:[#allocation2 + $0x48] sm:$0xff] %vm251_vm0, %v8585_v0  ;;  %s5837_s28 = scalar_lea.vmem %s8577_s0, %s4687_s20  ;;  %s5599_s9 = smov 24   ;;  %vm1210_vm8 = vcmask 228352   ;;  %vm1227_vm9 = vcmask 261120   ;;  %vm1250_vm10 = vcmask 293888  }
  0x49   : > { %263 = vst.msk [vmem:[#allocation2 + $0x50] sm:$0xff] %vm251_vm0, %v8585_v0  ;;  %265 = vst.msk [vmem:[#allocation2 + $0x60] sm:$0xff] %vm251_vm0, %v8585_v0  ;;  %v363_v1 = vld [vmem:[%s5837_s28] sm:$0xff]  ;;  %v365_v2 = vld [vmem:[%s5837_s28 + $0x10] sm:$0xff]  ;;  %s5600_s10 = smov 28   ;;  %s5601_s26 = smov 32  }
  0x4a   : > { %266 = vst.msk [vmem:[#allocation2 + $0x68] sm:$0xff] %vm251_vm0, %v8585_v0  ;;  %268 = vst.msk [vmem:[#allocation2 + $0x78] sm:$0xff] %vm251_vm0, %v8585_v0  ;;  %v364_v3 = vld [vmem:[%s5837_s28 + $0x8] sm:$0xff]  ;;  %v367_v6 = vld [vmem:[%s5837_s28 + $0x20] sm:$0xff]  ;;  %vm310_vm11 = vcmask 123904   ;;  %s5602_s27 = smov 48  }
  0x4b   : > { %269 = vst.msk [vmem:[#allocation2 + $0x80] sm:$0xff] %vm251_vm0, %v8585_v0  ;;  %271 = vst.msk [vmem:[#allocation2 + $0x90] sm:$0xff] %vm251_vm0, %v8585_v0  ;;  %v366_v7 = vld [vmem:[%s5837_s28 + $0x18] sm:$0xff]  ;;  %v369_v8 = vld [vmem:[%s5837_s28 + $0x30] sm:$0xff]  ;;  %s5603_s20 = smov 64   ;;  %s5605_s22 = smov 80  }
  0x4c   : > { %272 = vst.msk [vmem:[#allocation2 + $0x98] sm:$0xff] %vm251_vm0, %v8585_v0  ;;  %274 = vst.msk [vmem:[#allocation2 + $0xa8] sm:$0xff] %vm251_vm0, %v8585_v0  ;;  %v368_v9 = vld [vmem:[%s5837_s28 + $0x28] sm:$0xff]  ;;  %v371_v10 = vld [vmem:[%s5837_s28 + $0x40] sm:$0xff]  ;;  %s5606_s23 = smov 112   ;;  %s5607_s24 = smov 96  }
  0x4d   : > { %275 = vst.msk [vmem:[#allocation2 + $0xb0] sm:$0xff] %vm251_vm0, %v8585_v0  ;;  %277 = vst.msk [vmem:[#allocation2 + $0xc0] sm:$0xff] %vm251_vm0, %v8585_v0  ;;  %v469_v4 = vld [vmem:[#allocation2 + $0x1] sm:$0xff]  ;;  %v370_v11 = vld [vmem:[%s5837_s28 + $0x38] sm:$0xff]  ;;  %vm3119_vm12 = vcmask 392192   ;;  %vm3136_vm13 = vcmask 523264  }
  0x4e   : > { %278 = vst.msk [vmem:[#allocation2 + $0xc8] sm:$0xff] %vm251_vm0, %v8585_v0  ;;  %280 = vst.msk [vmem:[#allocation2 + $0xd8] sm:$0xff] %vm251_vm0, %v8585_v0  ;;  %614 = vrot.lane.b32.xlu0 %v469_v4, %s5594_s29  ;;  %v373_v12 = vld [vmem:[%s5837_s28 + $0x50] sm:$0xff]  ;;  %v372_v13 = vld [vmem:[%s5837_s28 + $0x48] sm:$0xff]  ;;  %vm3153_vm14 = vcmask 654336   ;;  %vm3170_vm15 = vcmask 785408  }
  0x4f   : > { %281 = vst.msk [vmem:[#allocation2 + $0xe0] sm:$0xff] %vm251_vm0, %v8585_v0  ;;  %283 = vst.msk [vmem:[#allocation2 + $0xf0] sm:$0xff] %vm251_vm0, %v8585_v0  ;;  %v375_v14 = vld [vmem:[%s5837_s28 + $0x60] sm:$0xff]  ;;  %v374_v15 = vld [vmem:[%s5837_s28 + $0x58] sm:$0xff] }
  0x50   : > { %284 = vst.msk [vmem:[#allocation2 + $0xf8] sm:$0xff] %vm251_vm0, %v8585_v0  ;;  %286 = vst.msk [vmem:[#allocation2 + $0x108] sm:$0xff] %vm251_vm0, %v8585_v0  ;;  %v376_v16 = vld [vmem:[%s5837_s28 + $0x68] sm:$0xff]  ;;  %v377_v17 = vld [vmem:[%s5837_s28 + $0x70] sm:$0xff] }
  0x51   : > { %287 = vst.msk [vmem:[#allocation2 + $0x110] sm:$0xff] %vm251_vm0, %v8585_v0  ;;  %289 = vst.msk [vmem:[#allocation2 + $0x120] sm:$0xff] %vm251_vm0, %v8585_v0  ;;  %v378_v18 = vld [vmem:[%s5837_s28 + $0x78] sm:$0xff]  ;;  %v485_v32 = vld [vmem:[#allocation2 + $0x2] sm:$0xff] }
  0x52   : > { %290 = vst.msk [vmem:[#allocation2 + $0x128] sm:$0xff] %vm251_vm0, %v8585_v0  ;;  %292 = vst.msk [vmem:[#allocation2 + $0x138] sm:$0xff] %vm251_vm0, %v8585_v0  ;;  %v379_v43 = vld [vmem:[%s5837_s28 + $0x80] sm:$0xff]  ;;  %v380_v48 = vld [vmem:[%s5837_s28 + $0x88] sm:$0xff] }
  0x53   : > { %293 = vst.msk [vmem:[#allocation2 + $0x140] sm:$0xff] %vm251_vm0, %v8585_v0  ;;  %295 = vst.msk [vmem:[#allocation2 + $0x150] sm:$0xff] %vm251_vm0, %v8585_v0 }
  0x54   : > { %296 = vst.msk [vmem:[#allocation2 + $0x158] sm:$0xff] %vm251_vm0, %v8585_v0  ;;  %298 = vst.msk [vmem:[#allocation2 + $0x168] sm:$0xff] %vm251_vm0, %v8585_v0 }
  0x55   : > { %299 = vst.msk [vmem:[#allocation2 + $0x170] sm:$0xff] %vm251_vm0, %v8585_v0  ;;  %301 = vst.msk [vmem:[#allocation2 + $0x180] sm:$0xff] %vm251_vm0, %v8585_v0 }
  0x56   : > { %302 = vst.msk [vmem:[#allocation2 + $0x188] sm:$0xff] %vm251_vm0, %v8585_v0  ;;  %304 = vst.msk [vmem:[#allocation2 + $0x198] sm:$0xff] %vm251_vm0, %v8585_v0 }
  0x57   : > { %305 = vst.msk [vmem:[#allocation2 + $0x1a0] sm:$0xff] %vm251_vm0, %v8585_v0  ;;  %396 = vst.msk [vmem:[#allocation2 + $0x19] sm:$0xff] %vm251_vm0, %v363_v1 }
  0x58   : > { %255 = vst.msk [vmem:[#allocation2 + $0x10] sm:$0x3] %vm254_vm1, %v8585_v0  ;;  %258 = vst.msk [vmem:[#allocation2 + $0x28] sm:$0x3] %vm254_vm1, %v8585_v0 }
  0x59   : > { %261 = vst.msk [vmem:[#allocation2 + $0x40] sm:$0x3] %vm254_vm1, %v8585_v0  ;;  %264 = vst.msk [vmem:[#allocation2 + $0x58] sm:$0x3] %vm254_vm1, %v8585_v0 }
  0x5a   : > { %267 = vst.msk [vmem:[#allocation2 + $0x70] sm:$0x3] %vm254_vm1, %v8585_v0  ;;  %270 = vst.msk [vmem:[#allocation2 + $0x88] sm:$0x3] %vm254_vm1, %v8585_v0 }
  0x5b   : > { %273 = vst.msk [vmem:[#allocation2 + $0xa0] sm:$0x3] %vm254_vm1, %v8585_v0  ;;  %276 = vst.msk [vmem:[#allocation2 + $0xb8] sm:$0x3] %vm254_vm1, %v8585_v0 }
  0x5c   : > { %279 = vst.msk [vmem:[#allocation2 + $0xd0] sm:$0x3] %vm254_vm1, %v8585_v0  ;;  %282 = vst.msk [vmem:[#allocation2 + $0xe8] sm:$0x3] %vm254_vm1, %v8585_v0 }
  0x5d   : > { %285 = vst.msk [vmem:[#allocation2 + $0x100] sm:$0x3] %vm254_vm1, %v8585_v0  ;;  %288 = vst.msk [vmem:[#allocation2 + $0x118] sm:$0x3] %vm254_vm1, %v8585_v0 }
  0x5e   : > { %291 = vst.msk [vmem:[#allocation2 + $0x130] sm:$0x3] %vm254_vm1, %v8585_v0  ;;  %294 = vst.msk [vmem:[#allocation2 + $0x148] sm:$0x3] %vm254_vm1, %v8585_v0  ;;  %v5873_v19 = vld [vmem:[#allocation2 + $0x19] sm:$0xff] }
  0x5f   : > { %297 = vst.msk [vmem:[#allocation2 + $0x160] sm:$0x3] %vm254_vm1, %v8585_v0  ;;  %300 = vst.msk [vmem:[#allocation2 + $0x178] sm:$0x3] %vm254_vm1, %v8585_v0  ;;  %v470_v5 = vld [vmem:[#allocation2 + $0x9] sm:$0xff]  ;;  %618 = vrot.lane.b32.xlu1 %v5873_v19, %s5594_s29  ;;  %v5985_v50 = vld [vmem:[#allocation2 + $0x18] sm:$0xff] }
  0x60   : > { %303 = vst.msk [vmem:[#allocation2 + $0x190] sm:$0x3] %vm254_vm1, %v8585_v0  ;;  %306 = vst.msk [vmem:[#allocation2 + $0x1a8] sm:$0x3] %vm254_vm1, %v8585_v0  ;;  %616 = vrot.lane.b32.xlu0 %v470_v5, %s5594_s29  ;;  %v486_v35 = vld [vmem:[#allocation2 + $0xa] sm:$0xff]  ;;  %vm3483_vm1 = vcmask 257024  }
  0x61   : > { %398 = vst.msk [vmem:[#allocation2 + $0x31] sm:$0xff] %vm251_vm0, %v365_v2  ;;  %397 = vst.msk [vmem:[#allocation2 + $0x21] sm:$0xff] %vm251_vm0, %v364_v3 }
  0x62   : > { %400 = vst.msk [vmem:[#allocation2 + $0x49] sm:$0xff] %vm251_vm0, %v367_v6  ;;  %399 = vst.msk [vmem:[#allocation2 + $0x39] sm:$0xff] %vm251_vm0, %v366_v7 }
  0x63   : > { %402 = vst.msk [vmem:[#allocation2 + $0x61] sm:$0xff] %vm251_vm0, %v369_v8  ;;  %401 = vst.msk [vmem:[#allocation2 + $0x51] sm:$0xff] %vm251_vm0, %v368_v9 }
  0x64   : > { %404 = vst.msk [vmem:[#allocation2 + $0x79] sm:$0xff] %vm251_vm0, %v371_v10  ;;  %403 = vst.msk [vmem:[#allocation2 + $0x69] sm:$0xff] %vm251_vm0, %v370_v11  ;;  %v381_v11 = vld [vmem:[%s5837_s28 + $0x90] sm:$0xff] }
  0x65   : > { %406 = vst.msk [vmem:[#allocation2 + $0x91] sm:$0xff] %vm251_vm0, %v373_v12  ;;  %405 = vst.msk [vmem:[#allocation2 + $0x81] sm:$0xff] %vm251_vm0, %v372_v13 }
  0x66   : > { %408 = vst.msk [vmem:[#allocation2 + $0xa9] sm:$0xff] %vm251_vm0, %v375_v14  ;;  %407 = vst.msk [vmem:[#allocation2 + $0x99] sm:$0xff] %vm251_vm0, %v374_v15  ;;  %v383_v15 = vld [vmem:[%s5837_s28 + $0xa0] sm:$0xff] }
  0x67   : > { %409 = vst.msk [vmem:[#allocation2 + $0xb1] sm:$0xff] %vm251_vm0, %v376_v16  ;;  %410 = vst.msk [vmem:[#allocation2 + $0xc1] sm:$0xff] %vm251_vm0, %v377_v17 }
  0x68   : > { %411 = vst.msk [vmem:[#allocation2 + $0xc9] sm:$0xff] %vm251_vm0, %v378_v18  ;;  %v5875_v20 = vld [vmem:[#allocation2 + $0x31] sm:$0xff]  ;;  %v5881_v21 = vld [vmem:[#allocation2 + $0x21] sm:$0xff]  ;;  %412 = vst.msk [vmem:[#allocation2 + $0xd9] sm:$0xff] %vm251_vm0, %v379_v43 }
  0x69   : > { %622 = vrot.lane.b32.xlu0 %v5875_v20, %s5594_s29  ;;  %v5883_v22 = vld [vmem:[#allocation2 + $0x49] sm:$0xff]  ;;  %620 = vrot.lane.b32.xlu1 %v5881_v21, %s5594_s29  ;;  %v5889_v23 = vld [vmem:[#allocation2 + $0x39] sm:$0xff]  ;;  %413 = vst.msk [vmem:[#allocation2 + $0xe1] sm:$0xff] %vm251_vm0, %v380_v48  ;;  %414 = vst.msk [vmem:[#allocation2 + $0xf1] sm:$0xff] %vm251_vm0, %v381_v11 }
  0x6a   : > { %v5891_v24 = vld [vmem:[#allocation2 + $0x61] sm:$0xff]  ;;  %v5897_v25 = vld [vmem:[#allocation2 + $0x51] sm:$0xff]  ;;  %308 = vst.msk [vmem:[#allocation3] sm:$0xff] %vm307_vm2, %v8585_v0  ;;  %309 = vst.msk [vmem:[#allocation3 + $0x8] sm:$0xff] %vm307_vm2, %v8585_v0 }
  0x6b   : > { %v5899_v26 = vld [vmem:[#allocation2 + $0x79] sm:$0xff]  ;;  %v5905_v27 = vld [vmem:[#allocation2 + $0x69] sm:$0xff]  ;;  %312 = vst.msk [vmem:[#allocation3 + $0x18] sm:$0xff] %vm307_vm2, %v8585_v0  ;;  %313 = vst.msk [vmem:[#allocation3 + $0x20] sm:$0xff] %vm307_vm2, %v8585_v0 }
  0x6c   : > { %v5907_v28 = vld [vmem:[#allocation2 + $0x91] sm:$0xff]  ;;  %v5913_v29 = vld [vmem:[#allocation2 + $0x81] sm:$0xff]  ;;  %315 = vst.msk [vmem:[#allocation3 + $0x30] sm:$0xff] %vm307_vm2, %v8585_v0  ;;  %316 = vst.msk [vmem:[#allocation3 + $0x38] sm:$0xff] %vm307_vm2, %v8585_v0 }
  0x6d   : > { %626 = vrot.lane.b32.xlu0 %v5883_v22, %s5594_s29  ;;  %624 = vrot.lane.b32.xlu1 %v5889_v23, %s5594_s29  ;;  %v5915_v30 = vld [vmem:[#allocation2 + $0xa9] sm:$0xff]  ;;  %v5921_v31 = vld [vmem:[#allocation2 + $0x99] sm:$0xff]  ;;  %318 = vst.msk [vmem:[#allocation3 + $0x48] sm:$0xff] %vm307_vm2, %v8585_v0  ;;  %319 = vst.msk [vmem:[#allocation3 + $0x50] sm:$0xff] %vm307_vm2, %v8585_v0 }
  0x6e   : > { %v5926_v33 = vld [vmem:[#allocation2 + $0xb1] sm:$0xff]  ;;  %v5928_v34 = vld [vmem:[#allocation2 + $0x1a] sm:$0xff]  ;;  %v5939_v37 = vld [vmem:[#allocation2 + $0x22] sm:$0xff]  ;;  %321 = vst.msk [vmem:[#allocation3 + $0x60] sm:$0xff] %vm307_vm2, %v8585_v0 }
  0x6f   : > { %v5934_v36 = vld [vmem:[#allocation2 + $0x32] sm:$0xff]  ;;  %v5941_v38 = vld [vmem:[#allocation2 + $0x4a] sm:$0xff]  ;;  %v5947_v39 = vld [vmem:[#allocation2 + $0x3a] sm:$0xff]  ;;  %322 = vst.msk [vmem:[#allocation3 + $0x68] sm:$0xff] %vm307_vm2, %v8585_v0 }
  0x70   : > { %v5949_v40 = vld [vmem:[#allocation2 + $0x62] sm:$0xff]  ;;  %v5955_v41 = vld [vmem:[#allocation2 + $0x52] sm:$0xff]  ;;  %v5957_v42 = vld [vmem:[#allocation2 + $0x7a] sm:$0xff]  ;;  %324 = vst.msk [vmem:[#allocation3 + $0x78] sm:$0xff] %vm307_vm2, %v8585_v0 }
  0x71   : > { %630 = vrot.lane.b32.xlu0 %v5891_v24, %s5594_s29  ;;  %628 = vrot.lane.b32.xlu1 %v5897_v25, %s5594_s29  ;;  %v5964_v44 = vld [vmem:[#allocation2 + $0x6a] sm:$0xff]  ;;  %v5967_v45 = vld [vmem:[#allocation2 + $0x92] sm:$0xff]  ;;  %v5973_v46 = vld [vmem:[#allocation2 + $0x82] sm:$0xff]  ;;  %325 = vst.msk [vmem:[#allocation3 + $0x80] sm:$0xff] %vm307_vm2, %v8585_v0 }
  0x72   : > { %v5975_v47 = vld [vmem:[#allocation2 + $0xaa] sm:$0xff]  ;;  %v5983_v49 = vld [vmem:[#allocation2 + $0x9a] sm:$0xff]  ;;  %v5991_v51 = vld [vmem:[#allocation2 + $0xb2] sm:$0xff]  ;;  %327 = vst.msk [vmem:[#allocation3 + $0x90] sm:$0xff] %vm307_vm2, %v8585_v0 }
  0x73   : > { %v5993_v52 = vld [vmem:[#allocation2 + $0x30] sm:$0xff]  ;;  %v5999_v53 = vld [vmem:[#allocation2 + $0x20] sm:$0xff]  ;;  %v6001_v54 = vld [vmem:[#allocation2 + $0x48] sm:$0xff]  ;;  %328 = vst.msk [vmem:[#allocation3 + $0x98] sm:$0xff] %vm307_vm2, %v8585_v0 }
  0x74   : > { %v6007_v55 = vld [vmem:[#allocation2 + $0x38] sm:$0xff]  ;;  %v6009_v56 = vld [vmem:[#allocation2 + $0x60] sm:$0xff]  ;;  %v6015_v57 = vld [vmem:[#allocation2 + $0x50] sm:$0xff]  ;;  %330 = vst.msk [vmem:[#allocation3 + $0xa8] sm:$0xff] %vm307_vm2, %v8585_v0 }
  0x75   : > { %634 = vrot.lane.b32.xlu0 %v5899_v26, %s5594_s29  ;;  %632 = vrot.lane.b32.xlu1 %v5905_v27, %s5594_s29  ;;  %v6017_v58 = vld [vmem:[#allocation2 + $0x78] sm:$0xff]  ;;  %v6023_v59 = vld [vmem:[#allocation2 + $0x68] sm:$0xff]  ;;  %v6025_v60 = vld [vmem:[#allocation2 + $0x90] sm:$0xff]  ;;  %331 = vst.msk [vmem:[#allocation3 + $0xb0] sm:$0xff] %vm307_vm2, %v8585_v0 }
  0x76   : > { %8648 = vst [vmem:[#allocation10_spill] sm:$0xff] %v6025_v60  ;;  %333 = vst.msk [vmem:[#allocation3 + $0xc0] sm:$0xff] %vm307_vm2, %v8585_v0  ;;  %v6103_v61 = vld [vmem:[#allocation2 + $0x80] sm:$0xff]  ;;  %v6105_v62 = vld [vmem:[#allocation2 + $0xa8] sm:$0xff] }
  0x77   : > { %334 = vst.msk [vmem:[#allocation3 + $0xc8] sm:$0xff] %vm307_vm2, %v8585_v0  ;;  %336 = vst.msk [vmem:[#allocation3 + $0xd8] sm:$0xff] %vm307_vm2, %v8585_v0  ;;  %v6111_v63 = vld [vmem:[#allocation2 + $0x98] sm:$0xff]  ;;  %v6113_v1 = vld [vmem:[#allocation2 + $0xc0] sm:$0xff] }
  0x78   : > { %337 = vst.msk [vmem:[#allocation3 + $0xe0] sm:$0xff] %vm307_vm2, %v8585_v0  ;;  %339 = vst.msk [vmem:[#allocation3 + $0xf0] sm:$0xff] %vm307_vm2, %v8585_v0  ;;  %v6119_v2 = vld [vmem:[#allocation2 + $0xb0] sm:$0xff]  ;;  %v6125_v3 = vld [vmem:[#allocation2 + $0xc8] sm:$0xff] }
  0x79   : > { %638 = vrot.lane.b32.xlu0 %v5907_v28, %s5594_s29  ;;  %636 = vrot.lane.b32.xlu1 %v5913_v29, %s5594_s29  ;;  %340 = vst.msk [vmem:[#allocation3 + $0xf8] sm:$0xff] %vm307_vm2, %v8585_v0  ;;  %342 = vst.msk [vmem:[#allocation3 + $0x108] sm:$0xff] %vm307_vm2, %v8585_v0  ;;  %v6157_v7 = vld [vmem:[#allocation2 + $0xc1] sm:$0xff]  ;;  %v6174_v12 = vld [vmem:[#allocation2 + $0xc9] sm:$0xff] }
  0x7a   : > { %343 = vst.msk [vmem:[#allocation3 + $0x110] sm:$0xff] %vm307_vm2, %v8585_v0  ;;  %345 = vst.msk [vmem:[#allocation3 + $0x120] sm:$0xff] %vm307_vm2, %v8585_v0  ;;  %v382_v18 = vld [vmem:[%s5837_s28 + $0x98] sm:$0xff]  ;;  %v389_v11 = vld [vmem:[%s5837_s28 + $0xd0] sm:$0xff] }
  0x7b   : > { %346 = vst.msk [vmem:[#allocation3 + $0x128] sm:$0xff] %vm307_vm2, %v8585_v0  ;;  %348 = vst.msk [vmem:[#allocation3 + $0x138] sm:$0xff] %vm307_vm2, %v8585_v0  ;;  %v386_v48 = vld [vmem:[%s5837_s28 + $0xb8] sm:$0xff] }
  0x7c   : > { %349 = vst.msk [vmem:[#allocation3 + $0x140] sm:$0xff] %vm307_vm2, %v8585_v0  ;;  %351 = vst.msk [vmem:[#allocation3 + $0x150] sm:$0xff] %vm307_vm2, %v8585_v0 }
  0x7d   : > { %642 = vrot.lane.b32.xlu0 %v5915_v30, %s5594_s29  ;;  %640 = vrot.lane.b32.xlu1 %v5921_v31, %s5594_s29  ;;  %352 = vst.msk [vmem:[#allocation3 + $0x158] sm:$0xff] %vm307_vm2, %v8585_v0  ;;  %354 = vst.msk [vmem:[#allocation3 + $0x168] sm:$0xff] %vm307_vm2, %v8585_v0 }
  0x7e   : > { %355 = vst.msk [vmem:[#allocation3 + $0x170] sm:$0xff] %vm307_vm2, %v8585_v0  ;;  %357 = vst.msk [vmem:[#allocation3 + $0x180] sm:$0xff] %vm307_vm2, %v8585_v0 }
  0x7f   : > { %358 = vst.msk [vmem:[#allocation3 + $0x188] sm:$0xff] %vm307_vm2, %v8585_v0  ;;  %360 = vst.msk [vmem:[#allocation3 + $0x198] sm:$0xff] %vm307_vm2, %v8585_v0 }
  0x80   : > { %361 = vst.msk [vmem:[#allocation3 + $0x1a0] sm:$0xff] %vm307_vm2, %v8585_v0  ;;  %8649 = vst [vmem:[#allocation11_spill] sm:$0xff] %v6105_v62  ;;  %v6247_v0 = vld [vmem:[#allocation2 + $0xc2] sm:$0xff] }
  0x81   : > { %678 = vrot.lane.b32.xlu0 %v485_v32, %s5595_s30  ;;  %644 = vrot.lane.b32.xlu1 %v5926_v33, %s5594_s29  ;;  %8650 = vst [vmem:[#allocation12_spill] sm:$0xff] %v6111_v63  ;;  %416 = vst.msk [vmem:[#allocation2 + $0x109] sm:$0xff] %vm251_vm0, %v383_v15 }
  0x82   : > { %415 = vst.msk [vmem:[#allocation2 + $0xf9] sm:$0xff] %vm251_vm0, %v382_v18  ;;  %419 = vst.msk [vmem:[#allocation2 + $0x129] sm:$0xff] %vm251_vm0, %v386_v48 }
  0x83   : > { %422 = vst.msk [vmem:[#allocation2 + $0x151] sm:$0xff] %vm251_vm0, %v389_v11  ;;  %v390_v11 = vld [vmem:[%s5837_s28 + $0xd8] sm:$0xff] }
  0x84   : > { %423 = vst.msk [vmem:[#allocation2 + $0x159] sm:$0xff] %vm251_vm0, %v390_v11 }
  0x85   : > { %682 = vrot.lane.b32.xlu0 %v5928_v34, %s5595_s30  ;;  %680 = vrot.lane.b32.xlu1 %v486_v35, %s5595_s30  ;;  %v387_v35 = vld [vmem:[%s5837_s28 + $0xc0] sm:$0xff] }
  0x86   : > { %420 = vst.msk [vmem:[#allocation2 + $0x139] sm:$0xff] %vm251_vm0, %v387_v35 }
  0x89   : > { %686 = vrot.lane.b32.xlu0 %v5934_v36, %s5595_s30  ;;  %684 = vrot.lane.b32.xlu1 %v5939_v37, %s5595_s30 }
  0x8d   : > { %690 = vrot.lane.b32.xlu0 %v5941_v38, %s5595_s30  ;;  %688 = vrot.lane.b32.xlu1 %v5947_v39, %s5595_s30 }
  0x91   : > { %694 = vrot.lane.b32.xlu0 %v5949_v40, %s5595_s30  ;;  %692 = vrot.lane.b32.xlu1 %v5955_v41, %s5595_s30 }
  0x95   : > { %698 = vrot.lane.b32.xlu0 %v5957_v42, %s5595_s30  ;;  %696 = vrot.lane.b32.xlu1 %v5964_v44, %s5595_s30 }
  0x99   : > { %702 = vrot.lane.b32.xlu0 %v5967_v45, %s5595_s30  ;;  %700 = vrot.lane.b32.xlu1 %v5973_v46, %s5595_s30 }
  0x9d   : > { %706 = vrot.lane.b32.xlu0 %v5975_v47, %s5595_s30  ;;  %704 = vrot.lane.b32.xlu1 %v5983_v49, %s5595_s30 }
  0xa1   : > { %742 = vrot.lane.b32.xlu0 %v5985_v50, %s5596_s6  ;;  %708 = vrot.lane.b32.xlu1 %v5991_v51, %s5595_s30 }
  0xa5   : > { %746 = vrot.lane.b32.xlu0 %v5993_v52, %s5596_s6  ;;  %744 = vrot.lane.b32.xlu1 %v5999_v53, %s5596_s6 }
  0xa9   : > { %750 = vrot.lane.b32.xlu0 %v6001_v54, %s5596_s6  ;;  %748 = vrot.lane.b32.xlu1 %v6007_v55, %s5596_s6 }
  0xad   : > { %754 = vrot.lane.b32.xlu0 %v6009_v56, %s5596_s6  ;;  %752 = vrot.lane.b32.xlu1 %v6015_v57, %s5596_s6 }
  0xb1   : > { %758 = vrot.lane.b32.xlu0 %v6017_v58, %s5596_s6  ;;  %756 = vrot.lane.b32.xlu1 %v6023_v59, %s5596_s6 }
  0xb5   : > { %762 = vrot.lane.b32.xlu0 %v6025_v60, %s5596_s6  ;;  %760 = vrot.lane.b32.xlu1 %v6103_v61, %s5596_s6 }
  0xb9   : > { %766 = vrot.lane.b32.xlu0 %v6105_v62, %s5596_s6  ;;  %764 = vrot.lane.b32.xlu1 %v6111_v63, %s5596_s6 }
  0xbd   : > { %770 = vrot.lane.b32.xlu0 %v6113_v1, %s5596_s6  ;;  %768 = vrot.lane.b32.xlu1 %v6119_v2, %s5596_s6 }
  0xc0   : > { %v6143_v4 = vpop.permute.xlu0 %614 }
  0xc1   : > { %806 = vrot.lane.b32.xlu0 %v5873_v19, %s5597_s7  ;;  %772 = vrot.lane.b32.xlu1 %v6125_v3, %s5596_s6  ;;  %v385_v19 = vld [vmem:[%s5837_s28 + $0xb0] sm:$0xff] }
  0xc2   : > { %418 = vst.msk [vmem:[#allocation2 + $0x121] sm:$0xff] %vm251_vm0, %v385_v19  ;;  %v388_v19 = vld [vmem:[%s5837_s28 + $0xc8] sm:$0xff] }
  0xc3   : > { %421 = vst.msk [vmem:[#allocation2 + $0x141] sm:$0xff] %vm251_vm0, %v388_v19 }
  0xc5   : > { %810 = vrot.lane.b32.xlu0 %v5875_v20, %s5597_s7  ;;  %808 = vrot.lane.b32.xlu1 %v5881_v21, %s5597_s7 }
  0xc9   : > { %814 = vrot.lane.b32.xlu0 %v5883_v22, %s5597_s7  ;;  %812 = vrot.lane.b32.xlu1 %v5889_v23, %s5597_s7 }
  0xcd   : > { %818 = vrot.lane.b32.xlu0 %v5891_v24, %s5597_s7  ;;  %816 = vrot.lane.b32.xlu1 %v5897_v25, %s5597_s7 }
  0xd1   : > { %822 = vrot.lane.b32.xlu0 %v5899_v26, %s5597_s7  ;;  %820 = vrot.lane.b32.xlu1 %v5905_v27, %s5597_s7  ;;  %v6155_v6 = vpop.permute.xlu1 %618 }
  0xd2   : > { %v6149_v5 = vpop.permute.xlu0 %616 }
  0xd5   : > { %826 = vrot.lane.b32.xlu0 %v5907_v28, %s5597_s7  ;;  %824 = vrot.lane.b32.xlu1 %v5913_v29, %s5597_s7 }
  0xd9   : > { %830 = vrot.lane.b32.xlu0 %v5915_v30, %s5597_s7  ;;  %828 = vrot.lane.b32.xlu1 %v5921_v31, %s5597_s7 }
  0xdb   : > { %v6159_v8 = vpop.permute.xlu0 %622  ;;  %v6165_v9 = vpop.permute.xlu1 %620 }
  0xdd   : > { %834 = vrot.lane.b32.xlu0 %v6157_v7, %s5597_s7  ;;  %832 = vrot.lane.b32.xlu1 %v5926_v33, %s5597_s7 }
  0xdf   : > { %v6167_v10 = vpop.permute.xlu0 %626  ;;  %v6177_v13 = vpop.permute.xlu1 %624 }
  0xe1   : > { %870 = vrot.lane.b32.xlu0 %v5928_v34, %s5598_s8  ;;  %836 = vrot.lane.b32.xlu1 %v6174_v12, %s5597_s7  ;;  %v384_v34 = vld [vmem:[%s5837_s28 + $0xa8] sm:$0xff] }
  0xe2   : > { %417 = vst.msk [vmem:[#allocation2 + $0x111] sm:$0xff] %vm251_vm0, %v384_v34  ;;  %v391_v34 = vld [vmem:[%s5837_s28 + $0xe0] sm:$0xff] }
  0xe3   : > { %v6179_v14 = vpop.permute.xlu0 %630  ;;  %v6187_v16 = vpop.permute.xlu1 %628  ;;  %424 = vst.msk [vmem:[#allocation2 + $0x169] sm:$0xff] %vm251_vm0, %v391_v34  ;;  %v392_v34 = vld [vmem:[%s5837_s28 + $0xe8] sm:$0xff] }
  0xe4   : > { %425 = vst.msk [vmem:[#allocation2 + $0x171] sm:$0xff] %vm251_vm0, %v392_v34 }
  0xe5   : > { %874 = vrot.lane.b32.xlu0 %v5934_v36, %s5598_s8  ;;  %872 = vrot.lane.b32.xlu1 %v5939_v37, %s5598_s8 }
  0xe7   : > { %v6189_v17 = vpop.permute.xlu0 %634  ;;  %v6199_v21 = vpop.permute.xlu1 %632 }
  0xe9   : > { %878 = vrot.lane.b32.xlu0 %v5941_v38, %s5598_s8  ;;  %876 = vrot.lane.b32.xlu1 %v5947_v39, %s5598_s8 }
  0xeb   : > { %v6201_v32 = vpop.permute.xlu0 %638  ;;  %v6211_v37 = vpop.permute.xlu1 %636 }
  0xec   : > { %8651 = vst [vmem:[#allocation13_spill] sm:$0xff] %v6211_v37 }
  0xed   : > { %882 = vrot.lane.b32.xlu0 %v5949_v40, %s5598_s8  ;;  %880 = vrot.lane.b32.xlu1 %v5955_v41, %s5598_s8 }
  0xef   : > { %v6213_v43 = vpop.permute.xlu0 %642  ;;  %v6223_v15 = vpop.permute.xlu1 %640 }
  0xf0   : > { %8652 = vst [vmem:[#allocation14_spill] sm:$0xff] %v6213_v43  ;;  %8653 = vst [vmem:[#allocation15_spill] sm:$0xff] %v6223_v15 }
  0xf1   : > { %886 = vrot.lane.b32.xlu0 %v5957_v42, %s5598_s8  ;;  %884 = vrot.lane.b32.xlu1 %v5964_v44, %s5598_s8 }
  0xf3   : > { %v6225_v18 = vpop.permute.xlu0 %678  ;;  %v6235_v35 = vpop.permute.xlu1 %644 }
  0xf4   : > { %8654 = vst [vmem:[#allocation16_spill] sm:$0xff] %v6235_v35 }
  0xf5   : > { %890 = vrot.lane.b32.xlu0 %v5967_v45, %s5598_s8  ;;  %888 = vrot.lane.b32.xlu1 %v5973_v46, %s5598_s8 }
  0xf7   : > { %v6237_v48 = vpop.permute.xlu0 %682  ;;  %v6245_v19 = vpop.permute.xlu1 %680 }
  0xf9   : > { %894 = vrot.lane.b32.xlu0 %v5975_v47, %s5598_s8  ;;  %892 = vrot.lane.b32.xlu1 %v5983_v49, %s5598_s8 }
  0xfb   : > { %v6249_v15 = vpop.permute.xlu0 %686  ;;  %v6257_v35 = vpop.permute.xlu1 %684 }
  0xfc   : > { %8655 = vst [vmem:[#allocation17_spill] sm:$0xff] %v6249_v15  ;;  %8656 = vst [vmem:[#allocation18_spill] sm:$0xff] %v6257_v35  ;;  %v6265_v15 = vld [vmem:[#allocation2 + $0xca] sm:$0xff] }
  0xfd   : > { %898 = vrot.lane.b32.xlu0 %v6247_v0, %s5598_s8  ;;  %896 = vrot.lane.b32.xlu1 %v5991_v51, %s5598_s8 }
  0xff   : > { %v6259_v11 = vpop.permute.xlu0 %690  ;;  %v6267_v43 = vpop.permute.xlu1 %688 }
 0x100   : > { %8657 = vst [vmem:[#allocation19_spill] sm:$0xff] %v6259_v11  ;;  %8658 = vst [vmem:[#allocation20_spill] sm:$0xff] %v6267_v43 }
 0x101   : > { %934 = vrot.lane.b32.xlu0 %v5993_v52, %s5599_s9  ;;  %900 = vrot.lane.b32.xlu1 %v6265_v15, %s5598_s8 }
 0x103   : > { %v6269_v37 = vpop.permute.xlu0 %694  ;;  %v6275_v34 = vpop.permute.xlu1 %692 }
 0x104   : > { %8659 = vst [vmem:[#allocation21_spill] sm:$0xff] %v6269_v37  ;;  %8660 = vst [vmem:[#allocation22_spill] sm:$0xff] %v6275_v34 }
 0x105   : > { %938 = vrot.lane.b32.xlu0 %v6001_v54, %s5599_s9  ;;  %936 = vrot.lane.b32.xlu1 %v6007_v55, %s5599_s9 }
 0x107   : > { %v6277_v11 = vpop.permute.xlu0 %698  ;;  %v6283_v35 = vpop.permute.xlu1 %696 }
 0x108   : > { %8661 = vst [vmem:[#allocation23_spill] sm:$0xff] %v6277_v11  ;;  %8662 = vst [vmem:[#allocation24_spill] sm:$0xff] %v6283_v35 }
 0x109   : > { %942 = vrot.lane.b32.xlu0 %v6009_v56, %s5599_s9  ;;  %940 = vrot.lane.b32.xlu1 %v6015_v57, %s5599_s9 }
 0x10b   : > { %v6285_v43 = vpop.permute.xlu0 %702  ;;  %v6291_v37 = vpop.permute.xlu1 %700 }
 0x10c   : > { %8663 = vst [vmem:[#allocation25_spill] sm:$0xff] %v6285_v43  ;;  %8664 = vst [vmem:[#allocation26_spill] sm:$0xff] %v6291_v37 }
 0x10d   : > { %946 = vrot.lane.b32.xlu0 %v6017_v58, %s5599_s9  ;;  %944 = vrot.lane.b32.xlu1 %v6023_v59, %s5599_s9 }
 0x10f   : > { %v6293_v34 = vpop.permute.xlu0 %706  ;;  %v6299_v11 = vpop.permute.xlu1 %704 }
 0x110   : > { %8665 = vst [vmem:[#allocation27_spill] sm:$0xff] %v6293_v34  ;;  %8666 = vst [vmem:[#allocation28_spill] sm:$0xff] %v6299_v11  ;;  %v6317_v11 = vld [vmem:[#allocation2 + $0xd8] sm:$0xff] }
 0x111   : > { %950 = vrot.lane.b32.xlu0 %v6025_v60, %s5599_s9  ;;  %948 = vrot.lane.b32.xlu1 %v6103_v61, %s5599_s9 }
 0x113   : > { %v6301_v35 = vpop.permute.xlu0 %742  ;;  %v6307_v43 = vpop.permute.xlu1 %708 }
 0x114   : > { %8667 = vst [vmem:[#allocation29_spill] sm:$0xff] %v6307_v43 }
 0x115   : > { %954 = vrot.lane.b32.xlu0 %v6105_v62, %s5599_s9  ;;  %952 = vrot.lane.b32.xlu1 %v6111_v63, %s5599_s9 }
 0x117   : > { %v6309_v37 = vpop.permute.xlu0 %746  ;;  %v6315_v34 = vpop.permute.xlu1 %744 }
 0x119   : > { %958 = vrot.lane.b32.xlu0 %v6113_v1, %s5599_s9  ;;  %956 = vrot.lane.b32.xlu1 %v6119_v2, %s5599_s9  ;;  %v6333_v1 = vld [vmem:[#allocation2 + $0xe0] sm:$0xff] }
 0x11b   : > { %v6319_v60 = vpop.permute.xlu0 %750  ;;  %v6325_v43 = vpop.permute.xlu1 %748 }
 0x11c   : > { %8668 = vst [vmem:[#allocation30_spill] sm:$0xff] %v6319_v60  ;;  %8669 = vst [vmem:[#allocation31_spill] sm:$0xff] %v6325_v43 }
 0x11d   : > { %962 = vrot.lane.b32.xlu0 %v6317_v11, %s5599_s9  ;;  %960 = vrot.lane.b32.xlu1 %v6125_v3, %s5599_s9 }
 0x11f   : > { %v6327_v62 = vpop.permute.xlu0 %754  ;;  %v6335_v60 = vpop.permute.xlu1 %752 }
 0x120   : > { %8670 = vst [vmem:[#allocation32_spill] sm:$0xff] %v6327_v62 }
 0x121   : > { %998 = vrot.lane.b32.xlu0 %v5875_v20, %s5600_s10  ;;  %964 = vrot.lane.b32.xlu1 %v6333_v1, %s5599_s9 }
 0x123   : > { %v6337_v63 = vpop.permute.xlu0 %758  ;;  %v6343_v62 = vpop.permute.xlu1 %756 }
 0x124   : > { %8671 = vst [vmem:[#allocation33_spill] sm:$0xff] %v6337_v63  ;;  %8672 = vst [vmem:[#allocation34_spill] sm:$0xff] %v6343_v62 }
 0x125   : > { %1002 = vrot.lane.b32.xlu0 %v5883_v22, %s5600_s10  ;;  %1000 = vrot.lane.b32.xlu1 %v5889_v23, %s5600_s10  ;;  %v428_v23 = vld [vmem:[%s8578_s1] sm:$0xff] }
 0x127   : > { %v6345_v43 = vpop.permute.xlu0 %762  ;;  %v6351_v20 = vpop.permute.xlu1 %760 }
 0x128   : > { %8673 = vst [vmem:[#allocation35_spill] sm:$0xff] %v6345_v43  ;;  %8674 = vst [vmem:[#allocation36_spill] sm:$0xff] %v6351_v20  ;;  %v6514_v20 = vld [vmem:[#allocation2 + $0xf9] sm:$0xff] }
 0x129   : > { %1006 = vrot.lane.b32.xlu0 %v5891_v24, %s5600_s10  ;;  %1004 = vrot.lane.b32.xlu1 %v5897_v25, %s5600_s10  ;;  %v429_v24 = vld [vmem:[%s8578_s1 + $0x8] sm:$0xff]  ;;  %8699 = vst [vmem:[#allocation61_spill] sm:$0xff] %v6514_v20 }
 0x12b   : > { %v6353_v3 = vpop.permute.xlu0 %766  ;;  %v6359_v22 = vpop.permute.xlu1 %764 }
 0x12c   : > { %8675 = vst [vmem:[#allocation37_spill] sm:$0xff] %v6353_v3  ;;  %8676 = vst [vmem:[#allocation38_spill] sm:$0xff] %v6359_v22  ;;  %v4831_v3 = vpack.c.bf16 %v429_v24, %v428_v23  ;;  %v431_v22 = vld [vmem:[%s8578_s1 + $0x18] sm:$0xff]  ;;  %v6416_v24 = vld [vmem:[#allocation2 + $0xe1] sm:$0xff] }
 0x12d   : > { %1010 = vrot.lane.b32.xlu0 %v5899_v26, %s5600_s10  ;;  %1008 = vrot.lane.b32.xlu1 %v5905_v27, %s5600_s10 }
 0x12e   : > { %4832 = vmatprep.subr.bf16.mxu0 %v4831_v3  ;;  %4840 = vmatprep.subr.bf16.mxu1 %v4831_v3 }
 0x12f   : > { %v6361_v63 = vpop.permute.xlu0 %770  ;;  %v6373_v25 = vpop.permute.xlu1 %768  ;;  %4834 = vmatpush3.bf16.msra.mxu0 %v4831_v3  ;;  %4842 = vmatpush3.bf16.msra.mxu1 %v4831_v3 }
 0x130   : > { %8677 = vst [vmem:[#allocation39_spill] sm:$0xff] %v6361_v63  ;;  %8678 = vst [vmem:[#allocation40_spill] sm:$0xff] %v6373_v25  ;;  %v430_v63 = vld [vmem:[%s8578_s1 + $0x10] sm:$0xff] }
 0x131   : > { %1014 = vrot.lane.b32.xlu0 %v5907_v28, %s5600_s10  ;;  %1012 = vrot.lane.b32.xlu1 %v5913_v29, %s5600_s10  ;;  %v4835_v27 = vpack.c.bf16 %v431_v22, %v430_v63  ;;  %v432_v29 = vld [vmem:[%s8578_s1 + $0x20] sm:$0xf] }
 0x132   : > { %v6400_v63 = vld [vmem:[#allocation2 + $0xd9] sm:$0xff] }
 0x133   : > { %v6375_v26 = vpop.permute.xlu0 %806  ;;  %v6387_v28 = vpop.permute.xlu1 %772  ;;  %4836 = vmatprep.subr.bf16.mxu0 %v4835_v27  ;;  %4844 = vmatprep.subr.bf16.mxu1 %v4835_v27 }
 0x134   : > { %8679 = vst [vmem:[#allocation41_spill] sm:$0xff] %v6387_v28  ;;  %4838 = vmatpush3.bf16.msra.mxu0 %v4835_v27  ;;  %4846 = vmatpush3.bf16.msra.mxu1 %v4835_v27 }
 0x135   : > { %1018 = vrot.lane.b32.xlu0 %v5915_v30, %s5600_s10  ;;  %1016 = vrot.lane.b32.xlu1 %v5921_v31, %s5600_s10 }
 0x136   : > { %4771 = vmatprep.subr.msk.mxu0 %vm1299_vm3, %v432_v29  ;;  %4805 = vmatprep.subr.msk.mxu1 %vm1299_vm3, %v432_v29 }
 0x137   : > { %v6389_v23 = vpop.permute.xlu0 %810  ;;  %v6398_v30 = vpop.permute.xlu1 %808 }
 0x138   : > { %4772 = vmatpush3.msk.msra.mxu0 %vm1299_vm3, %v432_v29  ;;  %4806 = vmatpush3.msk.msra.mxu1 %vm1299_vm3, %v432_v29 }
 0x139   : > { %1022 = vrot.lane.b32.xlu0 %v6157_v7, %s5600_s10  ;;  %1020 = vrot.lane.b32.xlu1 %v5926_v33, %s5600_s10 }
 0x13b   : > { %v6402_v3 = vpop.permute.xlu0 %814  ;;  %v6408_v31 = vpop.permute.xlu1 %812 }
 0x13d   : > { %1026 = vrot.lane.b32.xlu0 %v6400_v63, %s5600_s10  ;;  %1024 = vrot.lane.b32.xlu1 %v6174_v12, %s5600_s10 }
 0x13f   : > { %v6410_v22 = vpop.permute.xlu0 %818  ;;  %v6418_v27 = vpop.permute.xlu1 %816 }
 0x140   : > { %8680 = vst [vmem:[#allocation42_spill] sm:$0xff] %v6410_v22  ;;  %8681 = vst [vmem:[#allocation43_spill] sm:$0xff] %v6418_v27 }
 0x141   : > { %1062 = vrot.lane.b32.xlu0 %v5934_v36, %s5601_s26  ;;  %1028 = vrot.lane.b32.xlu1 %v6416_v24, %s5600_s10 }
 0x143   : > { %v6420_v29 = vpop.permute.xlu0 %822  ;;  %v6426_v33 = vpop.permute.xlu1 %820 }
 0x144   : > { %8682 = vst [vmem:[#allocation44_spill] sm:$0xff] %v6420_v29  ;;  %8683 = vst [vmem:[#allocation45_spill] sm:$0xff] %v6426_v33  ;;  %v6542_v29 = vld [vmem:[#allocation2 + $0x151] sm:$0xff]  ;;  %v6554_v33 = vld [vmem:[#allocation2 + $0x169] sm:$0xff] }
 0x145   : > { %1066 = vrot.lane.b32.xlu0 %v5941_v38, %s5601_s26  ;;  %1064 = vrot.lane.b32.xlu1 %v5947_v39, %s5601_s26  ;;  %8708 = vst [vmem:[#allocation70_spill] sm:$0xff] %v6542_v29  ;;  %8710 = vst [vmem:[#allocation72_spill] sm:$0xff] %v6554_v33 }
 0x147   : > { %v6428_v28 = vpop.permute.xlu0 %826  ;;  %v6434_v36 = vpop.permute.xlu1 %824 }
 0x148   : > { %8684 = vst [vmem:[#allocation46_spill] sm:$0xff] %v6428_v28  ;;  %8685 = vst [vmem:[#allocation47_spill] sm:$0xff] %v6434_v36  ;;  %v6506_v28 = vld [vmem:[#allocation2 + $0x109] sm:$0xff] }
 0x149   : > { %1070 = vrot.lane.b32.xlu0 %v5949_v40, %s5601_s26  ;;  %1068 = vrot.lane.b32.xlu1 %v5955_v41, %s5601_s26  ;;  %8697 = vst [vmem:[#allocation59_spill] sm:$0xff] %v6506_v28 }
 0x14b   : > { %v6436_v25 = vpop.permute.xlu0 %830  ;;  %v6442_v38 = vpop.permute.xlu1 %828 }
 0x14c   : > { %8686 = vst [vmem:[#allocation48_spill] sm:$0xff] %v6436_v25  ;;  %8687 = vst [vmem:[#allocation49_spill] sm:$0xff] %v6442_v38  ;;  %v6496_v25 = vld [vmem:[#allocation2 + $0xf1] sm:$0xff] }
 0x14d   : > { %1074 = vrot.lane.b32.xlu0 %v5957_v42, %s5601_s26  ;;  %1072 = vrot.lane.b32.xlu1 %v5964_v44, %s5601_s26 }
 0x14f   : > { %v6444_v43 = vpop.permute.xlu0 %834  ;;  %v6450_v39 = vpop.permute.xlu1 %832 }
 0x150   : > { %8688 = vst [vmem:[#allocation50_spill] sm:$0xff] %v6444_v43  ;;  %8689 = vst [vmem:[#allocation51_spill] sm:$0xff] %v6450_v39 }
 0x151   : > { %1078 = vrot.lane.b32.xlu0 %v5967_v45, %s5601_s26  ;;  %1076 = vrot.lane.b32.xlu1 %v5973_v46, %s5601_s26  ;;  %v6468_v45 = vld [vmem:[#allocation2 + $0xda] sm:$0xff] }
 0x153   : > { %v6452_v40 = vpop.permute.xlu0 %870  ;;  %v6458_v41 = vpop.permute.xlu1 %836 }
 0x154   : > { %8690 = vst [vmem:[#allocation52_spill] sm:$0xff] %v6458_v41 }
 0x155   : > { %1082 = vrot.lane.b32.xlu0 %v5975_v47, %s5601_s26  ;;  %1080 = vrot.lane.b32.xlu1 %v5983_v49, %s5601_s26  ;;  %v6484_v49 = vld [vmem:[#allocation2 + $0xe2] sm:$0xff] }
 0x157   : > { %v6460_v42 = vpop.permute.xlu0 %874  ;;  %v6466_v44 = vpop.permute.xlu1 %872 }
 0x159   : > { %1086 = vrot.lane.b32.xlu0 %v6247_v0, %s5601_s26  ;;  %1084 = vrot.lane.b32.xlu1 %v5991_v51, %s5601_s26 }
 0x15b   : > { %v6470_v43 = vpop.permute.xlu0 %878  ;;  %v6476_v46 = vpop.permute.xlu1 %876 }
 0x15d   : > { %1090 = vrot.lane.b32.xlu0 %v6468_v45, %s5601_s26  ;;  %1088 = vrot.lane.b32.xlu1 %v6265_v15, %s5601_s26 }
 0x15f   : > { %v6478_v47 = vpop.permute.xlu0 %882  ;;  %v6486_v41 = vpop.permute.xlu1 %880 }
 0x160   : > { %8691 = vst [vmem:[#allocation53_spill] sm:$0xff] %v6478_v47  ;;  %8692 = vst [vmem:[#allocation54_spill] sm:$0xff] %v6486_v41  ;;  %v6640_v41 = vld [vmem:[#allocation2 + $0x16a] sm:$0xff] }
 0x161   : > { %1644 = vrot.lane.b32.xlu0 %v6157_v7, %s5594_s29  ;;  %1092 = vrot.lane.b32.xlu1 %v6484_v49, %s5601_s26  ;;  %8732 = vst [vmem:[#allocation94_spill] sm:$0xff] %v6640_v41 }
 0x163   : > { %v6488_v39 = vpop.permute.xlu0 %886  ;;  %v6494_v51 = vpop.permute.xlu1 %884 }
 0x164   : > { %8693 = vst [vmem:[#allocation55_spill] sm:$0xff] %v6488_v39  ;;  %8694 = vst [vmem:[#allocation56_spill] sm:$0xff] %v6494_v51  ;;  %v6530_v51 = vld [vmem:[#allocation2 + $0x139] sm:$0xff] }
 0x165   : > { %1648 = vrot.lane.b32.xlu0 %v6400_v63, %s5594_s29  ;;  %1646 = vrot.lane.b32.xlu1 %v6174_v12, %s5594_s29  ;;  %v6518_v12 = vld [vmem:[#allocation2 + $0x121] sm:$0xff]  ;;  %8705 = vst [vmem:[#allocation67_spill] sm:$0xff] %v6530_v51 }
 0x166   : > { %8701 = vst [vmem:[#allocation63_spill] sm:$0xff] %v6518_v12 }
 0x167   : > { %v6498_v38 = vpop.permute.xlu0 %890  ;;  %v6504_v7 = vpop.permute.xlu1 %888 }
 0x168   : > { %8695 = vst [vmem:[#allocation57_spill] sm:$0xff] %v6498_v38  ;;  %8696 = vst [vmem:[#allocation58_spill] sm:$0xff] %v6504_v7 }
 0x169   : > { %1652 = vrot.lane.b32.xlu0 %v6496_v25, %s5594_s29  ;;  %1650 = vrot.lane.b32.xlu1 %v6416_v24, %s5594_s29 }
 0x16b   : > { %v6508_v36 = vpop.permute.xlu0 %894  ;;  %v6516_v38 = vpop.permute.xlu1 %892 }
 0x16c   : > { %8698 = vst [vmem:[#allocation60_spill] sm:$0xff] %v6508_v36  ;;  %8700 = vst [vmem:[#allocation62_spill] sm:$0xff] %v6516_v38  ;;  %v6526_v36 = vld [vmem:[#allocation2 + $0x111] sm:$0xff] }
 0x16d   : > { %1656 = vrot.lane.b32.xlu0 %v6506_v28, %s5594_s29  ;;  %1654 = vrot.lane.b32.xlu1 %v6514_v20, %s5594_s29  ;;  %8703 = vst [vmem:[#allocation65_spill] sm:$0xff] %v6526_v36  ;;  %v6618_v20 = vld [vmem:[#allocation2 + $0x13a] sm:$0xff] }
 0x16e   : > { %8727 = vst [vmem:[#allocation89_spill] sm:$0xff] %v6618_v20 }
 0x16f   : > { %v6520_v39 = vpop.permute.xlu0 %898  ;;  %v6528_v7 = vpop.permute.xlu1 %896 }
 0x170   : > { %8702 = vst [vmem:[#allocation64_spill] sm:$0xff] %v6520_v39  ;;  %8704 = vst [vmem:[#allocation66_spill] sm:$0xff] %v6528_v7  ;;  %v6538_v39 = vld [vmem:[#allocation2 + $0x129] sm:$0xff]  ;;  %v6550_v7 = vld [vmem:[#allocation2 + $0x141] sm:$0xff] }
 0x171   : > { %1660 = vrot.lane.b32.xlu0 %v6518_v12, %s5594_s29  ;;  %1658 = vrot.lane.b32.xlu1 %v6526_v36, %s5594_s29  ;;  %8706 = vst [vmem:[#allocation68_spill] sm:$0xff] %v6538_v39  ;;  %8709 = vst [vmem:[#allocation71_spill] sm:$0xff] %v6550_v7 }
 0x173   : > { %v6532_v28 = vpop.permute.xlu0 %934  ;;  %v6540_v38 = vpop.permute.xlu1 %900 }
 0x174   : > { %8707 = vst [vmem:[#allocation69_spill] sm:$0xff] %v6540_v38  ;;  %v6562_v38 = vld [vmem:[#allocation2 + $0x159] sm:$0xff] }
 0x175   : > { %1664 = vrot.lane.b32.xlu0 %v6530_v51, %s5594_s29  ;;  %1662 = vrot.lane.b32.xlu1 %v6538_v39, %s5594_s29  ;;  %8711 = vst [vmem:[#allocation73_spill] sm:$0xff] %v6562_v38 }
 0x177   : > { %v6544_v12 = vpop.permute.xlu0 %938  ;;  %v6552_v36 = vpop.permute.xlu1 %936 }
 0x179   : > { %1668 = vrot.lane.b32.xlu0 %v6542_v29, %s5594_s29  ;;  %1666 = vrot.lane.b32.xlu1 %v6550_v7, %s5594_s29  ;;  %v6572_v29 = vld [vmem:[#allocation2 + $0x171] sm:$0xff] }
 0x17a   : > { %8713 = vst [vmem:[#allocation75_spill] sm:$0xff] %v6572_v29 }
 0x17b   : > { %v6556_v51 = vpop.permute.xlu0 %942  ;;  %v6564_v39 = vpop.permute.xlu1 %940 }
 0x17d   : > { %1672 = vrot.lane.b32.xlu0 %v6554_v33, %s5594_s29  ;;  %1670 = vrot.lane.b32.xlu1 %v6562_v38, %s5594_s29 }
 0x17f   : > { %v6566_v62 = vpop.permute.xlu0 %946  ;;  %v6574_v47 = vpop.permute.xlu1 %944 }
 0x180   : > { %8712 = vst [vmem:[#allocation74_spill] sm:$0xff] %v6566_v62  ;;  %8714 = vst [vmem:[#allocation76_spill] sm:$0xff] %v6574_v47  ;;  %v6584_v62 = vld [vmem:[#allocation2 + $0xf2] sm:$0xff] }
 0x181   : > { %1708 = vrot.lane.b32.xlu0 %v6247_v0, %s5595_s30  ;;  %1674 = vrot.lane.b32.xlu1 %v6572_v29, %s5594_s29 }
 0x183   : > { %v6576_v7 = vpop.permute.xlu0 %950  ;;  %v6582_v33 = vpop.permute.xlu1 %948 }
 0x184   : > { %8715 = vst [vmem:[#allocation77_spill] sm:$0xff] %v6576_v7  ;;  %8716 = vst [vmem:[#allocation78_spill] sm:$0xff] %v6582_v33  ;;  %v6594_v7 = vld [vmem:[#allocation2 + $0x10a] sm:$0xff]  ;;  %v6602_v33 = vld [vmem:[#allocation2 + $0xfa] sm:$0xff] }
 0x185   : > { %1712 = vrot.lane.b32.xlu0 %v6468_v45, %s5595_s30  ;;  %1710 = vrot.lane.b32.xlu1 %v6265_v15, %s5595_s30  ;;  %8719 = vst [vmem:[#allocation81_spill] sm:$0xff] %v6594_v7  ;;  %8721 = vst [vmem:[#allocation83_spill] sm:$0xff] %v6602_v33  ;;  %v6606_v15 = vld [vmem:[#allocation2 + $0x122] sm:$0xff] }
 0x186   : > { %8723 = vst [vmem:[#allocation85_spill] sm:$0xff] %v6606_v15 }
 0x187   : > { %v6586_v38 = vpop.permute.xlu0 %954  ;;  %v6592_v0 = vpop.permute.xlu1 %952 }
 0x188   : > { %8717 = vst [vmem:[#allocation79_spill] sm:$0xff] %v6586_v38  ;;  %8718 = vst [vmem:[#allocation80_spill] sm:$0xff] %v6592_v0 }
 0x189   : > { %1716 = vrot.lane.b32.xlu0 %v6584_v62, %s5595_s30  ;;  %1714 = vrot.lane.b32.xlu1 %v6484_v49, %s5595_s30 }
 0x18b   : > { %v6596_v29 = vpop.permute.xlu0 %958  ;;  %v6604_v38 = vpop.permute.xlu1 %956 }
 0x18c   : > { %8720 = vst [vmem:[#allocation82_spill] sm:$0xff] %v6596_v29  ;;  %8722 = vst [vmem:[#allocation84_spill] sm:$0xff] %v6604_v38  ;;  %v6614_v29 = vld [vmem:[#allocation2 + $0x112] sm:$0xff] }
 0x18d   : > { %1720 = vrot.lane.b32.xlu0 %v6594_v7, %s5595_s30  ;;  %1718 = vrot.lane.b32.xlu1 %v6602_v33, %s5595_s30  ;;  %8725 = vst [vmem:[#allocation87_spill] sm:$0xff] %v6614_v29  ;;  %v6628_v33 = vld [vmem:[#allocation2 + $0x152] sm:$0xff] }
 0x18e   : > { %8730 = vst [vmem:[#allocation92_spill] sm:$0xff] %v6628_v33 }
 0x18f   : > { %v6608_v47 = vpop.permute.xlu0 %962  ;;  %v6616_v0 = vpop.permute.xlu1 %960 }
 0x190   : > { %8724 = vst [vmem:[#allocation86_spill] sm:$0xff] %v6608_v47  ;;  %8726 = vst [vmem:[#allocation88_spill] sm:$0xff] %v6616_v0  ;;  %v6624_v47 = vld [vmem:[#allocation2 + $0x12a] sm:$0xff]  ;;  %v6636_v0 = vld [vmem:[#allocation2 + $0x142] sm:$0xff] }
 0x191   : > { %1724 = vrot.lane.b32.xlu0 %v6606_v15, %s5595_s30  ;;  %1722 = vrot.lane.b32.xlu1 %v6614_v29, %s5595_s30  ;;  %8728 = vst [vmem:[#allocation90_spill] sm:$0xff] %v6624_v47  ;;  %8731 = vst [vmem:[#allocation93_spill] sm:$0xff] %v6636_v0 }
 0x193   : > { %v999_v7 = vpop.permute.xlu0 %998  ;;  %v6626_v38 = vpop.permute.xlu1 %964 }
 0x194   : > { %8729 = vst [vmem:[#allocation91_spill] sm:$0xff] %v6626_v38  ;;  %v6648_v38 = vld [vmem:[#allocation2 + $0x15a] sm:$0xff] }
 0x195   : > { %1728 = vrot.lane.b32.xlu0 %v6618_v20, %s5595_s30  ;;  %1726 = vrot.lane.b32.xlu1 %v6624_v47, %s5595_s30  ;;  %8734 = vst [vmem:[#allocation96_spill] sm:$0xff] %v6648_v38 }
 0x197   : > { %v6630_v15 = vpop.permute.xlu0 %1002  ;;  %v6638_v29 = vpop.permute.xlu1 %1000 }
 0x199   : > { %1732 = vrot.lane.b32.xlu0 %v6628_v33, %s5595_s30  ;;  %1730 = vrot.lane.b32.xlu1 %v6636_v0, %s5595_s30  ;;  %v6658_v33 = vld [vmem:[#allocation2 + $0x172] sm:$0xff] }
 0x19a   : > { %8737 = vst [vmem:[#allocation99_spill] sm:$0xff] %v6658_v33  ;;  %v6662_v0 = vld [vmem:[#allocation2 + $0xf0] sm:$0xff] }
 0x19b   : > { %v6642_v20 = vpop.permute.xlu0 %1006  ;;  %v6650_v47 = vpop.permute.xlu1 %1004 }
 0x19c   : > { %8733 = vst [vmem:[#allocation95_spill] sm:$0xff] %v6642_v20  ;;  %8735 = vst [vmem:[#allocation97_spill] sm:$0xff] %v6650_v47 }
 0x19d   : > { %1736 = vrot.lane.b32.xlu0 %v6640_v41, %s5595_s30  ;;  %1734 = vrot.lane.b32.xlu1 %v6648_v38, %s5595_s30  ;;  %v6672_v38 = vld [vmem:[#allocation2 + $0x108] sm:$0xff] }
 0x19e   : > { %8741 = vst [vmem:[#allocation103_spill] sm:$0xff] %v6672_v38 }
 0x19f   : > { %v6652_v22 = vpop.permute.xlu0 %1010  ;;  %v6660_v20 = vpop.permute.xlu1 %1008 }
 0x1a0   : > { %8736 = vst [vmem:[#allocation98_spill] sm:$0xff] %v6652_v22  ;;  %8738 = vst [vmem:[#allocation100_spill] sm:$0xff] %v6660_v20 }
 0x1a1   : > { %1772 = vrot.lane.b32.xlu0 %v6317_v11, %s5596_s6  ;;  %1738 = vrot.lane.b32.xlu1 %v6658_v33, %s5595_s30  ;;  %v6680_v11 = vld [vmem:[#allocation2 + $0xf8] sm:$0xff] }
 0x1a3   : > { %v6664_v27 = vpop.permute.xlu0 %1014  ;;  %v6670_v41 = vpop.permute.xlu1 %1012 }
 0x1a4   : > { %8739 = vst [vmem:[#allocation101_spill] sm:$0xff] %v6664_v27  ;;  %8740 = vst [vmem:[#allocation102_spill] sm:$0xff] %v6670_v41  ;;  %v453_v27 = vld [vmem:[#allocation2] sm:$0xff]  ;;  %v454_v41 = vld [vmem:[#allocation2 + $0x8] sm:$0xff] }
 0x1a5   : > { %1776 = vrot.lane.b32.xlu0 %v6662_v0, %s5596_s6  ;;  %1774 = vrot.lane.b32.xlu1 %v6333_v1, %s5596_s6 }
 0x1a7   : > { %v6674_v22 = vpop.permute.xlu0 %1018  ;;  %v6682_v20 = vpop.permute.xlu1 %1016 }
 0x1a8   : > { %8742 = vst [vmem:[#allocation104_spill] sm:$0xff] %v6674_v22  ;;  %8743 = vst [vmem:[#allocation105_spill] sm:$0xff] %v6682_v20  ;;  %v1110_v22 = vsel %vm251_vm0, %v453_v27, %v6143_v4  ;;  %v1116_v27 = vsel %vm251_vm0, %v6001_v54, %v6167_v10  ;;  %v8745_v10 = vld [vmem:[#allocation10_spill] sm:$0xff] }
 0x1a9   : > { %1780 = vrot.lane.b32.xlu0 %v6672_v38, %s5596_s6  ;;  %1778 = vrot.lane.b32.xlu1 %v6680_v11, %s5596_s6  ;;  %v1127_v1 = vsel %vm1126_vm4, %v1110_v22, %v6225_v18 }
 0x1aa   : > { %v1144_v20 = vsel %vm1143_vm5, %v1127_v1, %v6301_v35  ;;  %v8754_v1 = vld [vmem:[#allocation31_spill] sm:$0xff] }
 0x1ab   : > { %v6684_v33 = vpop.permute.xlu0 %1022  ;;  %v6694_v38 = vpop.permute.xlu1 %1020  ;;  %v1160_v47 = vsel %vm307_vm2, %v1144_v20, %v6375_v26  ;;  %v1111_v20 = vsel %vm251_vm0, %v454_v41, %v6149_v5  ;;  %v1112_v26 = vsel %vm251_vm0, %v5985_v50, %v6155_v6  ;;  %v1115_v5 = vsel %vm251_vm0, %v6007_v55, %v6177_v13 }
 0x1ac   : > { %8744 = vst [vmem:[#allocation106_spill] sm:$0xff] %v6684_v33  ;;  %v1177_v4 = vsel %vm1176_vm6, %v1160_v47, %v6452_v40  ;;  %v6737_v6 = vsel %vm251_vm0, %v6009_v56, %v6179_v14  ;;  %v1128_v54 = vsel %vm1126_vm4, %v1111_v20, %v6245_v19  ;;  %v6753_v55 = vsel %vm251_vm0, %v6017_v58, %v6189_v17  ;;  %v8746_v58 = vld [vmem:[#allocation13_spill] sm:$0xff] }
 0x1ad   : > { %1838 = vrot.lane.b32.xlu0 %v6416_v24, %s5597_s7  ;;  %1836 = vrot.lane.b32.xlu1 %v6400_v63, %s5597_s7  ;;  %v1194_v18 = vsel %vm1193_vm7, %v1177_v4, %v6532_v28  ;;  %v1114_v63 = vsel %vm251_vm0, %v5993_v52, %v6159_v8  ;;  %v1113_v28 = vsel %vm251_vm0, %v5999_v53, %v6165_v9  ;;  %v393_v52 = vld [vmem:[%s5837_s28 + $0xf0] sm:$0xff] }
 0x1ae   : > { %v1211_v22 = vsel %vm1210_vm8, %v1194_v18, %v999_v7  ;;  %v6742_v53 = vsel %vm251_vm0, %v6015_v57, %v6187_v16  ;;  %426 = vst.msk [vmem:[#allocation2 + $0x181] sm:$0xff] %vm251_vm0, %v393_v52  ;;  %v6758_v56 = vsel %vm251_vm0, %v6023_v59, %v6199_v21  ;;  %v1129_v57 = vsel %vm1126_vm4, %v1112_v26, %v6237_v48  ;;  %v8747_v21 = vld [vmem:[#allocation14_spill] sm:$0xff]  ;;  %v8748_v48 = vld [vmem:[#allocation11_spill] sm:$0xff] }
 0x1af   : > { %v6698_v33 = vpop.permute.xlu0 %1026  ;;  %v6710_v35 = vpop.permute.xlu1 %1024  ;;  %v1145_v8 = vsel %vm1143_vm5, %v1128_v54, %v6315_v34  ;;  %v6769_v13 = vsel %vm251_vm0, %v8745_v10, %v6201_v32  ;;  %v6774_v14 = vsel %vm251_vm0, %v6103_v61, %v8746_v58  ;;  %v1146_v59 = vsel %vm1143_vm5, %v1129_v57, %v6309_v37  ;;  %v8749_v34 = vld [vmem:[#allocation15_spill] sm:$0xff]  ;;  %v8750_v32 = vld [vmem:[#allocation12_spill] sm:$0xff]  ;;  %v8758_v57 = vld [vmem:[#allocation97_spill] sm:$0xff] }
 0x1b0   : > { %v1161_v16 = vsel %vm307_vm2, %v1145_v8, %v6398_v30  ;;  %v6783_v19 = vsel %vm251_vm0, %v8748_v48, %v8747_v21  ;;  %v6788_v40 = vsel %vm251_vm0, %v8750_v32, %v8749_v34  ;;  %v1162_v61 = vsel %vm307_vm2, %v1146_v59, %v6389_v23  ;;  %v8751_v30 = vld [vmem:[#allocation16_spill] sm:$0xff]  ;;  %v8760_v58 = vld [vmem:[#allocation43_spill] sm:$0xff] }
 0x1b1   : > { %1902 = vrot.lane.b32.xlu0 %v6484_v49, %s5598_s8  ;;  %1900 = vrot.lane.b32.xlu1 %v6468_v45, %s5598_s8  ;;  %v1178_v37 = vsel %vm1176_vm6, %v1161_v16, %v6466_v44  ;;  %v6799_v41 = vsel %vm251_vm0, %v6119_v2, %v8751_v30  ;;  %v8752_v45 = vld [vmem:[#allocation18_spill] sm:$0xff]  ;;  %v1179_v49 = vsel %vm1176_vm6, %v1162_v61, %v6460_v42  ;;  %v8753_v44 = vld [vmem:[#allocation17_spill] sm:$0xff]  ;;  %v8759_v10 = vld [vmem:[#allocation32_spill] sm:$0xff] }
 0x1b2   : > { %v1130_v47 = vsel %vm1126_vm4, %v1113_v28, %v8752_v45  ;;  %v1195_v23 = vsel %vm1193_vm7, %v1178_v37, %v6552_v36  ;;  %v1131_v7 = vsel %vm1126_vm4, %v1114_v63, %v8753_v44  ;;  %v1196_v2 = vsel %vm1193_vm7, %v1179_v49, %v6544_v12  ;;  %v8755_v42 = vld [vmem:[#allocation30_spill] sm:$0xff]  ;;  %v394_v28 = vld [vmem:[%s5837_s28 + $0xf8] sm:$0xff]  ;;  %v8761_v16 = vld [vmem:[#allocation95_spill] sm:$0xff] }
 0x1b3   : > { %v1063_v24 = vpop.permute.xlu0 %1062  ;;  %v6764_v9 = vpop.permute.xlu1 %1028  ;;  %v1147_v4 = vsel %vm1143_vm5, %v1130_v47, %v8754_v1  ;;  %v1212_v18 = vsel %vm1210_vm8, %v1195_v23, %v6638_v29  ;;  %v1148_v26 = vsel %vm1143_vm5, %v1131_v7, %v8755_v42  ;;  %427 = vst.msk [vmem:[#allocation2 + $0x189] sm:$0xff] %vm251_vm0, %v394_v28  ;;  %v8764_v61 = vld [vmem:[#allocation61_spill] sm:$0xff]  ;;  %v8765_v37 = vld [vmem:[#allocation22_spill] sm:$0xff]  ;;  %v8767_v49 = vld [vmem:[#allocation76_spill] sm:$0xff] }
 0x1b4   : > { %v1228_v50 = vsel %vm1227_vm9, %v1211_v22, %v1063_v24  ;;  %v1163_v36 = vsel %vm307_vm2, %v1147_v4, %v6408_v31  ;;  %v1213_v22 = vsel %vm1210_vm8, %v1196_v2, %v6630_v15  ;;  %v1164_v12 = vsel %vm307_vm2, %v1148_v26, %v6402_v3  ;;  %v8756_v31 = vld [vmem:[#allocation20_spill] sm:$0xff]  ;;  %v8766_v45 = vld [vmem:[#allocation53_spill] sm:$0xff]  ;;  %v8769_v1 = vld [vmem:[#allocation34_spill] sm:$0xff] }
 0x1b5   : > { %1966 = vrot.lane.b32.xlu0 %v6680_v11, %s5599_s9  ;;  %4773 = vmatprep.mubr.msk.f32.mxu0 %vm1250_vm10, %v1228_v50  ;;  %v1180_v29 = vsel %vm1176_vm6, %v1163_v36, %v6476_v46  ;;  %v1132_v15 = vsel %vm1126_vm4, %v1115_v5, %v8756_v31  ;;  %v1181_v52 = vsel %vm1176_vm6, %v1164_v12, %v6470_v43  ;;  %v8757_v46 = vld [vmem:[#allocation19_spill] sm:$0xff]  ;;  %v8768_v44 = vld [vmem:[#allocation21_spill] sm:$0xff]  ;;  %v8770_v2 = vld [vmem:[#allocation74_spill] sm:$0xff] }
 0x1b6   : > { %1964 = vrot.lane.b32.xlu1 %v6662_v0, %s5599_s9  ;;  %v1197_v3 = vsel %vm1193_vm7, %v1180_v29, %v6564_v39  ;;  %v1149_v54 = vsel %vm1143_vm5, %v1132_v15, %v6335_v60  ;;  %v1198_v5 = vsel %vm1193_vm7, %v1181_v52, %v6556_v51  ;;  %v8762_v60 = vld [vmem:[#allocation42_spill] sm:$0xff]  ;;  %v1134_v30 = vsel %vm1126_vm4, %v6742_v53, %v8765_v37  ;;  %v8772_v26 = vld [vmem:[#allocation33_spill] sm:$0xff]  ;;  %v8775_v12 = vld [vmem:[#allocation44_spill] sm:$0xff] }
 0x1b7   : > { %v1067_v17 = vpop.permute.xlu0 %1066  ;;  %v1065_v20 = vpop.permute.xlu1 %1064  ;;  %v1214_v43 = vsel %vm1210_vm8, %v1197_v3, %v8758_v57  ;;  %v1165_v59 = vsel %vm307_vm2, %v1149_v54, %v8760_v58  ;;  %v8763_v51 = vld [vmem:[#allocation54_spill] sm:$0xff]  ;;  %v1135_v7 = vsel %vm1126_vm4, %v6737_v6, %v8768_v44  ;;  %v1151_v4 = vsel %vm1143_vm5, %v1134_v30, %v8769_v1  ;;  %v8777_v52 = vld [vmem:[#allocation24_spill] sm:$0xff]  ;;  %v8780_v57 = vld [vmem:[#allocation83_spill] sm:$0xff] }
 0x1b8   : > { %v1229_v63 = vsel %vm1227_vm9, %v1212_v18, %v1065_v20  ;;  %v1230_v50 = vsel %vm1227_vm9, %v1213_v22, %v1067_v17  ;;  %v1215_v17 = vsel %vm1210_vm8, %v1198_v5, %v8761_v16  ;;  %v1182_v34 = vsel %vm1176_vm6, %v1165_v59, %v8763_v51  ;;  %v8771_v18 = vld [vmem:[#allocation100_spill] sm:$0xff]  ;;  %v8779_v54 = vld [vmem:[#allocation78_spill] sm:$0xff]  ;;  %v8783_v58 = vld [vmem:[#allocation77_spill] sm:$0xff] }
 0x1b9   : > { %1840 = vrot.lane.b32.xlu0 %v6496_v25, %s5597_s7  ;;  %4774 = vmatmul.mubr.msk.f32.vlgmr.msra.gmra.mrb[0].mxu0 %vm1250_vm10, %v1229_v63  ;;  %v1199_v23 = vsel %vm1193_vm7, %v1182_v34, %v8767_v49  ;;  %v1152_v36 = vsel %vm1143_vm5, %v1135_v7, %v8772_v26  ;;  %v8774_v63 = vld [vmem:[#allocation98_spill] sm:$0xff]  ;;  %v1136_v3 = vsel %vm1126_vm4, %v6758_v56, %v8777_v52  ;;  %v8787_v34 = vld [vmem:[#allocation101_spill] sm:$0xff]  ;;  %v8795_v26 = vld [vmem:[#allocation79_spill] sm:$0xff] }
 0x1ba   : > { %2028 = vrot.lane.b32.xlu1 %v6496_v25, %s5600_s10  ;;  %4776 = vmatprep.mubr.msk.f32.mxu0 %vm1250_vm10, %v1230_v50  ;;  %v1133_v25 = vsel %vm1126_vm4, %v1116_v27, %v8757_v46  ;;  %v1216_v20 = vsel %vm1210_vm8, %v1199_v23, %v8771_v18  ;;  %v1168_v29 = vsel %vm307_vm2, %v1152_v36, %v8775_v12  ;;  %v8776_v50 = vld [vmem:[#allocation56_spill] sm:$0xff]  ;;  %v8778_v46 = vld [vmem:[#allocation55_spill] sm:$0xff]  ;;  %v8784_v59 = vld [vmem:[#allocation102_spill] sm:$0xff] }
 0x1bb   : > { %v1071_v24 = vpop.permute.xlu0 %1070  ;;  %v1069_v8 = vpop.permute.xlu1 %1068  ;;  %v1150_v39 = vsel %vm1143_vm5, %v1133_v25, %v8759_v10  ;;  %v1185_v25 = vsel %vm1176_vm6, %v1168_v29, %v8778_v46  ;;  %v8782_v10 = vld [vmem:[#allocation36_spill] sm:$0xff]  ;;  %v8788_v37 = vld [vmem:[#allocation46_spill] sm:$0xff]  ;;  %v8791_v7 = vld [vmem:[#allocation57_spill] sm:$0xff] }
 0x1bc   : > { %v1231_v27 = vsel %vm1227_vm9, %v1214_v43, %v1069_v8  ;;  %v1166_v48 = vsel %vm307_vm2, %v1150_v39, %v8762_v60  ;;  %v1232_v32 = vsel %vm1227_vm9, %v1215_v17, %v1071_v24  ;;  %v8781_v43 = vld [vmem:[#allocation23_spill] sm:$0xff]  ;;  %v1153_v39 = vsel %vm1143_vm5, %v1136_v3, %v8782_v10  ;;  %v8790_v23 = vld [vmem:[#allocation26_spill] sm:$0xff]  ;;  %v8796_v36 = vld [vmem:[#allocation105_spill] sm:$0xff] }
 0x1bd   : > { %2092 = vrot.lane.b32.xlu0 %v6584_v62, %s5601_s26  ;;  %4777 = vmatmul.mubr.msk.f32.gmra.mrb[2].mxu0 %vm1250_vm10, %v1231_v27  ;;  %v1183_v47 = vsel %vm1176_vm6, %v1166_v48, %v8766_v45  ;;  %v1137_v8 = vsel %vm1126_vm4, %v6753_v55, %v8781_v43  ;;  %v1202_v56 = vsel %vm1193_vm7, %v1185_v25, %v8783_v58  ;;  %v6919_v27 = vld [vmem:[#allocation2 + $0x110] sm:$0xff]  ;;  %v8789_v45 = vld [vmem:[#allocation58_spill] sm:$0xff] }
 0x1be   : > { %2030 = vrot.lane.b32.xlu1 %v8764_v61, %s5600_s10  ;;  %4779 = vmatprep.mubr.msk.f32.mxu0 %vm1250_vm10, %v1232_v32  ;;  %v1200_v53 = vsel %vm1193_vm7, %v1183_v47, %v8770_v2  ;;  %v8786_v48 = vld [vmem:[#allocation47_spill] sm:$0xff]  ;;  %v1219_v55 = vsel %vm1210_vm8, %v1202_v56, %v8787_v34  ;;  %v1138_v44 = vsel %vm1126_vm4, %v6774_v14, %v8790_v23  ;;  %v8799_v12 = vld [vmem:[#allocation104_spill] sm:$0xff]  ;;  %v8801_v52 = vld [vmem:[#allocation62_spill] sm:$0xff] }
 0x1bf   : > { %v1075_v21 = vpop.permute.xlu0 %1074  ;;  %v1073_v42 = vpop.permute.xlu1 %1072  ;;  %v1217_v24 = vsel %vm1210_vm8, %v1200_v53, %v8774_v63  ;;  %v1169_v51 = vsel %vm307_vm2, %v1153_v39, %v8786_v48  ;;  %v8793_v53 = vld [vmem:[#allocation25_spill] sm:$0xff]  ;;  %v8802_v25 = vld [vmem:[#allocation103_spill] sm:$0xff] }
 0x1c0   : > { %v1233_v6 = vsel %vm1227_vm9, %v1216_v20, %v1073_v42  ;;  %v1234_v15 = vsel %vm1227_vm9, %v1217_v24, %v1075_v21  ;;  %v8785_v21 = vld [vmem:[#allocation35_spill] sm:$0xff]  ;;  %v1186_v47 = vsel %vm1176_vm6, %v1169_v51, %v8789_v45  ;;  %v1139_v18 = vsel %vm1126_vm4, %v6769_v13, %v8793_v53  ;;  %v8794_v20 = vld [vmem:[#allocation38_spill] sm:$0xff]  ;;  %v8797_v63 = vld [vmem:[#allocation37_spill] sm:$0xff] }
 0x1c1   : > { %1904 = vrot.lane.b32.xlu0 %v6584_v62, %s5598_s8  ;;  %v8773_v62 = vld [vmem:[#allocation45_spill] sm:$0xff]  ;;  %4780 = vmatmul.mubr.msk.f32.gmra.mrb[4].mxu0 %vm1250_vm10, %v1233_v6  ;;  %v1154_v60 = vsel %vm1143_vm5, %v1137_v8, %v8785_v21  ;;  %v1155_v42 = vsel %vm1143_vm5, %v1138_v44, %v8794_v20  ;;  %v1156_v24 = vsel %vm1143_vm5, %v1139_v18, %v8797_v63  ;;  %v8805_v8 = vld [vmem:[#allocation84_spill] sm:$0xff]  ;;  %v8807_v58 = vld [vmem:[#allocation27_spill] sm:$0xff] }
 0x1c2   : > { %v1167_v22 = vsel %vm307_vm2, %v1151_v4, %v8773_v62  ;;  %1842 = vrot.lane.b32.xlu1 %v8764_v61, %s5597_s7  ;;  %4782 = vmatprep.mubr.msk.f32.mxu0 %vm1250_vm10, %v1234_v15  ;;  %v1170_v30 = vsel %vm307_vm2, %v1154_v60, %v8788_v37  ;;  %v8792_v4 = vld [vmem:[#allocation80_spill] sm:$0xff]  ;;  %v8798_v6 = vld [vmem:[#allocation49_spill] sm:$0xff]  ;;  %v1141_v56 = vsel %vm1126_vm4, %v6783_v19, %v8807_v58  ;;  %v8810_v48 = vld [vmem:[#allocation39_spill] sm:$0xff] }
 0x1c3   : > { %v1079_v28 = vpop.permute.xlu0 %1078  ;;  %v1184_v31 = vsel %vm1176_vm6, %v1167_v22, %v8776_v50  ;;  %v1077_v17 = vpop.permute.xlu1 %1076  ;;  %v1187_v1 = vsel %vm1176_vm6, %v1170_v30, %v8791_v7  ;;  %v1203_v2 = vsel %vm1193_vm7, %v1186_v47, %v8792_v4  ;;  %v8806_v39 = vld [vmem:[#allocation65_spill] sm:$0xff]  ;;  %v1158_v51 = vsel %vm1143_vm5, %v1141_v56, %v8810_v48  ;;  %v8811_v34 = vld [vmem:[#allocation51_spill] sm:$0xff]  ;;  %v8813_v30 = vld [vmem:[#allocation50_spill] sm:$0xff] }
 0x1c4   : > { %v1201_v5 = vsel %vm1193_vm7, %v1184_v31, %v8779_v54  ;;  %v1236_v49 = vsel %vm1227_vm9, %v1219_v55, %v1079_v28  ;;  %v1204_v14 = vsel %vm1193_vm7, %v1187_v1, %v8795_v26  ;;  %v1220_v62 = vsel %vm1210_vm8, %v1203_v2, %v8796_v36  ;;  %v8800_v31 = vld [vmem:[#allocation48_spill] sm:$0xff]  ;;  %v8814_v47 = vld [vmem:[#allocation66_spill] sm:$0xff]  ;;  %v8815_v23 = vld [vmem:[#allocation59_spill] sm:$0xff] }
 0x1c5   : > { %1906 = vrot.lane.b32.xlu0 %v8780_v57, %s5598_s8  ;;  %v1218_v16 = vsel %vm1210_vm8, %v1201_v5, %v8784_v59  ;;  %v1171_v28 = vsel %vm307_vm2, %v1155_v42, %v8798_v6  ;;  %v1221_v29 = vsel %vm1210_vm8, %v1204_v14, %v8799_v12  ;;  %v1172_v15 = vsel %vm307_vm2, %v1156_v24, %v8800_v31  ;;  %v8803_v54 = vld [vmem:[#allocation28_spill] sm:$0xff]  ;;  %v8816_v44 = vld [vmem:[#allocation29_spill] sm:$0xff]  ;;  %v8819_v18 = vld [vmem:[#allocation87_spill] sm:$0xff] }
 0x1c6   : > { %v1235_v32 = vsel %vm1227_vm9, %v1218_v16, %v1077_v17  ;;  %2094 = vrot.lane.b32.xlu1 %v8780_v57, %s5601_s26  ;;  %v1188_v3 = vsel %vm1176_vm6, %v1171_v28, %v8801_v52  ;;  %v1140_v5 = vsel %vm1126_vm4, %v6788_v40, %v8803_v54  ;;  %v8804_v57 = vld [vmem:[#allocation60_spill] sm:$0xff]  ;;  %v8809_v17 = vld [vmem:[#allocation82_spill] sm:$0xff]  ;;  %v1174_v45 = vsel %vm307_vm2, %v1158_v51, %v8813_v30  ;;  %v8820_v20 = vld [vmem:[#allocation41_spill] sm:$0xff] }
 0x1c7   : > { %v1083_v61 = vpop.permute.xlu0 %1082  ;;  %4783 = vmatmul.mubr.msk.f32.gmra.mrb[6].mxu0 %vm1250_vm10, %v1235_v32  ;;  %v1081_v22 = vpop.permute.xlu1 %1080  ;;  %v1189_v43 = vsel %vm1176_vm6, %v1172_v15, %v8804_v57  ;;  %v1205_v10 = vsel %vm1193_vm7, %v1188_v3, %v8805_v8  ;;  %v8808_v59 = vld [vmem:[#allocation40_spill] sm:$0xff]  ;;  %v8812_v32 = vld [vmem:[#allocation106_spill] sm:$0xff]  ;;  %v1142_v7 = vsel %vm1126_vm4, %v6799_v41, %v8816_v44  ;;  %v8823_v28 = vld [vmem:[#allocation69_spill] sm:$0xff] }
 0x1c8   : > { %4785 = vmatprep.mubr.msk.f32.mxu0 %vm1250_vm10, %v1236_v49  ;;  %v1237_v13 = vsel %vm1227_vm9, %v1220_v62, %v1081_v22  ;;  %v1238_v46 = vsel %vm1227_vm9, %v1221_v29, %v1083_v61  ;;  %v1157_v16 = vsel %vm1143_vm5, %v1140_v5, %v8808_v59  ;;  %v1206_v40 = vsel %vm1193_vm7, %v1189_v43, %v8809_v17  ;;  %v8817_v1 = vld [vmem:[#allocation64_spill] sm:$0xff]  ;;  %v8821_v26 = vld [vmem:[#allocation86_spill] sm:$0xff]  ;;  %v8826_v57 = vld [vmem:[#allocation63_spill] sm:$0xff] }
 0x1c9   : > { %1970 = vrot.lane.b32.xlu0 %v6919_v27, %s5599_s9  ;;  %v1222_v21 = vsel %vm1210_vm8, %v1205_v10, %v6694_v38  ;;  %v1173_v55 = vsel %vm307_vm2, %v1157_v16, %v8811_v34  ;;  %v1223_v61 = vsel %vm1210_vm8, %v1206_v40, %v8812_v32  ;;  %v1191_v4 = vsel %vm1176_vm6, %v1174_v45, %v8817_v1  ;;  %v8818_v2 = vld [vmem:[#allocation88_spill] sm:$0xff]  ;;  %v7066_v43 = vld [vmem:[#allocation2 + $0x128] sm:$0xff]  ;;  %v8831_v45 = vld [vmem:[#allocation89_spill] sm:$0xff] }
 0x1ca   : > { %1968 = vrot.lane.b32.xlu1 %v8802_v25, %s5599_s9  ;;  %v1190_v49 = vsel %vm1176_vm6, %v1173_v55, %v8814_v47  ;;  %v1159_v42 = vsel %vm1143_vm5, %v1142_v7, %v8820_v20  ;;  %v1208_v14 = vsel %vm1193_vm7, %v1191_v4, %v8821_v26  ;;  %v8822_v62 = vld [vmem:[#allocation52_spill] sm:$0xff]  ;;  %v8829_v40 = vld [vmem:[#allocation90_spill] sm:$0xff]  ;;  %v8833_v7 = vld [vmem:[#allocation93_spill] sm:$0xff] }
 0x1cb   : > { %v1087_v50 = vpop.permute.xlu0 %1086  ;;  %4786 = vmatmul.mubr.msk.f32.gmra.mrb[8].mxu0 %vm1250_vm10, %v1237_v13  ;;  %v1085_v60 = vpop.permute.xlu1 %1084  ;;  %v1207_v53 = vsel %vm1193_vm7, %v1190_v49, %v8818_v2  ;;  %v1175_v22 = vsel %vm307_vm2, %v1159_v42, %v8822_v62  ;;  %v1225_v63 = vsel %vm1210_vm8, %v1208_v14, %v6698_v33  ;;  %v8824_v13 = vld [vmem:[#allocation81_spill] sm:$0xff]  ;;  %v8828_v59 = vld [vmem:[#allocation68_spill] sm:$0xff]  ;;  %v8834_v26 = vld [vmem:[#allocation70_spill] sm:$0xff]  ;;  %v8835_v14 = vmov 0.0  }
 0x1cc   : > { %4788 = vmatprep.mubr.msk.f32.mxu0 %vm1250_vm10, %v1238_v46  ;;  %v1239_v19 = vsel %vm1227_vm9, %v1222_v21, %v1085_v60  ;;  %v1240_v38 = vsel %vm1227_vm9, %v1223_v61, %v1087_v50  ;;  %v1224_v41 = vsel %vm1210_vm8, %v1207_v53, %v6710_v35  ;;  %v1192_v12 = vsel %vm1176_vm6, %v1175_v22, %v8823_v28  ;;  %v8825_v35 = vld [vmem:[#allocation91_spill] sm:$0xff]  ;;  %v7050_v46 = vld [vmem:[#allocation2 + $0x120] sm:$0xff]  ;;  %v7104_v34 = vld [vmem:[#allocation2 + $0x138] sm:$0xff] }
 0x1cd   : > { %2034 = vrot.lane.b32.xlu0 %v8806_v39, %s5600_s10  ;;  %v1209_v50 = vsel %vm1193_vm7, %v1192_v12, %v8825_v35  ;;  %v8830_v61 = vld [vmem:[#allocation67_spill] sm:$0xff]  ;;  %314 = vst.msk [vmem:[#allocation3 + $0x28] sm:$0x3] %vm310_vm11, %v8835_v14  ;;  %311 = vst.msk [vmem:[#allocation3 + $0x10] sm:$0x3] %vm310_vm11, %v8835_v14  ;;  %v8836_v22 = vld [vmem:[#allocation92_spill] sm:$0xff] }
 0x1ce   : > { %2032 = vrot.lane.b32.xlu1 %v8815_v23, %s5600_s10  ;;  %v1226_v33 = vsel %vm1210_vm8, %v1209_v50, %v6764_v9  ;;  %317 = vst.msk [vmem:[#allocation3 + $0x40] sm:$0x3] %vm310_vm11, %v8835_v14  ;;  %320 = vst.msk [vmem:[#allocation3 + $0x58] sm:$0x3] %vm310_vm11, %v8835_v14  ;;  %v8838_v28 = vld [vmem:[#allocation73_spill] sm:$0xff] }
 0x1cf   : > { %v1091_v37 = vpop.permute.xlu0 %1090  ;;  %4789 = vmatmul.mubr.msk.f32.gmra.mrb[10].mxu0 %vm1250_vm10, %v1239_v19  ;;  %v1089_v36 = vpop.permute.xlu1 %1088  ;;  %323 = vst.msk [vmem:[#allocation3 + $0x70] sm:$0x3] %vm310_vm11, %v8835_v14  ;;  %326 = vst.msk [vmem:[#allocation3 + $0x88] sm:$0x3] %vm310_vm11, %v8835_v14 }
 0x1d0   : > { %4791 = vmatprep.mubr.msk.f32.mxu0 %vm1250_vm10, %v1240_v38  ;;  %v1241_v24 = vsel %vm1227_vm9, %v1224_v41, %v1089_v36  ;;  %v1242_v29 = vsel %vm1227_vm9, %v1225_v63, %v1091_v37  ;;  %v7120_v37 = vld [vmem:[#allocation2 + $0x140] sm:$0xff]  ;;  %v8832_v38 = vld [vmem:[#allocation71_spill] sm:$0xff]  ;;  %329 = vst.msk [vmem:[#allocation3 + $0xa0] sm:$0x3] %vm310_vm11, %v8835_v14  ;;  %332 = vst.msk [vmem:[#allocation3 + $0xb8] sm:$0x3] %vm310_vm11, %v8835_v14 }
 0x1d1   : > { %2098 = vrot.lane.b32.xlu0 %v8819_v18, %s5601_s26  ;;  %335 = vst.msk [vmem:[#allocation3 + $0xd0] sm:$0x3] %vm310_vm11, %v8835_v14  ;;  %338 = vst.msk [vmem:[#allocation3 + $0xe8] sm:$0x3] %vm310_vm11, %v8835_v14  ;;  %v7208_v36 = vld [vmem:[#allocation2 + $0x158] sm:$0xff] }
 0x1d2   : > { %2096 = vrot.lane.b32.xlu1 %v8824_v13, %s5601_s26  ;;  %341 = vst.msk [vmem:[#allocation3 + $0x100] sm:$0x3] %vm310_vm11, %v8835_v14  ;;  %344 = vst.msk [vmem:[#allocation3 + $0x118] sm:$0x3] %vm310_vm11, %v8835_v14 }
 0x1d3   : > { %v7025_v6 = vpop.permute.xlu0 %1644  ;;  %4792 = vmatmul.mubr.msk.f32.gmra.mrb[12].mxu0 %vm1250_vm10, %v1241_v24  ;;  %v1093_v31 = vpop.permute.xlu1 %1092  ;;  %347 = vst.msk [vmem:[#allocation3 + $0x130] sm:$0x3] %vm310_vm11, %v8835_v14  ;;  %350 = vst.msk [vmem:[#allocation3 + $0x148] sm:$0x3] %vm310_vm11, %v8835_v14 }
 0x1d4   : > { %4794 = vmatprep.mubr.msk.f32.mxu0 %vm1250_vm10, %v1242_v29  ;;  %v1243_v15 = vsel %vm1227_vm9, %v1226_v33, %v1093_v31  ;;  %353 = vst.msk [vmem:[#allocation3 + $0x160] sm:$0x3] %vm310_vm11, %v8835_v14  ;;  %356 = vst.msk [vmem:[#allocation3 + $0x178] sm:$0x3] %vm310_vm11, %v8835_v14 }
 0x1d5   : > { %1844 = vrot.lane.b32.xlu0 %v8815_v23, %s5597_s7  ;;  %359 = vst.msk [vmem:[#allocation3 + $0x190] sm:$0x3] %vm310_vm11, %v8835_v14  ;;  %362 = vst.msk [vmem:[#allocation3 + $0x1a8] sm:$0x3] %vm310_vm11, %v8835_v14 }
 0x1d6   : > { %1782 = vrot.lane.b32.xlu1 %v6919_v27, %s5596_s6 }
 0x1d7   : > { %v7041_v52 = vpop.permute.xlu0 %1648  ;;  %4795 = vmatmul.mubr.msk.f32.gmra.mrb[14].mxu0 %vm1250_vm10, %v1243_v15  ;;  %v7048_v3 = vpop.permute.xlu1 %1646  ;;  %v7234_v15 = vld [vmem:[#allocation2 + $0x168] sm:$0xff] }
 0x1d9   : > { %1908 = vrot.lane.b32.xlu0 %v8824_v13, %s5598_s8  ;;  %v8839_v13 = vld [vmem:[#allocation96_spill] sm:$0xff] }
 0x1da   : > { %1846 = vrot.lane.b32.xlu1 %v8806_v39, %s5597_s7  ;;  %v8827_v39 = vld [vmem:[#allocation85_spill] sm:$0xff] }
 0x1db   : > { %v7052_v54 = vpop.permute.xlu0 %1652  ;;  %v7058_v9 = vpop.permute.xlu1 %1650 }
 0x1dd   : > { %1972 = vrot.lane.b32.xlu0 %v7050_v46, %s5599_s9 }
 0x1de   : > { %1910 = vrot.lane.b32.xlu1 %v8819_v18, %s5598_s8  ;;  %v7156_v18 = vld [vmem:[#allocation2 + $0x150] sm:$0xff] }
 0x1df   : > { %v7060_v5 = vpop.permute.xlu0 %1656  ;;  %v7068_v8 = vpop.permute.xlu1 %1654 }
 0x1e1   : > { %2036 = vrot.lane.b32.xlu0 %v8826_v57, %s5600_s10 }
 0x1e2   : > { %1974 = vrot.lane.b32.xlu1 %v7066_v43, %s5599_s9 }
 0x1e3   : > { %v7070_v10 = vpop.permute.xlu0 %1660  ;;  %v7076_v58 = vpop.permute.xlu1 %1658 }
 0x1e5   : > { %2100 = vrot.lane.b32.xlu0 %v8827_v39, %s5601_s26 }
 0x1e6   : > { %2038 = vrot.lane.b32.xlu1 %v8828_v59, %s5600_s10 }
 0x1e7   : > { %v7078_v56 = vpop.permute.xlu0 %1664  ;;  %v7084_v16 = vpop.permute.xlu1 %1662 }
 0x1e9   : > { %1784 = vrot.lane.b32.xlu0 %v7050_v46, %s5596_s6 }
 0x1ea   : > { %2102 = vrot.lane.b32.xlu1 %v8829_v40, %s5601_s26 }
 0x1eb   : > { %v7086_v17 = vpop.permute.xlu0 %1668  ;;  %v7092_v21 = vpop.permute.xlu1 %1666 }
 0x1ed   : > { %1848 = vrot.lane.b32.xlu0 %v8826_v57, %s5597_s7  ;;  %v1482_v57 = vld [vmem:[#allocation2 + $0xc0] sm:$0xff] }
 0x1ee   : > { %1786 = vrot.lane.b32.xlu1 %v7066_v43, %s5596_s6 }
 0x1ef   : > { %v7094_v60 = vpop.permute.xlu0 %1672  ;;  %v7100_v48 = vpop.permute.xlu1 %1670 }
 0x1f1   : > { %1912 = vrot.lane.b32.xlu0 %v8827_v39, %s5598_s8 }
 0x1f2   : > { %1850 = vrot.lane.b32.xlu1 %v8828_v59, %s5597_s7 }
 0x1f3   : > { %v7102_v51 = vpop.permute.xlu0 %1708  ;;  %v7110_v55 = vpop.permute.xlu1 %1674 }
 0x1f5   : > { %1976 = vrot.lane.b32.xlu0 %v7104_v34, %s5599_s9 }
 0x1f6   : > { %1914 = vrot.lane.b32.xlu1 %v8829_v40, %s5598_s8  ;;  %v2140_v40 = vsel %vm251_vm0, %v1482_v57, %v7025_v6  ;;  %v8841_v6 = vld [vmem:[#allocation94_spill] sm:$0xff] }
 0x1f7   : > { %v7112_v32 = vpop.permute.xlu0 %1712  ;;  %v7118_v19 = vpop.permute.xlu1 %1710 }
 0x1f9   : > { %2040 = vrot.lane.b32.xlu0 %v8830_v61, %s5600_s10 }
 0x1fa   : > { %1978 = vrot.lane.b32.xlu1 %v7120_v37, %s5599_s9 }
 0x1fb   : > { %v7122_v30 = vpop.permute.xlu0 %1716  ;;  %v7128_v47 = vpop.permute.xlu1 %1714 }
 0x1fd   : > { %2104 = vrot.lane.b32.xlu0 %v8831_v45, %s5601_s26 }
 0x1fe   : > { %2042 = vrot.lane.b32.xlu1 %v8832_v38, %s5600_s10 }
 0x1ff   : > { %v7130_v49 = vpop.permute.xlu0 %1720  ;;  %v7136_v23 = vpop.permute.xlu1 %1718 }
 0x201   : > { %1788 = vrot.lane.b32.xlu0 %v7104_v34, %s5596_s6 }
 0x202   : > { %2106 = vrot.lane.b32.xlu1 %v8833_v7, %s5601_s26 }
 0x203   : > { %v7138_v44 = vpop.permute.xlu0 %1724  ;;  %v7144_v1 = vpop.permute.xlu1 %1722 }
 0x205   : > { %1852 = vrot.lane.b32.xlu0 %v8830_v61, %s5597_s7  ;;  %v8840_v61 = vld [vmem:[#allocation72_spill] sm:$0xff] }
 0x206   : > { %1790 = vrot.lane.b32.xlu1 %v7120_v37, %s5596_s6 }
 0x207   : > { %v7146_v4 = vpop.permute.xlu0 %1728  ;;  %v7152_v2 = vpop.permute.xlu1 %1726 }
 0x209   : > { %1916 = vrot.lane.b32.xlu0 %v8831_v45, %s5598_s8  ;;  %v2156_v45 = vsel %vm1126_vm4, %v2140_v40, %v7102_v51 }
 0x20a   : > { %1854 = vrot.lane.b32.xlu1 %v8832_v38, %s5597_s7 }
 0x20b   : > { %v7154_v53 = vpop.permute.xlu0 %1732  ;;  %v7162_v20 = vpop.permute.xlu1 %1730 }
 0x20d   : > { %1980 = vrot.lane.b32.xlu0 %v7156_v18, %s5599_s9 }
 0x20e   : > { %1918 = vrot.lane.b32.xlu1 %v8833_v7, %s5598_s8  ;;  %v7248_v7 = vld [vmem:[#allocation2 + $0x170] sm:$0xff] }
 0x20f   : > { %v7164_v42 = vpop.permute.xlu0 %1736  ;;  %v7206_v41 = vpop.permute.xlu1 %1734 }
 0x211   : > { %2044 = vrot.lane.b32.xlu0 %v8834_v26, %s5600_s10 }
 0x212   : > { %1982 = vrot.lane.b32.xlu1 %v7208_v36, %s5599_s9 }
 0x213   : > { %v1773_v62 = vpop.permute.xlu0 %1772  ;;  %v7214_v63 = vpop.permute.xlu1 %1738 }
 0x214   : > { %8837 = vst [vmem:[#allocation10_spill] sm:$0xff] %v7214_v63  ;;  %v8842_v63 = vld [vmem:[#allocation75_spill] sm:$0xff] }
 0x215   : > { %2108 = vrot.lane.b32.xlu0 %v8836_v22, %s5601_s26 }
 0x216   : > { %2046 = vrot.lane.b32.xlu1 %v8838_v28, %s5600_s10 }
 0x217   : > { %v7216_v24 = vpop.permute.xlu0 %1776  ;;  %v1775_v12 = vpop.permute.xlu1 %1774 }
 0x219   : > { %1792 = vrot.lane.b32.xlu0 %v7156_v18, %s5596_s6 }
 0x21a   : > { %2110 = vrot.lane.b32.xlu1 %v8839_v13, %s5601_s26 }
 0x21b   : > { %v7222_v29 = vpop.permute.xlu0 %1780  ;;  %v7228_v35 = vpop.permute.xlu1 %1778 }
 0x21d   : > { %1856 = vrot.lane.b32.xlu0 %v8834_v26, %s5597_s7  ;;  %v2172_v26 = vsel %vm1143_vm5, %v2156_v45, %v1773_v62 }
 0x21e   : > { %1794 = vrot.lane.b32.xlu1 %v7208_v36, %s5596_s6 }
 0x21f   : > { %v1839_v50 = vpop.permute.xlu0 %1838  ;;  %v1837_v33 = vpop.permute.xlu1 %1836 }
 0x221   : > { %1920 = vrot.lane.b32.xlu0 %v8836_v22, %s5598_s8  ;;  %v2188_v22 = vsel %vm307_vm2, %v2172_v26, %v1837_v33  ;;  %v1483_v33 = vld [vmem:[#allocation2 + $0xc8] sm:$0xff] }
 0x222   : > { %1858 = vrot.lane.b32.xlu1 %v8838_v28, %s5597_s7  ;;  %v8843_v26 = vld [vmem:[#allocation99_spill] sm:$0xff] }
 0x223   : > { %v1903_v31 = vpop.permute.xlu0 %1902  ;;  %v1901_v39 = vpop.permute.xlu1 %1900 }
 0x224   : > { %v2204_v28 = vsel %vm1176_vm6, %v2188_v22, %v1901_v39 }
 0x225   : > { %1984 = vrot.lane.b32.xlu0 %v7234_v15, %s5599_s9 }
 0x226   : > { %1922 = vrot.lane.b32.xlu1 %v8839_v13, %s5598_s8 }
 0x227   : > { %v1967_v59 = vpop.permute.xlu0 %1966 }
 0x228   : > { %v1965_v38 = vpop.permute.xlu1 %1964 }
 0x229   : > { %2048 = vrot.lane.b32.xlu0 %v8840_v61, %s5600_s10  ;;  %v2220_v13 = vsel %vm1193_vm7, %v2204_v28, %v1965_v38  ;;  %v2141_v38 = vsel %vm251_vm0, %v1483_v33, %v7048_v3 }
 0x22a   : > { %1986 = vrot.lane.b32.xlu1 %v7248_v7, %s5599_s9  ;;  %v2157_v22 = vsel %vm1126_vm4, %v2141_v38, %v7118_v19 }
 0x22b   : > { %v1841_v14 = vpop.permute.xlu0 %1840  ;;  %v2173_v28 = vsel %vm1143_vm5, %v2157_v22, %v1775_v12 }
 0x22c   : > { %v2029_v57 = vpop.permute.xlu1 %2028 }
 0x22d   : > { %2112 = vrot.lane.b32.xlu0 %v8841_v6, %s5601_s26  ;;  %v2236_v51 = vsel %vm1210_vm8, %v2220_v13, %v2029_v57  ;;  %v2189_v57 = vsel %vm307_vm2, %v2173_v28, %v1839_v50 }
 0x22e   : > { %2050 = vrot.lane.b32.xlu1 %v8842_v63, %s5600_s10 }
 0x22f   : > { %v2093_v40 = vpop.permute.xlu0 %2092 }
 0x230   : > { %v2252_v62 = vsel %vm1227_vm9, %v2236_v51, %v2093_v40  ;;  %v2031_v39 = vpop.permute.xlu1 %2030  ;;  %v2205_v40 = vsel %vm1176_vm6, %v2189_v57, %v1903_v31  ;;  %v1608_v31 = vld [vmem:[#allocation2 + $0x181] sm:$0xff] }
 0x231   : > { %1796 = vrot.lane.b32.xlu0 %v7234_v15, %s5596_s6  ;;  %4807 = vmatprep.mubr.msk.f32.mxu1 %vm1250_vm10, %v2252_v62  ;;  %v2221_v3 = vsel %vm1193_vm7, %v2205_v40, %v1967_v59  ;;  %v5505_v59 = vld [vmem:[#allocation2 + $0xe0] sm:$0xff] }
 0x232   : > { %2114 = vrot.lane.b32.xlu1 %v8843_v26, %s5601_s26  ;;  %v2237_v19 = vsel %vm1210_vm8, %v2221_v3, %v2031_v39  ;;  %v5506_v39 = vld [vmem:[#allocation2 + $0xd8] sm:$0xff] }
 0x233   : > { %v1905_v45 = vpop.permute.xlu0 %1904  ;;  %v2142_v22 = vsel %vm251_vm0, %v5506_v39, %v7041_v52 }
 0x234   : > { %v1843_v13 = vpop.permute.xlu1 %1842 }
 0x235   : > { %1860 = vrot.lane.b32.xlu0 %v8840_v61, %s5597_s7  ;;  %v1592_v61 = vld [vmem:[#allocation2 + $0x180] sm:$0xff] }
 0x236   : > { %1798 = vrot.lane.b32.xlu1 %v7248_v7, %s5596_s6 }
 0x237   : > { %v1907_v51 = vpop.permute.xlu0 %1906 }
 0x238   : > { %v2095_v62 = vpop.permute.xlu1 %2094 }
 0x239   : > { %1924 = vrot.lane.b32.xlu0 %v8841_v6, %s5598_s8  ;;  %v2253_v12 = vsel %vm1227_vm9, %v2237_v19, %v2095_v62  ;;  %v2143_v6 = vsel %vm251_vm0, %v5505_v59, %v7058_v9  ;;  %v1593_v9 = vld [vmem:[#allocation2 + $0x188] sm:$0xff] }
 0x23a   : > { %1862 = vrot.lane.b32.xlu1 %v8842_v63, %s5597_s7  ;;  %4808 = vmatmul.mubr.msk.f32.vlgmr.msra.gmra.mrb[0].mxu1 %vm1250_vm10, %v2253_v12  ;;  %v2159_v28 = vsel %vm1126_vm4, %v2143_v6, %v7128_v47  ;;  %v2158_v63 = vsel %vm1126_vm4, %v2142_v22, %v7112_v32  ;;  %v1624_v19 = vld [vmem:[#allocation2 + $0x182] sm:$0xff] }
 0x23b   : > { %v1971_v33 = vpop.permute.xlu0 %1970  ;;  %v2175_v57 = vsel %vm1143_vm5, %v2159_v28, %v7228_v35  ;;  %v2174_v40 = vsel %vm1143_vm5, %v2158_v63, %v7216_v24  ;;  %v1609_v12 = vld [vmem:[#allocation2 + $0x189] sm:$0xff]  ;;  %v2144_v28 = vsel %vm251_vm0, %v6662_v0, %v7052_v54 }
 0x23c   : > { %v1969_v50 = vpop.permute.xlu1 %1968  ;;  %v2191_v52 = vsel %vm307_vm2, %v2175_v57, %v1843_v13  ;;  %v2190_v47 = vsel %vm307_vm2, %v2174_v40, %v1841_v14  ;;  %v1594_v57 = vld [vmem:[#allocation2 + $0x198] sm:$0xff] }
 0x23d   : > { %1988 = vrot.lane.b32.xlu0 %v1592_v61, %s5599_s9  ;;  %v2207_v32 = vsel %vm1176_vm6, %v2191_v52, %v1907_v51  ;;  %v1625_v51 = vld [vmem:[#allocation2 + $0x18a] sm:$0xff] }
 0x23e   : > { %1926 = vrot.lane.b32.xlu1 %v8843_v26, %s5598_s8  ;;  %v2206_v26 = vsel %vm1176_vm6, %v2190_v47, %v1905_v45  ;;  %v2223_v24 = vsel %vm1193_vm7, %v2207_v32, %v1971_v33 }
 0x23f   : > { %v2035_v38 = vpop.permute.xlu0 %2034  ;;  %v2222_v35 = vsel %vm1193_vm7, %v2206_v26, %v1969_v50  ;;  %v1595_v26 = vld [vmem:[#allocation2 + $0x1a0] sm:$0xff] }
 0x240   : > { %v2033_v3 = vpop.permute.xlu1 %2032  ;;  %v2239_v6 = vsel %vm1210_vm8, %v2223_v24, %v2035_v38  ;;  %v2510_v24 = vld [vmem:[#allocation3 + $0x1] sm:$0xff] }
 0x241   : > { %2052 = vrot.lane.b32.xlu0 %v1608_v31, %s5600_s10  ;;  %v2238_v13 = vsel %vm1210_vm8, %v2222_v35, %v2033_v3  ;;  %v1610_v3 = vld [vmem:[#allocation2 + $0x199] sm:$0xff] }
 0x242   : > { %1990 = vrot.lane.b32.xlu1 %v1593_v9, %s5599_s9 }
 0x243   : > { %v2099_v62 = vpop.permute.xlu0 %2098 }
 0x244   : > { %v2097_v59 = vpop.permute.xlu1 %2096  ;;  %v2255_v45 = vsel %vm1227_vm9, %v2239_v6, %v2099_v62  ;;  %v1611_v6 = vld [vmem:[#allocation2 + $0x1a1] sm:$0xff] }
 0x245   : > { %2116 = vrot.lane.b32.xlu0 %v1624_v19, %s5601_s26  ;;  %v2254_v14 = vsel %vm1227_vm9, %v2238_v13, %v2097_v59  ;;  %v2511_v13 = vld [vmem:[#allocation3 + $0x9] sm:$0xff] }
 0x246   : > { %2054 = vrot.lane.b32.xlu1 %v1609_v12, %s5600_s10  ;;  %4810 = vmatprep.mubr.msk.f32.mxu1 %vm1250_vm10, %v2254_v14  ;;  %v4945_v14 = vpack.i.bf16 %v2511_v13, %v2510_v24 }
 0x247   : > { %v1845_v39 = vpop.permute.xlu0 %1844  ;;  %4811 = vmatmul.mubr.msk.f32.gmra.mrb[2].mxu1 %vm1250_vm10, %v2255_v45 }
 0x248   : > { %v1783_v33 = vpop.permute.xlu1 %1782 }
 0x249   : > { %1800 = vrot.lane.b32.xlu0 %v1592_v61, %s5596_s6  ;;  %v2160_v61 = vsel %vm1126_vm4, %v2144_v28, %v7122_v30 }
 0x24a   : > { %2118 = vrot.lane.b32.xlu1 %v1625_v51, %s5601_s26  ;;  %v2176_v40 = vsel %vm1143_vm5, %v2160_v61, %v7222_v29  ;;  %v2145_v29 = vsel %vm251_vm0, %v6680_v11, %v7068_v8 }
 0x24b   : > { %v1909_v50 = vpop.permute.xlu0 %1908  ;;  %v2161_v62 = vsel %vm1126_vm4, %v2145_v29, %v7136_v23 }
 0x24c   : > { %v1847_v38 = vpop.permute.xlu1 %1846  ;;  %v2177_v32 = vsel %vm1143_vm5, %v2161_v62, %v1783_v33 }
 0x24d   : > { %1864 = vrot.lane.b32.xlu0 %v1608_v31, %s5597_s7  ;;  %v2192_v31 = vsel %vm307_vm2, %v2176_v40, %v1845_v39  ;;  %v2193_v11 = vsel %vm307_vm2, %v2177_v32, %v1847_v38 }
 0x24e   : > { %1802 = vrot.lane.b32.xlu1 %v1593_v9, %s5596_s6  ;;  %v2208_v9 = vsel %vm1176_vm6, %v2192_v31, %v1909_v50  ;;  %v1627_v50 = vld [vmem:[#allocation2 + $0x1a2] sm:$0xff] }
 0x24f   : > { %v1973_v22 = vpop.permute.xlu0 %1972 }
 0x250   : > { %v1911_v63 = vpop.permute.xlu1 %1910  ;;  %v2224_v0 = vsel %vm1193_vm7, %v2208_v9, %v1973_v22 }
 0x251   : > { %1928 = vrot.lane.b32.xlu0 %v1624_v19, %s5598_s8  ;;  %v2209_v59 = vsel %vm1176_vm6, %v2193_v11, %v1911_v63  ;;  %v2146_v63 = vsel %vm251_vm0, %v8802_v25, %v7060_v5  ;;  %v2147_v25 = vsel %vm251_vm0, %v6919_v27, %v7076_v58 }
 0x252   : > { %1866 = vrot.lane.b32.xlu1 %v1609_v12, %s5597_s7  ;;  %v1626_v12 = vld [vmem:[#allocation2 + $0x19a] sm:$0xff] }
 0x253   : > { %v2037_v52 = vpop.permute.xlu0 %2036 }
 0x254   : > { %v1975_v54 = vpop.permute.xlu1 %1974  ;;  %v2240_v30 = vsel %vm1210_vm8, %v2224_v0, %v2037_v52 }
 0x255   : > { %1992 = vrot.lane.b32.xlu0 %v1594_v57, %s5599_s9  ;;  %v2225_v23 = vsel %vm1193_vm7, %v2209_v59, %v1975_v54  ;;  %v2162_v57 = vsel %vm1126_vm4, %v2146_v63, %v7130_v49  ;;  %v2163_v49 = vsel %vm1126_vm4, %v2147_v25, %v7144_v1  ;;  %v2148_v59 = vsel %vm251_vm0, %v7050_v46, %v7070_v10 }
 0x256   : > { %1930 = vrot.lane.b32.xlu1 %v1625_v51, %s5598_s8  ;;  %v2149_v46 = vsel %vm251_vm0, %v7066_v43, %v7084_v16 }
 0x257   : > { %v2101_v19 = vpop.permute.xlu0 %2100 }
 0x258   : > { %v2256_v47 = vsel %vm1227_vm9, %v2240_v30, %v2101_v19  ;;  %v2039_v35 = vpop.permute.xlu1 %2038 }
 0x259   : > { %2056 = vrot.lane.b32.xlu0 %v1610_v3, %s5600_s10  ;;  %4813 = vmatprep.mubr.msk.f32.mxu1 %vm1250_vm10, %v2256_v47  ;;  %v2241_v39 = vsel %vm1210_vm8, %v2225_v23, %v2039_v35  ;;  %v2164_v23 = vsel %vm1126_vm4, %v2148_v59, %v7138_v44  ;;  %v2165_v44 = vsel %vm1126_vm4, %v2149_v46, %v7152_v2 }
 0x25a   : > { %1994 = vrot.lane.b32.xlu1 %v1595_v26, %s5599_s9 }
 0x25b   : > { %v1785_v8 = vpop.permute.xlu0 %1784 }
 0x25c   : > { %v2103_v45 = vpop.permute.xlu1 %2102  ;;  %v2178_v52 = vsel %vm1143_vm5, %v2162_v57, %v1785_v8 }
 0x25d   : > { %2120 = vrot.lane.b32.xlu0 %v1626_v12, %s5601_s26  ;;  %v2257_v51 = vsel %vm1227_vm9, %v2241_v39, %v2103_v45 }
 0x25e   : > { %2058 = vrot.lane.b32.xlu1 %v1611_v6, %s5600_s10  ;;  %4814 = vmatmul.mubr.msk.f32.gmra.mrb[4].mxu1 %vm1250_vm10, %v2257_v51 }
 0x25f   : > { %v1849_v33 = vpop.permute.xlu0 %1848 }
 0x260   : > { %v1787_v38 = vpop.permute.xlu1 %1786  ;;  %v2194_v9 = vsel %vm307_vm2, %v2178_v52, %v1849_v33 }
 0x261   : > { %4946 = vrot.lane.b32.xlu0 %v4945_v14, %s5597_s7  ;;  %v2179_v29 = vsel %vm1143_vm5, %v2163_v49, %v1787_v38 }
 0x262   : > { %2122 = vrot.lane.b32.xlu1 %v1627_v50, %s5601_s26 }
 0x263   : > { %v1913_v22 = vpop.permute.xlu0 %1912 }
 0x264   : > { %v1851_v28 = vpop.permute.xlu1 %1850  ;;  %v2210_v0 = vsel %vm1176_vm6, %v2194_v9, %v1913_v22 }
 0x265   : > { %v2195_v62 = vsel %vm307_vm2, %v2179_v29, %v1851_v28 }
 0x267   : > { %v1977_v61 = vpop.permute.xlu0 %1976 }
 0x268   : > { %v1915_v40 = vpop.permute.xlu1 %1914  ;;  %v2226_v54 = vsel %vm1193_vm7, %v2210_v0, %v1977_v61 }
 0x269   : > { %v2211_v32 = vsel %vm1176_vm6, %v2195_v62, %v1915_v40 }
 0x26b   : > { %v2041_v31 = vpop.permute.xlu0 %2040 }
 0x26c   : > { %v1979_v3 = vpop.permute.xlu1 %1978  ;;  %v2242_v30 = vsel %vm1210_vm8, %v2226_v54, %v2041_v31  ;;  %v7401_v31 = vld [vmem:[#allocation4] ss:$0 sm:$0xff] }
 0x26d   : > { %v2227_v35 = vsel %vm1193_vm7, %v2211_v32, %v1979_v3 }
 0x26f   : > { %v2105_v19 = vpop.permute.xlu0 %2104 }
 0x270   : > { %v2258_v5 = vsel %vm1227_vm9, %v2242_v30, %v2105_v19  ;;  %v2043_v47 = vpop.permute.xlu1 %2042 }
 0x271   : > { %4816 = vmatprep.mubr.msk.f32.mxu1 %vm1250_vm10, %v2258_v5  ;;  %v2243_v12 = vsel %vm1210_vm8, %v2227_v35, %v2043_v47 }
 0x273   : > { %v1789_v26 = vpop.permute.xlu0 %1788 }
 0x274   : > { %v2107_v27 = vpop.permute.xlu1 %2106  ;;  %v2180_v14 = vsel %vm1143_vm5, %v2164_v23, %v1789_v26 }
 0x275   : > { %v2259_v58 = vsel %vm1227_vm9, %v2243_v12, %v2107_v27 }
 0x276   : > { %4817 = vmatmul.mubr.msk.f32.gmra.mrb[6].mxu1 %vm1250_vm10, %v2259_v58 }
 0x277   : > { %v1853_v24 = vpop.permute.xlu0 %1852 }
 0x278   : > { %v1791_v1 = vpop.permute.xlu1 %1790  ;;  %v2196_v45 = vsel %vm307_vm2, %v2180_v14, %v1853_v24 }
 0x279   : > { %v2181_v28 = vsel %vm1143_vm5, %v2165_v44, %v1791_v1 }
 0x27b   : > { %v1917_v13 = vpop.permute.xlu0 %1916 }
 0x27c   : > { %v1855_v11 = vpop.permute.xlu1 %1854  ;;  %v2212_v51 = vsel %vm1176_vm6, %v2196_v45, %v1917_v13  ;;  %v2150_v13 = vsel %vm251_vm0, %v7104_v34, %v7078_v56 }
 0x27d   : > { %v2197_v63 = vsel %vm307_vm2, %v2181_v28, %v1855_v11 }
 0x27f   : > { %v1981_v8 = vpop.permute.xlu0 %1980 }
 0x280   : > { %v1919_v6 = vpop.permute.xlu1 %1918  ;;  %v2228_v33 = vsel %vm1193_vm7, %v2212_v51, %v1981_v8  ;;  %v2166_v8 = vsel %vm1126_vm4, %v2150_v13, %v7146_v4 }
 0x281   : > { %v2213_v40 = vsel %vm1176_vm6, %v2197_v63, %v1919_v6 }
 0x283   : > { %v2045_v39 = vpop.permute.xlu0 %2044 }
 0x284   : > { %v1983_v50 = vpop.permute.xlu1 %1982  ;;  %v2244_v38 = vsel %vm1210_vm8, %v2228_v33, %v2045_v39 }
 0x285   : > { %v2229_v52 = vsel %vm1193_vm7, %v2213_v40, %v1983_v50 }
 0x287   : > { %v2109_v22 = vpop.permute.xlu0 %2108 }
 0x288   : > { %v2260_v10 = vsel %vm1227_vm9, %v2244_v38, %v2109_v22  ;;  %v2047_v61 = vpop.permute.xlu1 %2046 }
 0x289   : > { %4819 = vmatprep.mubr.msk.f32.mxu1 %vm1250_vm10, %v2260_v10  ;;  %v2245_v43 = vsel %vm1210_vm8, %v2229_v52, %v2047_v61  ;;  %v2151_v52 = vsel %vm251_vm0, %v7120_v37, %v7092_v21 }
 0x28b   : > { %v1793_v57 = vpop.permute.xlu0 %1792 }
 0x28c   : > { %v2111_v16 = vpop.permute.xlu1 %2110  ;;  %v4775_v0 = vpop.f32.mrb[0].mxu0  ;;  %v2182_v6 = vsel %vm1143_vm5, %v2166_v8, %v1793_v57 }
 0x28d   : > { %v2261_v9 = vsel %vm1227_vm9, %v2245_v43, %v2111_v16  ;;  %v1375_v54 = vadd.f32 %v4775_v0, %v7401_v31  ;;  %v1369_v3 = vpop.f32.mrb[1].mxu0 }
 0x28e   : > { %4820 = vmatmul.mubr.msk.f32.gmra.mrb[8].mxu1 %vm1250_vm10, %v2261_v9  ;;  %v1370_v30 = vadd.f32 %v7401_v31, %v1369_v3 }
 0x28f   : > { %v1857_v2 = vpop.permute.xlu0 %1856  ;;  %v1449_v19 = vmax.f32 %v1375_v54, 0.0  ;;  %v2167_v54 = vsel %vm1126_vm4, %v2151_v52, %v7162_v20 }
 0x290   : > { %v1795_v25 = vpop.permute.xlu1 %1794  ;;  %v1448_v5 = vmax.f32 %v1370_v30, 0.0  ;;  %v4778_v29 = vpop.f32.mrb[2].mxu0  ;;  %v2198_v33 = vsel %vm307_vm2, %v2182_v6, %v1857_v2 }
 0x291   : > { %1466 = vst.msk [vmem:[#allocation3 + $0x21] sm:$0xff] %vm307_vm2, %v1449_v19  ;;  %v1385_v47 = vadd.f32 %v4778_v29, %v7401_v31  ;;  %v1379_v62 = vpop.f32.mrb[3].mxu0  ;;  %v2183_v37 = vsel %vm1143_vm5, %v2167_v54, %v1795_v25  ;;  %v2526_v54 = vld [vmem:[#allocation3 + $0x2] sm:$0xff] }
 0x292   : > { %1465 = vst.msk [vmem:[#allocation3 + $0x19] sm:$0xff] %vm307_vm2, %v1448_v5  ;;  %v1380_v26 = vadd.f32 %v7401_v31, %v1379_v62 }
 0x293   : > { %v1921_v49 = vpop.permute.xlu0 %1920  ;;  %v1451_v32 = vmax.f32 %v1385_v47, 0.0 }
 0x294   : > { %v1859_v35 = vpop.permute.xlu1 %1858  ;;  %v1450_v12 = vmax.f32 %v1380_v26, 0.0  ;;  %v4781_v58 = vpop.f32.mrb[4].mxu0  ;;  %v2214_v38 = vsel %vm1176_vm6, %v2198_v33, %v1921_v49 }
 0x295   : > { %1468 = vst.msk [vmem:[#allocation3 + $0x39] sm:$0xff] %vm307_vm2, %v1451_v32  ;;  %v1395_v24 = vadd.f32 %v4781_v58, %v7401_v31  ;;  %v1389_v1 = vpop.f32.mrb[5].mxu0  ;;  %v2199_v5 = vsel %vm307_vm2, %v2183_v37, %v1859_v35  ;;  %v2152_v37 = vsel %vm251_vm0, %v7156_v18, %v7086_v17 }
 0x296   : > { %1467 = vst.msk [vmem:[#allocation3 + $0x31] sm:$0xff] %vm307_vm2, %v1450_v12  ;;  %v1390_v11 = vadd.f32 %v7401_v31, %v1389_v1 }
 0x297   : > { %v1985_v27 = vpop.permute.xlu0 %1984  ;;  %v1453_v59 = vmax.f32 %v1395_v24, 0.0 }
 0x298   : > { %v1923_v23 = vpop.permute.xlu1 %1922  ;;  %v1452_v14 = vmax.f32 %v1390_v11, 0.0  ;;  %v2513_v51 = vld [vmem:[#allocation3 + $0x21] sm:$0xff]  ;;  %v2230_v46 = vsel %vm1193_vm7, %v2214_v38, %v1985_v27 }
 0x299   : > { %1470 = vst.msk [vmem:[#allocation3 + $0x51] sm:$0xff] %vm307_vm2, %v1453_v59  ;;  %v2512_v50 = vld [vmem:[#allocation3 + $0x19] sm:$0xff]  ;;  %v2215_v62 = vsel %vm1176_vm6, %v2199_v5, %v1923_v23 }
 0x29a   : > { %v4784_v45 = vpop.f32.mrb[6].mxu0  ;;  %1469 = vst.msk [vmem:[#allocation3 + $0x49] sm:$0xff] %vm307_vm2, %v1452_v14  ;;  %v7428_v22 = vpack.i.bf16 %v2513_v51, %v2512_v50 }
 0x29b   : > { %v2049_v39 = vpop.permute.xlu0 %2048  ;;  %v1405_v56 = vadd.f32 %v4784_v45, %v7401_v31  ;;  %v1399_v34 = vpop.f32.mrb[7].mxu0 }
 0x29c   : > { %v1400_v4 = vadd.f32 %v7401_v31, %v1399_v34  ;;  %v1987_v44 = vpop.permute.xlu1 %1986  ;;  %v2246_v28 = vsel %vm1210_vm8, %v2230_v46, %v2049_v39  ;;  %4951 = vrot.lane.b32.xlu1 %v7428_v22, %s5597_s7  ;;  %v7434_v40 = vld [vmem:[#allocation3 + $0x39] sm:$0xff] }
 0x29d   : > { %v1455_v10 = vmax.f32 %v1405_v56, 0.0  ;;  %v7442_v2 = vld [vmem:[#allocation3 + $0x32] sm:$0xff]  ;;  %v2231_v12 = vsel %vm1193_vm7, %v2215_v62, %v1987_v44 }
 0x29e   : > { %v1454_v61 = vmax.f32 %v1400_v4, 0.0  ;;  %v4787_v57 = vpop.f32.mrb[8].mxu0  ;;  %v7444_v0 = vld [vmem:[#allocation3 + $0x31] sm:$0xff]  ;;  %4621 = vmatprep.mubr.msk.f32.mxu0 %vm307_vm2, %v7442_v2 }
 0x29f   : > { %v2113_v63 = vpop.permute.xlu0 %2112  ;;  %1472 = vst.msk [vmem:[#allocation3 + $0x69] sm:$0xff] %vm307_vm2, %v1455_v10  ;;  %v1415_v16 = vadd.f32 %v4787_v57, %v7401_v31  ;;  %v1409_v9 = vpop.f32.mrb[9].mxu0  ;;  %v7455_v21 = vpack.i.bf16 %v7434_v40, %v7444_v0 }
 0x2a0   : > { %v2262_v43 = vsel %vm1227_vm9, %v2246_v28, %v2113_v63  ;;  %1471 = vst.msk [vmem:[#allocation3 + $0x61] sm:$0xff] %vm307_vm2, %v1454_v61  ;;  %v1410_v3 = vadd.f32 %v7401_v31, %v1409_v9  ;;  %v2051_v19 = vpop.permute.xlu1 %2050  ;;  %v7461_v47 = vld [vmem:[#allocation3 + $0x51] sm:$0xff] }
 0x2a1   : > { %4822 = vmatprep.mubr.msk.f32.mxu1 %vm1250_vm10, %v2262_v43  ;;  %v1457_v30 = vmax.f32 %v1415_v16, 0.0  ;;  %4956 = vrot.lane.b32.xlu0 %v7455_v21, %s5597_s7  ;;  %v7466_v25 = vld [vmem:[#allocation3 + $0x49] sm:$0xff]  ;;  %v2247_v58 = vsel %vm1210_vm8, %v2231_v12, %v2051_v19  ;;  %v2168_v19 = vsel %vm1126_vm4, %v2152_v37, %v7154_v53  ;;  %v7513_v53 = vld [vmem:[#allocation3 + $0x1a] sm:$0xff] }
 0x2a2   : > { %v1456_v20 = vmax.f32 %v1410_v3, 0.0  ;;  %v4790_v29 = vpop.f32.mrb[10].mxu0  ;;  %v4960_v27 = vpack.i.bf16 %v7461_v47, %v7466_v25  ;;  %v2527_v3 = vld [vmem:[#allocation3 + $0xa] sm:$0xff] }
 0x2a3   : > { %v1797_v49 = vpop.permute.xlu0 %1796  ;;  %1474 = vst.msk [vmem:[#allocation3 + $0x81] sm:$0xff] %vm307_vm2, %v1457_v30  ;;  %v1425_v26 = vadd.f32 %v4790_v29, %v7401_v31  ;;  %v1419_v32 = vpop.f32.mrb[11].mxu0  ;;  %v4985_v62 = vpack.i.bf16 %v2527_v3, %v2526_v54  ;;  %v2542_v3 = vld [vmem:[#allocation3 + $0x18] sm:$0xff] }
 0x2a4   : > { %1473 = vst.msk [vmem:[#allocation3 + $0x79] sm:$0xff] %vm307_vm2, %v1456_v20  ;;  %v1420_v35 = vadd.f32 %v7401_v31, %v1419_v32  ;;  %v2115_v1 = vpop.permute.xlu1 %2114  ;;  %4961 = vrot.lane.b32.xlu1 %v4960_v27, %s5597_s7  ;;  %v2184_v20 = vsel %vm1143_vm5, %v2168_v19, %v1797_v49 }
 0x2a5   : > { %v1459_v24 = vmax.f32 %v1425_v26, 0.0  ;;  %v2263_v11 = vsel %vm1227_vm9, %v2247_v58, %v2115_v1  ;;  %v7511_v58 = vld [vmem:[#allocation3 + $0x3a] sm:$0xff] }
 0x2a6   : > { %v1458_v13 = vmax.f32 %v1420_v35, 0.0  ;;  %v4793_v59 = vpop.f32.mrb[12].mxu0  ;;  %v7476_v23 = vld [vmem:[#allocation3 + $0x69] sm:$0xff]  ;;  %4823 = vmatmul.mubr.msk.f32.gmra.mrb[10].mxu1 %vm1250_vm10, %v2263_v11 }
 0x2a7   : > { %v1861_v8 = vpop.permute.xlu0 %1860  ;;  %1476 = vst.msk [vmem:[#allocation3 + $0x99] sm:$0xff] %vm307_vm2, %v1459_v24  ;;  %v1435_v6 = vadd.f32 %v4793_v59, %v7401_v31  ;;  %v1429_v14 = vpop.f32.mrb[13].mxu0  ;;  %v7481_v39 = vld [vmem:[#allocation3 + $0x61] sm:$0xff]  ;;  %v4995_v59 = vpack.i.bf16 %v7511_v58, %v7442_v2 }
 0x2a8   : > { %1475 = vst.msk [vmem:[#allocation3 + $0x91] sm:$0xff] %vm307_vm2, %v1458_v13  ;;  %v1430_v45 = vadd.f32 %v7401_v31, %v1429_v14  ;;  %v4965_v51 = vpack.i.bf16 %v7476_v23, %v7481_v39  ;;  %v1799_v56 = vpop.permute.xlu1 %1798  ;;  %v2200_v32 = vsel %vm307_vm2, %v2184_v20, %v1861_v8  ;;  %v7515_v24 = vld [vmem:[#allocation3 + $0x22] sm:$0xff]  ;;  %v2153_v13 = vsel %vm251_vm0, %v7208_v36, %v7100_v48  ;;  %v7531_v14 = vld [vmem:[#allocation3 + $0x52] sm:$0xff]  ;;  %v7536_v48 = vld [vmem:[#allocation3 + $0x6a] sm:$0xff] }
 0x2a9   : > { %v1461_v33 = vmax.f32 %v1435_v6, 0.0  ;;  %v2169_v8 = vsel %vm1126_vm4, %v2153_v13, %v7206_v41  ;;  %v4990_v6 = vpack.i.bf16 %v7515_v24, %v7513_v53  ;;  %v7538_v36 = vld [vmem:[#allocation3 + $0x4a] sm:$0xff]  ;;  %v7579_v13 = vld [vmem:[#allocation3 + $0x60] sm:$0xff] }
 0x2aa   : > { %v1460_v34 = vmax.f32 %v1430_v45, 0.0  ;;  %v4796_v38 = vpop.f32.mrb[14].mxu0  ;;  %4966 = vrot.lane.b32.xlu0 %v4965_v51, %s5597_s7  ;;  %v7488_v4 = vld [vmem:[#allocation3 + $0x81] sm:$0xff]  ;;  %v2185_v45 = vsel %vm1143_vm5, %v2169_v8, %v1799_v56 }
 0x2ab   : > { %v1925_v50 = vpop.permute.xlu0 %1924  ;;  %1478 = vst.msk [vmem:[#allocation3 + $0xb1] sm:$0xff] %vm307_vm2, %v1461_v33  ;;  %v1445_v46 = vadd.f32 %v4796_v38, %v7401_v31  ;;  %v1439_v10 = vpop.f32.mrb[15].mxu0  ;;  %v7492_v44 = vld [vmem:[#allocation3 + $0x79] sm:$0xff]  ;;  %v7534_v33 = vld [vmem:[#allocation3 + $0x62] sm:$0xff] }
 0x2ac   : > { %1477 = vst.msk [vmem:[#allocation3 + $0xa9] sm:$0xff] %vm307_vm2, %v1460_v34  ;;  %v1440_v28 = vadd.f32 %v7401_v31, %v1439_v10  ;;  %v4970_v61 = vpack.i.bf16 %v7488_v4, %v7492_v44  ;;  %v1863_v57 = vpop.permute.xlu1 %1862  ;;  %v2216_v35 = vsel %vm1176_vm6, %v2200_v32, %v1925_v50  ;;  %v5005_v56 = vpack.i.bf16 %v7536_v48, %v7534_v33  ;;  %v7549_v10 = vld [vmem:[#allocation3 + $0x82] sm:$0xff] }
 0x2ad   : > { %v1463_v63 = vmax.f32 %v1445_v46, 0.0  ;;  %v2201_v41 = vsel %vm307_vm2, %v2185_v45, %v1863_v57  ;;  %v5000_v46 = vpack.i.bf16 %v7531_v14, %v7538_v36  ;;  %v7587_v45 = vld [vmem:[#allocation3 + $0x68] sm:$0xff] }
 0x2ae   : > { %v1462_v52 = vmax.f32 %v1440_v28, 0.0  ;;  %4971 = vrot.lane.b32.xlu1 %v4970_v61, %s5597_s7  ;;  %v2523_v16 = vld [vmem:[#allocation3 + $0x99] sm:$0xff] }
 0x2af   : > { %v1989_v43 = vpop.permute.xlu0 %1988  ;;  %1480 = vst.msk [vmem:[#allocation3 + $0xc9] sm:$0xff] %vm307_vm2, %v1463_v63  ;;  %v2522_v9 = vld [vmem:[#allocation3 + $0x91] sm:$0xff]  ;;  %v2539_v57 = vld [vmem:[#allocation3 + $0x9a] sm:$0xff] }
 0x2b0   : > { %1479 = vst.msk [vmem:[#allocation3 + $0xc1] sm:$0xff] %vm307_vm2, %v1462_v52  ;;  %v4975_v30 = vpack.i.bf16 %v2523_v16, %v2522_v9  ;;  %v1927_v5 = vpop.permute.xlu1 %1926  ;;  %v2232_v18 = vsel %vm1193_vm7, %v2216_v35, %v1989_v43  ;;  %v2538_v63 = vld [vmem:[#allocation3 + $0x92] sm:$0xff]  ;;  %v7552_v52 = vld [vmem:[#allocation3 + $0x7a] sm:$0xff] }
 0x2b1   : > { %v2217_v50 = vsel %vm1176_vm6, %v2201_v41, %v1927_v5  ;;  %v5015_v9 = vpack.i.bf16 %v2539_v57, %v2538_v63  ;;  %v5010_v54 = vpack.i.bf16 %v7549_v10, %v7552_v52  ;;  %v7566_v35 = vld [vmem:[#allocation3 + $0x50] sm:$0xff] }
 0x2b2   : > { %4976 = vrot.lane.b32.xlu0 %v4975_v30, %s5597_s7  ;;  %v2525_v26 = vld [vmem:[#allocation3 + $0xb1] sm:$0xff]  ;;  %v2543_v30 = vld [vmem:[#allocation3 + $0x20] sm:$0xff] }
 0x2b3   : > { %v2053_v29 = vpop.permute.xlu0 %2052  ;;  %v2524_v12 = vld [vmem:[#allocation3 + $0xa9] sm:$0xff]  ;;  %v2541_v5 = vld [vmem:[#allocation3 + $0xb2] sm:$0xff] }
 0x2b4   : > { %v4980_v17 = vpack.i.bf16 %v2525_v26, %v2524_v12  ;;  %v1991_v27 = vpop.permute.xlu1 %1990  ;;  %v2248_v49 = vsel %vm1210_vm8, %v2232_v18, %v2053_v29  ;;  %v2540_v19 = vld [vmem:[#allocation3 + $0xaa] sm:$0xff]  ;;  %v5025_v29 = vpack.i.bf16 %v2543_v30, %v2542_v3 }
 0x2b5   : > { %v2233_v38 = vsel %vm1193_vm7, %v2217_v50, %v1991_v27  ;;  %v7562_v26 = vld [vmem:[#allocation3 + $0x30] sm:$0xff]  ;;  %v7564_v12 = vld [vmem:[#allocation3 + $0x48] sm:$0xff]  ;;  %v2154_v27 = vsel %vm251_vm0, %v7234_v15, %v7094_v60  ;;  %v5040_v50 = vpack.i.bf16 %v7587_v45, %v7579_v13 }
 0x2b6   : > { %4986 = vrot.lane.b32.xlu0 %v4985_v62, %s5601_s26  ;;  %4981 = vrot.lane.b32.xlu1 %v4980_v17, %s5597_s7  ;;  %v5020_v62 = vpack.i.bf16 %v2541_v5, %v2540_v19  ;;  %v7568_v17 = vld [vmem:[#allocation3 + $0x38] sm:$0xff] }
 0x2b7   : > { %v2117_v1 = vpop.permute.xlu0 %2116 }
 0x2b8   : > { %v2264_v11 = vsel %vm1227_vm9, %v2248_v49, %v2117_v1  ;;  %v2055_v51 = vpop.permute.xlu1 %2054  ;;  %v5035_v49 = vpack.i.bf16 %v7566_v35, %v7564_v12  ;;  %v5030_v1 = vpack.i.bf16 %v7568_v17, %v7562_v26 }
 0x2b9   : > { %4825 = vmatprep.mubr.msk.f32.mxu1 %vm1250_vm10, %v2264_v11  ;;  %v2249_v28 = vsel %vm1210_vm8, %v2233_v38, %v2055_v51  ;;  %v2170_v11 = vsel %vm1126_vm4, %v2154_v27, %v7164_v42  ;;  %v7598_v38 = vld [vmem:[#allocation3 + $0x90] sm:$0xff] }
 0x2ba   : > { %4996 = vrot.lane.b32.xlu0 %v4995_v59, %s5601_s26  ;;  %4991 = vrot.lane.b32.xlu1 %v4990_v6, %s5601_s26  ;;  %v7583_v59 = vld [vmem:[#allocation3 + $0x78] sm:$0xff]  ;;  %v7585_v6 = vld [vmem:[#allocation3 + $0x80] sm:$0xff] }
 0x2bb   : > { %v1801_v34 = vpop.permute.xlu0 %1800  ;;  %v5045_v42 = vpack.i.bf16 %v7585_v6, %v7583_v59 }
 0x2bc   : > { %v2119_v61 = vpop.permute.xlu1 %2118  ;;  %v2186_v60 = vsel %vm1143_vm5, %v2170_v11, %v1801_v34 }
 0x2bd   : > { %v2265_v43 = vsel %vm1227_vm9, %v2249_v28, %v2119_v61  ;;  %v7603_v28 = vld [vmem:[#allocation3 + $0xb0] sm:$0xff]  ;;  %v7605_v61 = vld [vmem:[#allocation3 + $0x98] sm:$0xff] }
 0x2be   : > { %5006 = vrot.lane.b32.xlu0 %v5005_v56, %s5601_s26  ;;  %5001 = vrot.lane.b32.xlu1 %v5000_v46, %s5601_s26  ;;  %v7601_v46 = vld [vmem:[#allocation3 + $0xa8] sm:$0xff]  ;;  %v5050_v30 = vpack.i.bf16 %v7605_v61, %v7598_v38 }
 0x2bf   : > { %v1865_v16 = vpop.permute.xlu0 %1864  ;;  %4826 = vmatmul.mubr.msk.f32.gmra.mrb[12].mxu1 %vm1250_vm10, %v2265_v43  ;;  %v2155_v43 = vsel %vm251_vm0, %v7248_v7, %v7110_v55  ;;  %v5055_v3 = vpack.i.bf16 %v7603_v28, %v7601_v46  ;;  %vm3187_vm0 = vcmask 916480  }
 0x2c0   : > { %v1803_v37 = vpop.permute.xlu1 %1802  ;;  %v2202_v51 = vsel %vm307_vm2, %v2186_v60, %v1865_v16  ;;  %v5604_v60 = vmov 0.0|0.0  }
 0x2c1   : > { %4847 = vmatprep.subr.bf16.mxu0 %v5604_v60  ;;  %4874 = vmatprep.subr.bf16.mxu1 %v5604_v60 }
 0x2c2   : > { %5016 = vrot.lane.b32.xlu0 %v5015_v9, %s5601_s26  ;;  %5011 = vrot.lane.b32.xlu1 %v5010_v54, %s5601_s26  ;;  %v8844_v9 = vld [vmem:[#allocation10_spill] sm:$0xff] }
 0x2c3   : > { %v1929_v20 = vpop.permute.xlu0 %1928  ;;  %v2171_v54 = vsel %vm1126_vm4, %v2155_v43, %v8844_v9  ;;  %v442_v9 = vld [vmem:[%s8580_s3 + $0x48] sm:$0xff] }
 0x2c4   : > { %v1867_v32 = vpop.permute.xlu1 %1866  ;;  %v2218_v41 = vsel %vm1176_vm6, %v2202_v51, %v1929_v20  ;;  %v2187_v19 = vsel %vm1143_vm5, %v2171_v54, %v1803_v37  ;;  %v7622_v20 = vld [vmem:[#allocation3 + $0xc0] sm:$0xff]  ;;  %v436_v51 = vld [vmem:[%s8580_s3 + $0x18] sm:$0xff] }
 0x2c5   : > { %v2203_v55 = vsel %vm307_vm2, %v2187_v19, %v1867_v32  ;;  %v3517_v32 = vld [vmem:[#allocation3 + $0xc1] sm:$0xff] }
 0x2c6   : > { %5026 = vrot.lane.b32.xlu0 %v5025_v29, %s5602_s27  ;;  %5021 = vrot.lane.b32.xlu1 %v5020_v62, %s5601_s26  ;;  %v7624_v29 = vld [vmem:[#allocation3 + $0xc8] sm:$0xff] }
 0x2c7   : > { %v1993_v18 = vpop.permute.xlu0 %1992 }
 0x2c8   : > { %v1931_v8 = vpop.permute.xlu1 %1930  ;;  %v2234_v56 = vsel %vm1193_vm7, %v2218_v41, %v1993_v18  ;;  %v5060_v18 = vpack.i.bf16 %v7624_v29, %v7622_v20 }
 0x2c9   : > { %v2219_v7 = vsel %vm1176_vm6, %v2203_v55, %v1931_v8  ;;  %v433_v8 = vld [vmem:[%s8580_s3] sm:$0xff] }
 0x2ca   : > { %5036 = vrot.lane.b32.xlu0 %v5035_v49, %s5602_s27  ;;  %5031 = vrot.lane.b32.xlu1 %v5030_v1, %s5602_s27  ;;  %v3518_v1 = vld [vmem:[#allocation3 + $0xc9] sm:$0xff] }
 0x2cb   : > { %v2057_v15 = vpop.permute.xlu0 %2056  ;;  %v5080_v11 = vpack.i.bf16 %v3518_v1, %v3517_v32 }
 0x2cc   : > { %v1995_v34 = vpop.permute.xlu1 %1994  ;;  %v2250_v63 = vsel %vm1210_vm8, %v2234_v56, %v2057_v15 }
 0x2cd   : > { %v2235_v62 = vsel %vm1193_vm7, %v2219_v7, %v1995_v34  ;;  %v439_v34 = vld [vmem:[%s8580_s3 + $0x30] sm:$0xff] }
 0x2ce   : > { %5046 = vrot.lane.b32.xlu0 %v5045_v42, %s5602_s27  ;;  %5041 = vrot.lane.b32.xlu1 %v5040_v50, %s5602_s27  ;;  %v437_v42 = vld [vmem:[%s8580_s3 + $0x20] sm:$0xff]  ;;  %v438_v50 = vld [vmem:[%s8580_s3 + $0x28] sm:$0xff] }
 0x2cf   : > { %v2121_v57 = vpop.permute.xlu0 %2120  ;;  %v4854_v56 = vpack.c.bf16 %v438_v50, %v437_v42  ;;  %v443_v7 = vld [vmem:[%s8580_s3 + $0x50] sm:$0xff] }
 0x2d0   : > { %v2266_v16 = vsel %vm1227_vm9, %v2250_v63, %v2121_v57  ;;  %v2059_v5 = vpop.permute.xlu1 %2058  ;;  %v440_v63 = vld [vmem:[%s8580_s3 + $0x38] sm:$0xff] }
 0x2d1   : > { %4828 = vmatprep.mubr.msk.f32.mxu1 %vm1250_vm10, %v2266_v16  ;;  %v2251_v37 = vsel %vm1210_vm8, %v2235_v62, %v2059_v5  ;;  %v4857_v57 = vpack.c.bf16 %v440_v63, %v439_v34  ;;  %v441_v16 = vld [vmem:[%s8580_s3 + $0x40] sm:$0xff]  ;;  %v444_v62 = vld [vmem:[%s8580_s3 + $0x58] sm:$0xff] }
 0x2d2   : > { %5056 = vrot.lane.b32.xlu0 %v5055_v3, %s5602_s27  ;;  %5051 = vrot.lane.b32.xlu1 %v5050_v30, %s5602_s27  ;;  %v4860_v30 = vpack.c.bf16 %v442_v9, %v441_v16  ;;  %v448_v34 = vld [vmem:[%s8580_s3 + $0x78] sm:$0xff] }
 0x2d4   : > { %v2123_v27 = vpop.permute.xlu1 %2122 }
 0x2d5   : > { %v2267_v49 = vsel %vm1227_vm9, %v2251_v37, %v2123_v27  ;;  %v4863_v37 = vpack.c.bf16 %v444_v62, %v443_v7  ;;  %v445_v27 = vld [vmem:[%s8580_s3 + $0x60] sm:$0xff]  ;;  %v450_v7 = vld [vmem:[%s8580_s3 + $0x88] sm:$0xff] }
 0x2d6   : > { %5066 = vrot.lane.b32.xlu0 %v7428_v22, %s5603_s20  ;;  %5061 = vrot.lane.b32.xlu1 %v5060_v18, %s5602_s27  ;;  %v434_v22 = vld [vmem:[%s8580_s3 + $0x8] sm:$0xff]  ;;  %v7694_v18 = vpop.permute.xlu0 %4946 }
 0x2d7   : > { %4829 = vmatmul.mubr.msk.f32.gmra.mrb[14].mxu1 %vm1250_vm10, %v2267_v49  ;;  %v4848_v15 = vpack.c.bf16 %v434_v22, %v433_v8  ;;  %v446_v49 = vld [vmem:[%s8580_s3 + $0x68] sm:$0xff] }
 0x2d8   : > { %v4866_v32 = vpack.c.bf16 %v446_v49, %v445_v27 }
 0x2d9   : > { %4849 = vmatpush1.bf16.msra.mxu0 %v4848_v15  ;;  %4876 = vmatpush1.bf16.msra.mxu1 %v4848_v15 }
 0x2da   : > { %5071 = vrot.lane.b32.xlu1 %v7455_v21, %s5603_s20  ;;  %v435_v21 = vld [vmem:[%s8580_s3 + $0x10] sm:$0xff]  ;;  %4850 = vmatprep.subr.bf16.mxu0 %v5604_v60 }
 0x2db   : > { %v4851_v41 = vpack.c.bf16 %v436_v51, %v435_v21  ;;  %4877 = vmatprep.subr.bf16.mxu1 %v5604_v60 }
 0x2dd   : > { %4852 = vmatpush1.bf16.msra.mxu0 %v4851_v41  ;;  %4879 = vmatpush1.bf16.msra.mxu1 %v4851_v41 }
 0x2de   : > { %5081 = vrot.lane.b32.xlu1 %v5080_v11, %s5597_s7  ;;  %4853 = vmatprep.subr.bf16.mxu0 %v5604_v60 }
 0x2df   : > { %4880 = vmatprep.subr.bf16.mxu1 %v5604_v60 }
 0x2e1   : > { %4855 = vmatpush1.bf16.msra.mxu0 %v4854_v56  ;;  %4882 = vmatpush1.bf16.msra.mxu1 %v4854_v56  ;;  %v447_v56 = vld [vmem:[%s8580_s3 + $0x70] sm:$0xff] }
 0x2e2   : > { %4856 = vmatprep.subr.bf16.mxu0 %v5604_v60  ;;  %4883 = vmatprep.subr.bf16.mxu1 %v5604_v60  ;;  %v4869_v9 = vpack.c.bf16 %v448_v34, %v447_v56 }
 0x2e5   : > { %4858 = vmatpush1.bf16.msra.mxu0 %v4857_v57  ;;  %4885 = vmatpush1.bf16.msra.mxu1 %v4857_v57  ;;  %v3533_v57 = vld [vmem:[#allocation3 + $0xc2] sm:$0xff] }
 0x2e6   : > { %4859 = vmatprep.subr.bf16.mxu0 %v5604_v60  ;;  %4886 = vmatprep.subr.bf16.mxu1 %v5604_v60 }
 0x2e9   : > { %4861 = vmatpush1.bf16.msra.mxu0 %v4860_v30  ;;  %4888 = vmatpush1.bf16.msra.mxu1 %v4860_v30 }
 0x2ea   : > { %4862 = vmatprep.subr.bf16.mxu0 %v5604_v60  ;;  %4889 = vmatprep.subr.bf16.mxu1 %v5604_v60 }
 0x2ed   : > { %4864 = vmatpush1.bf16.msra.mxu0 %v4863_v37  ;;  %4891 = vmatpush1.bf16.msra.mxu1 %v4863_v37 }
 0x2ee   : > { %4865 = vmatprep.subr.bf16.mxu0 %v5604_v60  ;;  %4892 = vmatprep.subr.bf16.mxu1 %v5604_v60 }
 0x2f1   : > { %4867 = vmatpush1.bf16.msra.mxu0 %v4866_v32  ;;  %4894 = vmatpush1.bf16.msra.mxu1 %v4866_v32 }
 0x2f2   : > { %4868 = vmatprep.subr.bf16.mxu0 %v5604_v60  ;;  %4895 = vmatprep.subr.bf16.mxu1 %v5604_v60 }
 0x2f5   : > { %4870 = vmatpush1.bf16.msra.mxu0 %v4869_v9  ;;  %4897 = vmatpush1.bf16.msra.mxu1 %v4869_v9 }
 0x2f6   : > { %4871 = vmatprep.subr.bf16.mxu0 %v5604_v60  ;;  %4898 = vmatprep.subr.bf16.mxu1 %v5604_v60 }
 0x30d   : > { %v4809_v43 = vpop.f32.mrb[0].mxu1 }
 0x30e   : > { %v2388_v54 = vadd.f32 %v4809_v43, %v7401_v31  ;;  %v2382_v3 = vpop.f32.mrb[1].mxu1  ;;  %v7704_v1 = vpop.permute.xlu1 %4951  ;;  %v3534_v43 = vld [vmem:[#allocation3 + $0xca] sm:$0xff] }
 0x30f   : > { %v2383_v19 = vadd.f32 %v7401_v31, %v2382_v3 }
 0x310   : > { %v2462_v5 = vmax.f32 %v2388_v54, 0.0 }
 0x311   : > { %v2461_v55 = vmax.f32 %v2383_v19, 0.0  ;;  %v5085_v19 = vpack.i.bf16 %v3534_v43, %v3533_v57 }
 0x312   : > { %2479 = vst.msk [vmem:[#allocation3 + $0xe1] sm:$0xff] %vm307_vm2, %v2462_v5 }
 0x313   : > { %2478 = vst.msk [vmem:[#allocation3 + $0xd9] sm:$0xff] %vm307_vm2, %v2461_v55  ;;  %v7712_v21 = vpop.permute.xlu0 %4956  ;;  %v449_v55 = vld [vmem:[%s8580_s3 + $0x80] sm:$0xff] }
 0x314   : > { %v4872_v62 = vpack.c.bf16 %v450_v7, %v449_v55 }
 0x316   : > { %v7730_v3 = vpop.permute.xlu1 %4961  ;;  %4873 = vmatpush1.bf16.msra.mxu0 %v4872_v62  ;;  %4900 = vmatpush1.bf16.msra.mxu1 %v4872_v62 }
 0x31a   : > { %v4812_v11 = vpop.f32.mrb[2].mxu1  ;;  %v7706_v8 = vld [vmem:[#allocation3 + $0xd9] sm:$0xff] }
 0x31b   : > { %v7708_v22 = vld [vmem:[#allocation3 + $0xd8] sm:$0xff]  ;;  %v7710_v15 = vld [vmem:[#allocation3 + $0xe0] sm:$0xff]  ;;  %v2398_v51 = vadd.f32 %v4812_v11, %v7401_v31  ;;  %v2392_v41 = vpop.f32.mrb[3].mxu1  ;;  %v5075_v42 = vpack.i.bf16 %v7706_v8, %v7466_v25 }
 0x31c   : > { %v5090_v50 = vpack.i.bf16 %v7710_v15, %v7708_v22  ;;  %v2393_v63 = vadd.f32 %v7401_v31, %v2392_v41  ;;  %v7733_v30 = vpop.permute.xlu0 %4966  ;;  %v3581_v5 = vld [vmem:[#allocation3 + $0xda] sm:$0xff] }
 0x31d   : > { %v2464_v16 = vmax.f32 %v2398_v51, 0.0  ;;  %5076 = vrot.lane.b32.xlu0 %v5075_v42, %s5603_s20  ;;  %v5095_v49 = vpack.i.bf16 %v3581_v5, %v7513_v53 }
 0x31e   : > { %5091 = vrot.lane.b32.xlu1 %v5090_v50, %s5602_s27  ;;  %v2463_v54 = vmax.f32 %v2393_v63, 0.0  ;;  %v3582_v50 = vld [vmem:[#allocation3 + $0xe2] sm:$0xff] }
 0x31f   : > { %2481 = vst.msk [vmem:[#allocation3 + $0xf9] sm:$0xff] %vm307_vm2, %v2464_v16  ;;  %v3566_v63 = vld [vmem:[#allocation3 + $0xe1] sm:$0xff]  ;;  %v5115_v57 = vpack.i.bf16 %v3582_v50, %v7515_v24 }
 0x320   : > { %2480 = vst.msk [vmem:[#allocation3 + $0xf1] sm:$0xff] %vm307_vm2, %v2463_v54  ;;  %v7745_v37 = vpop.permute.xlu1 %4971 }
 0x321   : > { %5086 = vrot.lane.b32.xlu0 %v5085_v19, %s5601_s26  ;;  %8845 = vst [vmem:[#allocation13_spill] sm:$0xff] %v7745_v37  ;;  %v5120_v19 = vpack.i.bf16 %v3566_v63, %v7706_v8  ;;  %v5130_v8 = vpack.i.bf16 %v3582_v50, %v3581_v5 }
 0x324   : > { %v7747_v27 = vpop.permute.xlu0 %4976 }
 0x325   : > { %5096 = vrot.lane.b32.xlu0 %v5095_v49, %s5605_s22 }
 0x326   : > { %v7780_v7 = vld [vmem:[#allocation3 + $0xf9] sm:$0xff] }
 0x327   : > { %v7755_v51 = vld [vmem:[#allocation3 + $0xf2] sm:$0xff] }
 0x328   : > { %v7751_v32 = vpop.permute.xlu0 %4986  ;;  %v7753_v11 = vpop.permute.xlu1 %4981  ;;  %v7757_v41 = vld [vmem:[#allocation3 + $0xf1] sm:$0xff]  ;;  %4653 = vmatprep.mubr.msk.f32.mxu1 %vm307_vm2, %v7755_v51 }
 0x329   : > { %v3598_v60 = vld [vmem:[#allocation3 + $0xf0] sm:$0xff]  ;;  %v5105_v53 = vpack.i.bf16 %v7757_v41, %v7444_v0  ;;  %v5110_v43 = vpack.i.bf16 %v7757_v41, %v3566_v63  ;;  %v3599_v16 = vld [vmem:[#allocation3 + $0xf8] sm:$0xff] }
 0x32a   : > { %v5100_v42 = vpack.i.bf16 %v3598_v60, %v7562_v26  ;;  %v5125_v54 = vpack.i.bf16 %v3599_v16, %v7568_v17  ;;  %v5135_v17 = vpack.i.bf16 %v7780_v7, %v7434_v40 }
 0x32b   : > { %5106 = vrot.lane.b32.xlu0 %v5105_v53, %s5606_s23 }
 0x32c   : > { %5101 = vrot.lane.b32.xlu1 %v5100_v42, %s5607_s24  ;;  %v7766_v56 = vpop.permute.xlu0 %4996  ;;  %v7768_v34 = vpop.permute.xlu1 %4991 }
 0x32f   : > { %5116 = vrot.lane.b32.xlu0 %v5115_v57, %s5605_s22 }
 0x330   : > { %5111 = vrot.lane.b32.xlu1 %v5110_v43, %s5603_s20  ;;  %v7774_v0 = vpop.permute.xlu0 %5006  ;;  %v7776_v26 = vpop.permute.xlu1 %5001 }
 0x331   : > { %8846 = vst [vmem:[#allocation14_spill] sm:$0xff] %v7774_v0  ;;  %v4815_v9 = vpop.f32.mrb[4].mxu1 }
 0x332   : > { %v2402_v55 = vpop.f32.mrb[5].mxu1  ;;  %v2408_v24 = vadd.f32 %v4815_v9, %v7401_v31  ;;  %v5145_v9 = vpack.i.bf16 %v7755_v51, %v7442_v2 }
 0x333   : > { %v2403_v62 = vadd.f32 %v7401_v31, %v2402_v55  ;;  %5126 = vrot.lane.b32.xlu0 %v5125_v54, %s5607_s24  ;;  %v5140_v54 = vpack.i.bf16 %v3599_v16, %v3598_v60  ;;  %v4979_v55 = vunpack.i.h.bf16 %v7747_v27  ;;  %v7815_v16 = vld [vmem:[#allocation3 + $0xfa] sm:$0xff] }
 0x334   : > { %5121 = vrot.lane.b32.xlu1 %v5120_v19, %s5597_s7  ;;  %v5017_v49 = vpop.permute.xlu0 %5016  ;;  %v7786_v53 = vpop.permute.xlu1 %5011  ;;  %v2466_v42 = vmax.f32 %v2408_v24, 0.0  ;;  %v4978_v24 = vunpack.i.l.bf16 %v7747_v27 }
 0x335   : > { %8847 = vst [vmem:[#allocation11_spill] sm:$0xff] %v7786_v53  ;;  %v2465_v57 = vmax.f32 %v2403_v62, 0.0  ;;  %v3100_v27 = vsel %vm307_vm2, %v7605_v61, %v4979_v55 }
 0x336   : > { %2483 = vst.msk [vmem:[#allocation3 + $0x111] sm:$0xff] %vm307_vm2, %v2466_v42 }
 0x337   : > { %2482 = vst.msk [vmem:[#allocation3 + $0x109] sm:$0xff] %vm307_vm2, %v2465_v57  ;;  %5136 = vrot.lane.b32.xlu0 %v5135_v17, %s5606_s23  ;;  %v5019_v57 = vunpack.i.h.bf16 %v5017_v49  ;;  %v5018_v17 = vunpack.i.l.bf16 %v5017_v49  ;;  %v4984_v49 = vunpack.i.h.bf16 %v7753_v11 }
 0x338   : > { %5131 = vrot.lane.b32.xlu1 %v5130_v8, %s5601_s26  ;;  %v7794_v63 = vpop.permute.xlu0 %5026  ;;  %v5022_v43 = vpop.permute.xlu1 %5021  ;;  %v3099_v8 = vsel %vm307_vm2, %v7598_v38, %v4978_v24 }
 0x339   : > { %v3115_v55 = vsel %vm1227_vm9, %v3099_v8, %v5018_v17  ;;  %v3116_v24 = vsel %vm1227_vm9, %v3100_v27, %v5019_v57  ;;  %v5023_v0 = vunpack.i.l.bf16 %v5022_v43  ;;  %v5170_v17 = vpack.i.bf16 %v7780_v7, %v7757_v41 }
 0x33a   : > { %v3102_v57 = vsel %vm307_vm2, %v7603_v28, %v4984_v49 }
 0x33b   : > { %5146 = vrot.lane.b32.xlu0 %v5145_v9, %s5605_s22 }
 0x33c   : > { %5141 = vrot.lane.b32.xlu1 %v5140_v54, %s5602_s27  ;;  %v7800_v40 = vpop.permute.xlu0 %5036  ;;  %v7802_v5 = vpop.permute.xlu1 %5031 }
 0x33e   : > { %v7804_v50 = vld [vmem:[#allocation3 + $0x109] sm:$0xff] }
 0x33f   : > { %v3600_v19 = vld [vmem:[#allocation3 + $0x108] sm:$0xff]  ;;  %v5155_v2 = vpack.i.bf16 %v7804_v50, %v7466_v25  ;;  %v5165_v25 = vpack.i.bf16 %v7815_v16, %v7511_v58  ;;  %v3601_v37 = vld [vmem:[#allocation3 + $0x110] sm:$0xff] }
 0x340   : > { %v7808_v62 = vpop.permute.xlu0 %5046  ;;  %v7810_v42 = vpop.permute.xlu1 %5041  ;;  %v5150_v60 = vpack.i.bf16 %v3600_v19, %v7564_v12  ;;  %v5160_v12 = vpack.i.bf16 %v7804_v50, %v7780_v7  ;;  %v7863_v49 = vld [vmem:[#allocation3 + $0x10a] sm:$0xff] }
 0x341   : > { %8848 = vst [vmem:[#allocation15_spill] sm:$0xff] %v7808_v62  ;;  %5156 = vrot.lane.b32.xlu0 %v5155_v2, %s5606_s23  ;;  %v4983_v2 = vunpack.i.l.bf16 %v7753_v11  ;;  %v5024_v62 = vunpack.i.h.bf16 %v5022_v43 }
 0x342   : > { %5151 = vrot.lane.b32.xlu1 %v5150_v60, %s5607_s24 }
 0x343   : > { %v3101_v43 = vsel %vm307_vm2, %v7601_v46, %v4983_v2 }
 0x344   : > { %v5057_v9 = vpop.permute.xlu0 %5056  ;;  %v7823_v54 = vpop.permute.xlu1 %5051 }
 0x345   : > { %8849 = vst [vmem:[#allocation12_spill] sm:$0xff] %v7823_v54  ;;  %v5059_v60 = vunpack.i.h.bf16 %v5057_v9  ;;  %v5058_v53 = vunpack.i.l.bf16 %v5057_v9  ;;  %5166 = vrot.lane.b32.xlu0 %v5165_v25, %s5605_s22  ;;  %v5175_v9 = vpack.i.bf16 %v3601_v37, %v7566_v35  ;;  %v3617_v25 = vld [vmem:[#allocation3 + $0x111] sm:$0xff] }
 0x346   : > { %5161 = vrot.lane.b32.xlu1 %v5160_v12, %s5603_s20  ;;  %v3117_v12 = vsel %vm1227_vm9, %v3101_v43, %v5023_v0  ;;  %v5185_v0 = vpack.i.bf16 %v3617_v25, %v7461_v47 }
 0x347   : > { %v7836_v58 = vsel %vm3119_vm12, %v3116_v24, %v5059_v60  ;;  %v7839_v54 = vsel %vm3119_vm12, %v3115_v55, %v5058_v53  ;;  %v3118_v53 = vsel %vm1227_vm9, %v3102_v57, %v5024_v62  ;;  %v5180_v62 = vpack.i.bf16 %v7815_v16, %v7755_v51  ;;  %v7875_v57 = vld [vmem:[#allocation3 + $0x112] sm:$0xff] }
 0x348   : > { %v5062_v11 = vpop.permute.xlu1 %5061  ;;  %v5195_v24 = vpack.i.bf16 %v7863_v49, %v7538_v36  ;;  %v5215_v36 = vpack.i.bf16 %v7875_v57, %v7531_v14 }
 0x349   : > { %v5064_v27 = vunpack.i.h.bf16 %v5062_v11  ;;  %v5063_v8 = vunpack.i.l.bf16 %v5062_v11  ;;  %v4818_v60 = vpop.f32.mrb[6].mxu1  ;;  %5176 = vrot.lane.b32.xlu0 %v5175_v9, %s5607_s24  ;;  %v5190_v11 = vpack.i.bf16 %v3601_v37, %v3600_v19 }
 0x34a   : > { %5171 = vrot.lane.b32.xlu1 %v5170_v17, %s5597_s7  ;;  %v2412_v41 = vpop.f32.mrb[7].mxu1  ;;  %v2418_v46 = vadd.f32 %v4818_v60, %v7401_v31 }
 0x34b   : > { %v7853_v35 = vsel %vm3119_vm12, %v3117_v12, %v5063_v8  ;;  %v7856_v28 = vsel %vm3119_vm12, %v3118_v53, %v5064_v27  ;;  %v2413_v7 = vadd.f32 %v7401_v31, %v2412_v41  ;;  %v5230_v53 = vpack.i.bf16 %v7875_v57, %v7863_v49 }
 0x34c   : > { %v2468_v2 = vmax.f32 %v2418_v46, 0.0 }
 0x34d   : > { %v2467_v55 = vmax.f32 %v2413_v7, 0.0  ;;  %5186 = vrot.lane.b32.xlu0 %v5185_v0, %s5606_s23 }
 0x34e   : > { %5181 = vrot.lane.b32.xlu1 %v5180_v62, %s5601_s26  ;;  %2485 = vst.msk [vmem:[#allocation3 + $0x129] sm:$0xff] %vm307_vm2, %v2468_v2 }
 0x34f   : > { %2484 = vst.msk [vmem:[#allocation3 + $0x121] sm:$0xff] %vm307_vm2, %v2467_v55 }
 0x351   : > { %5196 = vrot.lane.b32.xlu0 %v5195_v24, %s5605_s22 }
 0x352   : > { %5191 = vrot.lane.b32.xlu1 %v5190_v11, %s5602_s27 }
 0x355   : > { %v3619_v43 = vld [vmem:[#allocation3 + $0x129] sm:$0xff] }
 0x356   : > { %v3618_v47 = vld [vmem:[#allocation3 + $0x121] sm:$0xff]  ;;  %v5235_v12 = vpack.i.bf16 %v3619_v43, %v7476_v23 }
 0x357   : > { %v3602_v51 = vld [vmem:[#allocation3 + $0x120] sm:$0xff]  ;;  %v5205_v9 = vpack.i.bf16 %v3618_v47, %v7481_v39  ;;  %v3603_v37 = vld [vmem:[#allocation3 + $0x128] sm:$0xff]  ;;  %v5220_v39 = vpack.i.bf16 %v3617_v25, %v7804_v50 }
 0x358   : > { %v5200_v17 = vpack.i.bf16 %v3602_v51, %v7579_v13  ;;  %v5225_v19 = vpack.i.bf16 %v3603_v37, %v7587_v45  ;;  %v5240_v50 = vpack.i.bf16 %v3603_v37, %v3602_v51  ;;  %v7896_v25 = vld [vmem:[#allocation3 + $0x122] sm:$0xff] }
 0x359   : > { %5206 = vrot.lane.b32.xlu0 %v5205_v9, %s5606_s23 }
 0x35a   : > { %5201 = vrot.lane.b32.xlu1 %v5200_v17, %s5607_s24 }
 0x35d   : > { %5216 = vrot.lane.b32.xlu0 %v5215_v36, %s5605_s22  ;;  %v2566_v36 = vld [vmem:[#allocation3 + $0x79] sm:$0xff] }
 0x35e   : > { %5211 = vrot.lane.b32.xlu1 %v5185_v0, %s5603_s20  ;;  %v7905_v0 = vld [vmem:[#allocation3 + $0x12a] sm:$0xff] }
 0x35f   : > { %v5270_v62 = vpack.i.bf16 %v7905_v0, %v7536_v48 }
 0x361   : > { %v4821_v13 = vpop.f32.mrb[8].mxu1  ;;  %5226 = vrot.lane.b32.xlu0 %v5225_v19, %s5607_s24 }
 0x362   : > { %5221 = vrot.lane.b32.xlu1 %v5220_v39, %s5597_s7  ;;  %v2428_v27 = vadd.f32 %v4821_v13, %v7401_v31  ;;  %v2422_v8 = vpop.f32.mrb[9].mxu1 }
 0x363   : > { %v2423_v14 = vadd.f32 %v7401_v31, %v2422_v8  ;;  %v5250_v31 = vpack.i.bf16 %v7896_v25, %v7534_v33  ;;  %v5275_v33 = vpack.i.bf16 %v3619_v43, %v3618_v47  ;;  %v2615_v43 = vld [vmem:[#allocation3 + $0x91] sm:$0xff] }
 0x364   : > { %v2470_v60 = vmax.f32 %v2428_v27, 0.0 }
 0x365   : > { %v2469_v45 = vmax.f32 %v2423_v14, 0.0  ;;  %5236 = vrot.lane.b32.xlu0 %v5235_v12, %s5606_s23 }
 0x366   : > { %5231 = vrot.lane.b32.xlu1 %v5230_v53, %s5601_s26  ;;  %2487 = vst.msk [vmem:[#allocation3 + $0x141] sm:$0xff] %vm307_vm2, %v2470_v60  ;;  %v2567_v60 = vld [vmem:[#allocation3 + $0x81] sm:$0xff] }
 0x367   : > { %2486 = vst.msk [vmem:[#allocation3 + $0x139] sm:$0xff] %vm307_vm2, %v2469_v45 }
 0x369   : > { %5246 = vrot.lane.b32.xlu0 %v5205_v9, %s5603_s20  ;;  %v5285_v9 = vpack.i.bf16 %v7905_v0, %v7896_v25 }
 0x36a   : > { %5241 = vrot.lane.b32.xlu1 %v5240_v50, %s5602_s27 }
 0x36d   : > { %v7940_v53 = vld [vmem:[#allocation3 + $0x142] sm:$0xff] }
 0x36e   : > { %5251 = vrot.lane.b32.xlu1 %v5250_v31, %s5605_s22  ;;  %v3604_v23 = vld [vmem:[#allocation3 + $0x138] sm:$0xff]  ;;  %v3605_v2 = vld [vmem:[#allocation3 + $0x140] sm:$0xff]  ;;  %v5325_v45 = vpack.i.bf16 %v7940_v53, %v7549_v10  ;;  %v4948_v10 = vunpack.i.l.bf16 %v7694_v18 }
 0x36f   : > { %v3620_v41 = vld [vmem:[#allocation3 + $0x139] sm:$0xff]  ;;  %v5255_v46 = vpack.i.bf16 %v3604_v23, %v7583_v59  ;;  %v5280_v55 = vpack.i.bf16 %v3605_v2, %v7585_v6  ;;  %v3621_v59 = vld [vmem:[#allocation3 + $0x141] sm:$0xff]  ;;  %v5295_v37 = vpack.i.bf16 %v3605_v2, %v3604_v23 }
 0x370   : > { %v5260_v7 = vpack.i.bf16 %v3620_v41, %v7492_v44  ;;  %v7916_v44 = vld [vmem:[#allocation4] ss:$0 sm:$0xff]  ;;  %v5290_v47 = vpack.i.bf16 %v3621_v59, %v7488_v4  ;;  %v5300_v19 = vpack.i.bf16 %v3620_v41, %v2566_v36  ;;  %v7927_v39 = vld [vmem:[#allocation3 + $0x13a] sm:$0xff]  ;;  %v5320_v50 = vpack.i.bf16 %v3621_v59, %v2567_v60 }
 0x371   : > { %5256 = vrot.lane.b32.xlu0 %v5255_v46, %s5607_s24  ;;  %v5305_v4 = vpack.i.bf16 %v7927_v39, %v7552_v52  ;;  %v7944_v52 = vpop.permute.xlu0 %5066 }
 0x372   : > { %5261 = vrot.lane.b32.xlu1 %v5260_v7, %s5606_s23  ;;  %v5330_v7 = vpack.i.bf16 %v3621_v59, %v3620_v41  ;;  %v5340_v59 = vpack.i.bf16 %v7940_v53, %v7927_v39 }
 0x375   : > { %5266 = vrot.lane.b32.xlu0 %v5235_v12, %s5603_s20  ;;  %v7938_v12 = vpop.permute.xlu1 %5071 }
 0x376   : > { %5271 = vrot.lane.b32.xlu1 %v5270_v62, %s5605_s22 }
 0x379   : > { %v4824_v24 = vpop.f32.mrb[10].mxu1  ;;  %5276 = vrot.lane.b32.xlu0 %v5275_v33, %s5597_s7 }
 0x37a   : > { %5281 = vrot.lane.b32.xlu1 %v5280_v55, %s5607_s24  ;;  %v2438_v11 = vadd.f32 %v7916_v44, %v4824_v24  ;;  %v2432_v51 = vpop.f32.mrb[11].mxu1 }
 0x37b   : > { %v2433_v48 = vadd.f32 %v7916_v44, %v2432_v51  ;;  %v2494_v51 = vld [vmem:[#allocation3] sm:$0xff] }
 0x37c   : > { %v2472_v17 = vmax.f32 %v2438_v11, 0.0  ;;  %v2616_v11 = vld [vmem:[#allocation3 + $0x99] sm:$0xff] }
 0x37d   : > { %v2471_v6 = vmax.f32 %v2433_v48, 0.0  ;;  %5286 = vrot.lane.b32.xlu0 %v5285_v9, %s5601_s26 }
 0x37e   : > { %5291 = vrot.lane.b32.xlu1 %v5290_v47, %s5606_s23  ;;  %2489 = vst.msk [vmem:[#allocation3 + $0x159] sm:$0xff] %vm307_vm2, %v2472_v17 }
 0x37f   : > { %2488 = vst.msk [vmem:[#allocation3 + $0x151] sm:$0xff] %vm307_vm2, %v2471_v6  ;;  %v4988_v6 = vunpack.i.l.bf16 %v7751_v32 }
 0x381   : > { %5296 = vrot.lane.b32.xlu0 %v5295_v37, %s5602_s27 }
 0x382   : > { %5301 = vrot.lane.b32.xlu1 %v5300_v19, %s5603_s20  ;;  %v3087_v19 = vsel %vm307_vm2, %v2494_v51, %v4948_v10 }
 0x385   : > { %5306 = vrot.lane.b32.xlu0 %v5305_v4, %s5605_s22  ;;  %v7955_v62 = vld [vmem:[#allocation3 + $0x159] sm:$0xff] }
 0x386   : > { %v7934_v13 = vld [vmem:[#allocation3 + $0x151] sm:$0xff]  ;;  %v7966_v41 = vpack.i.bf16 %v7955_v62, %v2616_v11 }
 0x387   : > { %v3606_v27 = vld [vmem:[#allocation3 + $0x150] sm:$0xff]  ;;  %v5315_v8 = vpack.i.bf16 %v7934_v13, %v2615_v43  ;;  %v3607_v31 = vld [vmem:[#allocation3 + $0x158] sm:$0xff] }
 0x388   : > { %v5310_v14 = vpack.i.bf16 %v3606_v27, %v7598_v38  ;;  %v7950_v38 = vpop.permute.xlu1 %5081  ;;  %v5335_v46 = vpack.i.bf16 %v3607_v31, %v7605_v61  ;;  %v5350_v60 = vpack.i.bf16 %v3607_v31, %v3606_v27 }
 0x389   : > { %5316 = vrot.lane.b32.xlu0 %v5315_v8, %s5606_s23  ;;  %v5083_v2 = vunpack.i.l.bf16 %v7950_v38  ;;  %v5084_v51 = vunpack.i.h.bf16 %v7950_v38 }
 0x38a   : > { %5311 = vrot.lane.b32.xlu1 %v5310_v14, %s5607_s24 }
 0x38b   : > { %v4094_v36 = vsel %vm307_vm2, %v7622_v20, %v5083_v2  ;;  %v5028_v20 = vunpack.i.l.bf16 %v7794_v63 }
 0x38d   : > { %5326 = vrot.lane.b32.xlu0 %v5325_v45, %s5605_s22  ;;  %v7985_v45 = vld [vmem:[#allocation3 + $0x152] sm:$0xff] }
 0x38e   : > { %5321 = vrot.lane.b32.xlu1 %v5320_v50, %s5603_s20  ;;  %v3103_v50 = vsel %vm1227_vm9, %v3087_v19, %v4988_v6  ;;  %v2617_v19 = vld [vmem:[#allocation3 + $0xa9] sm:$0xff] }
 0x38f   : > { %v7952_v23 = vpop.permute.xlu0 %5076 }
 0x390   : > { %v7970_v9 = vpop.permute.xlu1 %5091  ;;  %v5079_v2 = vunpack.i.h.bf16 %v7952_v23 }
 0x391   : > { %5336 = vrot.lane.b32.xlu0 %v5335_v46, %s5607_s24  ;;  %v5093_v43 = vunpack.i.l.bf16 %v7970_v9  ;;  %v5068_v46 = vunpack.i.l.bf16 %v7944_v52 }
 0x392   : > { %v4827_v33 = vpop.f32.mrb[12].mxu1  ;;  %5331 = vrot.lane.b32.xlu1 %v5330_v7, %s5597_s7 }
 0x393   : > { %v2448_v55 = vadd.f32 %v7916_v44, %v4827_v33  ;;  %v2442_v24 = vpop.f32.mrb[13].mxu1  ;;  %v7963_v61 = vpop.permute.xlu0 %5086  ;;  %v7993_v33 = vld [vmem:[#allocation3 + $0x92] sm:$0xff] }
 0x394   : > { %v2443_v48 = vadd.f32 %v7916_v44, %v2442_v24  ;;  %v5088_v17 = vunpack.i.l.bf16 %v7963_v61  ;;  %v5360_v10 = vpack.i.bf16 %v7985_v45, %v7993_v33  ;;  %v3120_v24 = vsel %vm3119_vm12, %v3103_v50, %v5028_v20 }
 0x395   : > { %v2474_v47 = vmax.f32 %v2448_v55, 0.0  ;;  %5346 = vrot.lane.b32.xlu0 %v7966_v41, %s5606_s23  ;;  %v4949_v55 = vunpack.i.h.bf16 %v7694_v18  ;;  %v5089_v50 = vunpack.i.h.bf16 %v7963_v61 }
 0x396   : > { %v2473_v37 = vmax.f32 %v2443_v48, 0.0  ;;  %5341 = vrot.lane.b32.xlu1 %v5340_v59, %s5601_s26  ;;  %v4110_v4 = vsel %vm1227_vm9, %v4094_v36, %v5088_v17 }
 0x397   : > { %2491 = vst.msk [vmem:[#allocation3 + $0x171] sm:$0xff] %vm307_vm2, %v2474_v47  ;;  %v5097_v14 = vpop.permute.xlu0 %5096  ;;  %v4126_v7 = vsel %vm3119_vm12, %v4110_v4, %v5093_v43  ;;  %v2601_v47 = vld [vmem:[#allocation3 + $0xa8] sm:$0xff] }
 0x398   : > { %2490 = vst.msk [vmem:[#allocation3 + $0x169] sm:$0xff] %vm307_vm2, %v2473_v37  ;;  %v5099_v27 = vunpack.i.h.bf16 %v5097_v14  ;;  %v5098_v31 = vunpack.i.l.bf16 %v5097_v14  ;;  %v4142_v11 = vsel %vm3136_vm13, %v4126_v7, %v5079_v2  ;;  %v2495_v43 = vld [vmem:[#allocation3 + $0x8] sm:$0xff]  ;;  %v8016_v2 = vld [vmem:[#allocation3 + $0x15a] sm:$0xff] }
 0x399   : > { %5356 = vrot.lane.b32.xlu0 %v5315_v8, %s5603_s20  ;;  %v3137_v8 = vsel %vm3136_vm13, %v3120_v24, %v5068_v46 }
 0x39a   : > { %5351 = vrot.lane.b32.xlu1 %v5350_v60, %s5602_s27  ;;  %v3154_v14 = vsel %vm3153_vm14, %v3137_v8, %v5098_v31  ;;  %v4158_v38 = vsel %vm3153_vm14, %v4142_v11, %v5099_v27  ;;  %v3088_v31 = vsel %vm307_vm2, %v2495_v43, %v4949_v55  ;;  %v2624_v11 = vld [vmem:[#allocation3 + $0x3a] sm:$0xff]  ;;  %v2602_v43 = vld [vmem:[#allocation3 + $0xb0] sm:$0xff] }
 0x39b   : > { %v8027_v8 = vld [vmem:[#allocation3 + $0x9a] sm:$0xff] }
 0x39d   : > { %v5107_v48 = vpop.permute.xlu0 %5106 }
 0x39e   : > { %v5102_v59 = vpop.permute.xlu1 %5101  ;;  %5361 = vrot.lane.b32.xlu1 %v5360_v10, %s5605_s22  ;;  %v5109_v17 = vunpack.i.h.bf16 %v5107_v48  ;;  %v5108_v6 = vunpack.i.l.bf16 %v5107_v48  ;;  %v4989_v10 = vunpack.i.h.bf16 %v7751_v32  ;;  %v4095_v32 = vsel %vm307_vm2, %v7624_v29, %v5084_v51 }
 0x39f   : > { %v5104_v36 = vunpack.i.h.bf16 %v5102_v59  ;;  %v5103_v18 = vunpack.i.l.bf16 %v5102_v59  ;;  %v8003_v37 = vld [vmem:[#allocation3 + $0x168] sm:$0xff]  ;;  %v5380_v59 = vpack.i.bf16 %v8016_v2, %v8027_v8  ;;  %v4111_v55 = vsel %vm1227_vm9, %v4095_v32, %v5089_v50 }
 0x3a0   : > { %v8005_v4 = vld [vmem:[#allocation3 + $0x169] sm:$0xff]  ;;  %v5365_v60 = vpack.i.bf16 %v8003_v37, %v2601_v47  ;;  %v5029_v47 = vunpack.i.h.bf16 %v7794_v63  ;;  %v5069_v29 = vunpack.i.h.bf16 %v7944_v52  ;;  %v5094_v51 = vunpack.i.h.bf16 %v7970_v9  ;;  %v8053_v9 = vld [vmem:[#allocation3 + $0x171] sm:$0xff] }
 0x3a1   : > { %v8011_v20 = vpack.i.bf16 %v8005_v4, %v2617_v19  ;;  %v3171_v46 = vsel %vm3170_vm15, %v3154_v14, %v5103_v18  ;;  %v4174_v7 = vsel %vm3170_vm15, %v4158_v38, %v5104_v36  ;;  %v5117_v24 = vpop.permute.xlu0 %5116  ;;  %v3104_v36 = vsel %vm1227_vm9, %v3088_v31, %v4989_v10 }
 0x3a2   : > { %v8019_v48 = vpop.permute.xlu1 %5111  ;;  %5366 = vrot.lane.b32.xlu0 %v5365_v60, %s5607_s24  ;;  %v3188_v27 = vsel %vm3187_vm0, %v3171_v46, %v5108_v6  ;;  %v4190_v61 = vsel %vm3187_vm0, %v4174_v7, %v5109_v17  ;;  %v8039_v6 = vld [vmem:[#allocation3 + $0x170] sm:$0xff]  ;;  %v5118_v63 = vunpack.i.l.bf16 %v5117_v24  ;;  %v5119_v14 = vunpack.i.h.bf16 %v5117_v24 }
 0x3a3   : > { %5371 = vrot.lane.b32.xlu1 %v8011_v20, %s5606_s23  ;;  %3323 = vmatmul.mubr.f32.vlgmr.msra.gmra.mrb[16].mxu0 %v3188_v27  ;;  %v5113_v17 = vunpack.i.l.bf16 %v8019_v48  ;;  %v4127_v38 = vsel %vm3119_vm12, %v4111_v55, %v5094_v51  ;;  %v5390_v52 = vpack.i.bf16 %v8039_v6, %v2602_v43  ;;  %v3121_v50 = vsel %vm3119_vm12, %v3104_v36, %v5029_v47  ;;  %v2618_v24 = vld [vmem:[#allocation3 + $0xb1] sm:$0xff] }
 0x3a4   : > { %4319 = vmatmul.mubr.f32.vlgmr.msra.gmra.mrb[16].mxu1 %v4190_v61  ;;  %4622 = vmatprep.mubr.msk.f32.mxu0 %vm307_vm2, %v2624_v11  ;;  %v4953_v7 = vunpack.i.l.bf16 %v7704_v1  ;;  %v3138_v10 = vsel %vm3136_vm13, %v3121_v50, %v5069_v29  ;;  %v4993_v43 = vunpack.i.l.bf16 %v7768_v34 }
 0x3a5   : > { %4654 = vmatprep.mubr.msk.f32.mxu1 %vm307_vm2, %v7815_v16  ;;  %v5127_v18 = vpop.permute.xlu0 %5126  ;;  %v5385_v16 = vpack.i.bf16 %v7955_v62, %v7934_v13  ;;  %v4143_v46 = vsel %vm3136_vm13, %v4127_v38, %v5113_v17  ;;  %v5395_v62 = vpack.i.bf16 %v8016_v2, %v7985_v45  ;;  %v3155_v32 = vsel %vm3153_vm14, %v3138_v10, %v5118_v63 }
 0x3a6   : > { %v8044_v19 = vpop.permute.xlu1 %5121  ;;  %5376 = vrot.lane.b32.xlu0 %v7966_v41, %s5603_s20  ;;  %v5128_v60 = vunpack.i.l.bf16 %v5127_v18  ;;  %v5129_v41 = vunpack.i.h.bf16 %v5127_v18  ;;  %v4159_v29 = vsel %vm3153_vm14, %v4143_v46, %v5119_v14  ;;  %v5033_v14 = vunpack.i.l.bf16 %v7802_v5 }
 0x3a7   : > { %5381 = vrot.lane.b32.xlu1 %v5380_v59, %s5605_s22  ;;  %v8067_v59 = vpack.i.bf16 %v8053_v9, %v2618_v24  ;;  %v5123_v47 = vunpack.i.l.bf16 %v8044_v19  ;;  %v5508_v24 = vld [vmem:[#allocation3 + $0x18] sm:$0xff] }
 0x3a8   : > { %v3172_v36 = vsel %vm3170_vm15, %v3155_v32, %v5128_v60  ;;  %v4175_v63 = vsel %vm3170_vm15, %v4159_v29, %v5129_v41  ;;  %v5073_v41 = vunpack.i.l.bf16 %v7938_v12 }
 0x3a9   : > { %v5137_v27 = vpop.permute.xlu0 %5136  ;;  %v4096_v10 = vsel %vm307_vm2, %v7708_v22, %v5123_v47  ;;  %v8099_v22 = vld [vmem:[#allocation3 + $0x16a] sm:$0xff] }
 0x3aa   : > { %v8059_v13 = vpop.permute.xlu1 %5131  ;;  %5386 = vrot.lane.b32.xlu0 %v5385_v16, %s5597_s7  ;;  %v5139_v61 = vunpack.i.h.bf16 %v5137_v27  ;;  %v5138_v31 = vunpack.i.l.bf16 %v5137_v27  ;;  %v4830_v11 = vpop.f32.mrb[14].mxu1 }
 0x3ab   : > { %5391 = vrot.lane.b32.xlu1 %v5390_v52, %s5607_s24  ;;  %v2458_v55 = vadd.f32 %v7916_v44, %v4830_v11  ;;  %v2452_v17 = vpop.f32.mrb[15].mxu1  ;;  %v5133_v51 = vunpack.i.l.bf16 %v8059_v13 }
 0x3ac   : > { %v2453_v18 = vadd.f32 %v7916_v44, %v2452_v17  ;;  %v3189_v16 = vsel %vm3187_vm0, %v3172_v36, %v5138_v31  ;;  %v4191_v50 = vsel %vm3187_vm0, %v4175_v63, %v5139_v61  ;;  %v2625_v44 = vld [vmem:[#allocation3 + $0x4a] sm:$0xff]  ;;  %v3089_v61 = vsel %vm307_vm2, %v5508_v24, %v4953_v7 }
 0x3ad   : > { %v2476_v38 = vmax.f32 %v2458_v55, 0.0  ;;  %3328 = vmatmul.mubr.f32.gmra.mrb[18].mxu0 %v3189_v16  ;;  %v5147_v46 = vpop.permute.xlu0 %5146  ;;  %4324 = vmatmul.mubr.f32.gmra.mrb[18].mxu1 %v4191_v50  ;;  %v5114_v31 = vunpack.i.h.bf16 %v8019_v48  ;;  %v4112_v11 = vsel %vm1227_vm9, %v4096_v10, %v5133_v51  ;;  %v3105_v32 = vsel %vm1227_vm9, %v3089_v61, %v4993_v43 }
 0x3ae   : > { %v8078_v52 = vpop.permute.xlu1 %5141  ;;  %5396 = vrot.lane.b32.xlu0 %v5395_v62, %s5601_s26  ;;  %v2475_v60 = vmax.f32 %v2453_v18, 0.0  ;;  %4623 = vmatprep.mubr.msk.f32.mxu0 %vm307_vm2, %v2625_v44  ;;  %v5405_v62 = vpack.i.bf16 %v8039_v6, %v8003_v37  ;;  %v5148_v47 = vunpack.i.l.bf16 %v5147_v46  ;;  %v8107_v37 = vld [vmem:[#allocation3 + $0xaa] sm:$0xff]  ;;  %v5149_v7 = vunpack.i.h.bf16 %v5147_v46 }
 0x3af   : > { %5401 = vrot.lane.b32.xlu1 %v8067_v59, %s5606_s23  ;;  %2493 = vst.msk [vmem:[#allocation3 + $0x189] sm:$0xff] %vm307_vm2, %v2476_v38  ;;  %v5143_v27 = vunpack.i.l.bf16 %v8078_v52  ;;  %4655 = vmatprep.mubr.msk.f32.mxu1 %vm307_vm2, %v7863_v49  ;;  %v3122_v49 = vsel %vm3119_vm12, %v3105_v32, %v5033_v14  ;;  %v5415_v29 = vpack.i.bf16 %v8099_v22, %v8107_v37  ;;  %v5124_v38 = vunpack.i.h.bf16 %v8044_v19 }
 0x3b0   : > { %2492 = vst.msk [vmem:[#allocation3 + $0x181] sm:$0xff] %vm307_vm2, %v2475_v60  ;;  %v3139_v6 = vsel %vm3136_vm13, %v3122_v49, %v5073_v41  ;;  %v4954_v60 = vunpack.i.h.bf16 %v7704_v1  ;;  %v5134_v46 = vunpack.i.h.bf16 %v8059_v13  ;;  %v4994_v19 = vunpack.i.h.bf16 %v7768_v34  ;;  %v2603_v1 = vld [vmem:[#allocation3 + $0xc0] sm:$0xff] }
 0x3b1   : > { %v4128_v55 = vsel %vm3119_vm12, %v4112_v11, %v5143_v27  ;;  %v5144_v61 = vunpack.i.h.bf16 %v8078_v52  ;;  %v2626_v11 = vld [vmem:[#allocation3 + $0x52] sm:$0xff]  ;;  %v5034_v34 = vunpack.i.h.bf16 %v7802_v5  ;;  %v4097_v52 = vsel %vm307_vm2, %v7710_v15, %v5124_v38  ;;  %v5509_v49 = vld [vmem:[#allocation3 + $0x20] sm:$0xff] }
 0x3b2   : > { %5406 = vrot.lane.b32.xlu0 %v5405_v62, %s5602_s27  ;;  %v4144_v48 = vsel %vm3136_vm13, %v4128_v55, %v5114_v31  ;;  %v2619_v31 = vld [vmem:[#allocation3 + $0xc1] sm:$0xff]  ;;  %v8139_v55 = vld [vmem:[#allocation3 + $0x172] sm:$0xff] }
 0x3b3   : > { %5411 = vrot.lane.b32.xlu1 %v8011_v20, %s5603_s20  ;;  %v5157_v17 = vpop.permute.xlu0 %5156  ;;  %v3156_v20 = vsel %vm3153_vm14, %v3139_v6, %v5148_v47  ;;  %v4160_v43 = vsel %vm3153_vm14, %v4144_v48, %v5149_v7  ;;  %v3090_v48 = vsel %vm307_vm2, %v5509_v49, %v4954_v60  ;;  %v5074_v6 = vunpack.i.h.bf16 %v7938_v12  ;;  %v2627_v49 = vld [vmem:[#allocation3 + $0x62] sm:$0xff] }
 0x3b4   : > { %v5152_v36 = vpop.permute.xlu1 %5151  ;;  %v5159_v51 = vunpack.i.h.bf16 %v5157_v17  ;;  %v5158_v18 = vunpack.i.l.bf16 %v5157_v17  ;;  %v4113_v7 = vsel %vm1227_vm9, %v4097_v52, %v5134_v46  ;;  %v3106_v5 = vsel %vm1227_vm9, %v3090_v48, %v4994_v19  ;;  %v2620_v48 = vld [vmem:[#allocation3 + $0xc9] sm:$0xff] }
 0x3b5   : > { %v5154_v16 = vunpack.i.h.bf16 %v5152_v36  ;;  %v5153_v63 = vunpack.i.l.bf16 %v5152_v36  ;;  %v4129_v15 = vsel %vm3119_vm12, %v4113_v7, %v5144_v61  ;;  %v5440_v60 = vpack.i.bf16 %v8053_v9, %v8005_v4 }
 0x3b6   : > { %5416 = vrot.lane.b32.xlu0 %v5415_v29, %s5605_s22  ;;  %v3627_v9 = vld [vmem:[#allocation3 + $0x189] sm:$0xff] }
 0x3b7   : > { %v3173_v50 = vsel %vm3170_vm15, %v3156_v20, %v5153_v63  ;;  %v4176_v14 = vsel %vm3170_vm15, %v4160_v43, %v5154_v16  ;;  %v5167_v44 = vpop.permute.xlu0 %5166  ;;  %v3626_v62 = vld [vmem:[#allocation3 + $0x181] sm:$0xff]  ;;  %v3123_v20 = vsel %vm3119_vm12, %v3106_v5, %v5034_v34  ;;  %v3505_v34 = vld [vmem:[#allocation3 + $0xf0] sm:$0xff]  ;;  %v5450_v5 = vpack.i.bf16 %v8139_v55, %v8099_v22 }
 0x3b8   : > { %v8121_v41 = vpop.permute.xlu1 %5161  ;;  %v3190_v10 = vsel %vm3187_vm0, %v3173_v50, %v5158_v18  ;;  %v4192_v27 = vsel %vm3187_vm0, %v4176_v14, %v5159_v51  ;;  %v8125_v24 = vld [vmem:[#allocation3 + $0x180] sm:$0xff]  ;;  %v8130_v32 = vpack.i.bf16 %v3626_v62, %v2619_v31  ;;  %v5169_v36 = vunpack.i.h.bf16 %v5167_v44  ;;  %v8151_v51 = vld [vmem:[#allocation3 + $0xb2] sm:$0xff]  ;;  %v3611_v43 = vld [vmem:[#allocation3 + $0x188] sm:$0xff] }
 0x3b9   : > { %3333 = vmatmul.mubr.f32.gmra.mrb[20].mxu0 %v3190_v10  ;;  %4329 = vmatmul.mubr.f32.gmra.mrb[20].mxu1 %v4192_v27  ;;  %v5163_v13 = vunpack.i.l.bf16 %v8121_v41  ;;  %v5420_v47 = vpack.i.bf16 %v8125_v24, %v2603_v1  ;;  %v5168_v29 = vunpack.i.l.bf16 %v5167_v44  ;;  %v5435_v63 = vpack.i.bf16 %v8139_v55, %v8151_v51  ;;  %v2604_v10 = vld [vmem:[#allocation3 + $0xc8] sm:$0xff] }
 0x3ba   : > { %4624 = vmatprep.mubr.msk.f32.mxu0 %vm307_vm2, %v2626_v11  ;;  %4656 = vmatprep.mubr.msk.f32.mxu1 %vm307_vm2, %v7875_v57  ;;  %v3140_v38 = vsel %vm3136_vm13, %v3123_v20, %v5074_v6  ;;  %v5445_v61 = vpack.i.bf16 %v3611_v43, %v2604_v10  ;;  %v4998_v6 = vunpack.i.l.bf16 %v7766_v56 }
 0x3bb   : > { %5426 = vrot.lane.b32.xlu0 %v8130_v32, %s5606_s23  ;;  %5421 = vrot.lane.b32.xlu1 %v5420_v47, %s5607_s24  ;;  %v5177_v57 = vpop.permute.xlu0 %5176  ;;  %v4145_v12 = vsel %vm3136_vm13, %v4129_v15, %v5163_v13  ;;  %v3157_v27 = vsel %vm3153_vm14, %v3140_v38, %v5168_v29  ;;  %v4958_v47 = vunpack.i.l.bf16 %v7712_v21  ;;  %v5038_v15 = vunpack.i.l.bf16 %v7800_v40 }
 0x3bc   : > { %v8147_v17 = vpop.permute.xlu1 %5171  ;;  %v5179_v18 = vunpack.i.h.bf16 %v5177_v57  ;;  %v5178_v16 = vunpack.i.l.bf16 %v5177_v57  ;;  %v4161_v62 = vsel %vm3153_vm14, %v4145_v12, %v5169_v36  ;;  %v8184_v57 = vpack.i.bf16 %v3627_v9, %v2620_v48  ;;  %v3628_v48 = vld [vmem:[#allocation3 + $0x199] sm:$0xff] }
 0x3bd   : > { %v5173_v19 = vunpack.i.l.bf16 %v8147_v17  ;;  %v5078_v12 = vunpack.i.l.bf16 %v7952_v23  ;;  %v2605_v23 = vld [vmem:[#allocation3 + $0xd8] sm:$0xff] }
 0x3be   : > { %v3174_v31 = vsel %vm3170_vm15, %v3157_v27, %v5178_v16  ;;  %v4959_v27 = vunpack.i.h.bf16 %v7712_v21 }
 0x3bf   : > { %5436 = vrot.lane.b32.xlu0 %v5435_v63, %s5605_s22  ;;  %5431 = vrot.lane.b32.xlu1 %v8067_v59, %s5603_s20  ;;  %v5187_v50 = vpop.permute.xlu0 %5186  ;;  %v4177_v59 = vsel %vm3170_vm15, %v4161_v62, %v5179_v18  ;;  %v4098_v7 = vsel %vm307_vm2, %v3505_v34, %v5173_v19  ;;  %v5164_v63 = vunpack.i.h.bf16 %v8121_v41 }
 0x3c0   : > { %v8161_v14 = vpop.permute.xlu1 %5181  ;;  %v5189_v46 = vunpack.i.h.bf16 %v5187_v50  ;;  %v5188_v44 = vunpack.i.l.bf16 %v5187_v50  ;;  %v5460_v50 = vpack.i.bf16 %v3611_v43, %v8125_v24 }
 0x3c1   : > { %v5183_v1 = vunpack.i.l.bf16 %v8161_v14 }
 0x3c2   : > { %v3191_v11 = vsel %vm3187_vm0, %v3174_v31, %v5188_v44  ;;  %v4193_v4 = vsel %vm3187_vm0, %v4177_v59, %v5189_v46  ;;  %v3612_v46 = vld [vmem:[#allocation3 + $0x198] sm:$0xff]  ;;  %v8200_v44 = vld [vmem:[#allocation3 + $0x182] sm:$0xff] }
 0x3c3   : > { %5446 = vrot.lane.b32.xlu0 %v5445_v61, %s5607_s24  ;;  %5441 = vrot.lane.b32.xlu1 %v5440_v60, %s5597_s7  ;;  %v4114_v36 = vsel %vm1227_vm9, %v4098_v7, %v5183_v1  ;;  %v5197_v29 = vpop.permute.xlu0 %5196  ;;  %v8208_v1 = vld [vmem:[#allocation3 + $0xc2] sm:$0xff]  ;;  %v5184_v7 = vunpack.i.h.bf16 %v8161_v14  ;;  %s4688_s7 = sshll.u32 %s8856_s19, 7 }
 0x3c4   : > { %v8175_v13 = vpop.permute.xlu1 %5191  ;;  %3338 = vmatmul.mubr.f32.gmra.mrb[22].mxu0 %v3191_v11  ;;  %4334 = vmatmul.mubr.f32.gmra.mrb[22].mxu1 %v4193_v4  ;;  %v5198_v38 = vunpack.i.l.bf16 %v5197_v29  ;;  %v5199_v19 = vunpack.i.h.bf16 %v5197_v29  ;;  %v5475_v11 = vpack.i.bf16 %v3612_v46, %v2605_v23  ;;  %v5470_v21 = vpack.i.bf16 %v8200_v44, %v8208_v1  ;;  %v2628_v29 = vld [vmem:[#allocation3 + $0x6a] sm:$0xff] }
 0x3c5   : > { %v5193_v52 = vunpack.i.l.bf16 %v8175_v13  ;;  %4625 = vmatprep.mubr.msk.f32.mxu0 %vm307_vm2, %v2627_v49  ;;  %4657 = vmatprep.mubr.msk.f32.mxu1 %vm307_vm2, %v7896_v25  ;;  %v5510_v25 = vld [vmem:[#allocation3 + $0x30] sm:$0xff]  ;;  %v2621_v49 = vld [vmem:[#allocation3 + $0xd9] sm:$0xff] }
 0x3c6   : > { %v3091_v16 = vsel %vm307_vm2, %v5510_v25, %v4958_v47  ;;  %v5174_v47 = vunpack.i.h.bf16 %v8147_v17  ;;  %v3506_v25 = vld [vmem:[#allocation3 + $0xf8] sm:$0xff] }
 0x3c7   : > { %v4130_v18 = vsel %vm3119_vm12, %v4114_v36, %v5193_v52  ;;  %5456 = vrot.lane.b32.xlu0 %v8184_v57, %s5606_s23  ;;  %5451 = vrot.lane.b32.xlu1 %v5450_v5, %s5601_s26  ;;  %v3107_v20 = vsel %vm1227_vm9, %v3091_v16, %v4998_v6  ;;  %v5039_v6 = vunpack.i.h.bf16 %v7800_v40  ;;  %v5194_v36 = vunpack.i.h.bf16 %v8175_v13  ;;  %v5511_v40 = vld [vmem:[#allocation3 + $0x38] sm:$0xff] }
 0x3c8   : > { %v3124_v60 = vsel %vm3119_vm12, %v3107_v20, %v5038_v15  ;;  %v4146_v10 = vsel %vm3136_vm13, %v4130_v18, %v5164_v63  ;;  %v3613_v18 = vld [vmem:[#allocation3 + $0x1a0] sm:$0xff]  ;;  %v3092_v14 = vsel %vm307_vm2, %v5511_v40, %v4959_v27  ;;  %v5480_v20 = vpack.i.bf16 %v3628_v48, %v2621_v49  ;;  %v3507_v40 = vld [vmem:[#allocation3 + $0x108] sm:$0xff] }
 0x3c9   : > { %v3141_v62 = vsel %vm3136_vm13, %v3124_v60, %v5078_v12  ;;  %v4162_v9 = vsel %vm3153_vm14, %v4146_v10, %v5199_v19  ;;  %v2606_v12 = vld [vmem:[#allocation3 + $0xe0] sm:$0xff] }
 0x3ca   : > { %v3158_v4 = vsel %vm3153_vm14, %v3141_v62, %v5198_v38  ;;  %v8229_v38 = vld [vmem:[#allocation3 + $0x18a] sm:$0xff]  ;;  %v5495_v27 = vpack.i.bf16 %v3613_v18, %v2606_v12  ;;  %v5003_v18 = vunpack.i.l.bf16 %v7776_v26 }
 0x3cb   : > { %5466 = vrot.lane.b32.xlu0 %v8130_v32, %s5603_s20  ;;  %5461 = vrot.lane.b32.xlu1 %v5460_v50, %s5602_s27  ;;  %v5207_v41 = vpop.permute.xlu0 %5206  ;;  %v4999_v32 = vunpack.i.h.bf16 %v7766_v56  ;;  %v4099_v50 = vsel %vm307_vm2, %v3506_v25, %v5174_v47 }
 0x3cc   : > { %v5202_v24 = vpop.permute.xlu1 %5201  ;;  %v5209_v43 = vunpack.i.h.bf16 %v5207_v41  ;;  %v5208_v61 = vunpack.i.l.bf16 %v5207_v41  ;;  %v4115_v23 = vsel %vm1227_vm9, %v4099_v50, %v5184_v7  ;;  %v5512_v50 = vld [vmem:[#allocation3 + $0x48] sm:$0xff] }
 0x3cd   : > { %v5204_v31 = vunpack.i.h.bf16 %v5202_v24  ;;  %v5203_v59 = vunpack.i.l.bf16 %v5202_v24  ;;  %v3108_v13 = vsel %vm1227_vm9, %v3092_v14, %v4999_v32  ;;  %v4131_v62 = vsel %vm3119_vm12, %v4115_v23, %v5194_v36 }
 0x3ce   : > { %v3125_v60 = vsel %vm3119_vm12, %v3108_v13, %v5039_v6  ;;  %v4963_v36 = vunpack.i.l.bf16 %v7730_v3  ;;  %v5043_v14 = vunpack.i.l.bf16 %v7810_v42 }
 0x3cf   : > { %v3175_v34 = vsel %vm3170_vm15, %v3158_v4, %v5203_v59  ;;  %v4178_v52 = vsel %vm3170_vm15, %v4162_v9, %v5204_v31  ;;  %5476 = vrot.lane.b32.xlu0 %v5475_v11, %s5607_s24  ;;  %5471 = vrot.lane.b32.xlu1 %v5470_v21, %s5605_s22  ;;  %v5217_v5 = vpop.permute.xlu0 %5216  ;;  %v2622_v59 = vld [vmem:[#allocation3 + $0xe1] sm:$0xff] }
 0x3d0   : > { %v5212_v15 = vpop.permute.xlu1 %5211  ;;  %v3192_v56 = vsel %vm3187_vm0, %v3175_v34, %v5208_v61  ;;  %v4194_v17 = vsel %vm3187_vm0, %v4178_v52, %v5209_v43  ;;  %v5219_v19 = vunpack.i.h.bf16 %v5217_v5  ;;  %v5218_v41 = vunpack.i.l.bf16 %v5217_v5  ;;  %v3629_v11 = vld [vmem:[#allocation3 + $0x1a1] sm:$0xff] }
 0x3d1   : > { %3343 = vmatmul.mubr.f32.gmra.mrb[24].mxu0 %v3192_v56  ;;  %4339 = vmatmul.mubr.f32.gmra.mrb[24].mxu1 %v4194_v17  ;;  %v5214_v16 = vunpack.i.h.bf16 %v5212_v15  ;;  %v5213_v63 = vunpack.i.l.bf16 %v5212_v15  ;;  %v5500_v52 = vpack.i.bf16 %v3629_v11, %v2622_v59  ;;  %v2629_v17 = vld [vmem:[#allocation3 + $0x7a] sm:$0xff] }
 0x3d2   : > { %4626 = vmatprep.mubr.msk.f32.mxu0 %vm307_vm2, %v2628_v29  ;;  %4658 = vmatprep.mubr.msk.f32.mxu1 %vm307_vm2, %v7905_v0  ;;  %v8240_v0 = vld [vmem:[#allocation3 + $0xca] sm:$0xff] }
 0x3d3   : > { %5486 = vrot.lane.b32.xlu0 %v8184_v57, %s5603_s20  ;;  %5481 = vrot.lane.b32.xlu1 %v5480_v20, %s5606_s23  ;;  %v5227_v46 = vpop.permute.xlu0 %5226  ;;  %v5490_v24 = vpack.i.bf16 %v8229_v38, %v8240_v0  ;;  %v3142_v43 = vsel %vm3136_vm13, %v3125_v60, %v5213_v63  ;;  %v4147_v61 = vsel %vm3136_vm13, %v4131_v62, %v5214_v16  ;;  %s8478_s20 = scalar_lea.vmem %s8582_s5, %s4688_s7 }
 0x3d4   : > { %v8238_v10 = vpop.permute.xlu1 %5221  ;;  %v5229_v57 = vunpack.i.h.bf16 %v5227_v46  ;;  %v5228_v31 = vunpack.i.l.bf16 %v5227_v46  ;;  %v3159_v47 = vsel %vm3153_vm14, %v3142_v43, %v5218_v41  ;;  %v4163_v34 = vsel %vm3153_vm14, %v4147_v61, %v5219_v19 }
 0x3d5   : > { %v5223_v6 = vunpack.i.l.bf16 %v8238_v10  ;;  %v3093_v60 = vsel %vm307_vm2, %v5512_v50, %v4963_v36 }
 0x3d6   : > { %v3176_v49 = vsel %vm3170_vm15, %v3159_v47, %v5228_v31  ;;  %v4179_v48 = vsel %vm3170_vm15, %v4163_v34, %v5229_v57  ;;  %v3109_v46 = vsel %vm1227_vm9, %v3093_v60, %v5003_v18 }
 0x3d7   : > { %5496 = vrot.lane.b32.xlu0 %v5495_v27, %s5607_s24  ;;  %5491 = vrot.lane.b32.xlu1 %v5490_v24, %s5605_s22  ;;  %v5237_v21 = vpop.permute.xlu0 %5236  ;;  %v4100_v25 = vsel %vm307_vm2, %v3507_v40, %v5223_v6 }
 0x3d8   : > { %v8249_v4 = vpop.permute.xlu1 %5231  ;;  %v5239_v9 = vunpack.i.h.bf16 %v5237_v21  ;;  %v5238_v32 = vunpack.i.l.bf16 %v5237_v21 }
 0x3d9   : > { %v5233_v15 = vunpack.i.l.bf16 %v8249_v4 }
 0x3da   : > { %v3193_v7 = vsel %vm3187_vm0, %v3176_v49, %v5238_v32  ;;  %v4195_v5 = vsel %vm3187_vm0, %v4179_v48, %v5239_v9  ;;  %v4964_v9 = vunpack.i.h.bf16 %v7730_v3  ;;  %v5224_v32 = vunpack.i.h.bf16 %v8238_v10  ;;  %v2630_v10 = vld [vmem:[#allocation3 + $0x82] sm:$0xff] }
 0x3db   : > { %5501 = vrot.lane.b32.xlu1 %v5500_v52, %s5606_s23  ;;  %3348 = vmatmul.mubr.f32.gmra.mrb[26].mxu0 %v3193_v7  ;;  %v5247_v29 = vpop.permute.xlu0 %5246  ;;  %v4116_v16 = vsel %vm1227_vm9, %v4100_v25, %v5233_v15  ;;  %v5004_v52 = vunpack.i.h.bf16 %v7776_v26  ;;  %v5234_v49 = vunpack.i.h.bf16 %v8249_v4  ;;  %v5044_v15 = vunpack.i.h.bf16 %v7810_v42  ;;  %v5513_v26 = vld [vmem:[#allocation3 + $0x50] sm:$0xff] }
 0x3dc   : > { %v8260_v56 = vpop.permute.xlu1 %5241  ;;  %4344 = vmatmul.mubr.f32.gmra.mrb[26].mxu1 %v4195_v5  ;;  %4627 = vmatprep.mubr.msk.f32.mxu0 %vm307_vm2, %v2629_v17  ;;  %v5249_v63 = vunpack.i.h.bf16 %v5247_v29  ;;  %v5248_v20 = vunpack.i.l.bf16 %v5247_v29  ;;  %v3508_v17 = vld [vmem:[#allocation3 + $0x110] sm:$0xff]  ;;  %v3094_v4 = vsel %vm307_vm2, %v5513_v26, %v4964_v9 }
 0x3dd   : > { %v5243_v12 = vunpack.i.l.bf16 %v8260_v56  ;;  %4659 = vmatprep.mubr.msk.f32.mxu1 %vm307_vm2, %v7927_v39  ;;  %v3126_v39 = vsel %vm3119_vm12, %v3109_v46, %v5043_v14  ;;  %v5244_v3 = vunpack.i.h.bf16 %v8260_v56  ;;  %v3110_v42 = vsel %vm1227_vm9, %v3094_v4, %v5004_v52  ;;  %v8850_v9 = vld [vmem:[#allocation14_spill] sm:$0xff] }
 0x3de   : > { %v3143_v19 = vsel %vm3136_vm13, %v3126_v39, %v5248_v20  ;;  %v3127_v14 = vsel %vm3119_vm12, %v3110_v42, %v5044_v15  ;;  %v5514_v15 = vld [vmem:[#allocation3 + $0x60] sm:$0xff] }
 0x3df   : > { %v4132_v23 = vsel %vm3119_vm12, %v4116_v16, %v5243_v12  ;;  %v4101_v12 = vsel %vm307_vm2, %v3508_v17, %v5224_v32  ;;  %v5008_v32 = vunpack.i.l.bf16 %v8850_v9 }
 0x3e0   : > { %v5252_v13 = vpop.permute.xlu1 %5251  ;;  %v4148_v43 = vsel %vm3136_vm13, %v4132_v23, %v5249_v63  ;;  %v4117_v56 = vsel %vm1227_vm9, %v4101_v12, %v5234_v49 }
 0x3e1   : > { %v5254_v27 = vunpack.i.h.bf16 %v5252_v13  ;;  %v5253_v62 = vunpack.i.l.bf16 %v5252_v13  ;;  %v4133_v25 = vsel %vm3119_vm12, %v4117_v56, %v5244_v3 }
 0x3e3   : > { %v5257_v41 = vpop.permute.xlu0 %5256  ;;  %v3160_v11 = vsel %vm3153_vm14, %v3143_v19, %v5253_v62  ;;  %v4164_v21 = vsel %vm3153_vm14, %v4148_v43, %v5254_v27 }
 0x3e4   : > { %v5262_v24 = vpop.permute.xlu1 %5261  ;;  %v5259_v61 = vunpack.i.h.bf16 %v5257_v41  ;;  %v5258_v57 = vunpack.i.l.bf16 %v5257_v41 }
 0x3e5   : > { %v5264_v31 = vunpack.i.h.bf16 %v5262_v24  ;;  %v5263_v59 = vunpack.i.l.bf16 %v5262_v24 }
 0x3e6   : > { %v3177_v47 = vsel %vm3170_vm15, %v3160_v11, %v5258_v57  ;;  %v4180_v34 = vsel %vm3170_vm15, %v4164_v21, %v5259_v61 }
 0x3e7   : > { %v5267_v48 = vpop.permute.xlu0 %5266  ;;  %v3194_v7 = vsel %vm3187_vm0, %v3177_v47, %v5263_v59  ;;  %v4196_v5 = vsel %vm3187_vm0, %v4180_v34, %v5264_v31  ;;  %v4968_v59 = vunpack.i.l.bf16 %v7733_v30  ;;  %v3509_v47 = vld [vmem:[#allocation3 + $0x120] sm:$0xff] }
 0x3e8   : > { %v5272_v6 = vpop.permute.xlu1 %5271  ;;  %3353 = vmatmul.mubr.f32.gmra.mrb[28].mxu0 %v3194_v7  ;;  %4349 = vmatmul.mubr.f32.gmra.mrb[28].mxu1 %v4196_v5  ;;  %v5269_v36 = vunpack.i.h.bf16 %v5267_v48  ;;  %v5268_v29 = vunpack.i.l.bf16 %v5267_v48  ;;  %v8851_v34 = vld [vmem:[#allocation15_spill] sm:$0xff] }
 0x3e9   : > { %4628 = vmatprep.mubr.msk.f32.mxu0 %vm307_vm2, %v2630_v10  ;;  %4660 = vmatprep.mubr.msk.f32.mxu1 %vm307_vm2, %v7940_v53  ;;  %v5274_v16 = vunpack.i.h.bf16 %v5272_v6  ;;  %v5273_v63 = vunpack.i.l.bf16 %v5272_v6  ;;  %v5048_v52 = vunpack.i.l.bf16 %v8851_v34  ;;  %v3095_v3 = vsel %vm307_vm2, %v5514_v15, %v4968_v59 }
 0x3ea   : > { %v3144_v53 = vsel %vm3136_vm13, %v3127_v14, %v5268_v29  ;;  %v4149_v20 = vsel %vm3136_vm13, %v4133_v25, %v5269_v36  ;;  %v3111_v10 = vsel %vm1227_vm9, %v3095_v3, %v5008_v32 }
 0x3eb   : > { %v8296_v18 = vpop.permute.xlu0 %5276  ;;  %v3161_v62 = vsel %vm3153_vm14, %v3144_v53, %v5273_v63  ;;  %v4165_v39 = vsel %vm3153_vm14, %v4149_v20, %v5274_v16  ;;  %v3128_v36 = vsel %vm3119_vm12, %v3111_v10, %v5048_v52  ;;  %v4969_v63 = vunpack.i.h.bf16 %v7733_v30  ;;  %v3510_v30 = vld [vmem:[#allocation3 + $0x128] sm:$0xff] }
 0x3ec   : > { %v5282_v40 = vpop.permute.xlu1 %5281  ;;  %v5278_v24 = vunpack.i.l.bf16 %v8296_v18  ;;  %v5279_v53 = vunpack.i.h.bf16 %v8296_v18 }
 0x3ed   : > { %v5284_v13 = vunpack.i.h.bf16 %v5282_v40  ;;  %v5283_v50 = vunpack.i.l.bf16 %v5282_v40 }
 0x3ee   : > { %v4102_v49 = vsel %vm307_vm2, %v3509_v47, %v5278_v24 }
 0x3ef   : > { %v8302_v60 = vpop.permute.xlu0 %5286  ;;  %v3178_v19 = vsel %vm3170_vm15, %v3161_v62, %v5283_v50  ;;  %v4181_v41 = vsel %vm3170_vm15, %v4165_v39, %v5284_v13  ;;  %v5009_v50 = vunpack.i.h.bf16 %v8850_v9 }
 0x3f0   : > { %v5292_v23 = vpop.permute.xlu1 %5291  ;;  %v5288_v57 = vunpack.i.l.bf16 %v8302_v60 }
 0x3f1   : > { %v5294_v46 = vunpack.i.h.bf16 %v5292_v23  ;;  %v5293_v27 = vunpack.i.l.bf16 %v5292_v23  ;;  %v5289_v23 = vunpack.i.h.bf16 %v8302_v60  ;;  %v5515_v60 = vld [vmem:[#allocation3 + $0x68] sm:$0xff] }
 0x3f2   : > { %v4118_v48 = vsel %vm1227_vm9, %v4102_v49, %v5288_v57 }
 0x3f3   : > { %v3195_v43 = vsel %vm3187_vm0, %v3178_v19, %v5293_v27  ;;  %v4197_v61 = vsel %vm3187_vm0, %v4181_v41, %v5294_v46  ;;  %v5297_v31 = vpop.permute.xlu0 %5296  ;;  %v5049_v19 = vunpack.i.h.bf16 %v8851_v34 }
 0x3f4   : > { %3358 = vmatmul.mubr.f32.gmra.mrb[30].mxu0 %v3195_v43  ;;  %4354 = vmatmul.mubr.f32.gmra.mrb[30].mxu1 %v4197_v61  ;;  %v5298_v11 = vunpack.i.l.bf16 %v5297_v31  ;;  %v5302_v21 = vpop.permute.xlu1 %5301  ;;  %v5299_v41 = vunpack.i.h.bf16 %v5297_v31  ;;  %v3096_v43 = vsel %vm307_vm2, %v5515_v60, %v4969_v63  ;;  %v4103_v61 = vsel %vm307_vm2, %v3510_v30, %v5279_v53 }
 0x3f5   : > { %4629 = vmatprep.mubr.msk.f32.mxu0 %vm307_vm2, %v7993_v33  ;;  %4661 = vmatprep.mubr.msk.f32.mxu1 %vm307_vm2, %v7985_v45  ;;  %v5304_v6 = vunpack.i.h.bf16 %v5302_v21  ;;  %v5303_v7 = vunpack.i.l.bf16 %v5302_v21  ;;  %v3112_v57 = vsel %vm1227_vm9, %v3096_v43, %v5009_v50  ;;  %v4119_v31 = vsel %vm1227_vm9, %v4103_v61, %v5289_v23  ;;  %v5516_v23 = vld [vmem:[#allocation3 + $0x78] sm:$0xff] }
 0x3f6   : > { %v4134_v33 = vsel %vm3119_vm12, %v4118_v48, %v5298_v11  ;;  %v3129_v21 = vsel %vm3119_vm12, %v3112_v57, %v5049_v19  ;;  %v4135_v9 = vsel %vm3119_vm12, %v4119_v31, %v5299_v41 }
 0x3f7   : > { %v5307_v5 = vpop.permute.xlu0 %5306  ;;  %v4150_v29 = vsel %vm3136_vm13, %v4134_v33, %v5304_v6  ;;  %v3145_v26 = vsel %vm3136_vm13, %v3128_v36, %v5303_v7 }
 0x3f8   : > { %v5309_v45 = vunpack.i.h.bf16 %v5307_v5  ;;  %v5308_v17 = vunpack.i.l.bf16 %v5307_v5 }
 0x3fa   : > { %v3162_v25 = vsel %vm3153_vm14, %v3145_v26, %v5308_v17  ;;  %v4166_v16 = vsel %vm3153_vm14, %v4150_v29, %v5309_v45  ;;  %v8852_v26 = vld [vmem:[#allocation13_spill] sm:$0xff] }
 0x3fb   : > { %v5317_v4 = vpop.permute.xlu0 %5316 }
 0x3fc   : > { %v5312_v12 = vpop.permute.xlu1 %5311  ;;  %v5319_v42 = vunpack.i.h.bf16 %v5317_v4  ;;  %v5318_v56 = vunpack.i.l.bf16 %v5317_v4  ;;  %v4973_v4 = vunpack.i.l.bf16 %v8852_v26 }
 0x3fd   : > { %v5314_v40 = vunpack.i.h.bf16 %v5312_v12  ;;  %v5313_v14 = vunpack.i.l.bf16 %v5312_v12 }
 0x3ff   : > { %v3179_v20 = vsel %vm3170_vm15, %v3162_v25, %v5313_v14  ;;  %v4182_v13 = vsel %vm3170_vm15, %v4166_v16, %v5314_v40  ;;  %v5327_v46 = vpop.permute.xlu0 %5326  ;;  %v3511_v14 = vld [vmem:[#allocation3 + $0x138] sm:$0xff]  ;;  %v8854_v25 = vld [vmem:[#allocation12_spill] sm:$0xff] }
 0x400   : > { %v5322_v27 = vpop.permute.xlu1 %5321  ;;  %v3196_v62 = vsel %vm3187_vm0, %v3179_v20, %v5318_v56  ;;  %v4198_v39 = vsel %vm3187_vm0, %v4182_v13, %v5319_v42  ;;  %v5328_v32 = vunpack.i.l.bf16 %v5327_v46  ;;  %v8853_v56 = vld [vmem:[#allocation11_spill] sm:$0xff]  ;;  %v5053_v16 = vunpack.i.l.bf16 %v8854_v25 }
 0x401   : > { %3363 = vmatmul.mubr.f32.gmra.mrb[32].mxu0 %v3196_v62  ;;  %4359 = vmatmul.mubr.f32.gmra.mrb[32].mxu1 %v4198_v39  ;;  %v5324_v18 = vunpack.i.h.bf16 %v5322_v27  ;;  %v5323_v24 = vunpack.i.l.bf16 %v5322_v27  ;;  %v5013_v40 = vunpack.i.l.bf16 %v8853_v56 }
 0x402   : > { %4630 = vmatprep.mubr.msk.f32.mxu0 %vm307_vm2, %v8027_v8  ;;  %4662 = vmatprep.mubr.msk.f32.mxu1 %vm307_vm2, %v8016_v2  ;;  %v5329_v8 = vunpack.i.h.bf16 %v5327_v46  ;;  %v3097_v46 = vsel %vm307_vm2, %v5516_v23, %v4973_v4 }
 0x403   : > { %v5337_v59 = vpop.permute.xlu0 %5336  ;;  %v4151_v2 = vsel %vm3136_vm13, %v4135_v9, %v5324_v18  ;;  %v3146_v47 = vsel %vm3136_vm13, %v3129_v21, %v5323_v24  ;;  %v3113_v27 = vsel %vm1227_vm9, %v3097_v46, %v5013_v40  ;;  %v4974_v9 = vunpack.i.h.bf16 %v8852_v26 }
 0x404   : > { %v8346_v11 = vpop.permute.xlu1 %5331  ;;  %v5339_v34 = vunpack.i.h.bf16 %v5337_v59  ;;  %v5338_v52 = vunpack.i.l.bf16 %v5337_v59  ;;  %v3163_v5 = vsel %vm3153_vm14, %v3146_v47, %v5328_v32  ;;  %v4167_v15 = vsel %vm3153_vm14, %v4151_v2, %v5329_v8 }
 0x405   : > { %v5333_v10 = vunpack.i.l.bf16 %v8346_v11  ;;  %v3130_v39 = vsel %vm3119_vm12, %v3113_v27, %v5053_v16  ;;  %v5334_v8 = vunpack.i.h.bf16 %v8346_v11  ;;  %v3512_v11 = vld [vmem:[#allocation3 + $0x140] sm:$0xff] }
 0x406   : > { %v3180_v3 = vsel %vm3170_vm15, %v3163_v5, %v5338_v52  ;;  %v4183_v33 = vsel %vm3170_vm15, %v4167_v15, %v5339_v34  ;;  %v5014_v52 = vunpack.i.h.bf16 %v8853_v56 }
 0x407   : > { %v5347_v49 = vpop.permute.xlu0 %5346  ;;  %v4104_v63 = vsel %vm307_vm2, %v3511_v14, %v5333_v10  ;;  %v4105_v10 = vsel %vm307_vm2, %v3512_v11, %v5334_v8 }
 0x408   : > { %v8352_v48 = vpop.permute.xlu1 %5341  ;;  %v5349_v6 = vunpack.i.h.bf16 %v5347_v49  ;;  %v5348_v7 = vunpack.i.l.bf16 %v5347_v49 }
 0x409   : > { %v5343_v36 = vunpack.i.l.bf16 %v8352_v48  ;;  %v5344_v49 = vunpack.i.h.bf16 %v8352_v48 }
 0x40a   : > { %v3197_v45 = vsel %vm3187_vm0, %v3180_v3, %v5348_v7  ;;  %v4199_v17 = vsel %vm3187_vm0, %v4183_v33, %v5349_v6  ;;  %v5054_v6 = vunpack.i.h.bf16 %v8854_v25  ;;  %v5517_v3 = vld [vmem:[#allocation3 + $0x80] sm:$0xff] }
 0x40b   : > { %3368 = vmatmul.mubr.f32.gmra.mrb[34].mxu0 %v3197_v45  ;;  %4364 = vmatmul.mubr.f32.gmra.mrb[34].mxu1 %v4199_v17  ;;  %v5357_v12 = vpop.permute.xlu0 %5356  ;;  %v4120_v53 = vsel %vm1227_vm9, %v4104_v63, %v5343_v36  ;;  %v3098_v33 = vsel %vm307_vm2, %v5517_v3, %v4974_v9  ;;  %v4121_v36 = vsel %vm1227_vm9, %v4105_v10, %v5344_v49  ;;  %v3514_v3 = vld [vmem:[#allocation3 + $0x158] sm:$0xff] }
 0x40c   : > { %v5352_v29 = vpop.permute.xlu1 %5351  ;;  %4631 = vmatprep.mubr.msk.f32.mxu0 %vm307_vm2, %v8107_v37  ;;  %4663 = vmatprep.mubr.msk.f32.mxu1 %vm307_vm2, %v8099_v22  ;;  %v5359_v20 = vunpack.i.h.bf16 %v5357_v12  ;;  %v5358_v13 = vunpack.i.l.bf16 %v5357_v12  ;;  %v3114_v17 = vsel %vm1227_vm9, %v3098_v33, %v5014_v52 }
 0x40d   : > { %v5353_v42 = vunpack.i.l.bf16 %v5352_v29  ;;  %v5354_v7 = vunpack.i.h.bf16 %v5352_v29 }
 0x40e   : > { %v3147_v19 = vsel %vm3136_vm13, %v3130_v39, %v5358_v13  ;;  %v3513_v39 = vld [vmem:[#allocation3 + $0x150] sm:$0xff] }
 0x40f   : > { %v4136_v37 = vsel %vm3119_vm12, %v4120_v53, %v5353_v42  ;;  %v4137_v29 = vsel %vm3119_vm12, %v4121_v36, %v5354_v7 }
 0x410   : > { %v5362_v50 = vpop.permute.xlu1 %5361  ;;  %v4152_v18 = vsel %vm3136_vm13, %v4136_v37, %v5359_v20 }
 0x411   : > { %v5364_v22 = vunpack.i.h.bf16 %v5362_v50  ;;  %v5363_v62 = vunpack.i.l.bf16 %v5362_v50 }
 0x413   : > { %v3164_v57 = vsel %vm3153_vm14, %v3147_v19, %v5363_v62  ;;  %v4168_v31 = vsel %vm3153_vm14, %v4152_v18, %v5364_v22 }
 0x414   : > { %v5367_v41 = vpop.permute.xlu0 %5366 }
 0x415   : > { %v5372_v30 = vpop.permute.xlu1 %5371  ;;  %v5369_v24 = vunpack.i.h.bf16 %v5367_v41  ;;  %v5368_v60 = vunpack.i.l.bf16 %v5367_v41 }
 0x416   : > { %v5374_v43 = vunpack.i.h.bf16 %v5372_v30  ;;  %v5373_v61 = vunpack.i.l.bf16 %v5372_v30 }
 0x417   : > { %v3181_v59 = vsel %vm3170_vm15, %v3164_v57, %v5368_v60  ;;  %v4184_v21 = vsel %vm3170_vm15, %v4168_v31, %v5369_v24 }
 0x418   : > { %v5377_v32 = vpop.permute.xlu0 %5376  ;;  %v3198_v47 = vsel %vm3187_vm0, %v3181_v59, %v5373_v61  ;;  %v4200_v34 = vsel %vm3187_vm0, %v4184_v21, %v5374_v43 }
 0x419   : > { %v5382_v2 = vpop.permute.xlu1 %5381  ;;  %3373 = vmatmul.mubr.f32.gmra.mrb[36].mxu0 %v3198_v47  ;;  %4369 = vmatmul.mubr.f32.gmra.mrb[36].mxu1 %v4200_v34  ;;  %v5379_v5 = vunpack.i.h.bf16 %v5377_v32  ;;  %v5378_v15 = vunpack.i.l.bf16 %v5377_v32 }
 0x41a   : > { %4632 = vmatprep.mubr.msk.f32.mxu0 %vm307_vm2, %v8151_v51  ;;  %4664 = vmatprep.mubr.msk.f32.mxu1 %vm307_vm2, %v8139_v55  ;;  %v3131_v51 = vsel %vm3119_vm12, %v3114_v17, %v5054_v6  ;;  %v5384_v55 = vunpack.i.h.bf16 %v5382_v2  ;;  %v5383_v26 = vunpack.i.l.bf16 %v5382_v2 }
 0x41b   : > { %v3148_v4 = vsel %vm3136_vm13, %v3131_v51, %v5378_v15  ;;  %v4153_v12 = vsel %vm3136_vm13, %v4137_v29, %v5379_v5 }
 0x41c   : > { %v8394_v48 = vpop.permute.xlu0 %5386  ;;  %v3165_v63 = vsel %vm3153_vm14, %v3148_v4, %v5383_v26  ;;  %v4169_v53 = vsel %vm3153_vm14, %v4153_v12, %v5384_v55 }
 0x41d   : > { %v5392_v45 = vpop.permute.xlu1 %5391  ;;  %v5388_v37 = vunpack.i.l.bf16 %v8394_v48  ;;  %v5389_v47 = vunpack.i.h.bf16 %v8394_v48 }
 0x41e   : > { %v5394_v42 = vunpack.i.h.bf16 %v5392_v45  ;;  %v5393_v56 = vunpack.i.l.bf16 %v5392_v45 }
 0x41f   : > { %v4106_v41 = vsel %vm307_vm2, %v3513_v39, %v5388_v37  ;;  %v4107_v10 = vsel %vm307_vm2, %v3514_v3, %v5389_v47  ;;  %v2637_v37 = vld [vmem:[#allocation3 + $0xda] sm:$0xff] }
 0x420   : > { %v5397_v40 = vpop.permute.xlu0 %5396  ;;  %v3182_v20 = vsel %vm3170_vm15, %v3165_v63, %v5393_v56  ;;  %v4185_v13 = vsel %vm3170_vm15, %v4169_v53, %v5394_v42 }
 0x421   : > { %v5402_v14 = vpop.permute.xlu1 %5401  ;;  %v5398_v27 = vunpack.i.l.bf16 %v5397_v40  ;;  %v5399_v49 = vunpack.i.h.bf16 %v5397_v40 }
 0x422   : > { %v5404_v25 = vunpack.i.h.bf16 %v5402_v14  ;;  %v5403_v16 = vunpack.i.l.bf16 %v5402_v14 }
 0x423   : > { %v4122_v30 = vsel %vm1227_vm9, %v4106_v41, %v5398_v27  ;;  %v4123_v48 = vsel %vm1227_vm9, %v4107_v10, %v5399_v49  ;;  %v2638_v10 = vld [vmem:[#allocation3 + $0xe2] sm:$0xff] }
 0x424   : > { %v5407_v50 = vpop.permute.xlu0 %5406  ;;  %v3199_v23 = vsel %vm3187_vm0, %v3182_v20, %v5403_v16  ;;  %v4201_v46 = vsel %vm3187_vm0, %v4185_v13, %v5404_v25  ;;  %v3644_v20 = vld [vmem:[#allocation3 + $0x19a] sm:$0xff] }
 0x425   : > { %3378 = vmatmul.mubr.f32.gmra.mrb[38].mxu0 %v3199_v23  ;;  %4374 = vmatmul.mubr.f32.gmra.mrb[38].mxu1 %v4201_v46  ;;  %v5408_v22 = vunpack.i.l.bf16 %v5407_v50  ;;  %v5412_v62 = vpop.permute.xlu1 %5411  ;;  %v5409_v5 = vunpack.i.h.bf16 %v5407_v50  ;;  %v3515_v50 = vld [vmem:[#allocation3 + $0x168] sm:$0xff] }
 0x426   : > { %4633 = vmatprep.mubr.msk.f32.mxu0 %vm307_vm2, %v8208_v1  ;;  %4665 = vmatprep.mubr.msk.f32.mxu1 %vm307_vm2, %v8200_v44  ;;  %v5414_v18 = vunpack.i.h.bf16 %v5412_v62  ;;  %v5413_v24 = vunpack.i.l.bf16 %v5412_v62 }
 0x427   : > { %v4138_v60 = vsel %vm3119_vm12, %v4122_v30, %v5408_v22  ;;  %v4139_v51 = vsel %vm3119_vm12, %v4123_v48, %v5409_v5 }
 0x428   : > { %v5417_v19 = vpop.permute.xlu0 %5416  ;;  %v4154_v57 = vsel %vm3136_vm13, %v4138_v60, %v5414_v18  ;;  %v3149_v1 = vsel %vm3136_vm13, %v7839_v54, %v5413_v24 }
 0x429   : > { %v5419_v43 = vunpack.i.h.bf16 %v5417_v19  ;;  %v5418_v61 = vunpack.i.l.bf16 %v5417_v19 }
 0x42b   : > { %v3166_v32 = vsel %vm3153_vm14, %v3149_v1, %v5418_v61  ;;  %v4170_v2 = vsel %vm3153_vm14, %v4154_v57, %v5419_v43 }
 0x42d   : > { %v5427_v44 = vpop.permute.xlu0 %5426  ;;  %v5422_v31 = vpop.permute.xlu1 %5421 }
 0x42e   : > { %v5429_v59 = vunpack.i.h.bf16 %v5427_v44  ;;  %v5428_v21 = vunpack.i.l.bf16 %v5427_v44  ;;  %v5424_v9 = vunpack.i.h.bf16 %v5422_v31  ;;  %v5423_v8 = vunpack.i.l.bf16 %v5422_v31 }
 0x430   : > { %v3183_v34 = vsel %vm3170_vm15, %v3166_v32, %v5423_v8  ;;  %v4186_v52 = vsel %vm3170_vm15, %v4170_v2, %v5424_v9 }
 0x431   : > { %v5437_v6 = vpop.permute.xlu0 %5436  ;;  %v5432_v7 = vpop.permute.xlu1 %5431  ;;  %v3200_v54 = vsel %vm3187_vm0, %v3183_v34, %v5428_v21  ;;  %v4202_v11 = vsel %vm3187_vm0, %v4186_v52, %v5429_v59 }
 0x432   : > { %v5433_v15 = vunpack.i.l.bf16 %v5432_v7  ;;  %3383 = vmatmul.mubr.f32.gmra.mrb[40].mxu0 %v3200_v54  ;;  %4379 = vmatmul.mubr.f32.gmra.mrb[40].mxu1 %v4202_v11  ;;  %v5434_v33 = vunpack.i.h.bf16 %v5432_v7  ;;  %v5438_v45 = vunpack.i.l.bf16 %v5437_v6  ;;  %v5439_v29 = vunpack.i.h.bf16 %v5437_v6  ;;  %v3645_v6 = vld [vmem:[#allocation3 + $0x1a2] sm:$0xff]  ;;  %v5518_v7 = vld [vmem:[#allocation3 + $0x170] sm:$0xff] }
 0x433   : > { %4634 = vmatprep.mubr.msk.f32.mxu0 %vm307_vm2, %v8240_v0  ;;  %4666 = vmatprep.mubr.msk.f32.mxu1 %vm307_vm2, %v8229_v38 }
 0x434   : > { %v3150_v55 = vsel %vm3136_vm13, %v7836_v58, %v5433_v15  ;;  %v4155_v26 = vsel %vm3136_vm13, %v4139_v51, %v5434_v33 }
 0x435   : > { %v5447_v17 = vpop.permute.xlu0 %5446  ;;  %v5442_v36 = vpop.permute.xlu1 %5441  ;;  %v3167_v38 = vsel %vm3153_vm14, %v3150_v55, %v5438_v45  ;;  %v4171_v25 = vsel %vm3153_vm14, %v4155_v26, %v5439_v29 }
 0x436   : > { %v5449_v4 = vunpack.i.h.bf16 %v5447_v17  ;;  %v5448_v0 = vunpack.i.l.bf16 %v5447_v17  ;;  %v5443_v56 = vunpack.i.l.bf16 %v5442_v36  ;;  %v5444_v44 = vunpack.i.h.bf16 %v5442_v36 }
 0x438   : > { %v3184_v63 = vsel %vm3170_vm15, %v3167_v38, %v5448_v0  ;;  %v4187_v53 = vsel %vm3170_vm15, %v4171_v25, %v5449_v4  ;;  %v4108_v27 = vsel %vm307_vm2, %v3515_v50, %v5443_v56  ;;  %v4109_v54 = vsel %vm307_vm2, %v5518_v7, %v5444_v44 }
 0x439   : > { %v5457_v12 = vpop.permute.xlu0 %5456  ;;  %v5452_v42 = vpop.permute.xlu1 %5451 }
 0x43a   : > { %v5459_v40 = vunpack.i.h.bf16 %v5457_v12  ;;  %v5458_v14 = vunpack.i.l.bf16 %v5457_v12  ;;  %v5453_v16 = vunpack.i.l.bf16 %v5452_v42  ;;  %v5454_v21 = vunpack.i.h.bf16 %v5452_v42 }
 0x43c   : > { %v3201_v58 = vsel %vm3187_vm0, %v3184_v63, %v5458_v14  ;;  %v4203_v13 = vsel %vm3187_vm0, %v4187_v53, %v5459_v40  ;;  %v4124_v62 = vsel %vm1227_vm9, %v4108_v27, %v5453_v16  ;;  %v4125_v15 = vsel %vm1227_vm9, %v4109_v54, %v5454_v21  ;;  %v8470_v14 = vld [vmem:[#allocation6] ss:$0 sm:$0xff] }
 0x43d   : > { %v5467_v23 = vpop.permute.xlu0 %5466  ;;  %v5462_v46 = vpop.permute.xlu1 %5461  ;;  %3388 = vmatmul.mubr.f32.gmra.mrb[42].mxu0 %v3201_v58  ;;  %4384 = vmatmul.mubr.f32.gmra.mrb[42].mxu1 %v4203_v13 }
 0x43e   : > { %v5463_v22 = vunpack.i.l.bf16 %v5462_v46  ;;  %4635 = vmatprep.mubr.msk.f32.mxu0 %vm307_vm2, %v2637_v37  ;;  %4667 = vmatprep.mubr.msk.f32.mxu1 %vm307_vm2, %v3644_v20  ;;  %v5469_v39 = vunpack.i.h.bf16 %v5467_v23  ;;  %v5468_v19 = vunpack.i.l.bf16 %v5467_v23  ;;  %v5464_v32 = vunpack.i.h.bf16 %v5462_v46 }
 0x440   : > { %v4140_v41 = vsel %vm3119_vm12, %v4124_v62, %v5463_v22  ;;  %v3151_v43 = vsel %vm3136_vm13, %v7853_v35, %v5468_v19  ;;  %v4141_v48 = vsel %vm3119_vm12, %v4125_v15, %v5464_v32 }
 0x441   : > { %v5477_v30 = vpop.permute.xlu0 %5476  ;;  %v5472_v18 = vpop.permute.xlu1 %5471  ;;  %v4156_v1 = vsel %vm3136_vm13, %v4140_v41, %v5469_v39 }
 0x442   : > { %v5474_v24 = vunpack.i.h.bf16 %v5472_v18  ;;  %v5473_v60 = vunpack.i.l.bf16 %v5472_v18  ;;  %v5479_v61 = vunpack.i.h.bf16 %v5477_v30  ;;  %v5478_v57 = vunpack.i.l.bf16 %v5477_v30 }
 0x444   : > { %v3168_v31 = vsel %vm3153_vm14, %v3151_v43, %v5473_v60  ;;  %v4172_v59 = vsel %vm3153_vm14, %v4156_v1, %v5474_v24 }
 0x445   : > { %v5487_v9 = vpop.permute.xlu0 %5486  ;;  %v5482_v8 = vpop.permute.xlu1 %5481  ;;  %v3185_v49 = vsel %vm3170_vm15, %v3168_v31, %v5478_v57  ;;  %v4188_v35 = vsel %vm3170_vm15, %v4172_v59, %v5479_v61 }
 0x446   : > { %v5484_v2 = vunpack.i.h.bf16 %v5482_v8  ;;  %v5483_v47 = vunpack.i.l.bf16 %v5482_v8  ;;  %v5489_v34 = vunpack.i.h.bf16 %v5487_v9  ;;  %v5488_v52 = vunpack.i.l.bf16 %v5487_v9 }
 0x448   : > { %v3202_v11 = vsel %vm3187_vm0, %v3185_v49, %v5483_v47  ;;  %v4204_v5 = vsel %vm3187_vm0, %v4188_v35, %v5484_v2  ;;  %v3152_v36 = vsel %vm3136_vm13, %v7856_v28, %v5488_v52  ;;  %v4157_v51 = vsel %vm3136_vm13, %v4141_v48, %v5489_v34 }
 0x449   : > { %v5497_v3 = vpop.permute.xlu0 %5496  ;;  %v5492_v33 = vpop.permute.xlu1 %5491  ;;  %3393 = vmatmul.mubr.f32.gmra.mrb[44].mxu0 %v3202_v11  ;;  %4389 = vmatmul.mubr.f32.gmra.mrb[44].mxu1 %v4204_v5 }
 0x44a   : > { %v5494_v45 = vunpack.i.h.bf16 %v5492_v33  ;;  %v5493_v17 = vunpack.i.l.bf16 %v5492_v33  ;;  %4636 = vmatprep.mubr.msk.f32.mxu0 %vm307_vm2, %v2638_v10  ;;  %4668 = vmatprep.mubr.msk.f32.mxu1 %vm307_vm2, %v3645_v6  ;;  %v5499_v29 = vunpack.i.h.bf16 %v5497_v3  ;;  %v5498_v55 = vunpack.i.l.bf16 %v5497_v3 }
 0x44c   : > { %v3169_v26 = vsel %vm3153_vm14, %v3152_v36, %v5493_v17  ;;  %v4173_v4 = vsel %vm3153_vm14, %v4157_v51, %v5494_v45 }
 0x44d   : > { %v5502_v0 = vpop.permute.xlu1 %5501  ;;  %v3186_v38 = vsel %vm3170_vm15, %v3169_v26, %v5498_v55  ;;  %v4189_v56 = vsel %vm3170_vm15, %v4173_v4, %v5499_v29 }
 0x44e   : > { %v5504_v12 = vunpack.i.h.bf16 %v5502_v0  ;;  %v5503_v42 = vunpack.i.l.bf16 %v5502_v0 }
 0x450   : > { %v3203_v40 = vsel %vm3187_vm0, %v3186_v38, %v5503_v42  ;;  %v4205_v28 = vsel %vm3187_vm0, %v4189_v56, %v5504_v12 }
 0x451   : > { %3398 = vmatmul.mubr.f32.gmra.mrb[46].mxu0 %v3203_v40  ;;  %4394 = vmatmul.mubr.f32.gmra.mrb[46].mxu1 %v4205_v28 }
 0x476   : > { %v3324_v25 = vpop.f32.mrb[16].mxu0 }
 0x477   : > { %v4320_v16 = vpop.f32.mrb[16].mxu1  ;;  %v3325_v63 = vadd.f32 %v8470_v14, %v3324_v25  ;;  %v3326_v20 = vpop.f32.mrb[17].mxu0 }
 0x478   : > { %v4321_v53 = vadd.f32 %v8470_v14, %v4320_v16  ;;  %v4322_v58 = vpop.f32.mrb[17].mxu1 }
 0x479   : > { %v3403_v13 = vmax.f32 %v3325_v63, 0.0 }
 0x47a   : > { %v4399_v50 = vmax.f32 %v4321_v53, 0.0 }
 0x47b   : > { %v4689_v23 = vpack.c.bf16 %v3403_v13, %v3403_v13 }
 0x47c   : > { %v4705_v46 = vpack.c.bf16 %v4399_v50, %v4399_v50 }
 0x47d   : > { %3484 = vst.msk [vmem:[%s8478_s20] sm:$0xf] %vm3483_vm1, %v4689_v23 }
 0x47e   : > { %4479 = vst.msk [vmem:[%s8478_s20 + $0x40] sm:$0xf] %vm3483_vm1, %v4705_v46 }
 0x480   : > { %v3329_v37 = vpop.f32.mrb[18].mxu0  ;;  %v4325_v22 = vpop.f32.mrb[18].mxu1 }
 0x481   : > { %v3330_v27 = vadd.f32 %v8470_v14, %v3329_v37  ;;  %v3331_v62 = vpop.f32.mrb[19].mxu0  ;;  %v4326_v39 = vadd.f32 %v8470_v14, %v4325_v22  ;;  %v4327_v19 = vpop.f32.mrb[19].mxu1 }
 0x483   : > { %v3404_v41 = vmax.f32 %v3330_v27, 0.0  ;;  %v4400_v30 = vmax.f32 %v4326_v39, 0.0 }
 0x485   : > { %v4690_v18 = vpack.c.bf16 %v3404_v41, %v3404_v41  ;;  %v4706_v24 = vpack.c.bf16 %v4400_v30, %v4400_v30 }
 0x487   : > { %3485 = vst.msk [vmem:[%s8478_s20 + $0x4] sm:$0xf] %vm3483_vm1, %v4690_v18  ;;  %4480 = vst.msk [vmem:[%s8478_s20 + $0x44] sm:$0xf] %vm3483_vm1, %v4706_v24 }
 0x48c   : > { %v3334_v60 = vpop.f32.mrb[20].mxu0  ;;  %v4330_v43 = vpop.f32.mrb[20].mxu1 }
 0x48d   : > { %v3335_v61 = vadd.f32 %v8470_v14, %v3334_v60  ;;  %v4331_v57 = vadd.f32 %v8470_v14, %v4330_v43  ;;  %v3336_v1 = vpop.f32.mrb[21].mxu0  ;;  %v4332_v44 = vpop.f32.mrb[21].mxu1 }
 0x48f   : > { %v3405_v31 = vmax.f32 %v3335_v61, 0.0  ;;  %v4401_v59 = vmax.f32 %v4331_v57, 0.0 }
 0x491   : > { %v4691_v21 = vpack.c.bf16 %v3405_v31, %v3405_v31  ;;  %v4707_v9 = vpack.c.bf16 %v4401_v59, %v4401_v59 }
 0x493   : > { %3486 = vst.msk [vmem:[%s8478_s20 + $0x8] sm:$0xf] %vm3483_vm1, %v4691_v21  ;;  %4481 = vst.msk [vmem:[%s8478_s20 + $0x48] sm:$0xf] %vm3483_vm1, %v4707_v9 }
 0x497   : > { %v3339_v8 = vpop.f32.mrb[22].mxu0  ;;  %v4335_v32 = vpop.f32.mrb[22].mxu1 }
 0x498   : > { %v3340_v2 = vadd.f32 %v8470_v14, %v3339_v8  ;;  %v4336_v47 = vadd.f32 %v8470_v14, %v4335_v32  ;;  %v3341_v34 = vpop.f32.mrb[23].mxu0  ;;  %v4337_v52 = vpop.f32.mrb[23].mxu1 }
 0x49a   : > { %v3406_v49 = vmax.f32 %v3340_v2, 0.0  ;;  %v4402_v35 = vmax.f32 %v4336_v47, 0.0 }
 0x49c   : > { %v4692_v6 = vpack.c.bf16 %v3406_v49, %v3406_v49  ;;  %v4708_v7 = vpack.c.bf16 %v4402_v35, %v4402_v35 }
 0x49e   : > { %3487 = vst.msk [vmem:[%s8478_s20 + $0xc] sm:$0xf] %vm3483_vm1, %v4692_v6  ;;  %4482 = vst.msk [vmem:[%s8478_s20 + $0x4c] sm:$0xf] %vm3483_vm1, %v4708_v7 }
 0x4a4   : > { %v3344_v54 = vpop.f32.mrb[24].mxu0  ;;  %v4340_v11 = vpop.f32.mrb[24].mxu1 }
 0x4a5   : > { %v3345_v5 = vadd.f32 %v8470_v14, %v3344_v54  ;;  %v4341_v15 = vadd.f32 %v8470_v14, %v4340_v11  ;;  %v3346_v3 = vpop.f32.mrb[25].mxu0  ;;  %v4342_v33 = vpop.f32.mrb[25].mxu1 }
 0x4a7   : > { %v3407_v10 = vmax.f32 %v3345_v5, 0.0  ;;  %v4403_v48 = vmax.f32 %v4341_v15, 0.0 }
 0x4a9   : > { %v4693_v45 = vpack.c.bf16 %v3407_v10, %v3407_v10  ;;  %v4709_v17 = vpack.c.bf16 %v4403_v48, %v4403_v48 }
 0x4ab   : > { %3488 = vst.msk [vmem:[%s8478_s20 + $0x10] sm:$0xf] %vm3483_vm1, %v4693_v45  ;;  %4483 = vst.msk [vmem:[%s8478_s20 + $0x50] sm:$0xf] %vm3483_vm1, %v4709_v17 }
 0x4ae   : > { %v3349_v36 = vpop.f32.mrb[26].mxu0 }
 0x4af   : > { %v3350_v51 = vadd.f32 %v8470_v14, %v3349_v36  ;;  %v4345_v29 = vpop.f32.mrb[26].mxu1  ;;  %v3351_v55 = vpop.f32.mrb[27].mxu0 }
 0x4b0   : > { %v4346_v26 = vadd.f32 %v8470_v14, %v4345_v29  ;;  %v4347_v4 = vpop.f32.mrb[27].mxu1 }
 0x4b1   : > { %v3408_v0 = vmax.f32 %v3350_v51, 0.0 }
 0x4b2   : > { %v4404_v12 = vmax.f32 %v4346_v26, 0.0 }
 0x4b3   : > { %v4694_v42 = vpack.c.bf16 %v3408_v0, %v3408_v0 }
 0x4b4   : > { %v4710_v38 = vpack.c.bf16 %v4404_v12, %v4404_v12 }
 0x4b5   : > { %3489 = vst.msk [vmem:[%s8478_s20 + $0x14] sm:$0xf] %vm3483_vm1, %v4694_v42 }
 0x4b6   : > { %4484 = vst.msk [vmem:[%s8478_s20 + $0x54] sm:$0xf] %vm3483_vm1, %v4710_v38 }
 0x4bb   : > { %v3354_v56 = vpop.f32.mrb[28].mxu0  ;;  %v4350_v40 = vpop.f32.mrb[28].mxu1 }
 0x4bc   : > { %v3355_v28 = vadd.f32 %v8470_v14, %v3354_v56  ;;  %v4351_v25 = vadd.f32 %v8470_v14, %v4350_v40  ;;  %v3356_v16 = vpop.f32.mrb[29].mxu0  ;;  %v4352_v63 = vpop.f32.mrb[29].mxu1 }
 0x4be   : > { %v3409_v53 = vmax.f32 %v3355_v28, 0.0  ;;  %v4405_v20 = vmax.f32 %v4351_v25, 0.0 }
 0x4c0   : > { %v4695_v58 = vpack.c.bf16 %v3409_v53, %v3409_v53  ;;  %v4711_v13 = vpack.c.bf16 %v4405_v20, %v4405_v20 }
 0x4c2   : > { %3490 = vst.msk [vmem:[%s8478_s20 + $0x18] sm:$0xf] %vm3483_vm1, %v4695_v58  ;;  %4485 = vst.msk [vmem:[%s8478_s20 + $0x58] sm:$0xf] %vm3483_vm1, %v4711_v13 }
 0x4c7   : > { %v3359_v50 = vpop.f32.mrb[30].mxu0  ;;  %v4355_v23 = vpop.f32.mrb[30].mxu1 }
 0x4c8   : > { %v3360_v46 = vadd.f32 %v8470_v14, %v3359_v50  ;;  %v4356_v37 = vadd.f32 %v8470_v14, %v4355_v23  ;;  %v3361_v27 = vpop.f32.mrb[31].mxu0  ;;  %v4357_v22 = vpop.f32.mrb[31].mxu1 }
 0x4ca   : > { %v3410_v62 = vmax.f32 %v3360_v46, 0.0  ;;  %v4406_v39 = vmax.f32 %v4356_v37, 0.0 }
 0x4cc   : > { %v4696_v19 = vpack.c.bf16 %v3410_v62, %v3410_v62  ;;  %v4712_v41 = vpack.c.bf16 %v4406_v39, %v4406_v39 }
 0x4ce   : > { %3491 = vst.msk [vmem:[%s8478_s20 + $0x1c] sm:$0xf] %vm3483_vm1, %v4696_v19  ;;  %4486 = vst.msk [vmem:[%s8478_s20 + $0x5c] sm:$0xf] %vm3483_vm1, %v4712_v41 }
 0x4d4   : > { %v3364_v30 = vpop.f32.mrb[32].mxu0  ;;  %v4360_v18 = vpop.f32.mrb[32].mxu1 }
 0x4d5   : > { %v3365_v24 = vadd.f32 %v8470_v14, %v3364_v30  ;;  %v4361_v60 = vadd.f32 %v8470_v14, %v4360_v18  ;;  %v3366_v43 = vpop.f32.mrb[33].mxu0  ;;  %v4362_v61 = vpop.f32.mrb[33].mxu1 }
 0x4d7   : > { %v3411_v57 = vmax.f32 %v3365_v24, 0.0  ;;  %v4407_v1 = vmax.f32 %v4361_v60, 0.0 }
 0x4d9   : > { %v4697_v44 = vpack.c.bf16 %v3411_v57, %v3411_v57  ;;  %v4713_v31 = vpack.c.bf16 %v4407_v1, %v4407_v1 }
 0x4db   : > { %3492 = vst.msk [vmem:[%s8478_s20 + $0x20] sm:$0xf] %vm3483_vm1, %v4697_v44  ;;  %4487 = vst.msk [vmem:[%s8478_s20 + $0x60] sm:$0xf] %vm3483_vm1, %v4713_v31 }
 0x4de   : > { %v3369_v59 = vpop.f32.mrb[34].mxu0  ;;  %v4365_v21 = vpop.f32.mrb[34].mxu1 }
 0x4df   : > { %v3370_v9 = vadd.f32 %v8470_v14, %v3369_v59  ;;  %v4366_v8 = vadd.f32 %v8470_v14, %v4365_v21  ;;  %v3371_v32 = vpop.f32.mrb[35].mxu0  ;;  %v4367_v2 = vpop.f32.mrb[35].mxu1 }
 0x4e1   : > { %v3412_v47 = vmax.f32 %v3370_v9, 0.0  ;;  %v4408_v34 = vmax.f32 %v4366_v8, 0.0 }
 0x4e3   : > { %v4698_v52 = vpack.c.bf16 %v3412_v47, %v3412_v47  ;;  %v4714_v49 = vpack.c.bf16 %v4408_v34, %v4408_v34 }
 0x4e5   : > { %3493 = vst.msk [vmem:[%s8478_s20 + $0x24] sm:$0xf] %vm3483_vm1, %v4698_v52  ;;  %4488 = vst.msk [vmem:[%s8478_s20 + $0x64] sm:$0xf] %vm3483_vm1, %v4714_v49 }
 0x4ec   : > { %v3374_v35 = vpop.f32.mrb[36].mxu0  ;;  %v4370_v6 = vpop.f32.mrb[36].mxu1 }
 0x4ed   : > { %v3375_v7 = vadd.f32 %v8470_v14, %v3374_v35  ;;  %v4371_v54 = vadd.f32 %v8470_v14, %v4370_v6  ;;  %v3376_v11 = vpop.f32.mrb[37].mxu0  ;;  %v4372_v5 = vpop.f32.mrb[37].mxu1 }
 0x4ef   : > { %v3413_v15 = vmax.f32 %v3375_v7, 0.0  ;;  %v4409_v3 = vmax.f32 %v4371_v54, 0.0 }
 0x4f1   : > { %v4699_v33 = vpack.c.bf16 %v3413_v15, %v3413_v15  ;;  %v4715_v10 = vpack.c.bf16 %v4409_v3, %v4409_v3 }
 0x4f3   : > { %3494 = vst.msk [vmem:[%s8478_s20 + $0x28] sm:$0xf] %vm3483_vm1, %v4699_v33  ;;  %4489 = vst.msk [vmem:[%s8478_s20 + $0x68] sm:$0xf] %vm3483_vm1, %v4715_v10 }
 0x4f8   : > { %v3379_v48 = vpop.f32.mrb[38].mxu0  ;;  %v4375_v45 = vpop.f32.mrb[38].mxu1 }
 0x4f9   : > { %v3380_v17 = vadd.f32 %v8470_v14, %v3379_v48  ;;  %v4376_v36 = vadd.f32 %v8470_v14, %v4375_v45  ;;  %v3381_v51 = vpop.f32.mrb[39].mxu0  ;;  %v4377_v29 = vpop.f32.mrb[39].mxu1 }
 0x4fb   : > { %v3414_v55 = vmax.f32 %v3380_v17, 0.0  ;;  %v4410_v26 = vmax.f32 %v4376_v36, 0.0 }
 0x4fd   : > { %v4700_v4 = vpack.c.bf16 %v3414_v55, %v3414_v55  ;;  %v4716_v0 = vpack.c.bf16 %v4410_v26, %v4410_v26 }
 0x4ff   : > { %3495 = vst.msk [vmem:[%s8478_s20 + $0x2c] sm:$0xf] %vm3483_vm1, %v4700_v4  ;;  %4490 = vst.msk [vmem:[%s8478_s20 + $0x6c] sm:$0xf] %vm3483_vm1, %v4716_v0 }
 0x505   : > { %v3384_v12 = vpop.f32.mrb[40].mxu0  ;;  %v4380_v42 = vpop.f32.mrb[40].mxu1 }
 0x506   : > { %v3385_v38 = vadd.f32 %v8470_v14, %v3384_v12  ;;  %v4381_v56 = vadd.f32 %v8470_v14, %v4380_v42  ;;  %v3386_v40 = vpop.f32.mrb[41].mxu0  ;;  %v4382_v28 = vpop.f32.mrb[41].mxu1 }
 0x508   : > { %v3415_v25 = vmax.f32 %v3385_v38, 0.0  ;;  %v4411_v16 = vmax.f32 %v4381_v56, 0.0 }
 0x50a   : > { %v4701_v63 = vpack.c.bf16 %v3415_v25, %v3415_v25  ;;  %v4717_v53 = vpack.c.bf16 %v4411_v16, %v4411_v16 }
 0x50c   : > { %3496 = vst.msk [vmem:[%s8478_s20 + $0x30] sm:$0xf] %vm3483_vm1, %v4701_v63  ;;  %4491 = vst.msk [vmem:[%s8478_s20 + $0x70] sm:$0xf] %vm3483_vm1, %v4717_v53 }
 0x510   : > { %v3389_v20 = vpop.f32.mrb[42].mxu0  ;;  %v4385_v58 = vpop.f32.mrb[42].mxu1 }
 0x511   : > { %v3390_v13 = vadd.f32 %v8470_v14, %v3389_v20  ;;  %v4386_v50 = vadd.f32 %v8470_v14, %v4385_v58  ;;  %v3391_v23 = vpop.f32.mrb[43].mxu0  ;;  %v4387_v46 = vpop.f32.mrb[43].mxu1 }
 0x513   : > { %v3416_v37 = vmax.f32 %v3390_v13, 0.0  ;;  %v4412_v27 = vmax.f32 %v4386_v50, 0.0 }
 0x515   : > { %v4702_v22 = vpack.c.bf16 %v3416_v37, %v3416_v37  ;;  %v4718_v62 = vpack.c.bf16 %v4412_v27, %v4412_v27 }
 0x517   : > { %3497 = vst.msk [vmem:[%s8478_s20 + $0x34] sm:$0xf] %vm3483_vm1, %v4702_v22  ;;  %4492 = vst.msk [vmem:[%s8478_s20 + $0x74] sm:$0xf] %vm3483_vm1, %v4718_v62 }
 0x51c   : > { %v3394_v39 = vpop.f32.mrb[44].mxu0  ;;  %v4390_v19 = vpop.f32.mrb[44].mxu1 }
 0x51d   : > { %v3395_v41 = vadd.f32 %v8470_v14, %v3394_v39  ;;  %v4391_v30 = vadd.f32 %v8470_v14, %v4390_v19  ;;  %v3396_v18 = vpop.f32.mrb[45].mxu0  ;;  %v4392_v24 = vpop.f32.mrb[45].mxu1 }
 0x51f   : > { %v3417_v60 = vmax.f32 %v3395_v41, 0.0  ;;  %v4413_v43 = vmax.f32 %v4391_v30, 0.0 }
 0x521   : > { %v4703_v61 = vpack.c.bf16 %v3417_v60, %v3417_v60  ;;  %v4719_v57 = vpack.c.bf16 %v4413_v43, %v4413_v43 }
 0x523   : > { %3498 = vst.msk [vmem:[%s8478_s20 + $0x38] sm:$0xf] %vm3483_vm1, %v4703_v61  ;;  %4493 = vst.msk [vmem:[%s8478_s20 + $0x78] sm:$0xf] %vm3483_vm1, %v4719_v57 }
 0x524   : > { %v3399_v1 = vpop.f32.mrb[46].mxu0  ;;  %v4395_v44 = vpop.f32.mrb[46].mxu1 }
 0x525   : > { %v3400_v31 = vadd.f32 %v8470_v14, %v3399_v1  ;;  %v4396_v59 = vadd.f32 %v8470_v14, %v4395_v44  ;;  %v3401_v21 = vpop.f32.mrb[47].mxu0  ;;  %v4397_v9 = vpop.f32.mrb[47].mxu1 }
 0x527   : > { %v3418_v8 = vmax.f32 %v3400_v31, 0.0  ;;  %v4414_v32 = vmax.f32 %v4396_v59, 0.0 }
 0x529   : > { %v4704_v2 = vpack.c.bf16 %v3418_v8, %v3418_v8  ;;  %v4720_v47 = vpack.c.bf16 %v4414_v32, %v4414_v32 }
 0x52b   : > { %3499 = vst.msk [vmem:[%s8478_s20 + $0x3c] sm:$0xf] %vm3483_vm1, %v4704_v2  ;;  %4494 = vst.msk [vmem:[%s8478_s20 + $0x7c] sm:$0xf] %vm3483_vm1, %v4720_v47 }
 0x52c PF: > { %s17_s18 = sadd.s32 1, %s5589_s18  }
 0x52d   : > { %p14_p9 = scmp.ge.s32.totalorder %s17_s18, 4  }
 0x52f   :  { %16 = sbr.rel (!%p14_p9) target bundleno = 2 (0x2), region = 89 }
 0x536   :  { %4516 = vsyncpa [#allocation5], 1 }
 0x537   :  { %4518 = vsyncpa [#allocation5 + $0x1], 1 }
 0x538   :  { %4519 = vsyncpa [#allocation7], 1 }

// kernel: _hex_cnn_forward.3
= control target key start
LH: loop header
LB: loop body
LE: loop exit
PB: predicated region body
PF: predicated region fallthrough
CT: control target
= control target key end

     0   :  { %9 = vsyncpa [#allocation3], 0  ;;  %s9152_s0 = inlined_call_operand.vmem [shape: bf16[2,8192], index: 0, kind: input, shape index: {}]   ;;  %s9153_s1 = inlined_call_operand.hbm [shape: bf16[8192,256], index: 1, kind: input, shape index: {}]   ;;  %s9154_s2 = inlined_call_operand.hbm [shape: f32[1,256], index: 2, kind: input, shape index: {}]   ;;  %s9155_s3 = inlined_call_operand.vmem [shape: f32[256,9], index: 3, kind: input, shape index: {}]   ;;  %s9156_s4 = inlined_call_operand.vmem [shape: f32[2,2,9], index: 4, kind: output, shape index: {}]  }
   0x1   :  { %11 = vsyncpa [#allocation3 + $0x1], 0 }
   0x2   :  { %12 = vsyncpa [#allocation5], 0 }
   0x3   :  { %14 = vsyncpa [#allocation5 + $0x1], 0  ;;  %s8324_s15 = smov 0   ;;  %s8326_s16 = smov 0  }
   0x4   :  { %s8328_s17 = smov 0   ;;  %s8330_s18 = smov 0  }
   0x5 LB: > { %s8343_s19 = sadd.s32 4294967295, %s8288_s18   ;;  %s8346_s20 = sadd.s32 1, %s8288_s18   ;;  %s8288_s18 = sphi %s8330_s18, %s9166_s18   ;;  %s8284_s17 = sphi %s8328_s17, %s9165_s17   ;;  %s8280_s16 = sphi %s8326_s16, %s9164_s16   ;;  %s8276_s15 = sphi %s8324_s15, %s9163_s15  }
   0x6   : > { %s45_s21 = ssub.s32 %s8288_s18, %s8346_s20  ;;  %s48_s22 = sadd.s32 1, %s8284_s17 }
   0x7   : > { %p46_p0 = scmp.eq.s32.totalorder %s45_s21, 0  ;;  %p55_p1 = scmp.ne.s32.totalorder %s8284_s17, %s8280_s16 }
   0x8   : > { %p56_p2 = scmp.eq.s32.totalorder %s8288_s18, 0  ;;  %p61_p3 = scmp.ne.s32.totalorder %s8280_s16, %s8276_s15 }
   0x9   : > { %s8356_s23 = scalar_select %p46_p0, %s8284_s17, %s48_s22  }
   0xa   : > { %p57_p4 = por %p56_p2, %p55_p1  ;;  %p62_p5 = scmp.eq.s32.totalorder %s8343_s19, 0 }
   0xb   : > { %p7630_p6 = scmp.lt.s32.totalorder %s8288_s18, 2  ;;  %s8365_s25 = sand.u32 1, %s8284_s17  }
   0xc   : > { %p8360_p7 = por %p62_p5, %p61_p3  ;;  %s6316_s26 = sshll.u32 %s8365_s25, 12 }
   0xd   : > { %s6317_s27 = sshll.u32 %s8288_s18, 6  ;;  %s170_s5 = scalar_lea.vmem [#allocation2], %s6316_s26 }
   0xe   : > { %s9158_s24 = scalar_select %p8360_p7, 1, 0 }
   0xf   : > { %s8372_s30 = scalar_lea.hbm %s9153_s1, %s6317_s27  ;;  %s176_s6 = sshll.u32 %s170_s5, 4  ;;  %s8374_s6 = int_to_ptr.vmem [resolvable:$true] %s176_s6 }
  0x10   : > { %p8376_p8 = pnand %p7630_p6, %p57_p4  ;;  %s167_s8 = scalar_lea.sflag [#allocation3], %s8365_s25 }
  0x11   : > { %s8190_s9 = scalar_lea.hbm %s8372_s30, 65536  ;;  %s8195_s12 = scalar_lea.hbm %s9153_s1, 131072 }
  0x12   : > { %p8191_p9 = scmp.ne.s32.totalorder %s8372_s30, %s8190_s9  ;;  %p8192_p10 = pneg %p8376_p8 }
  0x13   : > { %p8196_p13 = scmp.lt.u32.totalorder %s8372_s30, %s9153_s1  ;;  %p8197_p0 = scmp.lt.u32.totalorder %s8195_s12, %s8190_s9 }
  0x14   : > { %p8193_p11 = pnand %p8192_p10, %p8191_p9  ;;  %p8199_p2 = scmp.lt.u32.totalorder %s8190_s9, %s8372_s30 }
  0x15   : > { %p8198_p1 = por %p8197_p0, %p8196_p13 }
  0x16   : > { %p8194_p12 = pneg %p8193_p11 }
  0x17   : > { %p8200_p3 = por %p8199_p2, %p8198_p1 }
  0x19   : > { %p8201_p4 = pnand %p8200_p3, %p8194_p12 }
  0x1b   : > { %8204 = shalt.err (!%p8201_p4)
}
  0x1c   : > { %s8205_s15 = scalar_lea.vmem %s8374_s6, 65536  ;;  %s8290_s21 = smov [#allocation2]  }
  0x1d   : > { %p8206_p5 = scmp.ne.s32.totalorder %s8374_s6, %s8205_s15  ;;  %s8210_s22 = sshll.u32 %s8290_s21, 4  ;;  %s8211_s22 = int_to_ptr.vmem [resolvable:$false] %s8210_s22 }
  0x1e   : > { %s8212_s26 = scalar_lea.vmem %s8211_s22, 131072  ;;  %p8213_p11 = scmp.lt.s32.totalorder %s8374_s6, %s8211_s22 }
  0x1f   : > { %p8208_p6 = pnand %p8206_p5, %p8192_p10  ;;  %p8214_p13 = scmp.lt.s32.totalorder %s8212_s26, %s8205_s15 }
  0x21   : > { %p8209_p9 = pneg %p8208_p6  ;;  %p8215_p0 = por %p8214_p13, %p8213_p11 }
  0x23   : > { %p8216_p1 = pnand %p8215_p0, %p8209_p9 }
  0x25   : > { %8219 = shalt.err (!%p8216_p1)
}
  0x26   : > { %s8291_s27 = smov 128   ;;  %s8292_s28 = smov 64  }
  0x27   : > { %s8293_s29 = smov 4   ;;  %p6319_p12 = scmp.ge.s32.totalorder %s8288_s18, 1 }
  0x28   : > { %7626 = dma.hbm_to_vmem [thread:$0]  (!%p8376_p8), %s8372_s30, 65536, %s8374_s6, %s167_s8, %s8291_s27, %s8292_s28, %s8293_s29  }
  0x29   : > { %p210_p2 = scmp.lt.s32.totalorder %s8288_s18, 3  ;;  %s6318_s9 = sshll.u32 %s8288_s18, 4 }
  0x2a   : > { %s8418_s12 = scalar_lea.hbm %s9154_s2, %s6318_s9  ;;  %s189_s13 = scalar_lea.vmem [#allocation4], %s8365_s25 }
  0x2b   : > { %p8410_p3 = pnand %p6319_p12, %p210_p2  ;;  %s196_s14 = sshll.u32 %s189_s13, 4  ;;  %s197_s14 = int_to_ptr.vmem [resolvable:$true] %s196_s14 }
  0x2c   : > { %s187_s30 = scalar_lea.sflag [#allocation5], %s8365_s25  ;;  %s8220_s6 = scalar_lea.hbm %s8418_s12, 16 }
  0x2d   : > { %s9160_s5 = scalar_select %p8410_p3, 1, 0 }
  0x2e   : > { %p8221_p4 = scmp.ne.s32.totalorder %s8418_s12, %s8220_s6  ;;  %s8225_s15 = scalar_lea.hbm %s9154_s2, 32 }
  0x2f   : > { %p8226_p9 = scmp.lt.u32.totalorder %s8418_s12, %s9154_s2  ;;  %p8227_p11 = scmp.lt.u32.totalorder %s8225_s15, %s8220_s6 }
  0x30   : > { %p8223_p5 = pnand %p8221_p4, %p8192_p10  ;;  %p8229_p0 = scmp.lt.u32.totalorder %s8220_s6, %s8418_s12 }
  0x31   : > { %p8228_p13 = por %p8227_p11, %p8226_p9 }
  0x32   : > { %p8224_p6 = pneg %p8223_p5 }
  0x33   : > { %p8230_p1 = por %p8229_p0, %p8228_p13 }
  0x35   : > { %p8231_p12 = pnand %p8230_p1, %p8224_p6 }
  0x37   : > { %8234 = shalt.err (!%p8231_p12)
}
  0x38   : > { %s8235_s25 = scalar_lea.vmem %s197_s14, 16  ;;  %s8294_s26 = smov [#allocation4]  }
  0x39   : > { %p8236_p2 = scmp.ne.s32.totalorder %s197_s14, %s8235_s25  ;;  %s8240_s27 = sshll.u32 %s8294_s26, 4  ;;  %s8241_s27 = int_to_ptr.vmem [resolvable:$false] %s8240_s27 }
  0x3a   : > { %s8242_s28 = scalar_lea.vmem %s8241_s27, 32  ;;  %p8243_p7 = scmp.lt.s32.totalorder %s197_s14, %s8241_s27 }
  0x3b   : > { %p8238_p4 = pnand %p8236_p2, %p8192_p10  ;;  %p8244_p3 = scmp.lt.s32.totalorder %s8242_s28, %s8235_s25 }
  0x3d   : > { %p8239_p5 = pneg %p8238_p4  ;;  %p8245_p9 = por %p8244_p3, %p8243_p7 }
  0x3f   : > { %p8246_p11 = pnand %p8245_p9, %p8239_p5 }
  0x41   : > { %8249 = shalt.err (!%p8246_p11)
}
  0x42   : > { %7629 = dma.hbm_to_vmem [thread:$0]  (!%p8376_p8), %s8418_s12, 16, %s197_s14, %s187_s30  }
  0x43   : > { %p9161_p6 = scmp.ne.s32.totalorder %s9160_s5, 0 }
  0x44   : > { %s8444_s29 = sand.u32 (!%p9161_p6), 1, %s8280_s16   ;;  %p9162_p7 = scmp.ne.s32.totalorder (!%p9161_p6), %s9158_s24, 0 }
  0x45   : > { %214 = sbr.rel (%p9161_p6) target bundleno = 1027 (0x403), region = 36  ;;  %s6320_s9 = sshll.u32 (!%p9161_p6), %s8444_s29, 12 }
  0x46   : > { %s217_s10 = scalar_lea.sflag (!%p9161_p6), [#allocation3], %s8444_s29  ;;  %s8448_s11 = scalar_lea.vmem (!%p9161_p6), [#allocation2], %s6320_s9 }
  0x4c   : > { %8267 = dma.done.wait (%p9162_p7), %s217_s10, 65536  }
  0x4d   : > { %8269 = vsyncadd (%p9162_p7), %s217_s10, 4294901760  ;;  %s226_s7 = scalar_lea.sflag [#allocation5], %s8444_s29  ;;  %s228_s5 = scalar_lea.vmem [#allocation4], %s8444_s29 }
  0x4e   : > { %8271 = dma.done.wait (%p9162_p7), %s226_s7, 16  }
  0x4f   : > { %8273 = vsyncadd (%p9162_p7), %s226_s7, 4294967280  ;;  %v7670_v0 = vld [vmem:[%s8448_s11 + $0x40] sm:$0xff]   ;;  %v7674_v4 = vld [vmem:[%s8448_s11 + $0x48] sm:$0xff]   ;;  %v8295_v22 = vmov 1966171168   ;;  %v1323_v24 = vlaneseq  ;;  %s6321_s9 = sshll.u32 %s8343_s19, 4 }
  0x50   : > { %v7671_v1 = vld [vmem:[%s8448_s11 + $0xc0] sm:$0xff]   ;;  %6839 = vmatprep.subr.bf16.mxu0 %v7670_v0  ;;  %v7675_v5 = vld [vmem:[%s8448_s11 + $0xc8] sm:$0xff]   ;;  %v7678_v8 = vld [vmem:[%s8448_s11 + $0x50] sm:$0xff]   ;;  %v1321_v23 = vunpack.c.l.s4 %v8295_v22  ;;  %p262_p8 = scmp.lt.s32.totalorder %s6321_s9, 31  ;;  %vm8297_vm0 = vmmov 0   ;;  %p267_p10 = scmp.lt.s32.totalorder %s8343_s19, 1 }
  0x51   : > { %v7672_v2 = vld [vmem:[%s8448_s11] sm:$0xff]   ;;  %6861 = vmatprep.subr.bf16.mxu1 %v7671_v1  ;;  %v7676_v6 = vld [vmem:[%s8448_s11 + $0x8] sm:$0xff]   ;;  %v7679_v9 = vld [vmem:[%s8448_s11 + $0xd0] sm:$0xff]   ;;  %v1324_v30 = vshrl.u32 %v1323_v24, 7  ;;  %vm6214_vm1 = vcmask 66560  }
  0x52   : > { %v7673_v3 = vld [vmem:[%s8448_s11 + $0x80] sm:$0xff]   ;;  %6840 = vmatpush3.bf16.msra.mxu0 %v7672_v2  ;;  %v7677_v7 = vld [vmem:[%s8448_s11 + $0x88] sm:$0xff]   ;;  %v7680_v10 = vld [vmem:[%s8448_s11 + $0x10] sm:$0xff]   ;;  %v1322_v29 = vunpack.c.0.s8 %v1321_v23  ;;  %s9168_s9 = smov (!%p262_p8, %s6321_s9), 31  ;;  %s9170_s19 = smov (!%p267_p10, %s8343_s19), 1 }
  0x53   : > { %6862 = vmatpush3.bf16.msra.mxu1 %v7673_v3  ;;  %6841 = vmatprep.subr.bf16.mxu0 %v7674_v4  ;;  %v7681_v11 = vld [vmem:[%s8448_s11 + $0x90] sm:$0xff]   ;;  %v7682_v12 = vld [vmem:[%s8448_s11 + $0x58] sm:$0xff]   ;;  %v7686_v16 = vld [vmem:[%s8448_s11 + $0x60] sm:$0xff]   ;;  %s6322_s10 = sshll.u32 %s9168_s9, 3  ;;  %s6323_s24 = sshll.u32 %s9170_s19, 1 }
  0x54   : > { %6863 = vmatprep.subr.bf16.mxu1 %v7675_v5  ;;  %v7683_v13 = vld [vmem:[%s8448_s11 + $0xd8] sm:$0xff]   ;;  %v7687_v17 = vld [vmem:[%s8448_s11 + $0xe0] sm:$0xff]   ;;  %v7690_v20 = vld [vmem:[%s8448_s11 + $0x68] sm:$0xff]   ;;  %v8490_v35 = vsub.s32 %v1322_v29, %v1324_v30  ;;  %s270_s14 = scalar_lea.vmem %s9156_s4, %s6323_s24 }
  0x55   : > { %v7684_v14 = vld [vmem:[%s8448_s11 + $0x18] sm:$0xff]   ;;  %v7688_v18 = vld [vmem:[%s8448_s11 + $0x20] sm:$0xff]   ;;  %v7691_v21 = vld [vmem:[%s8448_s11 + $0xe8] sm:$0xff]  }
  0x56   : > { %6842 = vmatpush3.bf16.msra.mxu0 %v7676_v6  ;;  %v7685_v15 = vld [vmem:[%s8448_s11 + $0x98] sm:$0xff]   ;;  %v7689_v19 = vld [vmem:[%s8448_s11 + $0xa0] sm:$0xff]   ;;  %v7692_v25 = vld [vmem:[%s8448_s11 + $0x28] sm:$0xff]  }
  0x57   : > { %6864 = vmatpush3.bf16.msra.mxu1 %v7677_v7  ;;  %6843 = vmatprep.subr.bf16.mxu0 %v7678_v8  ;;  %v7693_v26 = vld [vmem:[%s8448_s11 + $0xa8] sm:$0xff]   ;;  %v7694_v27 = vld [vmem:[%s8448_s11 + $0x70] sm:$0xff]   ;;  %v7698_v33 = vld [vmem:[%s8448_s11 + $0x78] sm:$0xff]  }
  0x58   : > { %6865 = vmatprep.subr.bf16.mxu1 %v7679_v9  ;;  %v7695_v28 = vld [vmem:[%s8448_s11 + $0xf0] sm:$0xff]   ;;  %v7699_v34 = vld [vmem:[%s8448_s11 + $0xf8] sm:$0xff]   ;;  %v272_v38 = vld [vmem:[%s9152_s0] sm:$0xff] }
  0x59   : > { %v7696_v31 = vld [vmem:[%s8448_s11 + $0x30] sm:$0xff]   ;;  %v7700_v36 = vld [vmem:[%s8448_s11 + $0x38] sm:$0xff]   ;;  %v1319_v39 = vcombine.high %v272_v38, %v272_v38  ;;  %v1326_v40 = vrot.slane %v272_v38, %v8490_v35  ;;  %v7703_v41 = vld [vmem:[%s8448_s11 + $0x140] sm:$0xff]  }
  0x5a   : > { %6844 = vmatpush3.bf16.msra.mxu0 %v7680_v10  ;;  %v7697_v32 = vld [vmem:[%s8448_s11 + $0xb0] sm:$0xff]   ;;  %v7701_v37 = vld [vmem:[%s8448_s11 + $0xb8] sm:$0xff]   ;;  %v7704_v42 = vld [vmem:[%s8448_s11 + $0x1c0] sm:$0xff]  }
  0x5b   : > { %6866 = vmatpush3.bf16.msra.mxu1 %v7681_v11  ;;  %6845 = vmatprep.subr.bf16.mxu0 %v7682_v12  ;;  %v1334_v43 = vcombine.high %v1326_v40, %v1326_v40  ;;  %v1342_v44 = vrot.slane %v1326_v40, %v8490_v35  ;;  %v8502_v45 = vrot.slane %v1319_v39, %v8490_v35  ;;  %v7705_v46 = vld [vmem:[%s8448_s11 + $0x100] sm:$0xff]   ;;  %v7707_v51 = vld [vmem:[%s8448_s11 + $0x148] sm:$0xff]   ;;  %v7711_v58 = vld [vmem:[%s8448_s11 + $0x150] sm:$0xff]  }
  0x5c   : > { %6867 = vmatprep.subr.bf16.mxu1 %v7683_v13  ;;  %v7706_v48 = vld [vmem:[%s8448_s11 + $0x180] sm:$0xff]   ;;  %v7708_v53 = vld [vmem:[%s8448_s11 + $0x1c8] sm:$0xff]   ;;  %v7712_v59 = vld [vmem:[%s8448_s11 + $0x1d0] sm:$0xff]  }
  0x5d   : > { %v1356_v47 = vrot.slane %v1334_v43, %v8490_v35  ;;  %v1335_v49 = vcombine.high %v8502_v45, %v8502_v45  ;;  %v1364_v50 = vcombine.high %v1342_v44, %v1342_v44  ;;  %v7709_v55 = vld [vmem:[%s8448_s11 + $0x108] sm:$0xff]   ;;  %v7713_v60 = vld [vmem:[%s8448_s11 + $0x110] sm:$0xff]   ;;  %v7715_v62 = vld [vmem:[%s8448_s11 + $0x158] sm:$0xff]  }
  0x5e   : > { %6846 = vmatpush3.bf16.msra.mxu0 %v7684_v14  ;;  %v7710_v56 = vld [vmem:[%s8448_s11 + $0x188] sm:$0xff]   ;;  %v7714_v61 = vld [vmem:[%s8448_s11 + $0x190] sm:$0xff]   ;;  %v7716_v63 = vld [vmem:[%s8448_s11 + $0x1d8] sm:$0xff]  }
  0x5f   : > { %6868 = vmatpush3.bf16.msra.mxu1 %v7685_v15  ;;  %6847 = vmatprep.subr.bf16.mxu0 %v7686_v16  ;;  %v1366_v52 = vcombine.high %v1356_v47, %v1356_v47  ;;  %v1363_v54 = vrot.slane %v1335_v49, %v8490_v35  ;;  %v7717_v0 = vld [vmem:[%s8448_s11 + $0x118] sm:$0xff]   ;;  %v7719_v2 = vld [vmem:[%s8448_s11 + $0x160] sm:$0xff]   ;;  %v7723_v6 = vld [vmem:[%s8448_s11 + $0x168] sm:$0xff]  }
  0x60   : > { %6869 = vmatprep.subr.bf16.mxu1 %v7687_v17  ;;  %4879 = vmatprep.mubr.bf16.mxu0 %v1356_v47  ;;  %v7718_v1 = vld [vmem:[%s8448_s11 + $0x198] sm:$0xff]   ;;  %v7720_v3 = vld [vmem:[%s8448_s11 + $0x1e0] sm:$0xff]   ;;  %v7724_v7 = vld [vmem:[%s8448_s11 + $0x1e8] sm:$0xff]  }
  0x61   : > { %4919 = vmatprep.mubr.bf16.mxu1 %v1366_v52  ;;  %v1367_v57 = vcombine.high %v1363_v54, %v1363_v54  ;;  %v7721_v4 = vld [vmem:[%s8448_s11 + $0x120] sm:$0xff]   ;;  %v7725_v8 = vld [vmem:[%s8448_s11 + $0x128] sm:$0xff]   ;;  %v7727_v10 = vld [vmem:[%s8448_s11 + $0x170] sm:$0xff]  }
  0x62   : > { %6848 = vmatpush3.bf16.msra.mxu0 %v7688_v18  ;;  %v7722_v5 = vld [vmem:[%s8448_s11 + $0x1a0] sm:$0xff]   ;;  %v7726_v9 = vld [vmem:[%s8448_s11 + $0x1a8] sm:$0xff]   ;;  %v7728_v11 = vld [vmem:[%s8448_s11 + $0x1f0] sm:$0xff]   ;;  %v1349_v18 = vrot.slane %v8502_v45, %v8490_v35 }
  0x63   : > { %6870 = vmatpush3.bf16.msra.mxu1 %v7689_v19  ;;  %6849 = vmatprep.subr.bf16.mxu0 %v7690_v20  ;;  %v7729_v12 = vld [vmem:[%s8448_s11 + $0x130] sm:$0xff]   ;;  %v7731_v14 = vld [vmem:[%s8448_s11 + $0x178] sm:$0xff]   ;;  %v7735_v19 = vld [vmem:[%s8448_s11 + $0x240] sm:$0xff]  }
  0x64   : > { %6871 = vmatprep.subr.bf16.mxu1 %v7691_v21  ;;  %v7730_v13 = vld [vmem:[%s8448_s11 + $0x1b0] sm:$0xff]   ;;  %v7732_v15 = vld [vmem:[%s8448_s11 + $0x1f8] sm:$0xff]   ;;  %v7736_v20 = vld [vmem:[%s8448_s11 + $0x2c0] sm:$0xff]   ;;  %v1365_v23 = vcombine.high %v1349_v18, %v1349_v18 }
  0x65   : > { %v7733_v16 = vld [vmem:[%s8448_s11 + $0x138] sm:$0xff]   ;;  %v7737_v21 = vld [vmem:[%s8448_s11 + $0x200] sm:$0xff]   ;;  %v7739_v24 = vld [vmem:[%s8448_s11 + $0x248] sm:$0xff]  }
  0x66   : > { %6850 = vmatpush3.bf16.msra.mxu0 %v7692_v25  ;;  %v7734_v17 = vld [vmem:[%s8448_s11 + $0x1b8] sm:$0xff]   ;;  %v7738_v22 = vld [vmem:[%s8448_s11 + $0x280] sm:$0xff]   ;;  %v7740_v25 = vld [vmem:[%s8448_s11 + $0x2c8] sm:$0xff]  }
  0x67   : > { %6872 = vmatpush3.bf16.msra.mxu1 %v7693_v26  ;;  %6851 = vmatprep.subr.bf16.mxu0 %v7694_v27  ;;  %v7741_v26 = vld [vmem:[%s8448_s11 + $0x208] sm:$0xff]   ;;  %v7744_v29 = vld [vmem:[%s8448_s11 + $0x2d0] sm:$0xff]   ;;  %v7752_v38 = vld [vmem:[%s8448_s11 + $0x2e0] sm:$0xff]  }
  0x68   : > { %6873 = vmatprep.subr.bf16.mxu1 %v7695_v28  ;;  %v7742_v27 = vld [vmem:[%s8448_s11 + $0x288] sm:$0xff]   ;;  %v7743_v28 = vld [vmem:[%s8448_s11 + $0x250] sm:$0xff]   ;;  %v7753_v39 = vld [vmem:[%s8448_s11 + $0x220] sm:$0xff]  }
  0x69   : > { %v7745_v30 = vld [vmem:[%s8448_s11 + $0x210] sm:$0xff]   ;;  %v7754_v40 = vld [vmem:[%s8448_s11 + $0x2a0] sm:$0xff]   ;;  %v7757_v43 = vld [vmem:[%s8448_s11 + $0x228] sm:$0xff]  }
  0x6a   : > { %6852 = vmatpush3.bf16.msra.mxu0 %v7696_v31  ;;  %v7746_v31 = vld [vmem:[%s8448_s11 + $0x290] sm:$0xff]   ;;  %v7763_v49 = vld [vmem:[%s8448_s11 + $0x278] sm:$0xff]   ;;  %v273_v52 = vld [vmem:[%s9152_s0 + $0x8] sm:$0xff] }
  0x6b   : > { %6874 = vmatpush3.bf16.msra.mxu1 %v7697_v32  ;;  %6853 = vmatprep.subr.bf16.mxu0 %v7698_v33  ;;  %v7747_v32 = vld [vmem:[%s8448_s11 + $0x258] sm:$0xff]   ;;  %v7759_v45 = vld [vmem:[%s8448_s11 + $0x270] sm:$0xff]  }
  0x6c   : > { %6875 = vmatprep.subr.bf16.mxu1 %v7699_v34  ;;  %v7748_v33 = vld [vmem:[%s8448_s11 + $0x2d8] sm:$0xff]   ;;  %v7761_v47 = vld [vmem:[%s8448_s11 + $0x230] sm:$0xff]  }
  0x6d   : > { %v7749_v34 = vld [vmem:[%s8448_s11 + $0x218] sm:$0xff]  }
  0x6e   : > { %6854 = vmatpush3.bf16.msra.mxu0 %v7700_v36  ;;  %v7750_v36 = vld [vmem:[%s8448_s11 + $0x298] sm:$0xff]  }
  0x6f   : > { %6876 = vmatpush3.bf16.msra.mxu1 %v7701_v37  ;;  %6883 = vmatprep.subr.bf16.mxu0 %v7703_v41  ;;  %v7751_v37 = vld [vmem:[%s8448_s11 + $0x260] sm:$0xff]   ;;  %v7755_v41 = vld [vmem:[%s8448_s11 + $0x268] sm:$0xff]  }
  0x70   : > { %6905 = vmatprep.subr.bf16.mxu1 %v7704_v42  ;;  %v7756_v42 = vld [vmem:[%s8448_s11 + $0x2e8] sm:$0xff]  }
  0x71   : > { %4880 = vmatmul.mubr.bf16.vlgmr.msra.gmra.mrb[0].mxu0 %v1342_v44  ;;  %v7758_v44 = vld [vmem:[%s8448_s11 + $0x2a8] sm:$0xff]  }
  0x72   : > { %6884 = vmatpush3.bf16.msra.mxu0 %v7705_v46  ;;  %4920 = vmatmul.mubr.bf16.vlgmr.msra.gmra.mrb[0].mxu1 %v1364_v50  ;;  %v7760_v46 = vld [vmem:[%s8448_s11 + $0x2f0] sm:$0xff]   ;;  %v7764_v50 = vld [vmem:[%s8448_s11 + $0x2f8] sm:$0xff]  }
  0x73   : > { %6885 = vmatprep.subr.bf16.mxu0 %v7707_v51  ;;  %6906 = vmatpush3.bf16.msra.mxu1 %v7706_v48  ;;  %v7762_v48 = vld [vmem:[%s8448_s11 + $0x2b0] sm:$0xff]   ;;  %v7765_v51 = vld [vmem:[%s8448_s11 + $0x238] sm:$0xff]  }
  0x74   : > { %4959 = vmatprep.mubr.bf16.mxu0 %v1363_v54  ;;  %6907 = vmatprep.subr.bf16.mxu1 %v7708_v53  ;;  %v7766_v53 = vld [vmem:[%s8448_s11 + $0x2b8] sm:$0xff]   ;;  %v1375_v54 = vrot.slane %v273_v52, %v8490_v35 }
  0x75   : > { %4999 = vmatprep.mubr.bf16.mxu1 %v1367_v57 }
  0x76   : > { %6886 = vmatpush3.bf16.msra.mxu0 %v7709_v55  ;;  %v1368_v55 = vcombine.high %v273_v52, %v273_v52  ;;  %v1383_v57 = vcombine.high %v1375_v54, %v1375_v54  ;;  %v7816_v52 = vld [vmem:[%s8448_s11 + $0x460] sm:$0xff]  }
  0x77   : > { %6887 = vmatprep.subr.bf16.mxu0 %v7711_v58  ;;  %6908 = vmatpush3.bf16.msra.mxu1 %v7710_v56  ;;  %v7767_v56 = vld [vmem:[%s8448_s11 + $0x340] sm:$0xff]   ;;  %v1391_v58 = vrot.slane %v1375_v54, %v8490_v35 }
  0x78   : > { %6909 = vmatprep.subr.bf16.mxu1 %v7712_v59  ;;  %v7768_v59 = vld [vmem:[%s8448_s11 + $0x3c0] sm:$0xff]  }
  0x79   : > { %v7818_v54 = vld [vmem:[%s8448_s11 + $0x420] sm:$0xff]  }
  0x7a   : > { %6888 = vmatpush3.bf16.msra.mxu0 %v7713_v60  ;;  %v8580_v60 = vrot.slane %v1368_v55, %v8490_v35  ;;  %v7819_v55 = vld [vmem:[%s8448_s11 + $0x4a0] sm:$0xff]  }
  0x7b   : > { %6889 = vmatprep.subr.bf16.mxu0 %v7715_v62  ;;  %6910 = vmatpush3.bf16.msra.mxu1 %v7714_v61  ;;  %v7769_v61 = vld [vmem:[%s8448_s11 + $0x300] sm:$0xff]   ;;  %v1405_v62 = vrot.slane %v1383_v57, %v8490_v35  ;;  %v7821_v57 = vld [vmem:[%s8448_s11 + $0x4e8] sm:$0xff]  }
  0x7c   : > { %6911 = vmatprep.subr.bf16.mxu1 %v7716_v63  ;;  %v7770_v63 = vld [vmem:[%s8448_s11 + $0x380] sm:$0xff]  }
  0x7e   : > { %6890 = vmatpush3.bf16.msra.mxu0 %v7717_v0  ;;  %v1384_v0 = vcombine.high %v8580_v60, %v8580_v60 }
  0x7f   : > { %6891 = vmatprep.subr.bf16.mxu0 %v7719_v2  ;;  %6912 = vmatpush3.bf16.msra.mxu1 %v7718_v1  ;;  %v1413_v1 = vcombine.high %v1391_v58, %v1391_v58  ;;  %v7771_v2 = vld [vmem:[%s8448_s11 + $0x348] sm:$0xff]  }
  0x80   : > { %6913 = vmatprep.subr.bf16.mxu1 %v7720_v3  ;;  %v1415_v3 = vcombine.high %v1405_v62, %v1405_v62 }
  0x82   : > { %6892 = vmatpush3.bf16.msra.mxu0 %v7721_v4  ;;  %v7772_v4 = vld [vmem:[%s8448_s11 + $0x3c8] sm:$0xff]  }
  0x83   : > { %6893 = vmatprep.subr.bf16.mxu0 %v7723_v6  ;;  %6914 = vmatpush3.bf16.msra.mxu1 %v7722_v5  ;;  %v1412_v5 = vrot.slane %v1384_v0, %v8490_v35  ;;  %v7773_v6 = vld [vmem:[%s8448_s11 + $0x308] sm:$0xff]   ;;  %v7828_v0 = vld [vmem:[%s8448_s11 + $0x478] sm:$0xff]  }
  0x84   : > { %6915 = vmatprep.subr.bf16.mxu1 %v7724_v7  ;;  %v7774_v7 = vld [vmem:[%s8448_s11 + $0x388] sm:$0xff]  }
  0x86   : > { %6894 = vmatpush3.bf16.msra.mxu0 %v7725_v8  ;;  %v1416_v8 = vcombine.high %v1412_v5, %v1412_v5 }
  0x87   : > { %6895 = vmatprep.subr.bf16.mxu0 %v7727_v10  ;;  %6916 = vmatpush3.bf16.msra.mxu1 %v7726_v9  ;;  %v7775_v9 = vld [vmem:[%s8448_s11 + $0x350] sm:$0xff]  }
  0x88   : > { %6917 = vmatprep.subr.bf16.mxu1 %v7728_v11  ;;  %v7776_v10 = vld [vmem:[%s8448_s11 + $0x3d0] sm:$0xff]  }
  0x89   : > { %v7777_v11 = vld [vmem:[%s8448_s11 + $0x310] sm:$0xff]  }
  0x8a   : > { %6896 = vmatpush3.bf16.msra.mxu0 %v7729_v12  ;;  %v7778_v12 = vld [vmem:[%s8448_s11 + $0x390] sm:$0xff]  }
  0x8b   : > { %6897 = vmatprep.subr.bf16.mxu0 %v7731_v14  ;;  %6918 = vmatpush3.bf16.msra.mxu1 %v7730_v13  ;;  %v7779_v13 = vld [vmem:[%s8448_s11 + $0x358] sm:$0xff]  }
  0x8c   : > { %6919 = vmatprep.subr.bf16.mxu1 %v7732_v15  ;;  %v7780_v14 = vld [vmem:[%s8448_s11 + $0x3d8] sm:$0xff]  }
  0x8d   : > { %v7781_v15 = vld [vmem:[%s8448_s11 + $0x318] sm:$0xff]  }
  0x8e   : > { %6898 = vmatpush3.bf16.msra.mxu0 %v7733_v16  ;;  %v7782_v16 = vld [vmem:[%s8448_s11 + $0x398] sm:$0xff]  }
  0x8f   : > { %6927 = vmatprep.subr.bf16.mxu0 %v7735_v19  ;;  %6920 = vmatpush3.bf16.msra.mxu1 %v7734_v17  ;;  %v7783_v17 = vld [vmem:[%s8448_s11 + $0x360] sm:$0xff]  }
  0x90   : > { %6949 = vmatprep.subr.bf16.mxu1 %v7736_v20  ;;  %v7785_v19 = vld [vmem:[%s8448_s11 + $0x320] sm:$0xff]  }
  0x91   : > { %4960 = vmatmul.mubr.bf16.vlgmr.msra.gmra.mrb[4].mxu0 %v1349_v18  ;;  %v7784_v18 = vld [vmem:[%s8448_s11 + $0x3e0] sm:$0xff]  }
  0x92   : > { %6928 = vmatpush3.bf16.msra.mxu0 %v7737_v21  ;;  %5000 = vmatmul.mubr.bf16.vlgmr.msra.gmra.mrb[4].mxu1 %v1365_v23  ;;  %v7786_v20 = vld [vmem:[%s8448_s11 + $0x3a0] sm:$0xff]   ;;  %v7787_v21 = vld [vmem:[%s8448_s11 + $0x368] sm:$0xff]  }
  0x93   : > { %6929 = vmatprep.subr.bf16.mxu0 %v7739_v24  ;;  %6950 = vmatpush3.bf16.msra.mxu1 %v7738_v22  ;;  %v7788_v22 = vld [vmem:[%s8448_s11 + $0x3e8] sm:$0xff]  }
  0x94   : > { %6951 = vmatprep.subr.bf16.mxu1 %v7740_v25  ;;  %5039 = vmatprep.mubr.bf16.mxu0 %v1405_v62  ;;  %v7789_v23 = vld [vmem:[%s8448_s11 + $0x328] sm:$0xff]   ;;  %v7791_v25 = vld [vmem:[%s8448_s11 + $0x370] sm:$0xff]  }
  0x95   : > { %5079 = vmatprep.mubr.bf16.mxu1 %v1415_v3  ;;  %v7790_v24 = vld [vmem:[%s8448_s11 + $0x3a8] sm:$0xff]   ;;  %v7826_v62 = vld [vmem:[%s8448_s11 + $0x430] sm:$0xff]  }
  0x96   : > { %6930 = vmatpush3.bf16.msra.mxu0 %v7741_v26  ;;  %v7792_v26 = vld [vmem:[%s8448_s11 + $0x3f0] sm:$0xff]  }
  0x97   : > { %6931 = vmatprep.subr.bf16.mxu0 %v7743_v28  ;;  %6952 = vmatpush3.bf16.msra.mxu1 %v7742_v27  ;;  %v7793_v27 = vld [vmem:[%s8448_s11 + $0x330] sm:$0xff]  }
  0x98   : > { %6953 = vmatprep.subr.bf16.mxu1 %v7744_v29  ;;  %v7794_v28 = vld [vmem:[%s8448_s11 + $0x3b0] sm:$0xff]   ;;  %v7795_v29 = vld [vmem:[%s8448_s11 + $0x378] sm:$0xff]  }
  0x99   : > { %v274_v3 = vld [vmem:[%s9152_s0 + $0x10] sm:$0xff] }
  0x9a   : > { %6932 = vmatpush3.bf16.msra.mxu0 %v7745_v30  ;;  %v7796_v30 = vld [vmem:[%s8448_s11 + $0x3f8] sm:$0xff]  }
  0x9b   : > { %6933 = vmatprep.subr.bf16.mxu0 %v7747_v32  ;;  %6954 = vmatpush3.bf16.msra.mxu1 %v7746_v31  ;;  %v7797_v31 = vld [vmem:[%s8448_s11 + $0x338] sm:$0xff]  }
  0x9c   : > { %6955 = vmatprep.subr.bf16.mxu1 %v7748_v33  ;;  %v7798_v32 = vld [vmem:[%s8448_s11 + $0x3b8] sm:$0xff]   ;;  %v1398_v33 = vrot.slane %v8580_v60, %v8490_v35  ;;  %v7824_v60 = vld [vmem:[%s8448_s11 + $0x470] sm:$0xff]  }
  0x9e   : > { %6934 = vmatpush3.bf16.msra.mxu0 %v7749_v34  ;;  %v7800_v34 = vld [vmem:[%s8448_s11 + $0x440] sm:$0xff]  }
  0x9f   : > { %6935 = vmatprep.subr.bf16.mxu0 %v7751_v37  ;;  %6956 = vmatpush3.bf16.msra.mxu1 %v7750_v36  ;;  %v7801_v36 = vld [vmem:[%s8448_s11 + $0x4c0] sm:$0xff]  }
  0xa0   : > { %6957 = vmatprep.subr.bf16.mxu1 %v7752_v38  ;;  %v7802_v37 = vld [vmem:[%s8448_s11 + $0x400] sm:$0xff]  }
  0xa1   : > { %v7803_v38 = vld [vmem:[%s8448_s11 + $0x480] sm:$0xff]  }
  0xa2   : > { %6936 = vmatpush3.bf16.msra.mxu0 %v7753_v39  ;;  %v1414_v39 = vcombine.high %v1398_v33, %v1398_v33 }
  0xa3   : > { %6937 = vmatprep.subr.bf16.mxu0 %v7755_v41  ;;  %6958 = vmatpush3.bf16.msra.mxu1 %v7754_v40  ;;  %v7804_v40 = vld [vmem:[%s8448_s11 + $0x448] sm:$0xff]  }
  0xa4   : > { %6959 = vmatprep.subr.bf16.mxu1 %v7756_v42  ;;  %v7805_v41 = vld [vmem:[%s8448_s11 + $0x4c8] sm:$0xff]  }
  0xa5   : > { %v7806_v42 = vld [vmem:[%s8448_s11 + $0x408] sm:$0xff]  }
  0xa6   : > { %6938 = vmatpush3.bf16.msra.mxu0 %v7757_v43  ;;  %v7807_v43 = vld [vmem:[%s8448_s11 + $0x488] sm:$0xff]  }
  0xa7   : > { %6939 = vmatprep.subr.bf16.mxu0 %v7759_v45  ;;  %6960 = vmatpush3.bf16.msra.mxu1 %v7758_v44  ;;  %v7808_v44 = vld [vmem:[%s8448_s11 + $0x450] sm:$0xff]  }
  0xa8   : > { %6961 = vmatprep.subr.bf16.mxu1 %v7760_v46  ;;  %v7809_v45 = vld [vmem:[%s8448_s11 + $0x4d0] sm:$0xff]  }
  0xa9   : > { %v7810_v46 = vld [vmem:[%s8448_s11 + $0x410] sm:$0xff]  }
  0xaa   : > { %6940 = vmatpush3.bf16.msra.mxu0 %v7761_v47  ;;  %v7811_v47 = vld [vmem:[%s8448_s11 + $0x490] sm:$0xff]  }
  0xab   : > { %6941 = vmatprep.subr.bf16.mxu0 %v7763_v49  ;;  %6962 = vmatpush3.bf16.msra.mxu1 %v7762_v48  ;;  %v7812_v48 = vld [vmem:[%s8448_s11 + $0x458] sm:$0xff]  }
  0xac   : > { %6963 = vmatprep.subr.bf16.mxu1 %v7764_v50  ;;  %v7813_v49 = vld [vmem:[%s8448_s11 + $0x4d8] sm:$0xff]  }
  0xad   : > { %v7814_v50 = vld [vmem:[%s8448_s11 + $0x418] sm:$0xff]  }
  0xae   : > { %6942 = vmatpush3.bf16.msra.mxu0 %v7765_v51  ;;  %v7815_v51 = vld [vmem:[%s8448_s11 + $0x498] sm:$0xff]  }
  0xaf   : > { %6971 = vmatprep.subr.bf16.mxu0 %v7767_v56  ;;  %6964 = vmatpush3.bf16.msra.mxu1 %v7766_v53  ;;  %v7817_v53 = vld [vmem:[%s8448_s11 + $0x4e0] sm:$0xff]   ;;  %v7820_v56 = vld [vmem:[%s8448_s11 + $0x468] sm:$0xff]  }
  0xb0   : > { %6993 = vmatprep.subr.bf16.mxu1 %v7768_v59  ;;  %v7823_v59 = vld [vmem:[%s8448_s11 + $0x4a8] sm:$0xff]  }
  0xb1   : > { %5040 = vmatmul.mubr.bf16.vlgmr.msra.gmra.mrb[8].mxu0 %v1391_v58  ;;  %v7822_v58 = vld [vmem:[%s8448_s11 + $0x428] sm:$0xff]  }
  0xb2   : > { %6972 = vmatpush3.bf16.msra.mxu0 %v7769_v61  ;;  %5080 = vmatmul.mubr.bf16.vlgmr.msra.gmra.mrb[8].mxu1 %v1413_v1  ;;  %v7825_v61 = vld [vmem:[%s8448_s11 + $0x4f0] sm:$0xff]   ;;  %v7829_v1 = vld [vmem:[%s8448_s11 + $0x4f8] sm:$0xff]  }
  0xb3   : > { %6973 = vmatprep.subr.bf16.mxu0 %v7771_v2  ;;  %6994 = vmatpush3.bf16.msra.mxu1 %v7770_v63  ;;  %v7827_v63 = vld [vmem:[%s8448_s11 + $0x4b0] sm:$0xff]   ;;  %v7830_v2 = vld [vmem:[%s8448_s11 + $0x438] sm:$0xff]  }
  0xb4   : > { %5119 = vmatprep.mubr.bf16.mxu0 %v1412_v5  ;;  %6995 = vmatprep.subr.bf16.mxu1 %v7772_v4  ;;  %v7831_v4 = vld [vmem:[%s8448_s11 + $0x4b8] sm:$0xff]   ;;  %v1424_v5 = vrot.slane %v274_v3, %v8490_v35 }
  0xb5   : > { %5159 = vmatprep.mubr.bf16.mxu1 %v1416_v8 }
  0xb6   : > { %6974 = vmatpush3.bf16.msra.mxu0 %v7773_v6  ;;  %v1417_v6 = vcombine.high %v274_v3, %v274_v3  ;;  %v1432_v8 = vcombine.high %v1424_v5, %v1424_v5  ;;  %v7881_v3 = vld [vmem:[%s8448_s11 + $0x660] sm:$0xff]  }
  0xb7   : > { %6975 = vmatprep.subr.bf16.mxu0 %v7775_v9  ;;  %6996 = vmatpush3.bf16.msra.mxu1 %v7774_v7  ;;  %v7832_v7 = vld [vmem:[%s8448_s11 + $0x540] sm:$0xff]   ;;  %v1440_v9 = vrot.slane %v1424_v5, %v8490_v35 }
  0xb8   : > { %6997 = vmatprep.subr.bf16.mxu1 %v7776_v10  ;;  %v7833_v10 = vld [vmem:[%s8448_s11 + $0x5c0] sm:$0xff]  }
  0xb9   : > { %v7883_v5 = vld [vmem:[%s8448_s11 + $0x620] sm:$0xff]  }
  0xba   : > { %6976 = vmatpush3.bf16.msra.mxu0 %v7777_v11  ;;  %v8658_v11 = vrot.slane %v1417_v6, %v8490_v35  ;;  %v7884_v6 = vld [vmem:[%s8448_s11 + $0x6a0] sm:$0xff]  }
  0xbb   : > { %6977 = vmatprep.subr.bf16.mxu0 %v7779_v13  ;;  %6998 = vmatpush3.bf16.msra.mxu1 %v7778_v12  ;;  %v7834_v12 = vld [vmem:[%s8448_s11 + $0x500] sm:$0xff]   ;;  %v1454_v13 = vrot.slane %v1432_v8, %v8490_v35  ;;  %v7886_v8 = vld [vmem:[%s8448_s11 + $0x6e8] sm:$0xff]  }
  0xbc   : > { %6999 = vmatprep.subr.bf16.mxu1 %v7780_v14  ;;  %v7835_v14 = vld [vmem:[%s8448_s11 + $0x580] sm:$0xff]  }
  0xbe   : > { %6978 = vmatpush3.bf16.msra.mxu0 %v7781_v15  ;;  %v1433_v15 = vcombine.high %v8658_v11, %v8658_v11 }
  0xbf   : > { %6979 = vmatprep.subr.bf16.mxu0 %v7783_v17  ;;  %7000 = vmatpush3.bf16.msra.mxu1 %v7782_v16  ;;  %v1462_v16 = vcombine.high %v1440_v9, %v1440_v9  ;;  %v7836_v17 = vld [vmem:[%s8448_s11 + $0x548] sm:$0xff]  }
  0xc0   : > { %7001 = vmatprep.subr.bf16.mxu1 %v7784_v18  ;;  %v1464_v18 = vcombine.high %v1454_v13, %v1454_v13 }
  0xc2   : > { %6980 = vmatpush3.bf16.msra.mxu0 %v7785_v19  ;;  %v7837_v19 = vld [vmem:[%s8448_s11 + $0x5c8] sm:$0xff]  }
  0xc3   : > { %6981 = vmatprep.subr.bf16.mxu0 %v7787_v21  ;;  %7002 = vmatpush3.bf16.msra.mxu1 %v7786_v20  ;;  %v1461_v20 = vrot.slane %v1433_v15, %v8490_v35  ;;  %v7838_v21 = vld [vmem:[%s8448_s11 + $0x508] sm:$0xff]   ;;  %v7893_v15 = vld [vmem:[%s8448_s11 + $0x678] sm:$0xff]  }
  0xc4   : > { %7003 = vmatprep.subr.bf16.mxu1 %v7788_v22  ;;  %v7839_v22 = vld [vmem:[%s8448_s11 + $0x588] sm:$0xff]  }
  0xc6   : > { %6982 = vmatpush3.bf16.msra.mxu0 %v7789_v23  ;;  %v1465_v23 = vcombine.high %v1461_v20, %v1461_v20 }
  0xc7   : > { %6983 = vmatprep.subr.bf16.mxu0 %v7791_v25  ;;  %7004 = vmatpush3.bf16.msra.mxu1 %v7790_v24  ;;  %v7840_v24 = vld [vmem:[%s8448_s11 + $0x550] sm:$0xff]  }
  0xc8   : > { %7005 = vmatprep.subr.bf16.mxu1 %v7792_v26  ;;  %v7841_v25 = vld [vmem:[%s8448_s11 + $0x5d0] sm:$0xff]  }
  0xc9   : > { %v7842_v26 = vld [vmem:[%s8448_s11 + $0x510] sm:$0xff]  }
  0xca   : > { %6984 = vmatpush3.bf16.msra.mxu0 %v7793_v27  ;;  %v7843_v27 = vld [vmem:[%s8448_s11 + $0x590] sm:$0xff]  }
  0xcb   : > { %6985 = vmatprep.subr.bf16.mxu0 %v7795_v29  ;;  %7006 = vmatpush3.bf16.msra.mxu1 %v7794_v28  ;;  %v7844_v28 = vld [vmem:[%s8448_s11 + $0x558] sm:$0xff]  }
  0xcc   : > { %7007 = vmatprep.subr.bf16.mxu1 %v7796_v30  ;;  %v7845_v29 = vld [vmem:[%s8448_s11 + $0x5d8] sm:$0xff]  }
  0xcd   : > { %v7846_v30 = vld [vmem:[%s8448_s11 + $0x518] sm:$0xff]  }
  0xce   : > { %6986 = vmatpush3.bf16.msra.mxu0 %v7797_v31  ;;  %v7847_v31 = vld [vmem:[%s8448_s11 + $0x598] sm:$0xff]  }
  0xcf   : > { %7015 = vmatprep.subr.bf16.mxu0 %v7800_v34  ;;  %7008 = vmatpush3.bf16.msra.mxu1 %v7798_v32  ;;  %v7848_v32 = vld [vmem:[%s8448_s11 + $0x560] sm:$0xff]  }
  0xd0   : > { %7037 = vmatprep.subr.bf16.mxu1 %v7801_v36  ;;  %v7850_v34 = vld [vmem:[%s8448_s11 + $0x520] sm:$0xff]  }
  0xd1   : > { %5120 = vmatmul.mubr.bf16.vlgmr.msra.gmra.mrb[12].mxu0 %v1398_v33  ;;  %v7849_v33 = vld [vmem:[%s8448_s11 + $0x5e0] sm:$0xff]  }
  0xd2   : > { %7016 = vmatpush3.bf16.msra.mxu0 %v7802_v37  ;;  %5160 = vmatmul.mubr.bf16.vlgmr.msra.gmra.mrb[12].mxu1 %v1414_v39  ;;  %v7851_v36 = vld [vmem:[%s8448_s11 + $0x5a0] sm:$0xff]   ;;  %v7852_v37 = vld [vmem:[%s8448_s11 + $0x568] sm:$0xff]  }
  0xd3   : > { %7017 = vmatprep.subr.bf16.mxu0 %v7804_v40  ;;  %7038 = vmatpush3.bf16.msra.mxu1 %v7803_v38  ;;  %v7853_v38 = vld [vmem:[%s8448_s11 + $0x5e8] sm:$0xff]  }
  0xd4   : > { %7039 = vmatprep.subr.bf16.mxu1 %v7805_v41  ;;  %5199 = vmatprep.mubr.bf16.mxu0 %v1454_v13  ;;  %v7854_v39 = vld [vmem:[%s8448_s11 + $0x528] sm:$0xff]   ;;  %v7856_v41 = vld [vmem:[%s8448_s11 + $0x570] sm:$0xff]  }
  0xd5   : > { %5239 = vmatprep.mubr.bf16.mxu1 %v1464_v18  ;;  %v7855_v40 = vld [vmem:[%s8448_s11 + $0x5a8] sm:$0xff]   ;;  %v7891_v13 = vld [vmem:[%s8448_s11 + $0x630] sm:$0xff]   ;;  %v275_v18 = vld [vmem:[%s9152_s0 + $0x18] sm:$0xff] }
  0xd6   : > { %7018 = vmatpush3.bf16.msra.mxu0 %v7806_v42  ;;  %v7857_v42 = vld [vmem:[%s8448_s11 + $0x5f0] sm:$0xff]  }
  0xd7   : > { %7019 = vmatprep.subr.bf16.mxu0 %v7808_v44  ;;  %7040 = vmatpush3.bf16.msra.mxu1 %v7807_v43  ;;  %v7858_v43 = vld [vmem:[%s8448_s11 + $0x530] sm:$0xff]  }
  0xd8   : > { %7041 = vmatprep.subr.bf16.mxu1 %v7809_v45  ;;  %v7859_v44 = vld [vmem:[%s8448_s11 + $0x5b0] sm:$0xff]   ;;  %v7860_v45 = vld [vmem:[%s8448_s11 + $0x578] sm:$0xff]  }
  0xda   : > { %7020 = vmatpush3.bf16.msra.mxu0 %v7810_v46  ;;  %v7861_v46 = vld [vmem:[%s8448_s11 + $0x5f8] sm:$0xff]  }
  0xdb   : > { %7021 = vmatprep.subr.bf16.mxu0 %v7812_v48  ;;  %7042 = vmatpush3.bf16.msra.mxu1 %v7811_v47  ;;  %v7862_v47 = vld [vmem:[%s8448_s11 + $0x538] sm:$0xff]  }
  0xdc   : > { %7043 = vmatprep.subr.bf16.mxu1 %v7813_v49  ;;  %v7863_v48 = vld [vmem:[%s8448_s11 + $0x5b8] sm:$0xff]   ;;  %v1447_v49 = vrot.slane %v8658_v11, %v8490_v35  ;;  %v7889_v11 = vld [vmem:[%s8448_s11 + $0x670] sm:$0xff]  }
  0xde   : > { %7022 = vmatpush3.bf16.msra.mxu0 %v7814_v50  ;;  %v7865_v50 = vld [vmem:[%s8448_s11 + $0x640] sm:$0xff]  }
  0xdf   : > { %7023 = vmatprep.subr.bf16.mxu0 %v7816_v52  ;;  %7044 = vmatpush3.bf16.msra.mxu1 %v7815_v51  ;;  %v7866_v51 = vld [vmem:[%s8448_s11 + $0x6c0] sm:$0xff]  }
  0xe0   : > { %7045 = vmatprep.subr.bf16.mxu1 %v7817_v53  ;;  %v7867_v52 = vld [vmem:[%s8448_s11 + $0x600] sm:$0xff]  }
  0xe1   : > { %v7868_v53 = vld [vmem:[%s8448_s11 + $0x680] sm:$0xff]  }
  0xe2   : > { %7024 = vmatpush3.bf16.msra.mxu0 %v7818_v54  ;;  %v1463_v54 = vcombine.high %v1447_v49, %v1447_v49 }
  0xe3   : > { %7025 = vmatprep.subr.bf16.mxu0 %v7820_v56  ;;  %7046 = vmatpush3.bf16.msra.mxu1 %v7819_v55  ;;  %v7869_v55 = vld [vmem:[%s8448_s11 + $0x648] sm:$0xff]  }
  0xe4   : > { %7047 = vmatprep.subr.bf16.mxu1 %v7821_v57  ;;  %v7870_v56 = vld [vmem:[%s8448_s11 + $0x6c8] sm:$0xff]  }
  0xe5   : > { %v7871_v57 = vld [vmem:[%s8448_s11 + $0x608] sm:$0xff]  }
  0xe6   : > { %7026 = vmatpush3.bf16.msra.mxu0 %v7822_v58  ;;  %v7872_v58 = vld [vmem:[%s8448_s11 + $0x688] sm:$0xff]  }
  0xe7   : > { %7027 = vmatprep.subr.bf16.mxu0 %v7824_v60  ;;  %7048 = vmatpush3.bf16.msra.mxu1 %v7823_v59  ;;  %v7873_v59 = vld [vmem:[%s8448_s11 + $0x650] sm:$0xff]  }
  0xe8   : > { %7049 = vmatprep.subr.bf16.mxu1 %v7825_v61  ;;  %v7874_v60 = vld [vmem:[%s8448_s11 + $0x6d0] sm:$0xff]  }
  0xe9   : > { %v7875_v61 = vld [vmem:[%s8448_s11 + $0x610] sm:$0xff]  }
  0xea   : > { %7028 = vmatpush3.bf16.msra.mxu0 %v7826_v62  ;;  %v7876_v62 = vld [vmem:[%s8448_s11 + $0x690] sm:$0xff]  }
  0xeb   : > { %7029 = vmatprep.subr.bf16.mxu0 %v7828_v0  ;;  %7050 = vmatpush3.bf16.msra.mxu1 %v7827_v63  ;;  %v7877_v63 = vld [vmem:[%s8448_s11 + $0x658] sm:$0xff]  }
  0xec   : > { %7051 = vmatprep.subr.bf16.mxu1 %v7829_v1  ;;  %v7878_v0 = vld [vmem:[%s8448_s11 + $0x6d8] sm:$0xff]  }
  0xed   : > { %v7879_v1 = vld [vmem:[%s8448_s11 + $0x618] sm:$0xff]  }
  0xee   : > { %7030 = vmatpush3.bf16.msra.mxu0 %v7830_v2  ;;  %v7880_v2 = vld [vmem:[%s8448_s11 + $0x698] sm:$0xff]  }
  0xef   : > { %7059 = vmatprep.subr.bf16.mxu0 %v7832_v7  ;;  %7052 = vmatpush3.bf16.msra.mxu1 %v7831_v4  ;;  %v7882_v4 = vld [vmem:[%s8448_s11 + $0x6e0] sm:$0xff]   ;;  %v7885_v7 = vld [vmem:[%s8448_s11 + $0x668] sm:$0xff]  }
  0xf0   : > { %7081 = vmatprep.subr.bf16.mxu1 %v7833_v10  ;;  %v7888_v10 = vld [vmem:[%s8448_s11 + $0x6a8] sm:$0xff]  }
  0xf1   : > { %5200 = vmatmul.mubr.bf16.vlgmr.msra.gmra.mrb[16].mxu0 %v1440_v9  ;;  %v7887_v9 = vld [vmem:[%s8448_s11 + $0x628] sm:$0xff]  }
  0xf2   : > { %7060 = vmatpush3.bf16.msra.mxu0 %v7834_v12  ;;  %5240 = vmatmul.mubr.bf16.vlgmr.msra.gmra.mrb[16].mxu1 %v1462_v16  ;;  %v7890_v12 = vld [vmem:[%s8448_s11 + $0x6f0] sm:$0xff]   ;;  %v7894_v16 = vld [vmem:[%s8448_s11 + $0x6f8] sm:$0xff]  }
  0xf3   : > { %7061 = vmatprep.subr.bf16.mxu0 %v7836_v17  ;;  %7082 = vmatpush3.bf16.msra.mxu1 %v7835_v14  ;;  %v7892_v14 = vld [vmem:[%s8448_s11 + $0x6b0] sm:$0xff]   ;;  %v7895_v17 = vld [vmem:[%s8448_s11 + $0x638] sm:$0xff]  }
  0xf4   : > { %5279 = vmatprep.mubr.bf16.mxu0 %v1461_v20  ;;  %7083 = vmatprep.subr.bf16.mxu1 %v7837_v19  ;;  %v1473_v19 = vrot.slane %v275_v18, %v8490_v35  ;;  %v7897_v20 = vld [vmem:[%s8448_s11 + $0x740] sm:$0xff]  }
  0xf5   : > { %5319 = vmatprep.mubr.bf16.mxu1 %v1465_v23 }
  0xf6   : > { %7062 = vmatpush3.bf16.msra.mxu0 %v7838_v21  ;;  %v1466_v21 = vcombine.high %v275_v18, %v275_v18  ;;  %v1481_v23 = vcombine.high %v1473_v19, %v1473_v19 }
  0xf7   : > { %7063 = vmatprep.subr.bf16.mxu0 %v7840_v24  ;;  %7084 = vmatpush3.bf16.msra.mxu1 %v7839_v22  ;;  %v7896_v22 = vld [vmem:[%s8448_s11 + $0x6b8] sm:$0xff]   ;;  %v1489_v24 = vrot.slane %v1473_v19, %v8490_v35  ;;  %v7934_v19 = vld [vmem:[%s8448_s11 + $0x848] sm:$0xff]  }
  0xf8   : > { %7085 = vmatprep.subr.bf16.mxu1 %v7841_v25  ;;  %v7898_v25 = vld [vmem:[%s8448_s11 + $0x7c0] sm:$0xff]  }
  0xfa   : > { %7064 = vmatpush3.bf16.msra.mxu0 %v7842_v26  ;;  %v8736_v26 = vrot.slane %v1466_v21, %v8490_v35  ;;  %v7936_v21 = vld [vmem:[%s8448_s11 + $0x808] sm:$0xff]  }
  0xfb   : > { %7065 = vmatprep.subr.bf16.mxu0 %v7844_v28  ;;  %7086 = vmatpush3.bf16.msra.mxu1 %v7843_v27  ;;  %v1503_v27 = vrot.slane %v1481_v23, %v8490_v35  ;;  %v7899_v28 = vld [vmem:[%s8448_s11 + $0x700] sm:$0xff]   ;;  %v7938_v23 = vld [vmem:[%s8448_s11 + $0x850] sm:$0xff]  }
  0xfc   : > { %7087 = vmatprep.subr.bf16.mxu1 %v7845_v29  ;;  %v1482_v29 = vcombine.high %v8736_v26, %v8736_v26 }
  0xfe   : > { %7066 = vmatpush3.bf16.msra.mxu0 %v7846_v30  ;;  %v1511_v30 = vcombine.high %v1489_v24, %v1489_v24 }
  0xff   : > { %7067 = vmatprep.subr.bf16.mxu0 %v7848_v32  ;;  %7088 = vmatpush3.bf16.msra.mxu1 %v7847_v31  ;;  %v7901_v31 = vld [vmem:[%s8448_s11 + $0x748] sm:$0xff]   ;;  %v1513_v32 = vcombine.high %v1503_v27, %v1503_v27 }
 0x100   : > { %7089 = vmatprep.subr.bf16.mxu1 %v7849_v33  ;;  %v7900_v33 = vld [vmem:[%s8448_s11 + $0x780] sm:$0xff]  }
 0x102   : > { %7068 = vmatpush3.bf16.msra.mxu0 %v7850_v34  ;;  %v1510_v34 = vrot.slane %v1482_v29, %v8490_v35  ;;  %v7944_v29 = vld [vmem:[%s8448_s11 + $0x818] sm:$0xff]  }
 0x103   : > { %7069 = vmatprep.subr.bf16.mxu0 %v7852_v37  ;;  %7090 = vmatpush3.bf16.msra.mxu1 %v7851_v36  ;;  %v7902_v36 = vld [vmem:[%s8448_s11 + $0x7c8] sm:$0xff]  }
 0x104   : > { %7091 = vmatprep.subr.bf16.mxu1 %v7853_v38  ;;  %v7903_v37 = vld [vmem:[%s8448_s11 + $0x708] sm:$0xff]   ;;  %v1514_v38 = vcombine.high %v1510_v34, %v1510_v34 }
 0x106   : > { %7070 = vmatpush3.bf16.msra.mxu0 %v7854_v39  ;;  %v7905_v39 = vld [vmem:[%s8448_s11 + $0x750] sm:$0xff]  }
 0x107   : > { %7071 = vmatprep.subr.bf16.mxu0 %v7856_v41  ;;  %7092 = vmatpush3.bf16.msra.mxu1 %v7855_v40  ;;  %v7904_v40 = vld [vmem:[%s8448_s11 + $0x788] sm:$0xff]   ;;  %v7906_v41 = vld [vmem:[%s8448_s11 + $0x7d0] sm:$0xff]  }
 0x108   : > { %7093 = vmatprep.subr.bf16.mxu1 %v7857_v42  ;;  %v7907_v42 = vld [vmem:[%s8448_s11 + $0x710] sm:$0xff]  }
 0x10a   : > { %7072 = vmatpush3.bf16.msra.mxu0 %v7858_v43  ;;  %v7909_v43 = vld [vmem:[%s8448_s11 + $0x758] sm:$0xff]  }
 0x10b   : > { %7073 = vmatprep.subr.bf16.mxu0 %v7860_v45  ;;  %7094 = vmatpush3.bf16.msra.mxu1 %v7859_v44  ;;  %v7908_v44 = vld [vmem:[%s8448_s11 + $0x790] sm:$0xff]   ;;  %v7910_v45 = vld [vmem:[%s8448_s11 + $0x7d8] sm:$0xff]  }
 0x10c   : > { %7095 = vmatprep.subr.bf16.mxu1 %v7861_v46  ;;  %v7911_v46 = vld [vmem:[%s8448_s11 + $0x718] sm:$0xff]  }
 0x10e   : > { %7074 = vmatpush3.bf16.msra.mxu0 %v7862_v47  ;;  %v7913_v47 = vld [vmem:[%s8448_s11 + $0x760] sm:$0xff]  }
 0x10f   : > { %7103 = vmatprep.subr.bf16.mxu0 %v7865_v50  ;;  %7096 = vmatpush3.bf16.msra.mxu1 %v7863_v48  ;;  %v7912_v48 = vld [vmem:[%s8448_s11 + $0x798] sm:$0xff]   ;;  %v7915_v50 = vld [vmem:[%s8448_s11 + $0x720] sm:$0xff]  }
 0x110   : > { %7125 = vmatprep.subr.bf16.mxu1 %v7866_v51  ;;  %v7917_v51 = vld [vmem:[%s8448_s11 + $0x768] sm:$0xff]  }
 0x111   : > { %5280 = vmatmul.mubr.bf16.vlgmr.msra.gmra.mrb[20].mxu0 %v1447_v49  ;;  %v7914_v49 = vld [vmem:[%s8448_s11 + $0x7e0] sm:$0xff]  }
 0x112   : > { %7104 = vmatpush3.bf16.msra.mxu0 %v7867_v52  ;;  %5320 = vmatmul.mubr.bf16.vlgmr.msra.gmra.mrb[20].mxu1 %v1463_v54  ;;  %v7916_v52 = vld [vmem:[%s8448_s11 + $0x7a0] sm:$0xff]  }
 0x113   : > { %7105 = vmatprep.subr.bf16.mxu0 %v7869_v55  ;;  %7126 = vmatpush3.bf16.msra.mxu1 %v7868_v53  ;;  %v7918_v53 = vld [vmem:[%s8448_s11 + $0x7e8] sm:$0xff]   ;;  %v6324_v54 = vld [vmem:[%s228_s5] ss:$0 sm:$0xff]  ;;  %s9116_s5 = scalar_lea.vmem %s9155_s3, %s6322_s10 }
 0x114   : > { %7127 = vmatprep.subr.bf16.mxu1 %v7870_v56  ;;  %5359 = vmatprep.mubr.bf16.mxu0 %v1503_v27  ;;  %v7919_v55 = vld [vmem:[%s8448_s11 + $0x728] sm:$0xff]   ;;  %v7942_v27 = vld [vmem:[%s8448_s11 + $0x858] sm:$0xff]  }
 0x115   : > { %5399 = vmatprep.mubr.bf16.mxu1 %v1513_v32  ;;  %v7947_v32 = vld [vmem:[%s8448_s11 + $0x8e0] sm:$0xff]  }
 0x116   : > { %7106 = vmatpush3.bf16.msra.mxu0 %v7871_v57  ;;  %v7921_v57 = vld [vmem:[%s8448_s11 + $0x770] sm:$0xff]  }
 0x117   : > { %7107 = vmatprep.subr.bf16.mxu0 %v7873_v59  ;;  %7128 = vmatpush3.bf16.msra.mxu1 %v7872_v58  ;;  %v7920_v59 = vld [vmem:[%s8448_s11 + $0x7a8] sm:$0xff]  }
 0x118   : > { %7129 = vmatprep.subr.bf16.mxu1 %v7874_v60 }
 0x11a   : > { %7108 = vmatpush3.bf16.msra.mxu0 %v7875_v61 }
 0x11b   : > { %7109 = vmatprep.subr.bf16.mxu0 %v7877_v63  ;;  %7130 = vmatpush3.bf16.msra.mxu1 %v7876_v62  ;;  %v7922_v63 = vld [vmem:[%s8448_s11 + $0x7f0] sm:$0xff]  }
 0x11c   : > { %7131 = vmatprep.subr.bf16.mxu1 %v7878_v0  ;;  %v7923_v0 = vld [vmem:[%s8448_s11 + $0x730] sm:$0xff]  }
 0x11e   : > { %7110 = vmatpush3.bf16.msra.mxu0 %v7879_v1 }
 0x11f   : > { %7111 = vmatprep.subr.bf16.mxu0 %v7881_v3  ;;  %7132 = vmatpush3.bf16.msra.mxu1 %v7880_v2  ;;  %v7924_v3 = vld [vmem:[%s8448_s11 + $0x7b0] sm:$0xff]  }
 0x120   : > { %7133 = vmatprep.subr.bf16.mxu1 %v7882_v4 }
 0x122   : > { %7112 = vmatpush3.bf16.msra.mxu0 %v7883_v5 }
 0x123   : > { %7113 = vmatprep.subr.bf16.mxu0 %v7885_v7  ;;  %7134 = vmatpush3.bf16.msra.mxu1 %v7884_v6  ;;  %v7925_v7 = vld [vmem:[%s8448_s11 + $0x778] sm:$0xff]  }
 0x124   : > { %7135 = vmatprep.subr.bf16.mxu1 %v7886_v8 }
 0x126   : > { %7114 = vmatpush3.bf16.msra.mxu0 %v7887_v9  ;;  %v7926_v9 = vld [vmem:[%s8448_s11 + $0x7f8] sm:$0xff]  }
 0x127   : > { %7115 = vmatprep.subr.bf16.mxu0 %v7889_v11  ;;  %7136 = vmatpush3.bf16.msra.mxu1 %v7888_v10  ;;  %v7927_v11 = vld [vmem:[%s8448_s11 + $0x738] sm:$0xff]  }
 0x128   : > { %7137 = vmatprep.subr.bf16.mxu1 %v7890_v12  ;;  %v7928_v12 = vld [vmem:[%s8448_s11 + $0x7b8] sm:$0xff]  }
 0x12a   : > { %7116 = vmatpush3.bf16.msra.mxu0 %v7891_v13  ;;  %v1496_v13 = vrot.slane %v8736_v26, %v8490_v35  ;;  %v7941_v26 = vld [vmem:[%s8448_s11 + $0x890] sm:$0xff]  }
 0x12b   : > { %7117 = vmatprep.subr.bf16.mxu0 %v7893_v15  ;;  %7138 = vmatpush3.bf16.msra.mxu1 %v7892_v14  ;;  %v7930_v14 = vld [vmem:[%s8448_s11 + $0x840] sm:$0xff]  }
 0x12c   : > { %7139 = vmatprep.subr.bf16.mxu1 %v7894_v16  ;;  %v7931_v15 = vld [vmem:[%s8448_s11 + $0x8c0] sm:$0xff]   ;;  %v1512_v18 = vcombine.high %v1496_v13, %v1496_v13 }
 0x12d   : > { %v7932_v16 = vld [vmem:[%s8448_s11 + $0x800] sm:$0xff]  }
 0x12e   : > { %7118 = vmatpush3.bf16.msra.mxu0 %v7895_v17  ;;  %v7933_v17 = vld [vmem:[%s8448_s11 + $0x880] sm:$0xff]  }
 0x12f   : > { %7147 = vmatprep.subr.bf16.mxu0 %v7897_v20  ;;  %7140 = vmatpush3.bf16.msra.mxu1 %v7896_v22  ;;  %v7935_v20 = vld [vmem:[%s8448_s11 + $0x8c8] sm:$0xff]  }
 0x130   : > { %7169 = vmatprep.subr.bf16.mxu1 %v7898_v25  ;;  %v7937_v22 = vld [vmem:[%s8448_s11 + $0x888] sm:$0xff]   ;;  %v7940_v25 = vld [vmem:[%s8448_s11 + $0x810] sm:$0xff]  }
 0x131   : > { %5360 = vmatmul.mubr.bf16.vlgmr.msra.gmra.mrb[24].mxu0 %v1489_v24  ;;  %v7939_v24 = vld [vmem:[%s8448_s11 + $0x8d0] sm:$0xff]  }
 0x132   : > { %7148 = vmatpush3.bf16.msra.mxu0 %v7899_v28  ;;  %5400 = vmatmul.mubr.bf16.vlgmr.msra.gmra.mrb[24].mxu1 %v1511_v30  ;;  %v7943_v28 = vld [vmem:[%s8448_s11 + $0x8d8] sm:$0xff]  }
 0x133   : > { %7149 = vmatprep.subr.bf16.mxu0 %v7901_v31  ;;  %7170 = vmatpush3.bf16.msra.mxu1 %v7900_v33  ;;  %v7945_v30 = vld [vmem:[%s8448_s11 + $0x898] sm:$0xff]   ;;  %v7946_v31 = vld [vmem:[%s8448_s11 + $0x860] sm:$0xff]  }
 0x134   : > { %5439 = vmatprep.mubr.bf16.mxu0 %v1510_v34  ;;  %7171 = vmatprep.subr.bf16.mxu1 %v7902_v36  ;;  %v7948_v33 = vld [vmem:[%s8448_s11 + $0x820] sm:$0xff]   ;;  %v7950_v36 = vld [vmem:[%s8448_s11 + $0x868] sm:$0xff]  }
 0x135   : > { %5479 = vmatprep.mubr.bf16.mxu1 %v1514_v38  ;;  %v7949_v34 = vld [vmem:[%s8448_s11 + $0x8a0] sm:$0xff]   ;;  %v7952_v38 = vld [vmem:[%s8448_s11 + $0x828] sm:$0xff]  }
 0x136   : > { %7150 = vmatpush3.bf16.msra.mxu0 %v7903_v37  ;;  %v7951_v37 = vld [vmem:[%s8448_s11 + $0x8e8] sm:$0xff]  }
 0x137   : > { %7151 = vmatprep.subr.bf16.mxu0 %v7905_v39  ;;  %7172 = vmatpush3.bf16.msra.mxu1 %v7904_v40  ;;  %v7953_v39 = vld [vmem:[%s8448_s11 + $0x8a8] sm:$0xff]  }
 0x138   : > { %7173 = vmatprep.subr.bf16.mxu1 %v7906_v41  ;;  %v7954_v41 = vld [vmem:[%s8448_s11 + $0x870] sm:$0xff]  }
 0x13a   : > { %7152 = vmatpush3.bf16.msra.mxu0 %v7907_v42 }
 0x13b   : > { %7153 = vmatprep.subr.bf16.mxu0 %v7909_v43  ;;  %7174 = vmatpush3.bf16.msra.mxu1 %v7908_v44  ;;  %v7955_v43 = vld [vmem:[%s8448_s11 + $0x8f0] sm:$0xff]  }
 0x13c   : > { %7175 = vmatprep.subr.bf16.mxu1 %v7910_v45 }
 0x13e   : > { %7154 = vmatpush3.bf16.msra.mxu0 %v7911_v46 }
 0x13f   : > { %7155 = vmatprep.subr.bf16.mxu0 %v7913_v47  ;;  %7176 = vmatpush3.bf16.msra.mxu1 %v7912_v48 }
 0x140   : > { %7177 = vmatprep.subr.bf16.mxu1 %v7914_v49  ;;  %v7956_v49 = vld [vmem:[%s8448_s11 + $0x830] sm:$0xff]  }
 0x142   : > { %7156 = vmatpush3.bf16.msra.mxu0 %v7915_v50  ;;  %v7957_v50 = vld [vmem:[%s8448_s11 + $0x8b0] sm:$0xff]  }
 0x143   : > { %7157 = vmatprep.subr.bf16.mxu0 %v7917_v51  ;;  %7178 = vmatpush3.bf16.msra.mxu1 %v7916_v52 }
 0x144   : > { %v6855_v56 = vpop.f32.mrb[0].mxu0  ;;  %7179 = vmatprep.subr.bf16.mxu1 %v7918_v53 }
 0x145   : > { %v6856_v58 = vpop.f32.mrb[1].mxu0  ;;  %v6877_v60 = vpop.f32.mrb[0].mxu1 }
 0x146   : > { %v6857_v61 = vadd.f32 %v6856_v58, %v6855_v56  ;;  %v6858_v62 = vpop.f32.mrb[2].mxu0  ;;  %v6878_v1 = vpop.f32.mrb[1].mxu1  ;;  %7158 = vmatpush3.bf16.msra.mxu0 %v7919_v55  ;;  %v7959_v56 = vld [vmem:[%s8448_s11 + $0x8f8] sm:$0xff]  }
 0x147   : > { %v6859_v2 = vpop.f32.mrb[3].mxu0  ;;  %v6879_v5 = vadd.f32 %v6878_v1, %v6877_v60  ;;  %v6880_v6 = vpop.f32.mrb[2].mxu1  ;;  %7159 = vmatprep.subr.bf16.mxu0 %v7921_v57  ;;  %7180 = vmatpush3.bf16.msra.mxu1 %v7920_v59  ;;  %v7960_v58 = vld [vmem:[%s8448_s11 + $0x838] sm:$0xff]   ;;  %v276_v59 = vld [vmem:[%s9152_s0 + $0x20] sm:$0xff] }
 0x148   : > { %v4882_v4 = vadd.f32 %v6857_v61, %v6324_v54  ;;  %v6881_v8 = vpop.f32.mrb[3].mxu1  ;;  %7181 = vmatprep.subr.bf16.mxu1 %v7922_v63  ;;  %v7958_v54 = vld [vmem:[%s8448_s11 + $0x878] sm:$0xff]   ;;  %v1522_v60 = vrot.slane %v276_v59, %v8490_v35  ;;  %v7962_v61 = vld [vmem:[%s8448_s11 + $0x940] sm:$0xff]   ;;  %v1515_v62 = vcombine.high %v276_v59, %v276_v59  ;;  %v7999_v59 = vld [vmem:[%s8448_s11 + $0xa48] sm:$0xff]  }
 0x149   : > { %v7961_v63 = vld [vmem:[%s8448_s11 + $0x8b8] sm:$0xff]   ;;  %v7963_v2 = vld [vmem:[%s8448_s11 + $0x9c0] sm:$0xff]  }
 0x14a   : > { %v8772_v10 = vadd.f32 %v6879_v5, %v4882_v4  ;;  %7160 = vmatpush3.bf16.msra.mxu0 %v7923_v0  ;;  %v1530_v0 = vcombine.high %v1522_v60, %v1522_v60  ;;  %v1538_v1 = vrot.slane %v1522_v60, %v8490_v35  ;;  %v7964_v4 = vld [vmem:[%s8448_s11 + $0x900] sm:$0xff]   ;;  %v8000_v60 = vld [vmem:[%s8448_s11 + $0xac8] sm:$0xff]  }
 0x14b   : > { %7161 = vmatprep.subr.bf16.mxu0 %v7925_v7  ;;  %7182 = vmatpush3.bf16.msra.mxu1 %v7924_v3  ;;  %v8821_v3 = vrot.slane %v1515_v62, %v8490_v35  ;;  %v7965_v6 = vld [vmem:[%s8448_s11 + $0x980] sm:$0xff]   ;;  %v8002_v62 = vld [vmem:[%s8448_s11 + $0xa88] sm:$0xff]  }
 0x14c   : > { %7183 = vmatprep.subr.bf16.mxu1 %v7926_v9  ;;  %v1552_v5 = vrot.slane %v1530_v0, %v8490_v35  ;;  %v1560_v8 = vcombine.high %v1538_v1, %v1538_v1  ;;  %v7966_v9 = vld [vmem:[%s8448_s11 + $0x948] sm:$0xff]   ;;  %v8004_v0 = vld [vmem:[%s8448_s11 + $0xad0] sm:$0xff]  }
 0x14d   : > { %v1531_v7 = vcombine.high %v8821_v3, %v8821_v3 }
 0x14e   : > { %7162 = vmatpush3.bf16.msra.mxu0 %v7927_v11  ;;  %v7967_v11 = vld [vmem:[%s8448_s11 + $0x9c8] sm:$0xff]  }
 0x14f   : > { %7191 = vmatprep.subr.bf16.mxu0 %v7930_v14  ;;  %7184 = vmatpush3.bf16.msra.mxu1 %v7928_v12  ;;  %v1559_v12 = vrot.slane %v1531_v7, %v8490_v35  ;;  %v7969_v14 = vld [vmem:[%s8448_s11 + $0x988] sm:$0xff]   ;;  %v8011_v7 = vld [vmem:[%s8448_s11 + $0xa60] sm:$0xff]  }
 0x150   : > { %7213 = vmatprep.subr.bf16.mxu1 %v7931_v15 }
 0x151   : > { %5440 = vmatmul.mubr.bf16.vlgmr.msra.gmra.mrb[28].mxu0 %v1496_v13  ;;  %v7968_v13 = vld [vmem:[%s8448_s11 + $0x908] sm:$0xff]   ;;  %v1563_v15 = vcombine.high %v1559_v12, %v1559_v12 }
 0x152   : > { %7192 = vmatpush3.bf16.msra.mxu0 %v7932_v16  ;;  %5480 = vmatmul.mubr.bf16.vlgmr.msra.gmra.mrb[28].mxu1 %v1512_v18  ;;  %v7970_v16 = vld [vmem:[%s8448_s11 + $0x950] sm:$0xff]  }
 0x153   : > { %7193 = vmatprep.subr.bf16.mxu0 %v7934_v19  ;;  %7214 = vmatpush3.bf16.msra.mxu1 %v7933_v17  ;;  %v7971_v17 = vld [vmem:[%s8448_s11 + $0x9d0] sm:$0xff]  }
 0x154   : > { %7215 = vmatprep.subr.bf16.mxu1 %v7935_v20  ;;  %5519 = vmatprep.mubr.bf16.mxu0 %v1552_v5  ;;  %v7972_v18 = vld [vmem:[%s8448_s11 + $0x910] sm:$0xff]   ;;  %v7974_v20 = vld [vmem:[%s8448_s11 + $0x958] sm:$0xff]  }
 0x155   : > { %v7973_v19 = vld [vmem:[%s8448_s11 + $0x990] sm:$0xff]  }
 0x156   : > { %7194 = vmatpush3.bf16.msra.mxu0 %v7936_v21  ;;  %v7975_v21 = vld [vmem:[%s8448_s11 + $0x9d8] sm:$0xff]  }
 0x157   : > { %7195 = vmatprep.subr.bf16.mxu0 %v7938_v23  ;;  %7216 = vmatpush3.bf16.msra.mxu1 %v7937_v22  ;;  %v7976_v22 = vld [vmem:[%s8448_s11 + $0x918] sm:$0xff]  }
 0x158   : > { %7217 = vmatprep.subr.bf16.mxu1 %v7939_v24  ;;  %v7977_v23 = vld [vmem:[%s8448_s11 + $0x998] sm:$0xff]   ;;  %v7978_v24 = vld [vmem:[%s8448_s11 + $0x960] sm:$0xff]  }
 0x15a   : > { %7196 = vmatpush3.bf16.msra.mxu0 %v7940_v25  ;;  %v7979_v25 = vld [vmem:[%s8448_s11 + $0x9e0] sm:$0xff]  }
 0x15b   : > { %7197 = vmatprep.subr.bf16.mxu0 %v7942_v27  ;;  %7218 = vmatpush3.bf16.msra.mxu1 %v7941_v26  ;;  %v7980_v26 = vld [vmem:[%s8448_s11 + $0x920] sm:$0xff]  }
 0x15c   : > { %7219 = vmatprep.subr.bf16.mxu1 %v7943_v28  ;;  %v7981_v27 = vld [vmem:[%s8448_s11 + $0x9a0] sm:$0xff]   ;;  %v7982_v28 = vld [vmem:[%s8448_s11 + $0x968] sm:$0xff]  }
 0x15e   : > { %7198 = vmatpush3.bf16.msra.mxu0 %v7944_v29  ;;  %v7983_v29 = vld [vmem:[%s8448_s11 + $0x9e8] sm:$0xff]  }
 0x15f   : > { %7199 = vmatprep.subr.bf16.mxu0 %v7946_v31  ;;  %7220 = vmatpush3.bf16.msra.mxu1 %v7945_v30  ;;  %v7984_v30 = vld [vmem:[%s8448_s11 + $0x928] sm:$0xff]  }
 0x160   : > { %7221 = vmatprep.subr.bf16.mxu1 %v7947_v32  ;;  %v7985_v32 = vld [vmem:[%s8448_s11 + $0x9a8] sm:$0xff]  }
 0x162   : > { %7200 = vmatpush3.bf16.msra.mxu0 %v7948_v33 }
 0x163   : > { %7201 = vmatprep.subr.bf16.mxu0 %v7950_v36  ;;  %7222 = vmatpush3.bf16.msra.mxu1 %v7949_v34  ;;  %v7986_v34 = vld [vmem:[%s8448_s11 + $0x970] sm:$0xff]  }
 0x164   : > { %v6899_v40 = vpop.f32.mrb[4].mxu0  ;;  %7223 = vmatprep.subr.bf16.mxu1 %v7951_v37 }
 0x165   : > { %v6900_v42 = vpop.f32.mrb[5].mxu0  ;;  %v6921_v44 = vpop.f32.mrb[4].mxu1 }
 0x166   : > { %v6901_v45 = vadd.f32 %v6900_v42, %v6899_v40  ;;  %v6902_v46 = vpop.f32.mrb[6].mxu0  ;;  %v6922_v47 = vpop.f32.mrb[5].mxu1  ;;  %7202 = vmatpush3.bf16.msra.mxu0 %v7952_v38  ;;  %v7988_v40 = vld [vmem:[%s8448_s11 + $0x930] sm:$0xff]  }
 0x167   : > { %v6903_v48 = vpop.f32.mrb[7].mxu0  ;;  %v6923_v52 = vadd.f32 %v6922_v47, %v6921_v44  ;;  %v6924_v53 = vpop.f32.mrb[6].mxu1  ;;  %7203 = vmatprep.subr.bf16.mxu0 %v7954_v41  ;;  %7224 = vmatpush3.bf16.msra.mxu1 %v7953_v39  ;;  %v7987_v39 = vld [vmem:[%s8448_s11 + $0x9f0] sm:$0xff]  }
 0x168   : > { %v4962_v51 = vadd.f32 %v6901_v45, %v8772_v10  ;;  %v6925_v55 = vpop.f32.mrb[7].mxu1  ;;  %7225 = vmatprep.subr.bf16.mxu1 %v7955_v43  ;;  %v1562_v10 = vcombine.high %v1552_v5, %v1552_v5  ;;  %v7989_v46 = vld [vmem:[%s8448_s11 + $0x9b0] sm:$0xff]   ;;  %v7990_v48 = vld [vmem:[%s8448_s11 + $0x978] sm:$0xff]   ;;  %v1545_v53 = vrot.slane %v8821_v3, %v8490_v35 }
 0x169   : > { %v7996_v55 = vld [vmem:[%s8448_s11 + $0xac0] sm:$0xff]   ;;  %v8007_v3 = vld [vmem:[%s8448_s11 + $0xa58] sm:$0xff]  }
 0x16a   : > { %v8809_v57 = vadd.f32 %v6923_v52, %v4962_v51  ;;  %7204 = vmatpush3.bf16.msra.mxu0 %v7956_v49  ;;  %5559 = vmatprep.mubr.bf16.mxu1 %v1562_v10  ;;  %v7992_v51 = vld [vmem:[%s8448_s11 + $0x938] sm:$0xff]   ;;  %v8014_v10 = vld [vmem:[%s8448_s11 + $0xaa0] sm:$0xff]  }
 0x16b   : > { %7205 = vmatprep.subr.bf16.mxu0 %v7958_v54  ;;  %7226 = vmatpush3.bf16.msra.mxu1 %v7957_v50  ;;  %v7991_v50 = vld [vmem:[%s8448_s11 + $0x9f8] sm:$0xff]   ;;  %v7995_v54 = vld [vmem:[%s8448_s11 + $0xa40] sm:$0xff]  }
 0x16c   : > { %7227 = vmatprep.subr.bf16.mxu1 %v7959_v56  ;;  %v7993_v52 = vld [vmem:[%s8448_s11 + $0x9b8] sm:$0xff]   ;;  %v7997_v56 = vld [vmem:[%s8448_s11 + $0xa00] sm:$0xff]  }
 0x16d   : > { %v8009_v5 = vld [vmem:[%s8448_s11 + $0xa18] sm:$0xff]  }
 0x16e   : > { %7206 = vmatpush3.bf16.msra.mxu0 %v7960_v58  ;;  %v1561_v58 = vcombine.high %v1545_v53, %v1545_v53 }
 0x16f   : > { %7235 = vmatprep.subr.bf16.mxu0 %v7962_v61  ;;  %7228 = vmatpush3.bf16.msra.mxu1 %v7961_v63  ;;  %v8001_v61 = vld [vmem:[%s8448_s11 + $0xa08] sm:$0xff]   ;;  %v8003_v63 = vld [vmem:[%s8448_s11 + $0xa50] sm:$0xff]  }
 0x170   : > { %7257 = vmatprep.subr.bf16.mxu1 %v7963_v2  ;;  %v8006_v2 = vld [vmem:[%s8448_s11 + $0xa90] sm:$0xff]  }
 0x171   : > { %5520 = vmatmul.mubr.bf16.vlgmr.msra.gmra.mrb[32].mxu0 %v1538_v1  ;;  %v8005_v1 = vld [vmem:[%s8448_s11 + $0xa10] sm:$0xff]  }
 0x172   : > { %7236 = vmatpush3.bf16.msra.mxu0 %v7964_v4  ;;  %5560 = vmatmul.mubr.bf16.vlgmr.msra.gmra.mrb[32].mxu1 %v1560_v8  ;;  %v8008_v4 = vld [vmem:[%s8448_s11 + $0xad8] sm:$0xff]   ;;  %v8012_v8 = vld [vmem:[%s8448_s11 + $0xae0] sm:$0xff]  }
 0x173   : > { %7237 = vmatprep.subr.bf16.mxu0 %v7966_v9  ;;  %7258 = vmatpush3.bf16.msra.mxu1 %v7965_v6  ;;  %v8010_v6 = vld [vmem:[%s8448_s11 + $0xa98] sm:$0xff]   ;;  %v8013_v9 = vld [vmem:[%s8448_s11 + $0xa20] sm:$0xff]  }
 0x174   : > { %5599 = vmatprep.mubr.bf16.mxu0 %v1559_v12  ;;  %7259 = vmatprep.subr.bf16.mxu1 %v7967_v11  ;;  %v8015_v11 = vld [vmem:[%s8448_s11 + $0xa68] sm:$0xff]  }
 0x175   : > { %5639 = vmatprep.mubr.bf16.mxu1 %v1563_v15  ;;  %v8016_v12 = vld [vmem:[%s8448_s11 + $0xae8] sm:$0xff]  }
 0x176   : > { %7238 = vmatpush3.bf16.msra.mxu0 %v7968_v13  ;;  %v8017_v13 = vld [vmem:[%s8448_s11 + $0xa28] sm:$0xff]  }
 0x177   : > { %7239 = vmatprep.subr.bf16.mxu0 %v7970_v16  ;;  %7260 = vmatpush3.bf16.msra.mxu1 %v7969_v14  ;;  %v8018_v15 = vld [vmem:[%s8448_s11 + $0xaa8] sm:$0xff]  }
 0x178   : > { %7261 = vmatprep.subr.bf16.mxu1 %v7971_v17  ;;  %v8019_v17 = vld [vmem:[%s8448_s11 + $0xa70] sm:$0xff]  }
 0x17a   : > { %7240 = vmatpush3.bf16.msra.mxu0 %v7972_v18 }
 0x17b   : > { %7241 = vmatprep.subr.bf16.mxu0 %v7974_v20  ;;  %7262 = vmatpush3.bf16.msra.mxu1 %v7973_v19 }
 0x17c   : > { %7263 = vmatprep.subr.bf16.mxu1 %v7975_v21 }
 0x17e   : > { %7242 = vmatpush3.bf16.msra.mxu0 %v7976_v22 }
 0x17f   : > { %7243 = vmatprep.subr.bf16.mxu0 %v7978_v24  ;;  %7264 = vmatpush3.bf16.msra.mxu1 %v7977_v23  ;;  %v8020_v23 = vld [vmem:[%s8448_s11 + $0xaf0] sm:$0xff]  }
 0x180   : > { %7265 = vmatprep.subr.bf16.mxu1 %v7979_v25  ;;  %v8021_v24 = vld [vmem:[%s8448_s11 + $0xa30] sm:$0xff]  }
 0x182   : > { %7244 = vmatpush3.bf16.msra.mxu0 %v7980_v26 }
 0x183   : > { %7245 = vmatprep.subr.bf16.mxu0 %v7982_v28  ;;  %7266 = vmatpush3.bf16.msra.mxu1 %v7981_v27  ;;  %v8022_v28 = vld [vmem:[%s8448_s11 + $0xab0] sm:$0xff]  }
 0x184   : > { %v6943_v31 = vpop.f32.mrb[8].mxu0  ;;  %7267 = vmatprep.subr.bf16.mxu1 %v7983_v29 }
 0x185   : > { %v6944_v33 = vpop.f32.mrb[9].mxu0  ;;  %v6965_v36 = vpop.f32.mrb[8].mxu1 }
 0x186   : > { %v6945_v37 = vadd.f32 %v6944_v33, %v6943_v31  ;;  %v6946_v38 = vpop.f32.mrb[10].mxu0  ;;  %v6966_v41 = vpop.f32.mrb[9].mxu1  ;;  %7246 = vmatpush3.bf16.msra.mxu0 %v7984_v30  ;;  %v8023_v30 = vld [vmem:[%s8448_s11 + $0xa78] sm:$0xff]  }
 0x187   : > { %v6947_v42 = vpop.f32.mrb[11].mxu0  ;;  %v6967_v44 = vadd.f32 %v6966_v41, %v6965_v36  ;;  %v6968_v45 = vpop.f32.mrb[10].mxu1  ;;  %7247 = vmatprep.subr.bf16.mxu0 %v7986_v34  ;;  %7268 = vmatpush3.bf16.msra.mxu1 %v7985_v32  ;;  %v8024_v32 = vld [vmem:[%s8448_s11 + $0xaf8] sm:$0xff]   ;;  %v277_v34 = vld [vmem:[%s9152_s0 + $0x28] sm:$0xff] }
 0x188   : > { %v5042_v43 = vadd.f32 %v6945_v37, %v8809_v57  ;;  %v6969_v47 = vpop.f32.mrb[11].mxu1  ;;  %7269 = vmatprep.subr.bf16.mxu1 %v7987_v39  ;;  %v7998_v57 = vld [vmem:[%s8448_s11 + $0xa80] sm:$0xff]   ;;  %v8025_v33 = vld [vmem:[%s8448_s11 + $0xa38] sm:$0xff]   ;;  %v1571_v36 = vrot.slane %v277_v34, %v8490_v35  ;;  %v1564_v38 = vcombine.high %v277_v34, %v277_v34  ;;  %v8064_v34 = vld [vmem:[%s8448_s11 + $0xc48] sm:$0xff]  }
 0x189   : > { %v8027_v37 = vld [vmem:[%s8448_s11 + $0xb40] sm:$0xff]   ;;  %v8026_v39 = vld [vmem:[%s8448_s11 + $0xab8] sm:$0xff]  }
 0x18a   : > { %v8855_v49 = vadd.f32 %v6967_v44, %v5042_v43  ;;  %7248 = vmatpush3.bf16.msra.mxu0 %v7988_v40  ;;  %v1579_v40 = vcombine.high %v1571_v36, %v1571_v36  ;;  %v1587_v41 = vrot.slane %v1571_v36, %v8490_v35  ;;  %v8028_v42 = vld [vmem:[%s8448_s11 + $0xbc0] sm:$0xff]   ;;  %v8905_v43 = vrot.slane %v1564_v38, %v8490_v35  ;;  %v8065_v36 = vld [vmem:[%s8448_s11 + $0xcc8] sm:$0xff]  }
 0x18b   : > { %7249 = vmatprep.subr.bf16.mxu0 %v7990_v48  ;;  %7270 = vmatpush3.bf16.msra.mxu1 %v7989_v46  ;;  %v8029_v44 = vld [vmem:[%s8448_s11 + $0xb00] sm:$0xff]   ;;  %v8067_v38 = vld [vmem:[%s8448_s11 + $0xc88] sm:$0xff]  }
 0x18c   : > { %7271 = vmatprep.subr.bf16.mxu1 %v7991_v50  ;;  %v1601_v45 = vrot.slane %v1579_v40, %v8490_v35  ;;  %v8030_v46 = vld [vmem:[%s8448_s11 + $0xb80] sm:$0xff]   ;;  %v1580_v47 = vcombine.high %v8905_v43, %v8905_v43  ;;  %v1609_v48 = vcombine.high %v1587_v41, %v1587_v41  ;;  %v8069_v40 = vld [vmem:[%s8448_s11 + $0xcd0] sm:$0xff]  }
 0x18e   : > { %7250 = vmatpush3.bf16.msra.mxu0 %v7992_v51  ;;  %v1611_v50 = vcombine.high %v1601_v45, %v1601_v45  ;;  %v8032_v51 = vld [vmem:[%s8448_s11 + $0xbc8] sm:$0xff]  }
 0x18f   : > { %7279 = vmatprep.subr.bf16.mxu0 %v7995_v54  ;;  %7272 = vmatpush3.bf16.msra.mxu1 %v7993_v52  ;;  %v1608_v52 = vrot.slane %v1580_v47, %v8490_v35  ;;  %v8034_v54 = vld [vmem:[%s8448_s11 + $0xb88] sm:$0xff]   ;;  %v8076_v47 = vld [vmem:[%s8448_s11 + $0xc60] sm:$0xff]  }
 0x190   : > { %7301 = vmatprep.subr.bf16.mxu1 %v7996_v55 }
 0x191   : > { %5600 = vmatmul.mubr.bf16.vlgmr.msra.gmra.mrb[36].mxu0 %v1545_v53  ;;  %v8033_v53 = vld [vmem:[%s8448_s11 + $0xb08] sm:$0xff]   ;;  %v1612_v55 = vcombine.high %v1608_v52, %v1608_v52 }
 0x192   : > { %7280 = vmatpush3.bf16.msra.mxu0 %v7997_v56  ;;  %5640 = vmatmul.mubr.bf16.vlgmr.msra.gmra.mrb[36].mxu1 %v1561_v58  ;;  %v8035_v56 = vld [vmem:[%s8448_s11 + $0xb50] sm:$0xff]  }
 0x193   : > { %7281 = vmatprep.subr.bf16.mxu0 %v7999_v59  ;;  %7302 = vmatpush3.bf16.msra.mxu1 %v7998_v57  ;;  %v8036_v57 = vld [vmem:[%s8448_s11 + $0xbd0] sm:$0xff]  }
 0x194   : > { %7303 = vmatprep.subr.bf16.mxu1 %v8000_v60  ;;  %5679 = vmatprep.mubr.bf16.mxu0 %v1601_v45  ;;  %v8037_v58 = vld [vmem:[%s8448_s11 + $0xb10] sm:$0xff]   ;;  %v8039_v60 = vld [vmem:[%s8448_s11 + $0xb58] sm:$0xff]  }
 0x195   : > { %5719 = vmatprep.mubr.bf16.mxu1 %v1611_v50  ;;  %v8038_v59 = vld [vmem:[%s8448_s11 + $0xb90] sm:$0xff]   ;;  %v8074_v45 = vld [vmem:[%s8448_s11 + $0xc18] sm:$0xff]   ;;  %v8079_v50 = vld [vmem:[%s8448_s11 + $0xca0] sm:$0xff]  }
 0x196   : > { %7282 = vmatpush3.bf16.msra.mxu0 %v8001_v61  ;;  %v8040_v61 = vld [vmem:[%s8448_s11 + $0xbd8] sm:$0xff]  }
 0x197   : > { %7283 = vmatprep.subr.bf16.mxu0 %v8003_v63  ;;  %7304 = vmatpush3.bf16.msra.mxu1 %v8002_v62  ;;  %v8041_v62 = vld [vmem:[%s8448_s11 + $0xb18] sm:$0xff]  }
 0x198   : > { %7305 = vmatprep.subr.bf16.mxu1 %v8004_v0  ;;  %v8042_v63 = vld [vmem:[%s8448_s11 + $0xb98] sm:$0xff]   ;;  %v8043_v0 = vld [vmem:[%s8448_s11 + $0xb60] sm:$0xff]  }
 0x19a   : > { %7284 = vmatpush3.bf16.msra.mxu0 %v8005_v1  ;;  %v8044_v1 = vld [vmem:[%s8448_s11 + $0xbe0] sm:$0xff]  }
 0x19b   : > { %7285 = vmatprep.subr.bf16.mxu0 %v8007_v3  ;;  %7306 = vmatpush3.bf16.msra.mxu1 %v8006_v2  ;;  %v8045_v2 = vld [vmem:[%s8448_s11 + $0xb20] sm:$0xff]  }
 0x19c   : > { %7307 = vmatprep.subr.bf16.mxu1 %v8008_v4  ;;  %v8046_v3 = vld [vmem:[%s8448_s11 + $0xba0] sm:$0xff]   ;;  %v8047_v4 = vld [vmem:[%s8448_s11 + $0xb68] sm:$0xff]  }
 0x19e   : > { %7286 = vmatpush3.bf16.msra.mxu0 %v8009_v5  ;;  %v8048_v5 = vld [vmem:[%s8448_s11 + $0xbe8] sm:$0xff]  }
 0x19f   : > { %7287 = vmatprep.subr.bf16.mxu0 %v8011_v7  ;;  %7308 = vmatpush3.bf16.msra.mxu1 %v8010_v6  ;;  %v8049_v7 = vld [vmem:[%s8448_s11 + $0xb28] sm:$0xff]  }
 0x1a0   : > { %7309 = vmatprep.subr.bf16.mxu1 %v8012_v8 }
 0x1a2   : > { %7288 = vmatpush3.bf16.msra.mxu0 %v8013_v9  ;;  %v8050_v9 = vld [vmem:[%s8448_s11 + $0xba8] sm:$0xff]  }
 0x1a3   : > { %7289 = vmatprep.subr.bf16.mxu0 %v8015_v11  ;;  %7310 = vmatpush3.bf16.msra.mxu1 %v8014_v10 }
 0x1a4   : > { %v6987_v14 = vpop.f32.mrb[12].mxu0  ;;  %7311 = vmatprep.subr.bf16.mxu1 %v8016_v12 }
 0x1a5   : > { %v6988_v16 = vpop.f32.mrb[13].mxu0  ;;  %v7009_v18 = vpop.f32.mrb[12].mxu1 }
 0x1a6   : > { %v6989_v19 = vadd.f32 %v6988_v16, %v6987_v14  ;;  %v6990_v20 = vpop.f32.mrb[14].mxu0  ;;  %v7010_v21 = vpop.f32.mrb[13].mxu1  ;;  %7290 = vmatpush3.bf16.msra.mxu0 %v8017_v13  ;;  %v8051_v13 = vld [vmem:[%s8448_s11 + $0xb70] sm:$0xff]  }
 0x1a7   : > { %v6991_v22 = vpop.f32.mrb[15].mxu0  ;;  %v7011_v26 = vadd.f32 %v7010_v21, %v7009_v18  ;;  %v7012_v27 = vpop.f32.mrb[14].mxu1  ;;  %7291 = vmatprep.subr.bf16.mxu0 %v8019_v17  ;;  %7312 = vmatpush3.bf16.msra.mxu1 %v8018_v15  ;;  %v8052_v14 = vld [vmem:[%s8448_s11 + $0xbf0] sm:$0xff]  }
 0x1a8   : > { %v5122_v25 = vadd.f32 %v6989_v19, %v8855_v49  ;;  %v7013_v29 = vpop.f32.mrb[15].mxu1  ;;  %7313 = vmatprep.subr.bf16.mxu1 %v8020_v23  ;;  %v8031_v49 = vld [vmem:[%s8448_s11 + $0xb48] sm:$0xff]   ;;  %v8053_v20 = vld [vmem:[%s8448_s11 + $0xb30] sm:$0xff]   ;;  %v8058_v27 = vld [vmem:[%s8448_s11 + $0xbb8] sm:$0xff]  }
 0x1a9   : > { %v8054_v22 = vld [vmem:[%s8448_s11 + $0xbb0] sm:$0xff]   ;;  %v8060_v29 = vld [vmem:[%s8448_s11 + $0xc40] sm:$0xff]  }
 0x1aa   : > { %v8892_v31 = vadd.f32 %v7011_v26, %v5122_v25  ;;  %7292 = vmatpush3.bf16.msra.mxu0 %v8021_v24  ;;  %v8055_v24 = vld [vmem:[%s8448_s11 + $0xb78] sm:$0xff]  }
 0x1ab   : > { %7293 = vmatprep.subr.bf16.mxu0 %v8023_v30  ;;  %7314 = vmatpush3.bf16.msra.mxu1 %v8022_v28  ;;  %v8056_v25 = vld [vmem:[%s8448_s11 + $0xbf8] sm:$0xff]   ;;  %v1594_v28 = vrot.slane %v8905_v43, %v8490_v35  ;;  %v8061_v30 = vld [vmem:[%s8448_s11 + $0xcc0] sm:$0xff]  }
 0x1ac   : > { %7315 = vmatprep.subr.bf16.mxu1 %v8024_v32  ;;  %v8057_v26 = vld [vmem:[%s8448_s11 + $0xb38] sm:$0xff]   ;;  %v8063_v32 = vld [vmem:[%s8448_s11 + $0xc80] sm:$0xff]  }
 0x1ad   : > { %v8072_v43 = vld [vmem:[%s8448_s11 + $0xc58] sm:$0xff]  }
 0x1ae   : > { %7294 = vmatpush3.bf16.msra.mxu0 %v8025_v33  ;;  %v1610_v33 = vcombine.high %v1594_v28, %v1594_v28 }
 0x1af   : > { %7323 = vmatprep.subr.bf16.mxu0 %v8027_v37  ;;  %7316 = vmatpush3.bf16.msra.mxu1 %v8026_v39  ;;  %v8066_v37 = vld [vmem:[%s8448_s11 + $0xc08] sm:$0xff]   ;;  %v8068_v39 = vld [vmem:[%s8448_s11 + $0xc50] sm:$0xff]  }
 0x1b0   : > { %7345 = vmatprep.subr.bf16.mxu1 %v8028_v42  ;;  %v8071_v42 = vld [vmem:[%s8448_s11 + $0xc90] sm:$0xff]  }
 0x1b1   : > { %5680 = vmatmul.mubr.bf16.vlgmr.msra.gmra.mrb[40].mxu0 %v1587_v41  ;;  %v8070_v41 = vld [vmem:[%s8448_s11 + $0xc10] sm:$0xff]  }
 0x1b2   : > { %7324 = vmatpush3.bf16.msra.mxu0 %v8029_v44  ;;  %5720 = vmatmul.mubr.bf16.vlgmr.msra.gmra.mrb[40].mxu1 %v1609_v48  ;;  %v8073_v44 = vld [vmem:[%s8448_s11 + $0xcd8] sm:$0xff]   ;;  %v8077_v48 = vld [vmem:[%s8448_s11 + $0xce0] sm:$0xff]  }
 0x1b3   : > { %7325 = vmatprep.subr.bf16.mxu0 %v8031_v49  ;;  %7346 = vmatpush3.bf16.msra.mxu1 %v8030_v46  ;;  %v8075_v46 = vld [vmem:[%s8448_s11 + $0xc98] sm:$0xff]   ;;  %v8078_v49 = vld [vmem:[%s8448_s11 + $0xc20] sm:$0xff]  }
 0x1b4   : > { %5759 = vmatprep.mubr.bf16.mxu0 %v1608_v52  ;;  %7347 = vmatprep.subr.bf16.mxu1 %v8032_v51  ;;  %v8080_v51 = vld [vmem:[%s8448_s11 + $0xc68] sm:$0xff]  }
 0x1b5   : > { %5799 = vmatprep.mubr.bf16.mxu1 %v1612_v55  ;;  %v8081_v52 = vld [vmem:[%s8448_s11 + $0xce8] sm:$0xff]  }
 0x1b6   : > { %7326 = vmatpush3.bf16.msra.mxu0 %v8033_v53 }
 0x1b7   : > { %7327 = vmatprep.subr.bf16.mxu0 %v8035_v56  ;;  %7348 = vmatpush3.bf16.msra.mxu1 %v8034_v54  ;;  %v8082_v54 = vld [vmem:[%s8448_s11 + $0xc28] sm:$0xff]   ;;  %v8084_v56 = vld [vmem:[%s8448_s11 + $0xc70] sm:$0xff]  }
 0x1b8   : > { %7349 = vmatprep.subr.bf16.mxu1 %v8036_v57 }
 0x1ba   : > { %7328 = vmatpush3.bf16.msra.mxu0 %v8037_v58 }
 0x1bb   : > { %7329 = vmatprep.subr.bf16.mxu0 %v8039_v60  ;;  %7350 = vmatpush3.bf16.msra.mxu1 %v8038_v59 }
 0x1bc   : > { %7351 = vmatprep.subr.bf16.mxu1 %v8040_v61  ;;  %v8083_v61 = vld [vmem:[%s8448_s11 + $0xca8] sm:$0xff]  }
 0x1be   : > { %7330 = vmatpush3.bf16.msra.mxu0 %v8041_v62 }
 0x1bf   : > { %7331 = vmatprep.subr.bf16.mxu0 %v8043_v0  ;;  %7352 = vmatpush3.bf16.msra.mxu1 %v8042_v63  ;;  %v8085_v63 = vld [vmem:[%s8448_s11 + $0xcf0] sm:$0xff]  }
 0x1c0   : > { %7353 = vmatprep.subr.bf16.mxu1 %v8044_v1 }
 0x1c2   : > { %7332 = vmatpush3.bf16.msra.mxu0 %v8045_v2 }
 0x1c3   : > { %7333 = vmatprep.subr.bf16.mxu0 %v8047_v4  ;;  %7354 = vmatpush3.bf16.msra.mxu1 %v8046_v3  ;;  %v8086_v3 = vld [vmem:[%s8448_s11 + $0xc30] sm:$0xff]  }
 0x1c4   : > { %v7031_v6 = vpop.f32.mrb[16].mxu0  ;;  %7355 = vmatprep.subr.bf16.mxu1 %v8048_v5  ;;  %v8088_v5 = vld [vmem:[%s8448_s11 + $0xc78] sm:$0xff]  }
 0x1c5   : > { %v7032_v8 = vpop.f32.mrb[17].mxu0  ;;  %v7053_v10 = vpop.f32.mrb[16].mxu1 }
 0x1c6   : > { %v7033_v11 = vadd.f32 %v7032_v8, %v7031_v6  ;;  %v7034_v12 = vpop.f32.mrb[18].mxu0  ;;  %v7054_v15 = vpop.f32.mrb[17].mxu1  ;;  %7334 = vmatpush3.bf16.msra.mxu0 %v8049_v7  ;;  %v8087_v7 = vld [vmem:[%s8448_s11 + $0xcb0] sm:$0xff]   ;;  %v8089_v8 = vld [vmem:[%s8448_s11 + $0xcf8] sm:$0xff]  }
 0x1c7   : > { %v7035_v16 = vpop.f32.mrb[19].mxu0  ;;  %v7055_v18 = vadd.f32 %v7054_v15, %v7053_v10  ;;  %v7056_v19 = vpop.f32.mrb[18].mxu1  ;;  %7335 = vmatprep.subr.bf16.mxu0 %v8051_v13  ;;  %7356 = vmatpush3.bf16.msra.mxu1 %v8050_v9  ;;  %v8090_v9 = vld [vmem:[%s8448_s11 + $0xc38] sm:$0xff]   ;;  %v278_v10 = vld [vmem:[%s9152_s0 + $0x30] sm:$0xff]  ;;  %v8092_v12 = vld [vmem:[%s8448_s11 + $0xd40] sm:$0xff]  }
 0x1c8   : > { %v5202_v17 = vadd.f32 %v7033_v11, %v8892_v31  ;;  %v7057_v21 = vpop.f32.mrb[19].mxu1  ;;  %7357 = vmatprep.subr.bf16.mxu1 %v8052_v14  ;;  %v8062_v31 = vld [vmem:[%s8448_s11 + $0xc00] sm:$0xff]   ;;  %v1620_v11 = vrot.slane %v278_v10, %v8490_v35  ;;  %v1613_v13 = vcombine.high %v278_v10, %v278_v10  ;;  %v8091_v14 = vld [vmem:[%s8448_s11 + $0xcb8] sm:$0xff]   ;;  %v8129_v10 = vld [vmem:[%s8448_s11 + $0xe48] sm:$0xff]  }
 0x1c9   : > { %v8094_v19 = vld [vmem:[%s8448_s11 + $0xd00] sm:$0xff]  }
 0x1ca   : > { %v8938_v23 = vadd.f32 %v7055_v18, %v5202_v17  ;;  %7336 = vmatpush3.bf16.msra.mxu0 %v8053_v20  ;;  %v1628_v15 = vcombine.high %v1620_v11, %v1620_v11  ;;  %v1636_v16 = vrot.slane %v1620_v11, %v8490_v35  ;;  %v8093_v17 = vld [vmem:[%s8448_s11 + $0xdc0] sm:$0xff]   ;;  %v8989_v18 = vrot.slane %v1613_v13, %v8490_v35  ;;  %v8130_v11 = vld [vmem:[%s8448_s11 + $0xec8] sm:$0xff]  }
 0x1cb   : > { %7337 = vmatprep.subr.bf16.mxu0 %v8055_v24  ;;  %7358 = vmatpush3.bf16.msra.mxu1 %v8054_v22  ;;  %v8095_v21 = vld [vmem:[%s8448_s11 + $0xd80] sm:$0xff]   ;;  %v8096_v24 = vld [vmem:[%s8448_s11 + $0xd48] sm:$0xff]  }
 0x1cc   : > { %7359 = vmatprep.subr.bf16.mxu1 %v8056_v25  ;;  %v1650_v20 = vrot.slane %v1628_v15, %v8490_v35  ;;  %v1629_v22 = vcombine.high %v8989_v18, %v8989_v18  ;;  %v8132_v13 = vld [vmem:[%s8448_s11 + $0xe88] sm:$0xff]   ;;  %v8134_v15 = vld [vmem:[%s8448_s11 + $0xed0] sm:$0xff]  }
 0x1ce   : > { %7338 = vmatpush3.bf16.msra.mxu0 %v8057_v26  ;;  %v1660_v25 = vcombine.high %v1650_v20, %v1650_v20  ;;  %v8097_v26 = vld [vmem:[%s8448_s11 + $0xdc8] sm:$0xff]  }
 0x1cf   : > { %7367 = vmatprep.subr.bf16.mxu0 %v8060_v29  ;;  %7360 = vmatpush3.bf16.msra.mxu1 %v8058_v27  ;;  %v1657_v27 = vrot.slane %v1629_v22, %v8490_v35  ;;  %v8099_v29 = vld [vmem:[%s8448_s11 + $0xd88] sm:$0xff]   ;;  %v8141_v22 = vld [vmem:[%s8448_s11 + $0xe60] sm:$0xff]  }
 0x1d0   : > { %7389 = vmatprep.subr.bf16.mxu1 %v8061_v30 }
 0x1d1   : > { %5760 = vmatmul.mubr.bf16.vlgmr.msra.gmra.mrb[44].mxu0 %v1594_v28  ;;  %v8098_v28 = vld [vmem:[%s8448_s11 + $0xd08] sm:$0xff]   ;;  %v1661_v30 = vcombine.high %v1657_v27, %v1657_v27 }
 0x1d2   : > { %7368 = vmatpush3.bf16.msra.mxu0 %v8062_v31  ;;  %5800 = vmatmul.mubr.bf16.vlgmr.msra.gmra.mrb[44].mxu1 %v1610_v33  ;;  %v8100_v31 = vld [vmem:[%s8448_s11 + $0xd50] sm:$0xff]  }
 0x1d3   : > { %7369 = vmatprep.subr.bf16.mxu0 %v8064_v34  ;;  %7390 = vmatpush3.bf16.msra.mxu1 %v8063_v32  ;;  %v8101_v32 = vld [vmem:[%s8448_s11 + $0xdd0] sm:$0xff]  }
 0x1d4   : > { %7391 = vmatprep.subr.bf16.mxu1 %v8065_v36  ;;  %5839 = vmatprep.mubr.bf16.mxu0 %v1650_v20  ;;  %v8102_v33 = vld [vmem:[%s8448_s11 + $0xd10] sm:$0xff]   ;;  %v8104_v36 = vld [vmem:[%s8448_s11 + $0xd58] sm:$0xff]  }
 0x1d5   : > { %5879 = vmatprep.mubr.bf16.mxu1 %v1660_v25  ;;  %v8103_v34 = vld [vmem:[%s8448_s11 + $0xd90] sm:$0xff]   ;;  %v8139_v20 = vld [vmem:[%s8448_s11 + $0xe18] sm:$0xff]   ;;  %v8144_v25 = vld [vmem:[%s8448_s11 + $0xea0] sm:$0xff]  }
 0x1d6   : > { %7370 = vmatpush3.bf16.msra.mxu0 %v8066_v37  ;;  %v8105_v37 = vld [vmem:[%s8448_s11 + $0xdd8] sm:$0xff]  }
 0x1d7   : > { %7371 = vmatprep.subr.bf16.mxu0 %v8068_v39  ;;  %7392 = vmatpush3.bf16.msra.mxu1 %v8067_v38  ;;  %v8106_v38 = vld [vmem:[%s8448_s11 + $0xd18] sm:$0xff]  }
 0x1d8   : > { %7393 = vmatprep.subr.bf16.mxu1 %v8069_v40  ;;  %v8107_v39 = vld [vmem:[%s8448_s11 + $0xd98] sm:$0xff]   ;;  %v8108_v40 = vld [vmem:[%s8448_s11 + $0xd60] sm:$0xff]  }
 0x1da   : > { %7372 = vmatpush3.bf16.msra.mxu0 %v8070_v41  ;;  %v8109_v41 = vld [vmem:[%s8448_s11 + $0xde0] sm:$0xff]  }
 0x1db   : > { %7373 = vmatprep.subr.bf16.mxu0 %v8072_v43  ;;  %7394 = vmatpush3.bf16.msra.mxu1 %v8071_v42  ;;  %v8110_v42 = vld [vmem:[%s8448_s11 + $0xd20] sm:$0xff]  }
 0x1dc   : > { %7395 = vmatprep.subr.bf16.mxu1 %v8073_v44  ;;  %v8111_v43 = vld [vmem:[%s8448_s11 + $0xda0] sm:$0xff]   ;;  %v8112_v44 = vld [vmem:[%s8448_s11 + $0xd68] sm:$0xff]  }
 0x1de   : > { %7374 = vmatpush3.bf16.msra.mxu0 %v8074_v45  ;;  %v8113_v45 = vld [vmem:[%s8448_s11 + $0xde8] sm:$0xff]  }
 0x1df   : > { %7375 = vmatprep.subr.bf16.mxu0 %v8076_v47  ;;  %7396 = vmatpush3.bf16.msra.mxu1 %v8075_v46  ;;  %v8114_v47 = vld [vmem:[%s8448_s11 + $0xd28] sm:$0xff]  }
 0x1e0   : > { %7397 = vmatprep.subr.bf16.mxu1 %v8077_v48 }
 0x1e2   : > { %7376 = vmatpush3.bf16.msra.mxu0 %v8078_v49  ;;  %v8115_v49 = vld [vmem:[%s8448_s11 + $0xda8] sm:$0xff]  }
 0x1e3   : > { %7377 = vmatprep.subr.bf16.mxu0 %v8080_v51  ;;  %7398 = vmatpush3.bf16.msra.mxu1 %v8079_v50 }
 0x1e4   : > { %v7075_v53 = vpop.f32.mrb[20].mxu0  ;;  %7399 = vmatprep.subr.bf16.mxu1 %v8081_v52 }
 0x1e5   : > { %v7076_v55 = vpop.f32.mrb[21].mxu0  ;;  %v7097_v57 = vpop.f32.mrb[20].mxu1 }
 0x1e6   : > { %v7077_v58 = vadd.f32 %v7076_v55, %v7075_v53  ;;  %v7078_v59 = vpop.f32.mrb[22].mxu0  ;;  %v7098_v60 = vpop.f32.mrb[21].mxu1  ;;  %7378 = vmatpush3.bf16.msra.mxu0 %v8082_v54  ;;  %v8116_v53 = vld [vmem:[%s8448_s11 + $0xd70] sm:$0xff]  }
 0x1e7   : > { %v7079_v62 = vpop.f32.mrb[23].mxu0  ;;  %v7099_v1 = vadd.f32 %v7098_v60, %v7097_v57  ;;  %v7100_v2 = vpop.f32.mrb[22].mxu1  ;;  %7379 = vmatprep.subr.bf16.mxu0 %v8084_v56  ;;  %7400 = vmatpush3.bf16.msra.mxu1 %v8083_v61  ;;  %v8117_v54 = vld [vmem:[%s8448_s11 + $0xdf0] sm:$0xff]  }
 0x1e8   : > { %v5282_v0 = vadd.f32 %v7077_v58, %v8938_v23  ;;  %v7101_v4 = vpop.f32.mrb[23].mxu1  ;;  %7401 = vmatprep.subr.bf16.mxu1 %v8085_v63  ;;  %v1658_v23 = vcombine.high %v1636_v16, %v1636_v16  ;;  %v8118_v60 = vld [vmem:[%s8448_s11 + $0xd30] sm:$0xff]   ;;  %v8122_v2 = vld [vmem:[%s8448_s11 + $0xd38] sm:$0xff]  }
 0x1e9   : > { %v8119_v62 = vld [vmem:[%s8448_s11 + $0xdb0] sm:$0xff]   ;;  %v1643_v4 = vrot.slane %v8989_v18, %v8490_v35  ;;  %v8137_v18 = vld [vmem:[%s8448_s11 + $0xe58] sm:$0xff]  }
 0x1ea   : > { %v8975_v6 = vadd.f32 %v7099_v1, %v5282_v0  ;;  %7380 = vmatpush3.bf16.msra.mxu0 %v8086_v3  ;;  %v8120_v0 = vld [vmem:[%s8448_s11 + $0xd78] sm:$0xff]  }
 0x1eb   : > { %7381 = vmatprep.subr.bf16.mxu0 %v8088_v5  ;;  %7402 = vmatpush3.bf16.msra.mxu1 %v8087_v7  ;;  %v8121_v1 = vld [vmem:[%s8448_s11 + $0xdf8] sm:$0xff]   ;;  %v8125_v5 = vld [vmem:[%s8448_s11 + $0xe40] sm:$0xff]  }
 0x1ec   : > { %7403 = vmatprep.subr.bf16.mxu1 %v8089_v8  ;;  %v8123_v3 = vld [vmem:[%s8448_s11 + $0xdb8] sm:$0xff]   ;;  %v8127_v7 = vld [vmem:[%s8448_s11 + $0xe00] sm:$0xff]  }
 0x1ed   : > { %v8128_v8 = vld [vmem:[%s8448_s11 + $0xe80] sm:$0xff]  }
 0x1ee   : > { %7382 = vmatpush3.bf16.msra.mxu0 %v8090_v9  ;;  %v1659_v9 = vcombine.high %v1643_v4, %v1643_v4 }
 0x1ef   : > { %7411 = vmatprep.subr.bf16.mxu0 %v8092_v12  ;;  %7404 = vmatpush3.bf16.msra.mxu1 %v8091_v14  ;;  %v8131_v12 = vld [vmem:[%s8448_s11 + $0xe08] sm:$0xff]   ;;  %v8133_v14 = vld [vmem:[%s8448_s11 + $0xe50] sm:$0xff]  }
 0x1f0   : > { %7433 = vmatprep.subr.bf16.mxu1 %v8093_v17  ;;  %v8136_v17 = vld [vmem:[%s8448_s11 + $0xe90] sm:$0xff]  }
 0x1f1   : > { %5840 = vmatmul.mubr.bf16.vlgmr.msra.gmra.mrb[48].mxu0 %v1636_v16  ;;  %v8135_v16 = vld [vmem:[%s8448_s11 + $0xe10] sm:$0xff]  }
 0x1f2   : > { %7412 = vmatpush3.bf16.msra.mxu0 %v8094_v19  ;;  %5880 = vmatmul.mubr.bf16.vlgmr.msra.gmra.mrb[48].mxu1 %v1658_v23  ;;  %v8138_v19 = vld [vmem:[%s8448_s11 + $0xed8] sm:$0xff]   ;;  %v8142_v23 = vld [vmem:[%s8448_s11 + $0xee0] sm:$0xff]  }
 0x1f3   : > { %7413 = vmatprep.subr.bf16.mxu0 %v8096_v24  ;;  %7434 = vmatpush3.bf16.msra.mxu1 %v8095_v21  ;;  %v8140_v21 = vld [vmem:[%s8448_s11 + $0xe98] sm:$0xff]   ;;  %v8143_v24 = vld [vmem:[%s8448_s11 + $0xe20] sm:$0xff]  }
 0x1f4   : > { %5919 = vmatprep.mubr.bf16.mxu0 %v1657_v27  ;;  %7435 = vmatprep.subr.bf16.mxu1 %v8097_v26  ;;  %v8145_v26 = vld [vmem:[%s8448_s11 + $0xe68] sm:$0xff]  }
 0x1f5   : > { %5959 = vmatprep.mubr.bf16.mxu1 %v1661_v30  ;;  %v8146_v27 = vld [vmem:[%s8448_s11 + $0xee8] sm:$0xff]  }
 0x1f6   : > { %7414 = vmatpush3.bf16.msra.mxu0 %v8098_v28 }
 0x1f7   : > { %7415 = vmatprep.subr.bf16.mxu0 %v8100_v31  ;;  %7436 = vmatpush3.bf16.msra.mxu1 %v8099_v29  ;;  %v8147_v29 = vld [vmem:[%s8448_s11 + $0xe28] sm:$0xff]   ;;  %v8149_v31 = vld [vmem:[%s8448_s11 + $0xe70] sm:$0xff]  }
 0x1f8   : > { %7437 = vmatprep.subr.bf16.mxu1 %v8101_v32 }
 0x1fa   : > { %7416 = vmatpush3.bf16.msra.mxu0 %v8102_v33 }
 0x1fb   : > { %7417 = vmatprep.subr.bf16.mxu0 %v8104_v36  ;;  %7438 = vmatpush3.bf16.msra.mxu1 %v8103_v34 }
 0x1fc   : > { %7439 = vmatprep.subr.bf16.mxu1 %v8105_v37  ;;  %v8148_v37 = vld [vmem:[%s8448_s11 + $0xea8] sm:$0xff]  }
 0x1fe   : > { %7418 = vmatpush3.bf16.msra.mxu0 %v8106_v38 }
 0x1ff   : > { %7419 = vmatprep.subr.bf16.mxu0 %v8108_v40  ;;  %7440 = vmatpush3.bf16.msra.mxu1 %v8107_v39  ;;  %v8150_v39 = vld [vmem:[%s8448_s11 + $0xef0] sm:$0xff]  }
 0x200   : > { %7441 = vmatprep.subr.bf16.mxu1 %v8109_v41 }
 0x202   : > { %7420 = vmatpush3.bf16.msra.mxu0 %v8110_v42 }
 0x203   : > { %7421 = vmatprep.subr.bf16.mxu0 %v8112_v44  ;;  %7442 = vmatpush3.bf16.msra.mxu1 %v8111_v43  ;;  %v8151_v43 = vld [vmem:[%s8448_s11 + $0xe30] sm:$0xff]  }
 0x204   : > { %v7119_v46 = vpop.f32.mrb[24].mxu0  ;;  %7443 = vmatprep.subr.bf16.mxu1 %v8113_v45  ;;  %v8153_v45 = vld [vmem:[%s8448_s11 + $0xe78] sm:$0xff]  }
 0x205   : > { %v7120_v48 = vpop.f32.mrb[25].mxu0  ;;  %v7141_v50 = vpop.f32.mrb[24].mxu1 }
 0x206   : > { %v7121_v51 = vadd.f32 %v7120_v48, %v7119_v46  ;;  %v7122_v52 = vpop.f32.mrb[26].mxu0  ;;  %v7142_v55 = vpop.f32.mrb[25].mxu1  ;;  %7422 = vmatpush3.bf16.msra.mxu0 %v8114_v47  ;;  %v8152_v47 = vld [vmem:[%s8448_s11 + $0xeb0] sm:$0xff]   ;;  %v8154_v48 = vld [vmem:[%s8448_s11 + $0xef8] sm:$0xff]  }
 0x207   : > { %v7123_v56 = vpop.f32.mrb[27].mxu0  ;;  %v7143_v58 = vadd.f32 %v7142_v55, %v7141_v50  ;;  %v7144_v59 = vpop.f32.mrb[26].mxu1  ;;  %7423 = vmatprep.subr.bf16.mxu0 %v8116_v53  ;;  %7444 = vmatpush3.bf16.msra.mxu1 %v8115_v49  ;;  %v8155_v49 = vld [vmem:[%s8448_s11 + $0xe38] sm:$0xff]   ;;  %v8157_v52 = vld [vmem:[%s8448_s11 + $0xf40] sm:$0xff]  }
 0x208   : > { %v5362_v57 = vadd.f32 %v7121_v51, %v8975_v6  ;;  %v7145_v61 = vpop.f32.mrb[27].mxu1  ;;  %7445 = vmatprep.subr.bf16.mxu1 %v8117_v54  ;;  %v8126_v6 = vld [vmem:[%s8448_s11 + $0xec0] sm:$0xff]   ;;  %v279_v50 = vld [vmem:[%s9152_s0 + $0x38] sm:$0xff] }
 0x209   : > { %v1669_v51 = vrot.slane %v279_v50, %v8490_v35  ;;  %v1662_v53 = vcombine.high %v279_v50, %v279_v50  ;;  %v8156_v54 = vld [vmem:[%s8448_s11 + $0xeb8] sm:$0xff]  }
 0x20a   : > { %v9022_v63 = vadd.f32 %v7143_v58, %v5362_v57  ;;  %7424 = vmatpush3.bf16.msra.mxu0 %v8118_v60  ;;  %v8158_v57 = vld [vmem:[%s8448_s11 + $0xfc0] sm:$0xff]  }
 0x20b   : > { %7425 = vmatprep.subr.bf16.mxu0 %v8120_v0  ;;  %7446 = vmatpush3.bf16.msra.mxu1 %v8119_v62  ;;  %v1677_v55 = vcombine.high %v1669_v51, %v1669_v51  ;;  %v1685_v56 = vrot.slane %v1669_v51, %v8490_v35  ;;  %v9073_v58 = vrot.slane %v1662_v53, %v8490_v35  ;;  %v8159_v60 = vld [vmem:[%s8448_s11 + $0xf00] sm:$0xff]  }
 0x20c   : > { %7447 = vmatprep.subr.bf16.mxu1 %v8121_v1  ;;  %v8160_v1 = vld [vmem:[%s8448_s11 + $0xf80] sm:$0xff]  }
 0x20d   : > { %v1699_v59 = vrot.slane %v1677_v55, %v8490_v35  ;;  %v1678_v61 = vcombine.high %v9073_v58, %v9073_v58  ;;  %v1707_v62 = vcombine.high %v1685_v56, %v1685_v56 }
 0x20e   : > { %7426 = vmatpush3.bf16.msra.mxu0 %v8122_v2 }
 0x20f   : > { %7455 = vmatprep.subr.bf16.mxu0 %v8125_v5  ;;  %7448 = vmatpush3.bf16.msra.mxu1 %v8123_v3  ;;  %v1709_v0 = vcombine.high %v1699_v59, %v1699_v59  ;;  %v1706_v2 = vrot.slane %v1678_v61, %v8490_v35  ;;  %v8162_v3 = vld [vmem:[%s8448_s11 + $0xfc8] sm:$0xff]  }
 0x210   : > { %7477 = vmatprep.subr.bf16.mxu1 %v8126_v6  ;;  %v8165_v6 = vld [vmem:[%s8448_s11 + $0xf50] sm:$0xff]  }
 0x211   : > { %5920 = vmatmul.mubr.bf16.vlgmr.msra.gmra.mrb[52].mxu0 %v1643_v4  ;;  %v8163_v4 = vld [vmem:[%s8448_s11 + $0xf08] sm:$0xff]   ;;  %v1710_v5 = vcombine.high %v1706_v2, %v1706_v2 }
 0x212   : > { %7456 = vmatpush3.bf16.msra.mxu0 %v8127_v7  ;;  %5960 = vmatmul.mubr.bf16.vlgmr.msra.gmra.mrb[52].mxu1 %v1659_v9  ;;  %v8164_v7 = vld [vmem:[%s8448_s11 + $0xf88] sm:$0xff]   ;;  %v8167_v9 = vld [vmem:[%s8448_s11 + $0xf10] sm:$0xff]  }
 0x213   : > { %7457 = vmatprep.subr.bf16.mxu0 %v8129_v10  ;;  %7478 = vmatpush3.bf16.msra.mxu1 %v8128_v8  ;;  %v8166_v8 = vld [vmem:[%s8448_s11 + $0xfd0] sm:$0xff]   ;;  %v8169_v10 = vld [vmem:[%s8448_s11 + $0xf58] sm:$0xff]  }
 0x214   : > { %7479 = vmatprep.subr.bf16.mxu1 %v8130_v11  ;;  %5999 = vmatprep.mubr.bf16.mxu0 %v1699_v59  ;;  %v8168_v11 = vld [vmem:[%s8448_s11 + $0xf90] sm:$0xff]  }
 0x215   : > { %6039 = vmatprep.mubr.bf16.mxu1 %v1709_v0 }
 0x216   : > { %7458 = vmatpush3.bf16.msra.mxu0 %v8131_v12  ;;  %v8170_v12 = vld [vmem:[%s8448_s11 + $0xfd8] sm:$0xff]  }
 0x217   : > { %7459 = vmatprep.subr.bf16.mxu0 %v8133_v14  ;;  %7480 = vmatpush3.bf16.msra.mxu1 %v8132_v13  ;;  %v8171_v13 = vld [vmem:[%s8448_s11 + $0xf18] sm:$0xff]   ;;  %v8173_v14 = vld [vmem:[%s8448_s11 + $0xf60] sm:$0xff]  }
 0x218   : > { %7481 = vmatprep.subr.bf16.mxu1 %v8134_v15  ;;  %v8172_v15 = vld [vmem:[%s8448_s11 + $0xf98] sm:$0xff]  }
 0x21a   : > { %7460 = vmatpush3.bf16.msra.mxu0 %v8135_v16  ;;  %v8174_v16 = vld [vmem:[%s8448_s11 + $0xfe0] sm:$0xff]  }
 0x21b   : > { %7461 = vmatprep.subr.bf16.mxu0 %v8137_v18  ;;  %7482 = vmatpush3.bf16.msra.mxu1 %v8136_v17  ;;  %v8175_v17 = vld [vmem:[%s8448_s11 + $0xf20] sm:$0xff]   ;;  %v8177_v18 = vld [vmem:[%s8448_s11 + $0xf68] sm:$0xff]  }
 0x21c   : > { %7483 = vmatprep.subr.bf16.mxu1 %v8138_v19  ;;  %v8176_v19 = vld [vmem:[%s8448_s11 + $0xfa0] sm:$0xff]  }
 0x21e   : > { %7462 = vmatpush3.bf16.msra.mxu0 %v8139_v20 }
 0x21f   : > { %7463 = vmatprep.subr.bf16.mxu0 %v8141_v22  ;;  %7484 = vmatpush3.bf16.msra.mxu1 %v8140_v21  ;;  %v8178_v21 = vld [vmem:[%s8448_s11 + $0xfe8] sm:$0xff]  }
 0x220   : > { %7485 = vmatprep.subr.bf16.mxu1 %v8142_v23  ;;  %v8179_v23 = vld [vmem:[%s8448_s11 + $0xf28] sm:$0xff]  }
 0x222   : > { %7464 = vmatpush3.bf16.msra.mxu0 %v8143_v24 }
 0x223   : > { %7465 = vmatprep.subr.bf16.mxu0 %v8145_v26  ;;  %7486 = vmatpush3.bf16.msra.mxu1 %v8144_v25 }
 0x224   : > { %v7163_v28 = vpop.f32.mrb[28].mxu0  ;;  %7487 = vmatprep.subr.bf16.mxu1 %v8146_v27  ;;  %v8180_v27 = vld [vmem:[%s8448_s11 + $0xfa8] sm:$0xff]  }
 0x225   : > { %v7164_v30 = vpop.f32.mrb[29].mxu0  ;;  %v7185_v32 = vpop.f32.mrb[28].mxu1 }
 0x226   : > { %v7165_v33 = vadd.f32 %v7164_v30, %v7163_v28  ;;  %v7166_v34 = vpop.f32.mrb[30].mxu0  ;;  %v7186_v36 = vpop.f32.mrb[29].mxu1  ;;  %7466 = vmatpush3.bf16.msra.mxu0 %v8147_v29  ;;  %v8181_v28 = vld [vmem:[%s8448_s11 + $0xf70] sm:$0xff]  }
 0x227   : > { %v7167_v38 = vpop.f32.mrb[31].mxu0  ;;  %v7187_v41 = vadd.f32 %v7186_v36, %v7185_v32  ;;  %v7188_v42 = vpop.f32.mrb[30].mxu1  ;;  %7467 = vmatprep.subr.bf16.mxu0 %v8149_v31  ;;  %7488 = vmatpush3.bf16.msra.mxu1 %v8148_v37  ;;  %v8182_v34 = vld [vmem:[%s8448_s11 + $0xff0] sm:$0xff]  }
 0x228   : > { %v5442_v40 = vadd.f32 %v7165_v33, %v9022_v63  ;;  %v7189_v44 = vpop.f32.mrb[31].mxu1  ;;  %7489 = vmatprep.subr.bf16.mxu1 %v8150_v39  ;;  %v8161_v63 = vld [vmem:[%s8448_s11 + $0xf48] sm:$0xff]   ;;  %v8183_v37 = vld [vmem:[%s8448_s11 + $0xf30] sm:$0xff]   ;;  %v8185_v39 = vld [vmem:[%s8448_s11 + $0xf78] sm:$0xff]  }
 0x229   : > { %v8187_v42 = vld [vmem:[%s8448_s11 + $0xf38] sm:$0xff]  }
 0x22a   : > { %v9059_v46 = vadd.f32 %v7187_v41, %v5442_v40  ;;  %7468 = vmatpush3.bf16.msra.mxu0 %v8151_v43  ;;  %v8184_v40 = vld [vmem:[%s8448_s11 + $0xfb0] sm:$0xff]   ;;  %v8186_v41 = vld [vmem:[%s8448_s11 + $0xff8] sm:$0xff]   ;;  %v1692_v43 = vrot.slane %v9073_v58, %v8490_v35 }
 0x22b   : > { %7469 = vmatprep.subr.bf16.mxu0 %v8153_v45  ;;  %7490 = vmatpush3.bf16.msra.mxu1 %v8152_v47  ;;  %v8188_v44 = vld [vmem:[%s8448_s11 + $0xfb8] sm:$0xff]  }
 0x22c   : > { %7491 = vmatprep.subr.bf16.mxu1 %v8154_v48  ;;  %v1708_v45 = vcombine.high %v1692_v43, %v1692_v43 }
 0x22e   : > { %7470 = vmatpush3.bf16.msra.mxu0 %v8155_v49 }
 0x22f   : > { %7499 = vmatprep.subr.bf16.mxu0 %v8157_v52  ;;  %7492 = vmatpush3.bf16.msra.mxu1 %v8156_v54 }
 0x230   : > { %7521 = vmatprep.subr.bf16.mxu1 %v8158_v57 }
 0x231   : > { %6000 = vmatmul.mubr.bf16.vlgmr.msra.gmra.mrb[56].mxu0 %v1685_v56 }
 0x232   : > { %7500 = vmatpush3.bf16.msra.mxu0 %v8159_v60  ;;  %6040 = vmatmul.mubr.bf16.vlgmr.msra.gmra.mrb[56].mxu1 %v1707_v62 }
 0x233   : > { %7501 = vmatprep.subr.bf16.mxu0 %v8161_v63  ;;  %7522 = vmatpush3.bf16.msra.mxu1 %v8160_v1 }
 0x234   : > { %6079 = vmatprep.mubr.bf16.mxu0 %v1706_v2  ;;  %7523 = vmatprep.subr.bf16.mxu1 %v8162_v3 }
 0x235   : > { %6119 = vmatprep.mubr.bf16.mxu1 %v1710_v5  ;;  %v8296_v5 = vmov 0.0|0.0  }
 0x236   : > { %7502 = vmatpush3.bf16.msra.mxu0 %v8163_v4 }
 0x237   : > { %7503 = vmatprep.subr.bf16.mxu0 %v8165_v6  ;;  %7524 = vmatpush3.bf16.msra.mxu1 %v8164_v7  ;;  %v6128_v6 = vld [vmem:[%s9116_s5] sm:$0xff]  ;;  %v6129_v7 = vld [vmem:[%s9116_s5 + $0x8] sm:$0xff] }
 0x238   : > { %7525 = vmatprep.subr.bf16.mxu1 %v8166_v8  ;;  %v6130_v8 = vld [vmem:[%s9116_s5 + $0x10] sm:$0xff] }
 0x23a   : > { %7504 = vmatpush3.bf16.msra.mxu0 %v8167_v9  ;;  %v7596_v9 = vpack.c.bf16 %v6129_v7, %v6128_v6 }
 0x23b   : > { %7505 = vmatprep.subr.bf16.mxu0 %v8169_v10  ;;  %7526 = vmatpush3.bf16.msra.mxu1 %v8168_v11  ;;  %v6131_v10 = vld [vmem:[%s9116_s5 + $0x18] sm:$0xff] }
 0x23c   : > { %7527 = vmatprep.subr.bf16.mxu1 %v8170_v12  ;;  %v7599_v11 = vpack.c.bf16 %v6131_v10, %v6130_v8  ;;  %v6132_v12 = vld [vmem:[%s9116_s5 + $0x20] sm:$0xff] }
 0x23e   : > { %7506 = vmatpush3.bf16.msra.mxu0 %v8171_v13  ;;  %v6133_v13 = vld [vmem:[%s9116_s5 + $0x28] sm:$0xff] }
 0x23f   : > { %7507 = vmatprep.subr.bf16.mxu0 %v8173_v14  ;;  %7528 = vmatpush3.bf16.msra.mxu1 %v8172_v15  ;;  %v7602_v14 = vpack.c.bf16 %v6133_v13, %v6132_v12  ;;  %v6134_v15 = vld [vmem:[%s9116_s5 + $0x30] sm:$0xff] }
 0x240   : > { %7529 = vmatprep.subr.bf16.mxu1 %v8174_v16  ;;  %v6135_v16 = vld [vmem:[%s9116_s5 + $0x38] sm:$0xff] }
 0x242   : > { %7508 = vmatpush3.bf16.msra.mxu0 %v8175_v17  ;;  %v7605_v17 = vpack.c.bf16 %v6135_v16, %v6134_v15 }
 0x243   : > { %7509 = vmatprep.subr.bf16.mxu0 %v8177_v18  ;;  %7530 = vmatpush3.bf16.msra.mxu1 %v8176_v19  ;;  %v6136_v18 = vld [vmem:[%s9116_s5 + $0x40] sm:$0xff]  ;;  %v6137_v19 = vld [vmem:[%s9116_s5 + $0x48] sm:$0xff] }
 0x244   : > { %v7207_v20 = vpop.f32.mrb[32].mxu0  ;;  %7531 = vmatprep.subr.bf16.mxu1 %v8178_v21  ;;  %v6138_v21 = vld [vmem:[%s9116_s5 + $0x50] sm:$0xff] }
 0x245   : > { %v7208_v22 = vpop.f32.mrb[33].mxu0  ;;  %v7229_v24 = vpop.f32.mrb[32].mxu1 }
 0x246   : > { %v7209_v25 = vadd.f32 %v7208_v22, %v7207_v20  ;;  %v7210_v26 = vpop.f32.mrb[34].mxu0  ;;  %v7230_v29 = vpop.f32.mrb[33].mxu1  ;;  %7510 = vmatpush3.bf16.msra.mxu0 %v8179_v23  ;;  %v7608_v20 = vpack.c.bf16 %v6137_v19, %v6136_v18  ;;  %v6139_v22 = vld [vmem:[%s9116_s5 + $0x58] sm:$0xff] }
 0x247   : > { %v7211_v30 = vpop.f32.mrb[35].mxu0  ;;  %v7231_v32 = vadd.f32 %v7230_v29, %v7229_v24  ;;  %v7232_v33 = vpop.f32.mrb[34].mxu1  ;;  %7511 = vmatprep.subr.bf16.mxu0 %v8181_v28  ;;  %7532 = vmatpush3.bf16.msra.mxu1 %v8180_v27  ;;  %v7611_v23 = vpack.c.bf16 %v6139_v22, %v6138_v21 }
 0x248   : > { %v5522_v31 = vadd.f32 %v7209_v25, %v9059_v46  ;;  %v7233_v36 = vpop.f32.mrb[35].mxu1  ;;  %7533 = vmatprep.subr.bf16.mxu1 %v8182_v34  ;;  %v6140_v34 = vld [vmem:[%s9116_s5 + $0x60] sm:$0xff] }
 0x249   : > { %v6141_v36 = vld [vmem:[%s9116_s5 + $0x68] sm:$0xff] }
 0x24a   : > { %v5562_v38 = vadd.f32 %v7231_v32, %v5522_v31  ;;  %7512 = vmatpush3.bf16.msra.mxu0 %v8183_v37 }
 0x24b   : > { %7513 = vmatprep.subr.bf16.mxu0 %v8185_v39  ;;  %7534 = vmatpush3.bf16.msra.mxu1 %v8184_v40  ;;  %v6142_v40 = vld [vmem:[%s9116_s5 + $0x70] sm:$0xff] }
 0x24c   : > { %7535 = vmatprep.subr.bf16.mxu1 %v8186_v41  ;;  %v6143_v41 = vld [vmem:[%s9116_s5 + $0x78] sm:$0xff] }
 0x24e   : > { %7514 = vmatpush3.bf16.msra.mxu0 %v8187_v42  ;;  %v7617_v42 = vpack.c.bf16 %v6143_v41, %v6142_v40 }
 0x24f   : > { %7536 = vmatpush3.bf16.msra.mxu1 %v8188_v44  ;;  %7595 = vmatprep.subr.bf16.mxu0 %v8296_v5 }
 0x251   : > { %6080 = vmatmul.mubr.bf16.vlgmr.msra.gmra.mrb[60].mxu0 %v1692_v43  ;;  %v8298_v43 = vmov 0.0  }
 0x252   : > { %6120 = vmatmul.mubr.bf16.vlgmr.msra.gmra.mrb[60].mxu1 %v1708_v45  ;;  %7597 = vmatpush3.bf16.msra.mxu0 %v7596_v9 }
 0x253   : > { %7598 = vmatprep.subr.bf16.mxu0 %v8296_v5  ;;  %7592 = vmatprep.mubr.msk.f32.mxu0 %vm8297_vm0, %v8298_v43 }
 0x256   : > { %7600 = vmatpush3.bf16.msra.mxu0 %v7599_v11 }
 0x257   : > { %7601 = vmatprep.subr.bf16.mxu0 %v8296_v5 }
 0x25a   : > { %7603 = vmatpush3.bf16.msra.mxu0 %v7602_v14 }
 0x25b   : > { %7604 = vmatprep.subr.bf16.mxu0 %v8296_v5 }
 0x25e   : > { %7606 = vmatpush3.bf16.msra.mxu0 %v7605_v17 }
 0x25f   : > { %7607 = vmatprep.subr.bf16.mxu0 %v8296_v5 }
 0x262   : > { %7609 = vmatpush3.bf16.msra.mxu0 %v7608_v20 }
 0x263   : > { %7610 = vmatprep.subr.bf16.mxu0 %v8296_v5 }
 0x264   : > { %v7251_v46 = vpop.f32.mrb[36].mxu0 }
 0x265   : > { %v7252_v47 = vpop.f32.mrb[37].mxu0  ;;  %v7273_v48 = vpop.f32.mrb[36].mxu1 }
 0x266   : > { %v7253_v49 = vadd.f32 %v7252_v47, %v7251_v46  ;;  %v7254_v50 = vpop.f32.mrb[38].mxu0  ;;  %v7274_v51 = vpop.f32.mrb[37].mxu1  ;;  %7612 = vmatpush3.bf16.msra.mxu0 %v7611_v23 }
 0x267   : > { %v7255_v52 = vpop.f32.mrb[39].mxu0  ;;  %v7275_v54 = vadd.f32 %v7274_v51, %v7273_v48  ;;  %v7276_v55 = vpop.f32.mrb[38].mxu1  ;;  %7613 = vmatprep.subr.bf16.mxu0 %v8296_v5 }
 0x268   : > { %v5602_v53 = vadd.f32 %v7253_v49, %v5562_v38  ;;  %v7277_v35 = vpop.f32.mrb[39].mxu1  ;;  %v7614_v38 = vpack.c.bf16 %v6141_v36, %v6140_v34 }
 0x26a   : > { %v5642_v56 = vadd.f32 %v7275_v54, %v5602_v53  ;;  %7615 = vmatpush3.bf16.msra.mxu0 %v7614_v38 }
 0x26b   : > { %7616 = vmatprep.subr.bf16.mxu0 %v8296_v5 }
 0x26e   : > { %7618 = vmatpush3.bf16.msra.mxu0 %v7617_v42 }
 0x284   : > { %v7295_v57 = vpop.f32.mrb[40].mxu0 }
 0x285   : > { %v7296_v58 = vpop.f32.mrb[41].mxu0  ;;  %v7317_v59 = vpop.f32.mrb[40].mxu1 }
 0x286   : > { %v7297_v60 = vadd.f32 %v7296_v58, %v7295_v57  ;;  %v7298_v61 = vpop.f32.mrb[42].mxu0  ;;  %v7318_v62 = vpop.f32.mrb[41].mxu1 }
 0x287   : > { %v7299_v63 = vpop.f32.mrb[43].mxu0  ;;  %v7319_v1 = vadd.f32 %v7318_v62, %v7317_v59  ;;  %v7320_v2 = vpop.f32.mrb[42].mxu1 }
 0x288   : > { %v5682_v0 = vadd.f32 %v7297_v60, %v5642_v56  ;;  %v7321_v3 = vpop.f32.mrb[43].mxu1 }
 0x28a   : > { %v5722_v4 = vadd.f32 %v7319_v1, %v5682_v0 }
 0x2a4   : > { %v7339_v24 = vpop.f32.mrb[44].mxu0 }
 0x2a5   : > { %v7340_v25 = vpop.f32.mrb[45].mxu0  ;;  %v7361_v26 = vpop.f32.mrb[44].mxu1 }
 0x2a6   : > { %v7341_v27 = vadd.f32 %v7340_v25, %v7339_v24  ;;  %v7342_v28 = vpop.f32.mrb[46].mxu0  ;;  %v7362_v29 = vpop.f32.mrb[45].mxu1 }
 0x2a7   : > { %v7343_v30 = vpop.f32.mrb[47].mxu0  ;;  %v7363_v32 = vadd.f32 %v7362_v29, %v7361_v26  ;;  %v7364_v33 = vpop.f32.mrb[46].mxu1 }
 0x2a8   : > { %v5762_v31 = vadd.f32 %v7341_v27, %v5722_v4  ;;  %v7365_v37 = vpop.f32.mrb[47].mxu1 }
 0x2aa   : > { %v5802_v39 = vadd.f32 %v7363_v32, %v5762_v31 }
 0x2c4   : > { %v7383_v44 = vpop.f32.mrb[48].mxu0 }
 0x2c5   : > { %v7384_v45 = vpop.f32.mrb[49].mxu0  ;;  %v7405_v46 = vpop.f32.mrb[48].mxu1 }
 0x2c6   : > { %v7385_v47 = vadd.f32 %v7384_v45, %v7383_v44  ;;  %v7386_v48 = vpop.f32.mrb[50].mxu0  ;;  %v7406_v49 = vpop.f32.mrb[49].mxu1 }
 0x2c7   : > { %v7387_v50 = vpop.f32.mrb[51].mxu0  ;;  %v7407_v52 = vadd.f32 %v7406_v49, %v7405_v46  ;;  %v7408_v53 = vpop.f32.mrb[50].mxu1 }
 0x2c8   : > { %v5842_v51 = vadd.f32 %v7385_v47, %v5802_v39  ;;  %v7409_v54 = vpop.f32.mrb[51].mxu1 }
 0x2ca   : > { %v5882_v55 = vadd.f32 %v7407_v52, %v5842_v51 }
 0x2e4   : > { %v7427_v35 = vpop.f32.mrb[52].mxu0 }
 0x2e5   : > { %v7428_v56 = vpop.f32.mrb[53].mxu0  ;;  %v7449_v57 = vpop.f32.mrb[52].mxu1 }
 0x2e6   : > { %v7429_v58 = vadd.f32 %v7428_v56, %v7427_v35  ;;  %v7430_v59 = vpop.f32.mrb[54].mxu0  ;;  %v7450_v60 = vpop.f32.mrb[53].mxu1 }
 0x2e7   : > { %v7431_v61 = vpop.f32.mrb[55].mxu0  ;;  %v7451_v63 = vadd.f32 %v7450_v60, %v7449_v57  ;;  %v7452_v0 = vpop.f32.mrb[54].mxu1 }
 0x2e8   : > { %v5922_v62 = vadd.f32 %v7429_v58, %v5882_v55  ;;  %v7453_v1 = vpop.f32.mrb[55].mxu1 }
 0x2ea   : > { %v5962_v2 = vadd.f32 %v7451_v63, %v5922_v62 }
 0x304   : > { %v7471_v3 = vpop.f32.mrb[56].mxu0 }
 0x305   : > { %v7472_v4 = vpop.f32.mrb[57].mxu0  ;;  %v7493_v5 = vpop.f32.mrb[56].mxu1 }
 0x306   : > { %v7473_v6 = vadd.f32 %v7472_v4, %v7471_v3  ;;  %v7474_v7 = vpop.f32.mrb[58].mxu0  ;;  %v7494_v8 = vpop.f32.mrb[57].mxu1 }
 0x307   : > { %v7475_v9 = vpop.f32.mrb[59].mxu0  ;;  %v7495_v11 = vadd.f32 %v7494_v8, %v7493_v5  ;;  %v7496_v12 = vpop.f32.mrb[58].mxu1 }
 0x308   : > { %v6002_v10 = vadd.f32 %v7473_v6, %v5962_v2  ;;  %v7497_v13 = vpop.f32.mrb[59].mxu1 }
 0x30a   : > { %v6042_v14 = vadd.f32 %v7495_v11, %v6002_v10 }
 0x324   : > { %v7515_v15 = vpop.f32.mrb[60].mxu0 }
 0x325   : > { %v7516_v16 = vpop.f32.mrb[61].mxu0  ;;  %v7537_v17 = vpop.f32.mrb[60].mxu1 }
 0x326   : > { %v7517_v18 = vadd.f32 %v7516_v16, %v7515_v15  ;;  %v7518_v19 = vpop.f32.mrb[62].mxu0  ;;  %v7538_v20 = vpop.f32.mrb[61].mxu1 }
 0x327   : > { %v7519_v21 = vpop.f32.mrb[63].mxu0  ;;  %v7539_v23 = vadd.f32 %v7538_v20, %v7537_v17  ;;  %v7540_v24 = vpop.f32.mrb[62].mxu1 }
 0x328   : > { %v6082_v22 = vadd.f32 %v7517_v18, %v6042_v14  ;;  %v7541_v25 = vpop.f32.mrb[63].mxu1 }
 0x32a   : > { %v6122_v26 = vadd.f32 %v7539_v23, %v6082_v22 }
 0x32c   : > { %v6127_v27 = vmax.f32 %v6122_v26, 0.0 }
 0x32e   : > { %7593 = vmatmul.mubr.f32.vlgmr.msra.gmra.mrb[64].mxu0 %v6127_v27 }
 0x401   : > { %v6210_v28 = vpop.f32.mrb[64].mxu0 }
 0x402   : > { %6215 = vst.msk [vmem:[%s270_s14] sm:$0x3] %vm6214_vm1, %v6210_v28  ;;  %v7594_v29 = vpop.f32.mrb[65].mxu0 }
 0x403 PF: > { %p17_p3 = scmp.ge.s32.totalorder %s8346_s20, 4   ;;  %s9163_s15 = smov %s8280_s16 }
 0x404   : > { %s9164_s16 = smov %s8284_s17  ;;  %s9165_s17 = smov %s8356_s23 }
 0x405   : > { %s9166_s18 = smov %s8346_s20  ;;  %19 = sbr.rel (!%p17_p3) target bundleno = 5 (0x5), region = 92 }
 0x40c   :  { %6235 = vsyncpa [#allocation3], 1 }
 0x40d   :  { %6237 = vsyncpa [#allocation3 + $0x1], 1 }
 0x40e   :  { %6238 = vsyncpa [#allocation5], 1 }
 0x40f   :  { %6240 = vsyncpa [#allocation5 + $0x1], 1 }

</bundles_post_ra>
